<compile_context>
chip_gen: v7x
topology: tpu7x:2x2x1
jax: 0.10.0
libtpu: 0.0.40
codegen_flags: <defaults>
</compile_context>

<pallas_src>
import functools

import jax
import jax.numpy as jnp
from jax.experimental import pallas as pl
from jax.experimental.pallas import tpu as pltpu

_ATT_PAD = 8  # padded width of the a_src / a_dst logit column groups (>= heads)


def _round_up(x, m):
    return ((x + m - 1) // m) * m


# ----------------------------------------------------------------------------
# One multi-head GAT layer, flash-style online softmax over key tiles.
# ----------------------------------------------------------------------------
def _gat_layer_kernel(xd_ref, xs_ref, mask_ref, w_ref, b_ref, out_ref,
                      attd_scr, m_scr, l_scr, acc_scr,
                      *, heads, head_width, mode, negative_slope):
    # xd_ref  : [TR, Fp]  bf16  destination-node features (row block, resident per i)
    # xs_ref  : [TK, Fp]  bf16  source-node features (streamed per key block)
    # mask_ref: [TR, TK]  int8  adjacency (1 = edge src->dst, incl. self loops)
    # w_ref   : [Fp, Wp + 2*_ATT_PAD] bf16  [W | W@a_src | W@a_dst] (zero padded)
    # b_ref   : [1, Wp]   f32   bias (zero padded)
    # out_ref : [TR, Wp]        concat-heads output block (written at last key step)
    # attd_scr: [TR, _ATT_PAD] f32  dst-side logits (computed once at k == 0)
    # m_scr   : [TR, _ATT_PAD] f32  running max (online softmax)
    # l_scr   : [TR, _ATT_PAD] f32  running sum (online softmax)
    # acc_scr : [TR, Wp]       f32  un-normalized weighted-message accumulator
    k = pl.program_id(1)
    nk = pl.num_programs(1)
    feat_width = out_ref.shape[1]

    @pl.when(k == 0)
    def _init():
        m_scr[...] = jnp.full_like(m_scr, -1e30)
        l_scr[...] = jnp.zeros_like(l_scr)
        acc_scr[...] = jnp.zeros_like(acc_scr)
        # dst-side logits (W x_i) . a_dst for all heads, once per row block.
        attd_scr[...] = jnp.dot(xd_ref[...], w_ref[:, feat_width + _ATT_PAD:],
                                preferred_element_type=jnp.float32)

    # Source projection: messages AND per-head src logits in ONE MXU matmul
    # (attention vectors folded into the weight matrix wrapper-side).
    proj_s = jnp.dot(xs_ref[...], w_ref[:, :feat_width + _ATT_PAD],
                     preferred_element_type=jnp.float32)           # [TK, Wp+8] f32
    feat_s = proj_s[:, :feat_width].astype(jnp.bfloat16)            # MXU operand
    atts_t = jnp.transpose(proj_s[:, feat_width:])                  # [8, TK] f32

    mask_f = mask_ref[...].astype(jnp.float32)                      # 0 / 1
    off_edge = (mask_f - 1.0) * 1e30                                # 0 edge, -1e30 off

    # Static unroll over heads; every head's result is written to scratch
    # immediately so [TR, TK] temporaries do not stay live across heads.
    for h in range(heads):
        c0, c1 = h * head_width, (h + 1) * head_width
        e = attd_scr[:, h:h + 1] + atts_t[h:h + 1, :]               # [TR, TK]
        e = jnp.where(e > 0, e, negative_slope * e)                 # LeakyReLU (f32)
        e = e + off_edge
        m_prev = m_scr[:, h:h + 1]
        m_new = jnp.maximum(m_prev, jnp.max(e, axis=1, keepdims=True))
        p = jnp.exp(e - m_new) * mask_f                             # masked, no NaNs
        corr = jnp.exp(m_prev - m_new)
        l_scr[:, h:h + 1] = corr * l_scr[:, h:h + 1] + jnp.sum(p, axis=1, keepdims=True)
        acc_scr[:, c0:c1] = corr * acc_scr[:, c0:c1] + jnp.dot(
            p.astype(jnp.bfloat16), feat_s[:, c0:c1],
            preferred_element_type=jnp.float32)
        m_scr[:, h:h + 1] = m_new

    @pl.when(k == nk - 1)
    def _finalize():
        for h in range(heads):
            c0, c1 = h * head_width, (h + 1) * head_width
            acc_scr[:, c0:c1] = acc_scr[:, c0:c1] * pl.reciprocal(
                l_scr[:, h:h + 1], approx=False)
        z = acc_scr[...] + b_ref[...]
        if mode == "relu":
            out_ref[...] = jnp.maximum(z, 0.0).astype(out_ref.dtype)
        else:  # "mu_softplus": head 0 -> mu (identity), head 1 -> logvar (softplus)
            col = jax.lax.broadcasted_iota(jnp.int32, z.shape, 1)
            out_ref[...] = jnp.where(col < head_width, z,
                                     jnp.logaddexp(z, 0.0)).astype(out_ref.dtype)


# ----------------------------------------------------------------------------
# pallas_call wrapper for one GAT layer
# ----------------------------------------------------------------------------
def _run_gat_layer(x_pad, adj, w_aug, bias, *, heads, head_width,
                   row_block, key_block, mode, out_dtype):
    n_pad, f_pad = x_pad.shape
    wp = bias.shape[1]
    nr, nk = n_pad // row_block, n_pad // key_block

    kernel = functools.partial(_gat_layer_kernel, heads=heads,
                               head_width=head_width, mode=mode,
                               negative_slope=0.2)

    out_bytes = 2 if out_dtype == jnp.bfloat16 else 4
    cost = pl.CostEstimate(
        flops=int(2 * nr * n_pad * f_pad * (wp + 2 * _ATT_PAD)
                  + 2 * heads * n_pad * n_pad * head_width
                  + 10 * heads * n_pad * n_pad),
        transcendentals=int(2 * heads * n_pad * n_pad),
        bytes_accessed=int(n_pad * n_pad                      # int8 adjacency
                           + (nr + 1) * n_pad * f_pad * 2     # bf16 features
                           + f_pad * (wp + 2 * _ATT_PAD) * 2
                           + n_pad * wp * out_bytes),
    )

    return pl.pallas_call(
        kernel,
        out_shape=jax.ShapeDtypeStruct((n_pad, wp), out_dtype),
        grid=(nr, nk),
        in_specs=[
            pl.BlockSpec((row_block, f_pad), lambda i, k: (i, 0)),        # dst feats
            pl.BlockSpec((key_block, f_pad), lambda i, k: (k, 0)),        # src feats
            pl.BlockSpec((row_block, key_block), lambda i, k: (i, k)),    # int8 adj
            pl.BlockSpec(w_aug.shape, lambda i, k: (0, 0)),               # weights
            pl.BlockSpec(bias.shape, lambda i, k: (0, 0)),                # bias
        ],
        out_specs=pl.BlockSpec((row_block, wp), lambda i, k: (i, 0)),
        scratch_shapes=[
            pltpu.VMEM((row_block, _ATT_PAD), jnp.float32),   # dst logits
            pltpu.VMEM((row_block, _ATT_PAD), jnp.float32),   # running max
            pltpu.VMEM((row_block, _ATT_PAD), jnp.float32),   # running sum
            pltpu.VMEM((row_block, wp), jnp.float32),         # accumulator
        ],
        compiler_params=pltpu.CompilerParams(
            dimension_semantics=("parallel", "arbitrary"),
            vmem_limit_bytes=48 * 1024 * 1024,                # fits v7x's 64 MiB VMEM
        ),
        cost_estimate=cost,
    )(x_pad, x_pad, adj, w_aug, bias)


# ----------------------------------------------------------------------------
# Wrapper glue: padding, int8 adjacency, attention-fold weight packing.
# ----------------------------------------------------------------------------
def _pack_gat_weights(w, att_src, att_dst, bias, fin_p, wout_p):
    """[fin, H*C] GATConv weights + [H, C] attention vectors ->
    bf16 [fin_p, wout_p + 2*_ATT_PAD] augmented matrix [W | W@a_src | W@a_dst]
    (zero padded) and f32 [1, wout_p] bias."""
    fin, hc = w.shape
    H, C = att_src.shape
    assert hc == H * C and H <= _ATT_PAD
    eye = jnp.eye(H, dtype=jnp.float32)
    a_src = (att_src[:, :, None] * eye[:, None, :]).reshape(hc, H)   # block-diag fold
    a_dst = (att_dst[:, :, None] * eye[:, None, :]).reshape(hc, H)
    w_feat = jnp.zeros((fin_p, wout_p), jnp.float32).at[:fin, :hc].set(w)
    w_s = jnp.zeros((fin_p, _ATT_PAD), jnp.float32).at[:fin, :H].set(w @ a_src)
    w_d = jnp.zeros((fin_p, _ATT_PAD), jnp.float32).at[:fin, :H].set(w @ a_dst)
    w_aug = jnp.concatenate([w_feat, w_s, w_d], axis=1).astype(jnp.bfloat16)
    b = jnp.zeros((1, wout_p), jnp.float32).at[0, :hc].set(bias)
    return w_aug, b


def gat_encoder_forward(convs, x, edge_index, edge_attr):
    """GATEncoder.forward (num_layers >= 3 path; the in-loop `return` fires at i==0)."""
    del edge_attr  # TODO(synk): edge_attr unused because GATConv has edge_dim=None
    N, fin = x.shape
    W0, asrc0, adst0, b0, H, C1 = convs[0]
    Wmu, asrc_mu, adst_mu, bmu, _, out_ch = convs[-2]
    Wlv, asrc_lv, adst_lv, blv, _, _ = convs[-1]
    HC1 = H * C1

    # Padded sizes: lane-dense (multiple-of-128) feature dims; row/key tiles divide Np.
    n_pad = _round_up(N, 128)
    row_block = 256 if n_pad % 256 == 0 else 128
    key_block = 512 if n_pad % 512 == 0 else (256 if n_pad % 256 == 0 else 128)
    fin_p = _round_up(fin, 128)
    hid_p = _round_up(HC1, 128)
    out_p = _round_up(2 * out_ch, 128)
    # TODO(synk): for throughput benchmarking, batch several graphs block-diagonally
    #             so tensors exceed one (8,128) vreg tile at real workloads.

    # int8 adjacency (row = destination, col = source); self loops on every row
    # (also on padded rows so their softmax denominators stay finite).
    adj = jnp.zeros((n_pad, n_pad), jnp.int8)
    adj = adj.at[edge_index[1], edge_index[0]].set(1)
    rng = jnp.arange(n_pad)
    adj = adj.at[rng, rng].set(1)

    x_p = jnp.zeros((n_pad, fin_p), jnp.float32).at[:N, :fin].set(x).astype(jnp.bfloat16)

    w0_aug, b0_p = _pack_gat_weights(W0, asrc0, adst0, b0, fin_p, hid_p)

    # mu / logvar convs fused as a single 2-head GAT layer -> one lane-dense slab.
    w12 = jnp.concatenate([Wmu, Wlv], axis=1)
    a_src12 = jnp.concatenate([asrc_mu, asrc_lv], axis=0)
    a_dst12 = jnp.concatenate([adst_mu, adst_lv], axis=0)
    b12 = jnp.concatenate([bmu, blv])
    w12_aug, b12_p = _pack_gat_weights(w12, a_src12, a_dst12, b12, hid_p, out_p)

    # Call 1: h = relu(GAT_0(x)); bf16 hidden goes back to HBM so call 2 can
    # attend over ALL source nodes regardless of N (no VMEM residency limit).
    h = _run_gat_layer(x_p, adj, w0_aug, b0_p, heads=H, head_width=C1,
                       row_block=row_block, key_block=key_block,
                       mode="relu", out_dtype=jnp.bfloat16)
    # Call 2: [mu | softplus(logvar)] slab.
    out = _run_gat_layer(h, adj, w12_aug, b12_p, heads=2, head_width=out_ch,
                         row_block=row_block, key_block=key_block,
                         mode="mu_softplus", out_dtype=jnp.float32)
    mu = out[:N, :out_ch]
    logvar = out[:N, out_ch:2 * out_ch]
    return mu, logvar


# ----------------------------------------------------------------------------
# Parameter construction (deterministic, synthetic) mirroring GATEncoder.__init__
# ----------------------------------------------------------------------------
def _glorot(key, shape):
    fan_in, fan_out = shape[0], shape[-1]
    lim = jnp.sqrt(6.0 / (fan_in + fan_out))
    return jax.random.uniform(key, shape, jnp.float32, -lim, lim)


def make_gat_params(key, fin, c_per_head, heads):
    k1, k2, k3 = jax.random.split(key, 3)
    W = _glorot(k1, (fin, heads * c_per_head))
    att_src = _glorot(k2, (heads, c_per_head))
    att_dst = _glorot(k3, (heads, c_per_head))
    bias = jnp.zeros((heads * c_per_head,), jnp.float32)
    return (W, att_src, att_dst, bias, heads, c_per_head)


def make_gat_encoder_params(key, in_channels, hidden_channels, num_layers,
                            out_channels, heads=4):
    assert num_layers >= 3, "use num_layers >= 3 for the non-degenerate path"
    keys = jax.random.split(key, num_layers + 1)
    convs = [make_gat_params(keys[0], in_channels, hidden_channels // heads, heads)]
    for i in range(num_layers - 2):   # middle layers (dead code due to early return)
        convs.append(make_gat_params(keys[1 + i], hidden_channels,
                                     hidden_channels // heads, heads))
    convs.append(make_gat_params(keys[-2], hidden_channels, out_channels, 1))  # mu
    convs.append(make_gat_params(keys[-1], hidden_channels, out_channels, 1))  # logvar
    return convs


# ----------------------------------------------------------------------------
if __name__ == "__main__":
    key = jax.random.PRNGKey(0)
    k_x, k_e, k_p = jax.random.split(key, 3)

    N = 16            # nodes
    in_channels = 8
    hidden_channels = 32
    out_channels = 16
    num_layers = 3
    heads = 4

    # Node features.
    x = jax.random.normal(k_x, (N, in_channels), jnp.float32)

    # Deterministic edge list (ring + chords), no duplicates / self loops.
    src = jnp.concatenate([jnp.arange(N), jnp.arange(N)]).astype(jnp.int32)
    dst = jnp.concatenate([(jnp.arange(N) + 1) % N,
                           (jnp.arange(N) + 3) % N]).astype(jnp.int32)
    edge_index = jnp.stack([src, dst])                       # [2, 32]
    edge_attr = jax.random.normal(k_e, (edge_index.shape[1], 4), jnp.float32)

    convs = make_gat_encoder_params(k_p, in_channels, hidden_channels,
                                    num_layers, out_channels, heads=heads)

    mu, logvar = jax.jit(
        lambda x_, ei_, ea_: gat_encoder_forward(convs, x_, ei_, ea_)
    )(x, edge_index, edge_attr)
    jax.block_until_ready((mu, logvar))

    assert mu.shape == (N, out_channels) and logvar.shape == (N, out_channels)
    assert bool(jnp.all(jnp.isfinite(mu))) and bool(jnp.all(jnp.isfinite(logvar)))
    assert bool(jnp.all(logvar >= 0.0))   # softplus output is non-negative
    print("KERNEL_OK")
</pallas_src>

<mosaic_0001>
module attributes {stable_mosaic.version = 11 : i64} {
  func.func @_gat_layer_kernel(%arg0: i32, %arg1: i32, %arg2: memref<128x128xbf16, #tpu.memory_space<vmem>>, %arg3: memref<128x128xbf16, #tpu.memory_space<vmem>>, %arg4: memref<128x128xi8, #tpu.memory_space<vmem>>, %arg5: memref<128x144xbf16, #tpu.memory_space<vmem>>, %arg6: memref<1x128xf32, #tpu.memory_space<vmem>>, %arg7: memref<128x128xbf16, #tpu.memory_space<vmem>>, %arg8: memref<128x8xf32, #tpu.memory_space<vmem>>, %arg9: memref<128x8xf32, #tpu.memory_space<vmem>>, %arg10: memref<128x8xf32, #tpu.memory_space<vmem>>, %arg11: memref<128x128xf32, #tpu.memory_space<vmem>>) attributes {dimension_semantics = [#tpu.dimension_semantics<parallel>, #tpu.dimension_semantics<arbitrary>], iteration_bounds = array<i64: 1, 1>, scalar_prefetch = 0 : i64, scratch_operands = 4 : i64, tpu.core_type = #tpu.core_type<tc>, window_params = [{transform_indices = @transform_0, window_bounds = array<i64: 128, 128>}, {transform_indices = @transform_1, window_bounds = array<i64: 128, 128>}, {transform_indices = @transform_2, window_bounds = array<i64: 128, 128>}, {pipeline_mode = #tpu.pipeline_mode<synchronous>, transform_indices = @transform_3, window_bounds = array<i64: 128, 144>}, {pipeline_mode = #tpu.pipeline_mode<synchronous>, transform_indices = @transform_4, window_bounds = array<i64: 1, 128>}, {transform_indices = @transform_5, window_bounds = array<i64: 128, 128>}]} {
    %c0_i32 = arith.constant 0 : i32
    %0 = arith.cmpi eq, %arg1, %c0_i32 : i32
    %1 = arith.extui %0 : i1 to i32
    %c0_i32_0 = arith.constant 0 : i32
    %2 = arith.cmpi ne, %1, %c0_i32_0 : i32
    scf.if %2 {
      %cst_80 = arith.constant -1.000000e+30 : f32
      %163 = vector.broadcast %cst_80 : f32 to vector<128x8xf32>
      %c0_81 = arith.constant 0 : index
      %c0_82 = arith.constant 0 : index
      %164 = vector.load %arg9[%c0_81, %c0_82] : memref<128x8xf32, #tpu.memory_space<vmem>>, vector<128x8xf32>
      tpu.vector_store %arg9[%c0_81, %c0_82], %163 {strides = array<i32>} : memref<128x8xf32, #tpu.memory_space<vmem>>, vector<128x8xf32>,
      %cst_83 = arith.constant 0.000000e+00 : f32
      %165 = vector.broadcast %cst_83 : f32 to vector<128x8xf32>
      %c0_84 = arith.constant 0 : index
      %c0_85 = arith.constant 0 : index
      %166 = vector.load %arg10[%c0_84, %c0_85] : memref<128x8xf32, #tpu.memory_space<vmem>>, vector<128x8xf32>
      tpu.vector_store %arg10[%c0_84, %c0_85], %165 {strides = array<i32>} : memref<128x8xf32, #tpu.memory_space<vmem>>, vector<128x8xf32>,
      %cst_86 = arith.constant 0.000000e+00 : f32
      %167 = vector.broadcast %cst_86 : f32 to vector<128x128xf32>
      %c0_87 = arith.constant 0 : index
      %c0_88 = arith.constant 0 : index
      %168 = vector.load %arg11[%c0_87, %c0_88] : memref<128x128xf32, #tpu.memory_space<vmem>>, vector<128x128xf32>
      tpu.vector_store %arg11[%c0_87, %c0_88], %167 {strides = array<i32>} : memref<128x128xf32, #tpu.memory_space<vmem>>, vector<128x128xf32>,
      %c0_89 = arith.constant 0 : index
      %c0_90 = arith.constant 0 : index
      %169 = vector.load %arg2[%c0_89, %c0_90] : memref<128x128xbf16, #tpu.memory_space<vmem>>, vector<128x128xbf16>
      %c0_91 = arith.constant 0 : index
      %c136 = arith.constant 136 : index
      %170 = vector.load %arg5[%c0_91, %c136] : memref<128x144xbf16, #tpu.memory_space<vmem>>, vector<128x8xbf16>
      %cst_92 = arith.constant dense<0.000000e+00> : vector<128x8xf32>
      %171 = tpu.matmul %169, %170, %cst_92 {dimension_numbers = #tpu.dot_dimension_numbers<[1], [0], [0], [1], [0, 0, 1, 1], [], []>} : vector<128x128xbf16>, vector<128x8xbf16>, vector<128x8xf32> -> vector<128x8xf32>
      %c0_93 = arith.constant 0 : index
      %c0_94 = arith.constant 0 : index
      %172 = vector.load %arg8[%c0_93, %c0_94] : memref<128x8xf32, #tpu.memory_space<vmem>>, vector<128x8xf32>
      tpu.vector_store %arg8[%c0_93, %c0_94], %171 {strides = array<i32>} : memref<128x8xf32, #tpu.memory_space<vmem>>, vector<128x8xf32>,
    } else {
    }
    %c0 = arith.constant 0 : index
    %c0_1 = arith.constant 0 : index
    %3 = vector.load %arg3[%c0, %c0_1] : memref<128x128xbf16, #tpu.memory_space<vmem>>, vector<128x128xbf16>
    %c0_2 = arith.constant 0 : index
    %c0_3 = arith.constant 0 : index
    %4 = vector.load %arg5[%c0_2, %c0_3] : memref<128x144xbf16, #tpu.memory_space<vmem>>, vector<128x136xbf16>
    %cst = arith.constant dense<0.000000e+00> : vector<128x136xf32>
    %5 = tpu.matmul %3, %4, %cst {dimension_numbers = #tpu.dot_dimension_numbers<[1], [0], [0], [1], [0, 0, 1, 1], [], []>} : vector<128x128xbf16>, vector<128x136xbf16>, vector<128x136xf32> -> vector<128x136xf32>
    %6 = vector.extract_strided_slice %5 {offsets = [0, 0], sizes = [128, 128], strides = [1, 1]} : vector<128x136xf32> to vector<128x128xf32>
    %7 = arith.truncf %6 : vector<128x128xf32> to vector<128x128xbf16>
    %8 = vector.extract_strided_slice %5 {offsets = [0, 128], sizes = [128, 8], strides = [1, 1]} : vector<128x136xf32> to vector<128x8xf32>
    %9 = tpu.transpose %8, [1, 0] : vector<128x8xf32> -> vector<8x128xf32>
    %c0_4 = arith.constant 0 : index
    %c0_5 = arith.constant 0 : index
    %10 = vector.load %arg4[%c0_4, %c0_5] : memref<128x128xi8, #tpu.memory_space<vmem>>, vector<128x128xi8>
    %11 = arith.sitofp %10 : vector<128x128xi8> to vector<128x128xf32>
    %cst_6 = arith.constant 1.000000e+00 : f32
    %12 = vector.broadcast %cst_6 : f32 to vector<128x128xf32>
    %13 = arith.subf %11, %12 : vector<128x128xf32>
    %cst_7 = arith.constant 1.000000e+30 : f32
    %14 = vector.broadcast %cst_7 : f32 to vector<128x128xf32>
    %15 = arith.mulf %13, %14 : vector<128x128xf32>
    %c0_8 = arith.constant 0 : index
    %c0_9 = arith.constant 0 : index
    %16 = vector.load %arg8[%c0_8, %c0_9] : memref<128x8xf32, #tpu.memory_space<vmem>>, vector<128x1xf32>
    %17 = vector.extract_strided_slice %9 {offsets = [0, 0], sizes = [1, 128], strides = [1, 1]} : vector<8x128xf32> to vector<1x128xf32>
    %18 = vector.broadcast %16 : vector<128x1xf32> to vector<128x128xf32>
    %19 = vector.broadcast %17 : vector<1x128xf32> to vector<128x128xf32>
    %20 = arith.addf %18, %19 : vector<128x128xf32>
    %cst_10 = arith.constant 0.000000e+00 : f32
    %21 = vector.broadcast %cst_10 : f32 to vector<128x128xf32>
    %22 = arith.cmpf ogt, %20, %21 : vector<128x128xf32>
    %cst_11 = arith.constant 2.000000e-01 : f32
    %23 = vector.broadcast %cst_11 : f32 to vector<128x128xf32>
    %24 = arith.mulf %23, %20 : vector<128x128xf32>
    %25 = arith.select %22, %20, %24 : vector<128x128xi1>, vector<128x128xf32>
    %26 = arith.addf %25, %15 : vector<128x128xf32>
    %c0_12 = arith.constant 0 : index
    %c0_13 = arith.constant 0 : index
    %27 = vector.load %arg9[%c0_12, %c0_13] : memref<128x8xf32, #tpu.memory_space<vmem>>, vector<128x1xf32>
    %cst_14 = arith.constant dense<0xFF800000> : vector<128xf32>
    %28 = vector.multi_reduction <maximumf>, %26, %cst_14 [1] : vector<128x128xf32> to vector<128xf32>
    %29 = vector.shape_cast %28 : vector<128xf32> to vector<128x1xf32>
    %30 = arith.maximumf %27, %29 : vector<128x1xf32>
    %31 = vector.broadcast %30 : vector<128x1xf32> to vector<128x128xf32>
    %32 = arith.subf %26, %31 : vector<128x128xf32>
    %33 = math.exp %32 : vector<128x128xf32>
    %34 = arith.mulf %33, %11 : vector<128x128xf32>
    %35 = arith.subf %27, %30 : vector<128x1xf32>
    %36 = math.exp %35 : vector<128x1xf32>
    %c0_15 = arith.constant 0 : index
    %c0_16 = arith.constant 0 : index
    %37 = vector.load %arg10[%c0_15, %c0_16] : memref<128x8xf32, #tpu.memory_space<vmem>>, vector<128x1xf32>
    %38 = arith.mulf %36, %37 : vector<128x1xf32>
    %cst_17 = arith.constant dense<0.000000e+00> : vector<128xf32>
    %39 = vector.multi_reduction <add>, %34, %cst_17 [1] : vector<128x128xf32> to vector<128xf32>
    %40 = vector.shape_cast %39 : vector<128xf32> to vector<128x1xf32>
    %41 = arith.addf %38, %40 : vector<128x1xf32>
    %c0_18 = arith.constant 0 : index
    %c0_19 = arith.constant 0 : index
    %42 = vector.load %arg10[%c0_18, %c0_19] : memref<128x8xf32, #tpu.memory_space<vmem>>, vector<128x1xf32>
    tpu.vector_store %arg10[%c0_18, %c0_19], %41 {strides = array<i32>} : memref<128x8xf32, #tpu.memory_space<vmem>>, vector<128x1xf32>,
    %c0_20 = arith.constant 0 : index
    %c0_21 = arith.constant 0 : index
    %43 = vector.load %arg11[%c0_20, %c0_21] : memref<128x128xf32, #tpu.memory_space<vmem>>, vector<128x8xf32>
    %44 = vector.broadcast %36 : vector<128x1xf32> to vector<128x8xf32>
    %45 = arith.mulf %44, %43 : vector<128x8xf32>
    %46 = arith.truncf %34 : vector<128x128xf32> to vector<128x128xbf16>
    %47 = vector.extract_strided_slice %7 {offsets = [0, 0], sizes = [128, 8], strides = [1, 1]} : vector<128x128xbf16> to vector<128x8xbf16>
    %cst_22 = arith.constant dense<0.000000e+00> : vector<128x8xf32>
    %48 = tpu.matmul %46, %47, %cst_22 {dimension_numbers = #tpu.dot_dimension_numbers<[1], [0], [0], [1], [0, 0, 1, 1], [], []>} : vector<128x128xbf16>, vector<128x8xbf16>, vector<128x8xf32> -> vector<128x8xf32>
    %49 = arith.addf %45, %48 : vector<128x8xf32>
    %c0_23 = arith.constant 0 : index
    %c0_24 = arith.constant 0 : index
    %50 = vector.load %arg11[%c0_23, %c0_24] : memref<128x128xf32, #tpu.memory_space<vmem>>, vector<128x8xf32>
    tpu.vector_store %arg11[%c0_23, %c0_24], %49 {strides = array<i32>} : memref<128x128xf32, #tpu.memory_space<vmem>>, vector<128x8xf32>,
    %c0_25 = arith.constant 0 : index
    %c0_26 = arith.constant 0 : index
    %51 = vector.load %arg9[%c0_25, %c0_26] : memref<128x8xf32, #tpu.memory_space<vmem>>, vector<128x1xf32>
    tpu.vector_store %arg9[%c0_25, %c0_26], %30 {strides = array<i32>} : memref<128x8xf32, #tpu.memory_space<vmem>>, vector<128x1xf32>,
    %c0_27 = arith.constant 0 : index
    %c1 = arith.constant 1 : index
    %52 = vector.load %arg8[%c0_27, %c1] : memref<128x8xf32, #tpu.memory_space<vmem>>, vector<128x1xf32>
    %53 = vector.extract_strided_slice %9 {offsets = [1, 0], sizes = [1, 128], strides = [1, 1]} : vector<8x128xf32> to vector<1x128xf32>
    %54 = vector.broadcast %52 : vector<128x1xf32> to vector<128x128xf32>
    %55 = vector.broadcast %53 : vector<1x128xf32> to vector<128x128xf32>
    %56 = arith.addf %54, %55 : vector<128x128xf32>
    %cst_28 = arith.constant 0.000000e+00 : f32
    %57 = vector.broadcast %cst_28 : f32 to vector<128x128xf32>
    %58 = arith.cmpf ogt, %56, %57 : vector<128x128xf32>
    %cst_29 = arith.constant 2.000000e-01 : f32
    %59 = vector.broadcast %cst_29 : f32 to vector<128x128xf32>
    %60 = arith.mulf %59, %56 : vector<128x128xf32>
    %61 = arith.select %58, %56, %60 : vector<128x128xi1>, vector<128x128xf32>
    %62 = arith.addf %61, %15 : vector<128x128xf32>
    %c0_30 = arith.constant 0 : index
    %c1_31 = arith.constant 1 : index
    %63 = vector.load %arg9[%c0_30, %c1_31] : memref<128x8xf32, #tpu.memory_space<vmem>>, vector<128x1xf32>
    %cst_32 = arith.constant dense<0xFF800000> : vector<128xf32>
    %64 = vector.multi_reduction <maximumf>, %62, %cst_32 [1] : vector<128x128xf32> to vector<128xf32>
    %65 = vector.shape_cast %64 : vector<128xf32> to vector<128x1xf32>
    %66 = arith.maximumf %63, %65 : vector<128x1xf32>
    %67 = vector.broadcast %66 : vector<128x1xf32> to vector<128x128xf32>
    %68 = arith.subf %62, %67 : vector<128x128xf32>
    %69 = math.exp %68 : vector<128x128xf32>
    %70 = arith.mulf %69, %11 : vector<128x128xf32>
    %71 = arith.subf %63, %66 : vector<128x1xf32>
    %72 = math.exp %71 : vector<128x1xf32>
    %c0_33 = arith.constant 0 : index
    %c1_34 = arith.constant 1 : index
    %73 = vector.load %arg10[%c0_33, %c1_34] : memref<128x8xf32, #tpu.memory_space<vmem>>, vector<128x1xf32>
    %74 = arith.mulf %72, %73 : vector<128x1xf32>
    %cst_35 = arith.constant dense<0.000000e+00> : vector<128xf32>
    %75 = vector.multi_reduction <add>, %70, %cst_35 [1] : vector<128x128xf32> to vector<128xf32>
    %76 = vector.shape_cast %75 : vector<128xf32> to vector<128x1xf32>
    %77 = arith.addf %74, %76 : vector<128x1xf32>
    %c0_36 = arith.constant 0 : index
    %c1_37 = arith.constant 1 : index
    %78 = vector.load %arg10[%c0_36, %c1_37] : memref<128x8xf32, #tpu.memory_space<vmem>>, vector<128x1xf32>
    tpu.vector_store %arg10[%c0_36, %c1_37], %77 {strides = array<i32>} : memref<128x8xf32, #tpu.memory_space<vmem>>, vector<128x1xf32>,
    %c0_38 = arith.constant 0 : index
    %c8 = arith.constant 8 : index
    %79 = vector.load %arg11[%c0_38, %c8] : memref<128x128xf32, #tpu.memory_space<vmem>>, vector<128x8xf32>
    %80 = vector.broadcast %72 : vector<128x1xf32> to vector<128x8xf32>
    %81 = arith.mulf %80, %79 : vector<128x8xf32>
    %82 = arith.truncf %70 : vector<128x128xf32> to vector<128x128xbf16>
    %83 = vector.extract_strided_slice %7 {offsets = [0, 8], sizes = [128, 8], strides = [1, 1]} : vector<128x128xbf16> to vector<128x8xbf16>
    %cst_39 = arith.constant dense<0.000000e+00> : vector<128x8xf32>
    %84 = tpu.matmul %82, %83, %cst_39 {dimension_numbers = #tpu.dot_dimension_numbers<[1], [0], [0], [1], [0, 0, 1, 1], [], []>} : vector<128x128xbf16>, vector<128x8xbf16>, vector<128x8xf32> -> vector<128x8xf32>
    %85 = arith.addf %81, %84 : vector<128x8xf32>
    %c0_40 = arith.constant 0 : index
    %c8_41 = arith.constant 8 : index
    %86 = vector.load %arg11[%c0_40, %c8_41] : memref<128x128xf32, #tpu.memory_space<vmem>>, vector<128x8xf32>
    tpu.vector_store %arg11[%c0_40, %c8_41], %85 {strides = array<i32>} : memref<128x128xf32, #tpu.memory_space<vmem>>, vector<128x8xf32>,
    %c0_42 = arith.constant 0 : index
    %c1_43 = arith.constant 1 : index
    %87 = vector.load %arg9[%c0_42, %c1_43] : memref<128x8xf32, #tpu.memory_space<vmem>>, vector<128x1xf32>
    tpu.vector_store %arg9[%c0_42, %c1_43], %66 {strides = array<i32>} : memref<128x8xf32, #tpu.memory_space<vmem>>, vector<128x1xf32>,
    %c0_44 = arith.constant 0 : index
    %c2 = arith.constant 2 : index
    %88 = vector.load %arg8[%c0_44, %c2] : memref<128x8xf32, #tpu.memory_space<vmem>>, vector<128x1xf32>
    %89 = vector.extract_strided_slice %9 {offsets = [2, 0], sizes = [1, 128], strides = [1, 1]} : vector<8x128xf32> to vector<1x128xf32>
    %90 = vector.broadcast %88 : vector<128x1xf32> to vector<128x128xf32>
    %91 = vector.broadcast %89 : vector<1x128xf32> to vector<128x128xf32>
    %92 = arith.addf %90, %91 : vector<128x128xf32>
    %cst_45 = arith.constant 0.000000e+00 : f32
    %93 = vector.broadcast %cst_45 : f32 to vector<128x128xf32>
    %94 = arith.cmpf ogt, %92, %93 : vector<128x128xf32>
    %cst_46 = arith.constant 2.000000e-01 : f32
    %95 = vector.broadcast %cst_46 : f32 to vector<128x128xf32>
    %96 = arith.mulf %95, %92 : vector<128x128xf32>
    %97 = arith.select %94, %92, %96 : vector<128x128xi1>, vector<128x128xf32>
    %98 = arith.addf %97, %15 : vector<128x128xf32>
    %c0_47 = arith.constant 0 : index
    %c2_48 = arith.constant 2 : index
    %99 = vector.load %arg9[%c0_47, %c2_48] : memref<128x8xf32, #tpu.memory_space<vmem>>, vector<128x1xf32>
    %cst_49 = arith.constant dense<0xFF800000> : vector<128xf32>
    %100 = vector.multi_reduction <maximumf>, %98, %cst_49 [1] : vector<128x128xf32> to vector<128xf32>
    %101 = vector.shape_cast %100 : vector<128xf32> to vector<128x1xf32>
    %102 = arith.maximumf %99, %101 : vector<128x1xf32>
    %103 = vector.broadcast %102 : vector<128x1xf32> to vector<128x128xf32>
    %104 = arith.subf %98, %103 : vector<128x128xf32>
    %105 = math.exp %104 : vector<128x128xf32>
    %106 = arith.mulf %105, %11 : vector<128x128xf32>
    %107 = arith.subf %99, %102 : vector<128x1xf32>
    %108 = math.exp %107 : vector<128x1xf32>
    %c0_50 = arith.constant 0 : index
    %c2_51 = arith.constant 2 : index
    %109 = vector.load %arg10[%c0_50, %c2_51] : memref<128x8xf32, #tpu.memory_space<vmem>>, vector<128x1xf32>
    %110 = arith.mulf %108, %109 : vector<128x1xf32>
    %cst_52 = arith.constant dense<0.000000e+00> : vector<128xf32>
    %111 = vector.multi_reduction <add>, %106, %cst_52 [1] : vector<128x128xf32> to vector<128xf32>
    %112 = vector.shape_cast %111 : vector<128xf32> to vector<128x1xf32>
    %113 = arith.addf %110, %112 : vector<128x1xf32>
    %c0_53 = arith.constant 0 : index
    %c2_54 = arith.constant 2 : index
    %114 = vector.load %arg10[%c0_53, %c2_54] : memref<128x8xf32, #tpu.memory_space<vmem>>, vector<128x1xf32>
    tpu.vector_store %arg10[%c0_53, %c2_54], %113 {strides = array<i32>} : memref<128x8xf32, #tpu.memory_space<vmem>>, vector<128x1xf32>,
    %c0_55 = arith.constant 0 : index
    %c16 = arith.constant 16 : index
    %115 = vector.load %arg11[%c0_55, %c16] : memref<128x128xf32, #tpu.memory_space<vmem>>, vector<128x8xf32>
    %116 = vector.broadcast %108 : vector<128x1xf32> to vector<128x8xf32>
    %117 = arith.mulf %116, %115 : vector<128x8xf32>
    %118 = arith.truncf %106 : vector<128x128xf32> to vector<128x128xbf16>
    %119 = vector.extract_strided_slice %7 {offsets = [0, 16], sizes = [128, 8], strides = [1, 1]} : vector<128x128xbf16> to vector<128x8xbf16>
    %cst_56 = arith.constant dense<0.000000e+00> : vector<128x8xf32>
    %120 = tpu.matmul %118, %119, %cst_56 {dimension_numbers = #tpu.dot_dimension_numbers<[1], [0], [0], [1], [0, 0, 1, 1], [], []>} : vector<128x128xbf16>, vector<128x8xbf16>, vector<128x8xf32> -> vector<128x8xf32>
    %121 = arith.addf %117, %120 : vector<128x8xf32>
    %c0_57 = arith.constant 0 : index
    %c16_58 = arith.constant 16 : index
    %122 = vector.load %arg11[%c0_57, %c16_58] : memref<128x128xf32, #tpu.memory_space<vmem>>, vector<128x8xf32>
    tpu.vector_store %arg11[%c0_57, %c16_58], %121 {strides = array<i32>} : memref<128x128xf32, #tpu.memory_space<vmem>>, vector<128x8xf32>,
    %c0_59 = arith.constant 0 : index
    %c2_60 = arith.constant 2 : index
    %123 = vector.load %arg9[%c0_59, %c2_60] : memref<128x8xf32, #tpu.memory_space<vmem>>, vector<128x1xf32>
    tpu.vector_store %arg9[%c0_59, %c2_60], %102 {strides = array<i32>} : memref<128x8xf32, #tpu.memory_space<vmem>>, vector<128x1xf32>,
    %c0_61 = arith.constant 0 : index
    %c3 = arith.constant 3 : index
    %124 = vector.load %arg8[%c0_61, %c3] : memref<128x8xf32, #tpu.memory_space<vmem>>, vector<128x1xf32>
    %125 = vector.extract_strided_slice %9 {offsets = [3, 0], sizes = [1, 128], strides = [1, 1]} : vector<8x128xf32> to vector<1x128xf32>
    %126 = vector.broadcast %124 : vector<128x1xf32> to vector<128x128xf32>
    %127 = vector.broadcast %125 : vector<1x128xf32> to vector<128x128xf32>
    %128 = arith.addf %126, %127 : vector<128x128xf32>
    %cst_62 = arith.constant 0.000000e+00 : f32
    %129 = vector.broadcast %cst_62 : f32 to vector<128x128xf32>
    %130 = arith.cmpf ogt, %128, %129 : vector<128x128xf32>
    %cst_63 = arith.constant 2.000000e-01 : f32
    %131 = vector.broadcast %cst_63 : f32 to vector<128x128xf32>
    %132 = arith.mulf %131, %128 : vector<128x128xf32>
    %133 = arith.select %130, %128, %132 : vector<128x128xi1>, vector<128x128xf32>
    %134 = arith.addf %133, %15 : vector<128x128xf32>
    %c0_64 = arith.constant 0 : index
    %c3_65 = arith.constant 3 : index
    %135 = vector.load %arg9[%c0_64, %c3_65] : memref<128x8xf32, #tpu.memory_space<vmem>>, vector<128x1xf32>
    %cst_66 = arith.constant dense<0xFF800000> : vector<128xf32>
    %136 = vector.multi_reduction <maximumf>, %134, %cst_66 [1] : vector<128x128xf32> to vector<128xf32>
    %137 = vector.shape_cast %136 : vector<128xf32> to vector<128x1xf32>
    %138 = arith.maximumf %135, %137 : vector<128x1xf32>
    %139 = vector.broadcast %138 : vector<128x1xf32> to vector<128x128xf32>
    %140 = arith.subf %134, %139 : vector<128x128xf32>
    %141 = math.exp %140 : vector<128x128xf32>
    %142 = arith.mulf %141, %11 : vector<128x128xf32>
    %143 = arith.subf %135, %138 : vector<128x1xf32>
    %144 = math.exp %143 : vector<128x1xf32>
    %c0_67 = arith.constant 0 : index
    %c3_68 = arith.constant 3 : index
    %145 = vector.load %arg10[%c0_67, %c3_68] : memref<128x8xf32, #tpu.memory_space<vmem>>, vector<128x1xf32>
    %146 = arith.mulf %144, %145 : vector<128x1xf32>
    %cst_69 = arith.constant dense<0.000000e+00> : vector<128xf32>
    %147 = vector.multi_reduction <add>, %142, %cst_69 [1] : vector<128x128xf32> to vector<128xf32>
    %148 = vector.shape_cast %147 : vector<128xf32> to vector<128x1xf32>
    %149 = arith.addf %146, %148 : vector<128x1xf32>
    %c0_70 = arith.constant 0 : index
    %c3_71 = arith.constant 3 : index
    %150 = vector.load %arg10[%c0_70, %c3_71] : memref<128x8xf32, #tpu.memory_space<vmem>>, vector<128x1xf32>
    tpu.vector_store %arg10[%c0_70, %c3_71], %149 {strides = array<i32>} : memref<128x8xf32, #tpu.memory_space<vmem>>, vector<128x1xf32>,
    %c0_72 = arith.constant 0 : index
    %c24 = arith.constant 24 : index
    %151 = vector.load %arg11[%c0_72, %c24] : memref<128x128xf32, #tpu.memory_space<vmem>>, vector<128x8xf32>
    %152 = vector.broadcast %144 : vector<128x1xf32> to vector<128x8xf32>
    %153 = arith.mulf %152, %151 : vector<128x8xf32>
    %154 = arith.truncf %142 : vector<128x128xf32> to vector<128x128xbf16>
    %155 = vector.extract_strided_slice %7 {offsets = [0, 24], sizes = [128, 8], strides = [1, 1]} : vector<128x128xbf16> to vector<128x8xbf16>
    %cst_73 = arith.constant dense<0.000000e+00> : vector<128x8xf32>
    %156 = tpu.matmul %154, %155, %cst_73 {dimension_numbers = #tpu.dot_dimension_numbers<[1], [0], [0], [1], [0, 0, 1, 1], [], []>} : vector<128x128xbf16>, vector<128x8xbf16>, vector<128x8xf32> -> vector<128x8xf32>
    %157 = arith.addf %153, %156 : vector<128x8xf32>
    %c0_74 = arith.constant 0 : index
    %c24_75 = arith.constant 24 : index
    %158 = vector.load %arg11[%c0_74, %c24_75] : memref<128x128xf32, #tpu.memory_space<vmem>>, vector<128x8xf32>
    tpu.vector_store %arg11[%c0_74, %c24_75], %157 {strides = array<i32>} : memref<128x128xf32, #tpu.memory_space<vmem>>, vector<128x8xf32>,
    %c0_76 = arith.constant 0 : index
    %c3_77 = arith.constant 3 : index
    %159 = vector.load %arg9[%c0_76, %c3_77] : memref<128x8xf32, #tpu.memory_space<vmem>>, vector<128x1xf32>
    tpu.vector_store %arg9[%c0_76, %c3_77], %138 {strides = array<i32>} : memref<128x8xf32, #tpu.memory_space<vmem>>, vector<128x1xf32>,
    %c0_i32_78 = arith.constant 0 : i32
    %160 = arith.cmpi eq, %arg1, %c0_i32_78 : i32
    %161 = arith.extui %160 : i1 to i32
    %c0_i32_79 = arith.constant 0 : i32
    %162 = arith.cmpi ne, %161, %c0_i32_79 : i32
    scf.if %162 {
      %c0_80 = arith.constant 0 : index
      %c0_81 = arith.constant 0 : index
      %163 = vector.load %arg11[%c0_80, %c0_81] : memref<128x128xf32, #tpu.memory_space<vmem>>, vector<128x8xf32>
      %c0_82 = arith.constant 0 : index
      %c0_83 = arith.constant 0 : index
      %164 = vector.load %arg10[%c0_82, %c0_83] : memref<128x8xf32, #tpu.memory_space<vmem>>, vector<128x1xf32>
      %165 = tpu.reciprocal %164 : vector<128x1xf32> -> vector<128x1xf32>
      %166 = vector.broadcast %165 : vector<128x1xf32> to vector<128x8xf32>
      %167 = arith.mulf %163, %166 : vector<128x8xf32>
      %c0_84 = arith.constant 0 : index
      %c0_85 = arith.constant 0 : index
      %168 = vector.load %arg11[%c0_84, %c0_85] : memref<128x128xf32, #tpu.memory_space<vmem>>, vector<128x8xf32>
      tpu.vector_store %arg11[%c0_84, %c0_85], %167 {strides = array<i32>} : memref<128x128xf32, #tpu.memory_space<vmem>>, vector<128x8xf32>,
      %c0_86 = arith.constant 0 : index
      %c8_87 = arith.constant 8 : index
      %169 = vector.load %arg11[%c0_86, %c8_87] : memref<128x128xf32, #tpu.memory_space<vmem>>, vector<128x8xf32>
      %c0_88 = arith.constant 0 : index
      %c1_89 = arith.constant 1 : index
      %170 = vector.load %arg10[%c0_88, %c1_89] : memref<128x8xf32, #tpu.memory_space<vmem>>, vector<128x1xf32>
      %171 = tpu.reciprocal %170 : vector<128x1xf32> -> vector<128x1xf32>
      %172 = vector.broadcast %171 : vector<128x1xf32> to vector<128x8xf32>
      %173 = arith.mulf %169, %172 : vector<128x8xf32>
      %c0_90 = arith.constant 0 : index
      %c8_91 = arith.constant 8 : index
      %174 = vector.load %arg11[%c0_90, %c8_91] : memref<128x128xf32, #tpu.memory_space<vmem>>, vector<128x8xf32>
      tpu.vector_store %arg11[%c0_90, %c8_91], %173 {strides = array<i32>} : memref<128x128xf32, #tpu.memory_space<vmem>>, vector<128x8xf32>,
      %c0_92 = arith.constant 0 : index
      %c16_93 = arith.constant 16 : index
      %175 = vector.load %arg11[%c0_92, %c16_93] : memref<128x128xf32, #tpu.memory_space<vmem>>, vector<128x8xf32>
      %c0_94 = arith.constant 0 : index
      %c2_95 = arith.constant 2 : index
      %176 = vector.load %arg10[%c0_94, %c2_95] : memref<128x8xf32, #tpu.memory_space<vmem>>, vector<128x1xf32>
      %177 = tpu.reciprocal %176 : vector<128x1xf32> -> vector<128x1xf32>
      %178 = vector.broadcast %177 : vector<128x1xf32> to vector<128x8xf32>
      %179 = arith.mulf %175, %178 : vector<128x8xf32>
      %c0_96 = arith.constant 0 : index
      %c16_97 = arith.constant 16 : index
      %180 = vector.load %arg11[%c0_96, %c16_97] : memref<128x128xf32, #tpu.memory_space<vmem>>, vector<128x8xf32>
      tpu.vector_store %arg11[%c0_96, %c16_97], %179 {strides = array<i32>} : memref<128x128xf32, #tpu.memory_space<vmem>>, vector<128x8xf32>,
      %c0_98 = arith.constant 0 : index
      %c24_99 = arith.constant 24 : index
      %181 = vector.load %arg11[%c0_98, %c24_99] : memref<128x128xf32, #tpu.memory_space<vmem>>, vector<128x8xf32>
      %c0_100 = arith.constant 0 : index
      %c3_101 = arith.constant 3 : index
      %182 = vector.load %arg10[%c0_100, %c3_101] : memref<128x8xf32, #tpu.memory_space<vmem>>, vector<128x1xf32>
      %183 = tpu.reciprocal %182 : vector<128x1xf32> -> vector<128x1xf32>
      %184 = vector.broadcast %183 : vector<128x1xf32> to vector<128x8xf32>
      %185 = arith.mulf %181, %184 : vector<128x8xf32>
      %c0_102 = arith.constant 0 : index
      %c24_103 = arith.constant 24 : index
      %186 = vector.load %arg11[%c0_102, %c24_103] : memref<128x128xf32, #tpu.memory_space<vmem>>, vector<128x8xf32>
      tpu.vector_store %arg11[%c0_102, %c24_103], %185 {strides = array<i32>} : memref<128x128xf32, #tpu.memory_space<vmem>>, vector<128x8xf32>,
      %c0_104 = arith.constant 0 : index
      %c0_105 = arith.constant 0 : index
      %187 = vector.load %arg11[%c0_104, %c0_105] : memref<128x128xf32, #tpu.memory_space<vmem>>, vector<128x128xf32>
      %c0_106 = arith.constant 0 : index
      %c0_107 = arith.constant 0 : index
      %188 = vector.load %arg6[%c0_106, %c0_107] : memref<1x128xf32, #tpu.memory_space<vmem>>, vector<1x128xf32>
      %189 = vector.broadcast %188 : vector<1x128xf32> to vector<128x128xf32>
      %190 = arith.addf %187, %189 : vector<128x128xf32>
      %cst_108 = arith.constant 0.000000e+00 : f32
      %191 = vector.broadcast %cst_108 : f32 to vector<128x128xf32>
      %192 = arith.maximumf %190, %191 : vector<128x128xf32>
      %193 = arith.truncf %192 : vector<128x128xf32> to vector<128x128xbf16>
      %c0_109 = arith.constant 0 : index
      %c0_110 = arith.constant 0 : index
      %194 = vector.load %arg7[%c0_109, %c0_110] : memref<128x128xbf16, #tpu.memory_space<vmem>>, vector<128x128xbf16>
      tpu.vector_store %arg7[%c0_109, %c0_110], %193 {strides = array<i32>} : memref<128x128xbf16, #tpu.memory_space<vmem>>, vector<128x128xbf16>,
    } else {
    }
    return
  }
  func.func @transform_0(%arg0: i32, %arg1: i32) -> (i32, i32) {
    %c0_i32 = arith.constant 0 : i32
    %c0_i32_0 = arith.constant 0 : i32
    return %arg0, %c0_i32 : i32, i32
  }
  func.func @transform_1(%arg0: i32, %arg1: i32) -> (i32, i32) {
    %c0_i32 = arith.constant 0 : i32
    %c0_i32_0 = arith.constant 0 : i32
    return %arg1, %c0_i32 : i32, i32
  }
  func.func @transform_2(%arg0: i32, %arg1: i32) -> (i32, i32) {
    %c0_i32 = arith.constant 0 : i32
    return %arg0, %arg1 : i32, i32
  }
  func.func @transform_3(%arg0: i32, %arg1: i32) -> (i32, i32) {
    %c0_i32 = arith.constant 0 : i32
    %c0_i32_0 = arith.constant 0 : i32
    %c0_i32_1 = arith.constant 0 : i32
    return %c0_i32, %c0_i32_0 : i32, i32
  }
  func.func @transform_4(%arg0: i32, %arg1: i32) -> (i32, i32) {
    %c0_i32 = arith.constant 0 : i32
    %c0_i32_0 = arith.constant 0 : i32
    %c0_i32_1 = arith.constant 0 : i32
    return %c0_i32, %c0_i32_0 : i32, i32
  }
  func.func @transform_5(%arg0: i32, %arg1: i32) -> (i32, i32) {
    %c0_i32 = arith.constant 0 : i32
    %c0_i32_0 = arith.constant 0 : i32
    return %arg0, %c0_i32 : i32, i32
  }
}

module attributes {stable_mosaic.version = 11 : i64} {
  func.func @_gat_layer_kernel(%arg0: i32, %arg1: i32, %arg2: memref<128x128xbf16, #tpu.memory_space<vmem>>, %arg3: memref<128x128xbf16, #tpu.memory_space<vmem>>, %arg4: memref<128x128xi8, #tpu.memory_space<vmem>>, %arg5: memref<128x144xbf16, #tpu.memory_space<vmem>>, %arg6: memref<1x128xf32, #tpu.memory_space<vmem>>, %arg7: memref<128x128xf32, #tpu.memory_space<vmem>>, %arg8: memref<128x8xf32, #tpu.memory_space<vmem>>, %arg9: memref<128x8xf32, #tpu.memory_space<vmem>>, %arg10: memref<128x8xf32, #tpu.memory_space<vmem>>, %arg11: memref<128x128xf32, #tpu.memory_space<vmem>>) attributes {dimension_semantics = [#tpu.dimension_semantics<parallel>, #tpu.dimension_semantics<arbitrary>], iteration_bounds = array<i64: 1, 1>, scalar_prefetch = 0 : i64, scratch_operands = 4 : i64, tpu.core_type = #tpu.core_type<tc>, window_params = [{transform_indices = @transform_0, window_bounds = array<i64: 128, 128>}, {transform_indices = @transform_1, window_bounds = array<i64: 128, 128>}, {transform_indices = @transform_2, window_bounds = array<i64: 128, 128>}, {pipeline_mode = #tpu.pipeline_mode<synchronous>, transform_indices = @transform_3, window_bounds = array<i64: 128, 144>}, {pipeline_mode = #tpu.pipeline_mode<synchronous>, transform_indices = @transform_4, window_bounds = array<i64: 1, 128>}, {transform_indices = @transform_5, window_bounds = array<i64: 128, 128>}]} {
    %c0_i32 = arith.constant 0 : i32
    %0 = arith.cmpi eq, %arg1, %c0_i32 : i32
    %1 = arith.extui %0 : i1 to i32
    %c0_i32_0 = arith.constant 0 : i32
    %2 = arith.cmpi ne, %1, %c0_i32_0 : i32
    scf.if %2 {
      %cst_46 = arith.constant -1.000000e+30 : f32
      %91 = vector.broadcast %cst_46 : f32 to vector<128x8xf32>
      %c0_47 = arith.constant 0 : index
      %c0_48 = arith.constant 0 : index
      %92 = vector.load %arg9[%c0_47, %c0_48] : memref<128x8xf32, #tpu.memory_space<vmem>>, vector<128x8xf32>
      tpu.vector_store %arg9[%c0_47, %c0_48], %91 {strides = array<i32>} : memref<128x8xf32, #tpu.memory_space<vmem>>, vector<128x8xf32>,
      %cst_49 = arith.constant 0.000000e+00 : f32
      %93 = vector.broadcast %cst_49 : f32 to vector<128x8xf32>
      %c0_50 = arith.constant 0 : index
      %c0_51 = arith.constant 0 : index
      %94 = vector.load %arg10[%c0_50, %c0_51] : memref<128x8xf32, #tpu.memory_space<vmem>>, vector<128x8xf32>
      tpu.vector_store %arg10[%c0_50, %c0_51], %93 {strides = array<i32>} : memref<128x8xf32, #tpu.memory_space<vmem>>, vector<128x8xf32>,
      %cst_52 = arith.constant 0.000000e+00 : f32
      %95 = vector.broadcast %cst_52 : f32 to vector<128x128xf32>
      %c0_53 = arith.constant 0 : index
      %c0_54 = arith.constant 0 : index
      %96 = vector.load %arg11[%c0_53, %c0_54] : memref<128x128xf32, #tpu.memory_space<vmem>>, vector<128x128xf32>
      tpu.vector_store %arg11[%c0_53, %c0_54], %95 {strides = array<i32>} : memref<128x128xf32, #tpu.memory_space<vmem>>, vector<128x128xf32>,
      %c0_55 = arith.constant 0 : index
      %c0_56 = arith.constant 0 : index
      %97 = vector.load %arg2[%c0_55, %c0_56] : memref<128x128xbf16, #tpu.memory_space<vmem>>, vector<128x128xbf16>
      %c0_57 = arith.constant 0 : index
      %c136 = arith.constant 136 : index
      %98 = vector.load %arg5[%c0_57, %c136] : memref<128x144xbf16, #tpu.memory_space<vmem>>, vector<128x8xbf16>
      %cst_58 = arith.constant dense<0.000000e+00> : vector<128x8xf32>
      %99 = tpu.matmul %97, %98, %cst_58 {dimension_numbers = #tpu.dot_dimension_numbers<[1], [0], [0], [1], [0, 0, 1, 1], [], []>} : vector<128x128xbf16>, vector<128x8xbf16>, vector<128x8xf32> -> vector<128x8xf32>
      %c0_59 = arith.constant 0 : index
      %c0_60 = arith.constant 0 : index
      %100 = vector.load %arg8[%c0_59, %c0_60] : memref<128x8xf32, #tpu.memory_space<vmem>>, vector<128x8xf32>
      tpu.vector_store %arg8[%c0_59, %c0_60], %99 {strides = array<i32>} : memref<128x8xf32, #tpu.memory_space<vmem>>, vector<128x8xf32>,
    } else {
    }
    %c0 = arith.constant 0 : index
    %c0_1 = arith.constant 0 : index
    %3 = vector.load %arg3[%c0, %c0_1] : memref<128x128xbf16, #tpu.memory_space<vmem>>, vector<128x128xbf16>
    %c0_2 = arith.constant 0 : index
    %c0_3 = arith.constant 0 : index
    %4 = vector.load %arg5[%c0_2, %c0_3] : memref<128x144xbf16, #tpu.memory_space<vmem>>, vector<128x136xbf16>
    %cst = arith.constant dense<0.000000e+00> : vector<128x136xf32>
    %5 = tpu.matmul %3, %4, %cst {dimension_numbers = #tpu.dot_dimension_numbers<[1], [0], [0], [1], [0, 0, 1, 1], [], []>} : vector<128x128xbf16>, vector<128x136xbf16>, vector<128x136xf32> -> vector<128x136xf32>
    %6 = vector.extract_strided_slice %5 {offsets = [0, 0], sizes = [128, 128], strides = [1, 1]} : vector<128x136xf32> to vector<128x128xf32>
    %7 = arith.truncf %6 : vector<128x128xf32> to vector<128x128xbf16>
    %8 = vector.extract_strided_slice %5 {offsets = [0, 128], sizes = [128, 8], strides = [1, 1]} : vector<128x136xf32> to vector<128x8xf32>
    %9 = tpu.transpose %8, [1, 0] : vector<128x8xf32> -> vector<8x128xf32>
    %c0_4 = arith.constant 0 : index
    %c0_5 = arith.constant 0 : index
    %10 = vector.load %arg4[%c0_4, %c0_5] : memref<128x128xi8, #tpu.memory_space<vmem>>, vector<128x128xi8>
    %11 = arith.sitofp %10 : vector<128x128xi8> to vector<128x128xf32>
    %cst_6 = arith.constant 1.000000e+00 : f32
    %12 = vector.broadcast %cst_6 : f32 to vector<128x128xf32>
    %13 = arith.subf %11, %12 : vector<128x128xf32>
    %cst_7 = arith.constant 1.000000e+30 : f32
    %14 = vector.broadcast %cst_7 : f32 to vector<128x128xf32>
    %15 = arith.mulf %13, %14 : vector<128x128xf32>
    %c0_8 = arith.constant 0 : index
    %c0_9 = arith.constant 0 : index
    %16 = vector.load %arg8[%c0_8, %c0_9] : memref<128x8xf32, #tpu.memory_space<vmem>>, vector<128x1xf32>
    %17 = vector.extract_strided_slice %9 {offsets = [0, 0], sizes = [1, 128], strides = [1, 1]} : vector<8x128xf32> to vector<1x128xf32>
    %18 = vector.broadcast %16 : vector<128x1xf32> to vector<128x128xf32>
    %19 = vector.broadcast %17 : vector<1x128xf32> to vector<128x128xf32>
    %20 = arith.addf %18, %19 : vector<128x128xf32>
    %cst_10 = arith.constant 0.000000e+00 : f32
    %21 = vector.broadcast %cst_10 : f32 to vector<128x128xf32>
    %22 = arith.cmpf ogt, %20, %21 : vector<128x128xf32>
    %cst_11 = arith.constant 2.000000e-01 : f32
    %23 = vector.broadcast %cst_11 : f32 to vector<128x128xf32>
    %24 = arith.mulf %23, %20 : vector<128x128xf32>
    %25 = arith.select %22, %20, %24 : vector<128x128xi1>, vector<128x128xf32>
    %26 = arith.addf %25, %15 : vector<128x128xf32>
    %c0_12 = arith.constant 0 : index
    %c0_13 = arith.constant 0 : index
    %27 = vector.load %arg9[%c0_12, %c0_13] : memref<128x8xf32, #tpu.memory_space<vmem>>, vector<128x1xf32>
    %cst_14 = arith.constant dense<0xFF800000> : vector<128xf32>
    %28 = vector.multi_reduction <maximumf>, %26, %cst_14 [1] : vector<128x128xf32> to vector<128xf32>
    %29 = vector.shape_cast %28 : vector<128xf32> to vector<128x1xf32>
    %30 = arith.maximumf %27, %29 : vector<128x1xf32>
    %31 = vector.broadcast %30 : vector<128x1xf32> to vector<128x128xf32>
    %32 = arith.subf %26, %31 : vector<128x128xf32>
    %33 = math.exp %32 : vector<128x128xf32>
    %34 = arith.mulf %33, %11 : vector<128x128xf32>
    %35 = arith.subf %27, %30 : vector<128x1xf32>
    %36 = math.exp %35 : vector<128x1xf32>
    %c0_15 = arith.constant 0 : index
    %c0_16 = arith.constant 0 : index
    %37 = vector.load %arg10[%c0_15, %c0_16] : memref<128x8xf32, #tpu.memory_space<vmem>>, vector<128x1xf32>
    %38 = arith.mulf %36, %37 : vector<128x1xf32>
    %cst_17 = arith.constant dense<0.000000e+00> : vector<128xf32>
    %39 = vector.multi_reduction <add>, %34, %cst_17 [1] : vector<128x128xf32> to vector<128xf32>
    %40 = vector.shape_cast %39 : vector<128xf32> to vector<128x1xf32>
    %41 = arith.addf %38, %40 : vector<128x1xf32>
    %c0_18 = arith.constant 0 : index
    %c0_19 = arith.constant 0 : index
    %42 = vector.load %arg10[%c0_18, %c0_19] : memref<128x8xf32, #tpu.memory_space<vmem>>, vector<128x1xf32>
    tpu.vector_store %arg10[%c0_18, %c0_19], %41 {strides = array<i32>} : memref<128x8xf32, #tpu.memory_space<vmem>>, vector<128x1xf32>,
    %c0_20 = arith.constant 0 : index
    %c0_21 = arith.constant 0 : index
    %43 = vector.load %arg11[%c0_20, %c0_21] : memref<128x128xf32, #tpu.memory_space<vmem>>, vector<128x16xf32>
    %44 = vector.broadcast %36 : vector<128x1xf32> to vector<128x16xf32>
    %45 = arith.mulf %44, %43 : vector<128x16xf32>
    %46 = arith.truncf %34 : vector<128x128xf32> to vector<128x128xbf16>
    %47 = vector.extract_strided_slice %7 {offsets = [0, 0], sizes = [128, 16], strides = [1, 1]} : vector<128x128xbf16> to vector<128x16xbf16>
    %cst_22 = arith.constant dense<0.000000e+00> : vector<128x16xf32>
    %48 = tpu.matmul %46, %47, %cst_22 {dimension_numbers = #tpu.dot_dimension_numbers<[1], [0], [0], [1], [0, 0, 1, 1], [], []>} : vector<128x128xbf16>, vector<128x16xbf16>, vector<128x16xf32> -> vector<128x16xf32>
    %49 = arith.addf %45, %48 : vector<128x16xf32>
    %c0_23 = arith.constant 0 : index
    %c0_24 = arith.constant 0 : index
    %50 = vector.load %arg11[%c0_23, %c0_24] : memref<128x128xf32, #tpu.memory_space<vmem>>, vector<128x16xf32>
    tpu.vector_store %arg11[%c0_23, %c0_24], %49 {strides = array<i32>} : memref<128x128xf32, #tpu.memory_space<vmem>>, vector<128x16xf32>,
    %c0_25 = arith.constant 0 : index
    %c0_26 = arith.constant 0 : index
    %51 = vector.load %arg9[%c0_25, %c0_26] : memref<128x8xf32, #tpu.memory_space<vmem>>, vector<128x1xf32>
    tpu.vector_store %arg9[%c0_25, %c0_26], %30 {strides = array<i32>} : memref<128x8xf32, #tpu.memory_space<vmem>>, vector<128x1xf32>,
    %c0_27 = arith.constant 0 : index
    %c1 = arith.constant 1 : index
    %52 = vector.load %arg8[%c0_27, %c1] : memref<128x8xf32, #tpu.memory_space<vmem>>, vector<128x1xf32>
    %53 = vector.extract_strided_slice %9 {offsets = [1, 0], sizes = [1, 128], strides = [1, 1]} : vector<8x128xf32> to vector<1x128xf32>
    %54 = vector.broadcast %52 : vector<128x1xf32> to vector<128x128xf32>
    %55 = vector.broadcast %53 : vector<1x128xf32> to vector<128x128xf32>
    %56 = arith.addf %54, %55 : vector<128x128xf32>
    %cst_28 = arith.constant 0.000000e+00 : f32
    %57 = vector.broadcast %cst_28 : f32 to vector<128x128xf32>
    %58 = arith.cmpf ogt, %56, %57 : vector<128x128xf32>
    %cst_29 = arith.constant 2.000000e-01 : f32
    %59 = vector.broadcast %cst_29 : f32 to vector<128x128xf32>
    %60 = arith.mulf %59, %56 : vector<128x128xf32>
    %61 = arith.select %58, %56, %60 : vector<128x128xi1>, vector<128x128xf32>
    %62 = arith.addf %61, %15 : vector<128x128xf32>
    %c0_30 = arith.constant 0 : index
    %c1_31 = arith.constant 1 : index
    %63 = vector.load %arg9[%c0_30, %c1_31] : memref<128x8xf32, #tpu.memory_space<vmem>>, vector<128x1xf32>
    %cst_32 = arith.constant dense<0xFF800000> : vector<128xf32>
    %64 = vector.multi_reduction <maximumf>, %62, %cst_32 [1] : vector<128x128xf32> to vector<128xf32>
    %65 = vector.shape_cast %64 : vector<128xf32> to vector<128x1xf32>
    %66 = arith.maximumf %63, %65 : vector<128x1xf32>
    %67 = vector.broadcast %66 : vector<128x1xf32> to vector<128x128xf32>
    %68 = arith.subf %62, %67 : vector<128x128xf32>
    %69 = math.exp %68 : vector<128x128xf32>
    %70 = arith.mulf %69, %11 : vector<128x128xf32>
    %71 = arith.subf %63, %66 : vector<128x1xf32>
    %72 = math.exp %71 : vector<128x1xf32>
    %c0_33 = arith.constant 0 : index
    %c1_34 = arith.constant 1 : index
    %73 = vector.load %arg10[%c0_33, %c1_34] : memref<128x8xf32, #tpu.memory_space<vmem>>, vector<128x1xf32>
    %74 = arith.mulf %72, %73 : vector<128x1xf32>
    %cst_35 = arith.constant dense<0.000000e+00> : vector<128xf32>
    %75 = vector.multi_reduction <add>, %70, %cst_35 [1] : vector<128x128xf32> to vector<128xf32>
    %76 = vector.shape_cast %75 : vector<128xf32> to vector<128x1xf32>
    %77 = arith.addf %74, %76 : vector<128x1xf32>
    %c0_36 = arith.constant 0 : index
    %c1_37 = arith.constant 1 : index
    %78 = vector.load %arg10[%c0_36, %c1_37] : memref<128x8xf32, #tpu.memory_space<vmem>>, vector<128x1xf32>
    tpu.vector_store %arg10[%c0_36, %c1_37], %77 {strides = array<i32>} : memref<128x8xf32, #tpu.memory_space<vmem>>, vector<128x1xf32>,
    %c0_38 = arith.constant 0 : index
    %c16 = arith.constant 16 : index
    %79 = vector.load %arg11[%c0_38, %c16] : memref<128x128xf32, #tpu.memory_space<vmem>>, vector<128x16xf32>
    %80 = vector.broadcast %72 : vector<128x1xf32> to vector<128x16xf32>
    %81 = arith.mulf %80, %79 : vector<128x16xf32>
    %82 = arith.truncf %70 : vector<128x128xf32> to vector<128x128xbf16>
    %83 = vector.extract_strided_slice %7 {offsets = [0, 16], sizes = [128, 16], strides = [1, 1]} : vector<128x128xbf16> to vector<128x16xbf16>
    %cst_39 = arith.constant dense<0.000000e+00> : vector<128x16xf32>
    %84 = tpu.matmul %82, %83, %cst_39 {dimension_numbers = #tpu.dot_dimension_numbers<[1], [0], [0], [1], [0, 0, 1, 1], [], []>} : vector<128x128xbf16>, vector<128x16xbf16>, vector<128x16xf32> -> vector<128x16xf32>
    %85 = arith.addf %81, %84 : vector<128x16xf32>
    %c0_40 = arith.constant 0 : index
    %c16_41 = arith.constant 16 : index
    %86 = vector.load %arg11[%c0_40, %c16_41] : memref<128x128xf32, #tpu.memory_space<vmem>>, vector<128x16xf32>
    tpu.vector_store %arg11[%c0_40, %c16_41], %85 {strides = array<i32>} : memref<128x128xf32, #tpu.memory_space<vmem>>, vector<128x16xf32>,
    %c0_42 = arith.constant 0 : index
    %c1_43 = arith.constant 1 : index
    %87 = vector.load %arg9[%c0_42, %c1_43] : memref<128x8xf32, #tpu.memory_space<vmem>>, vector<128x1xf32>
    tpu.vector_store %arg9[%c0_42, %c1_43], %66 {strides = array<i32>} : memref<128x8xf32, #tpu.memory_space<vmem>>, vector<128x1xf32>,
    %c0_i32_44 = arith.constant 0 : i32
    %88 = arith.cmpi eq, %arg1, %c0_i32_44 : i32
    %89 = arith.extui %88 : i1 to i32
    %c0_i32_45 = arith.constant 0 : i32
    %90 = arith.cmpi ne, %89, %c0_i32_45 : i32
    scf.if %90 {
      %c0_46 = arith.constant 0 : index
      %c0_47 = arith.constant 0 : index
      %91 = vector.load %arg11[%c0_46, %c0_47] : memref<128x128xf32, #tpu.memory_space<vmem>>, vector<128x16xf32>
      %c0_48 = arith.constant 0 : index
      %c0_49 = arith.constant 0 : index
      %92 = vector.load %arg10[%c0_48, %c0_49] : memref<128x8xf32, #tpu.memory_space<vmem>>, vector<128x1xf32>
      %93 = tpu.reciprocal %92 : vector<128x1xf32> -> vector<128x1xf32>
      %94 = vector.broadcast %93 : vector<128x1xf32> to vector<128x16xf32>
      %95 = arith.mulf %91, %94 : vector<128x16xf32>
      %c0_50 = arith.constant 0 : index
      %c0_51 = arith.constant 0 : index
      %96 = vector.load %arg11[%c0_50, %c0_51] : memref<128x128xf32, #tpu.memory_space<vmem>>, vector<128x16xf32>
      tpu.vector_store %arg11[%c0_50, %c0_51], %95 {strides = array<i32>} : memref<128x128xf32, #tpu.memory_space<vmem>>, vector<128x16xf32>,
      %c0_52 = arith.constant 0 : index
      %c16_53 = arith.constant 16 : index
      %97 = vector.load %arg11[%c0_52, %c16_53] : memref<128x128xf32, #tpu.memory_space<vmem>>, vector<128x16xf32>
      %c0_54 = arith.constant 0 : index
      %c1_55 = arith.constant 1 : index
      %98 = vector.load %arg10[%c0_54, %c1_55] : memref<128x8xf32, #tpu.memory_space<vmem>>, vector<128x1xf32>
      %99 = tpu.reciprocal %98 : vector<128x1xf32> -> vector<128x1xf32>
      %100 = vector.broadcast %99 : vector<128x1xf32> to vector<128x16xf32>
      %101 = arith.mulf %97, %100 : vector<128x16xf32>
      %c0_56 = arith.constant 0 : index
      %c16_57 = arith.constant 16 : index
      %102 = vector.load %arg11[%c0_56, %c16_57] : memref<128x128xf32, #tpu.memory_space<vmem>>, vector<128x16xf32>
      tpu.vector_store %arg11[%c0_56, %c16_57], %101 {strides = array<i32>} : memref<128x128xf32, #tpu.memory_space<vmem>>, vector<128x16xf32>,
      %c0_58 = arith.constant 0 : index
      %c0_59 = arith.constant 0 : index
      %103 = vector.load %arg11[%c0_58, %c0_59] : memref<128x128xf32, #tpu.memory_space<vmem>>, vector<128x128xf32>
      %c0_60 = arith.constant 0 : index
      %c0_61 = arith.constant 0 : index
      %104 = vector.load %arg6[%c0_60, %c0_61] : memref<1x128xf32, #tpu.memory_space<vmem>>, vector<1x128xf32>
      %105 = vector.broadcast %104 : vector<1x128xf32> to vector<128x128xf32>
      %106 = arith.addf %103, %105 : vector<128x128xf32>
      %107 = tpu.iota {dimensions = array<i32: 1>} : vector<128x128xi32>
      %c16_i32 = arith.constant 16 : i32
      %108 = vector.broadcast %c16_i32 : i32 to vector<128x128xi32>
      %109 = arith.cmpi slt, %107, %108 : vector<128x128xi32>
      %cst_62 = arith.constant 0.000000e+00 : f32
      %110 = vector.broadcast %cst_62 : f32 to vector<128x128xf32>
      %111 = arith.maximumf %106, %110 : vector<128x128xf32>
      %112 = vector.broadcast %cst_62 : f32 to vector<128x128xf32>
      %113 = arith.subf %106, %112 : vector<128x128xf32>
      %114 = arith.cmpf one, %113, %113 : vector<128x128xf32>
      %115 = vector.broadcast %cst_62 : f32 to vector<128x128xf32>
      %116 = arith.addf %106, %115 : vector<128x128xf32>
      %117 = math.absf %113 : vector<128x128xf32>
      %cst_63 = arith.constant 0.000000e+00 : f32
      %118 = vector.broadcast %cst_63 : f32 to vector<128x128xf32>
      %119 = arith.subf %118, %117 : vector<128x128xf32>
      %120 = math.exp %119 : vector<128x128xf32>
      %121 = math.log1p %120 : vector<128x128xf32>
      %122 = arith.addf %111, %121 : vector<128x128xf32>
      %123 = arith.select %114, %116, %122 : vector<128x128xi1>, vector<128x128xf32>
      %124 = arith.select %109, %106, %123 : vector<128x128xi1>, vector<128x128xf32>
      %c0_64 = arith.constant 0 : index
      %c0_65 = arith.constant 0 : index
      %125 = vector.load %arg7[%c0_64, %c0_65] : memref<128x128xf32, #tpu.memory_space<vmem>>, vector<128x128xf32>
      tpu.vector_store %arg7[%c0_64, %c0_65], %124 {strides = array<i32>} : memref<128x128xf32, #tpu.memory_space<vmem>>, vector<128x128xf32>,
    } else {
    }
    return
  }
  func.func @transform_0(%arg0: i32, %arg1: i32) -> (i32, i32) {
    %c0_i32 = arith.constant 0 : i32
    %c0_i32_0 = arith.constant 0 : i32
    return %arg0, %c0_i32 : i32, i32
  }
  func.func @transform_1(%arg0: i32, %arg1: i32) -> (i32, i32) {
    %c0_i32 = arith.constant 0 : i32
    %c0_i32_0 = arith.constant 0 : i32
    return %arg1, %c0_i32 : i32, i32
  }
  func.func @transform_2(%arg0: i32, %arg1: i32) -> (i32, i32) {
    %c0_i32 = arith.constant 0 : i32
    return %arg0, %arg1 : i32, i32
  }
  func.func @transform_3(%arg0: i32, %arg1: i32) -> (i32, i32) {
    %c0_i32 = arith.constant 0 : i32
    %c0_i32_0 = arith.constant 0 : i32
    %c0_i32_1 = arith.constant 0 : i32
    return %c0_i32, %c0_i32_0 : i32, i32
  }
  func.func @transform_4(%arg0: i32, %arg1: i32) -> (i32, i32) {
    %c0_i32 = arith.constant 0 : i32
    %c0_i32_0 = arith.constant 0 : i32
    %c0_i32_1 = arith.constant 0 : i32
    return %c0_i32, %c0_i32_0 : i32, i32
  }
  func.func @transform_5(%arg0: i32, %arg1: i32) -> (i32, i32) {
    %c0_i32 = arith.constant 0 : i32
    %c0_i32_0 = arith.constant 0 : i32
    return %arg0, %c0_i32 : i32, i32
  }
}

</mosaic_0001>

<bundles_post_ra>
// kernel: _lambda_.3
= control target key start
LH: loop header
LB: loop body
LE: loop exit
PB: predicated region body
PF: predicated region fallthrough
CT: control target
= control target key end

     0   :  { %v5604_v1 = vmov 0   ;;  %s3699_s22 = smov 120   ;;  %s3700_s23 = smov 112   ;;  %vm25_vm0 = vcmask 64512   ;;  %s5597_s3 = inlined_call_operand.vmem [shape: bf16[128,144], index: 3, kind: input, shape index: {}]   ;;  %s5598_s1 = inlined_call_operand.vmem [shape: bf16[128,128], index: 1, kind: input, shape index: {}, may-alias: {0,1}]   ;;  %s5599_s0 = inlined_call_operand.vmem [shape: bf16[128,128], index: 0, kind: input, shape index: {}, may-alias: {0,1}]   ;;  %s5600_s2 = inlined_call_operand.vmem [shape: s8[128,128], index: 2, kind: input, shape index: {}]   ;;  %s5601_s4 = inlined_call_operand.vmem [shape: f32[1,128], index: 4, kind: input, shape index: {}]   ;;  %s5602_s5 = inlined_call_operand.vmem [shape: f32[128,128], index: 5, kind: output, shape index: {}]  }
   0x1   :  { %v3425_v0 = vld [vmem:[%s5597_s3 + $0x4] ss:$8 sps:$4 sm:$0xff]   ;;  %523 = vmatprep.mubr.bf16.mxu1 %v5604_v1  ;;  %3370 = vset.pattern.permute.xlu1 %v5604_v1  ;;  %v3426_v2 = vld [vmem:[%s5597_s3 + $0x14] ss:$8 sps:$4 sm:$0xff]   ;;  %v3433_v7 = vld [vmem:[%s5597_s3] ss:$8 sps:$4 sm:$0xff]  }
   0x2   :  { %194 = vrot.lane.b32.xlu0 %v3425_v0, %s3699_s22  ;;  %v3427_v3 = vld [vmem:[%s5597_s3 + $0x24] ss:$8 sps:$4 sm:$0xff]   ;;  %v3428_v4 = vld [vmem:[%s5597_s3 + $0x34] ss:$8 sps:$4 sm:$0xff]   ;;  %v3437_v10 = vld [vmem:[%s5597_s3 + $0x10] ss:$8 sps:$4 sm:$0xff]  }
   0x3   :  { %198 = vrot.lane.b32.xlu1 %v3427_v3, %s3699_s22  ;;  %v3429_v5 = vld [vmem:[%s5597_s3 + $0x44] ss:$8 sps:$4 sm:$0xff]   ;;  %v3430_v8 = vld [vmem:[%s5597_s3 + $0x54] ss:$8 sps:$4 sm:$0xff]   ;;  %v3441_v14 = vld [vmem:[%s5597_s3 + $0x20] ss:$8 sps:$4 sm:$0xff]  }
   0x4   :  { %v3431_v6 = vld [vmem:[%s5597_s3 + $0x4] ss:$8 sps:$4 sm:$0xff]   ;;  %v3435_v9 = vld [vmem:[%s5597_s3 + $0x14] ss:$8 sps:$4 sm:$0xff]   ;;  %v3444_v16 = vld [vmem:[%s5597_s3 + $0x30] ss:$8 sps:$4 sm:$0xff]  }
   0x5   :  { %491 = vmatprep.subr.bf16.mxu1 %v3431_v6  ;;  %v3434_v11 = vld [vmem:[%s5597_s3 + $0x64] ss:$8 sps:$4 sm:$0xff]   ;;  %v3438_v13 = vld [vmem:[%s5597_s3 + $0x74] ss:$8 sps:$4 sm:$0xff]   ;;  %v3447_v18 = vld [vmem:[%s5597_s3 + $0x40] ss:$8 sps:$4 sm:$0xff]  }
   0x6   :  { %196 = vrot.lane.b32.xlu0 %v3426_v2, %s3699_s22  ;;  %492 = vmatpush1.bf16.msra.mxu1 %v3433_v7  ;;  %v3439_v12 = vld [vmem:[%s5597_s3 + $0x24] ss:$8 sps:$4 sm:$0xff]   ;;  %v3442_v15 = vld [vmem:[%s5597_s3 + $0x34] ss:$8 sps:$4 sm:$0xff]   ;;  %v3450_v20 = vld [vmem:[%s5597_s3 + $0x50] ss:$8 sps:$4 sm:$0xff]  }
   0x7   :  { %200 = vrot.lane.b32.xlu1 %v3428_v4, %s3699_s22  ;;  %493 = vmatprep.subr.bf16.mxu1 %v3435_v9  ;;  %v3445_v17 = vld [vmem:[%s5597_s3 + $0x44] ss:$8 sps:$4 sm:$0xff]   ;;  %v3448_v19 = vld [vmem:[%s5597_s3 + $0x54] ss:$8 sps:$4 sm:$0xff]   ;;  %v3453_v23 = vld [vmem:[%s5597_s3 + $0x60] ss:$8 sps:$4 sm:$0xff]  }
   0x8   :  { %v3451_v21 = vld [vmem:[%s5597_s3 + $0x64] ss:$8 sps:$4 sm:$0xff]   ;;  %v3454_v24 = vld [vmem:[%s5597_s3 + $0x74] ss:$8 sps:$4 sm:$0xff]   ;;  %v3456_v25 = vld [vmem:[%s5597_s3 + $0x70] ss:$8 sps:$4 sm:$0xff]  }
   0x9   :  { %v3465_v22 = vld [vmem:[%s5599_s0] sm:$0xff]   ;;  %v3458_v27 = vld [vmem:[%s5598_s1 + $0x8] sm:$0xff]   ;;  %v3459_v28 = vld [vmem:[%s5598_s1 + $0x10] sm:$0xff]  }
   0xa   :  { %202 = vrot.lane.b32.xlu0 %v3429_v5, %s3699_s22  ;;  %494 = vmatpush1.bf16.msra.mxu1 %v3437_v10  ;;  %v3457_v26 = vld [vmem:[%s5598_s1] sm:$0xff]   ;;  %v3460_v29 = vld [vmem:[%s5598_s1 + $0x18] sm:$0xff]   ;;  %v3462_v31 = vld [vmem:[%s5598_s1 + $0x28] sm:$0xff]  }
   0xb   :  { %204 = vrot.lane.b32.xlu1 %v3430_v8, %s3699_s22  ;;  %495 = vmatprep.subr.bf16.mxu1 %v3439_v12  ;;  %v3461_v30 = vld [vmem:[%s5598_s1 + $0x20] sm:$0xff]   ;;  %v3463_v32 = vld [vmem:[%s5598_s1 + $0x30] sm:$0xff]   ;;  %v3464_v33 = vld [vmem:[%s5598_s1 + $0x38] sm:$0xff]  }
   0xc   :  { %3260 = vmatprep.mubr.bf16.mxu0 %v3465_v22  ;;  %v3466_v42 = vld [vmem:[%s5599_s0 + $0x8] sm:$0xff]   ;;  %v3467_v43 = vld [vmem:[%s5599_s0 + $0x10] sm:$0xff]   ;;  %v3468_v44 = vld [vmem:[%s5599_s0 + $0x18] sm:$0xff]  }
   0xd   :  { %v3469_v45 = vld [vmem:[%s5599_s0 + $0x20] sm:$0xff]   ;;  %v3470_v46 = vld [vmem:[%s5599_s0 + $0x28] sm:$0xff]   ;;  %v3471_v47 = vld [vmem:[%s5599_s0 + $0x30] sm:$0xff]  }
   0xe   :  { %206 = vrot.lane.b32.xlu0 %v3434_v11, %s3699_s22  ;;  %496 = vmatpush1.bf16.msra.mxu1 %v3441_v14  ;;  %v3472_v48 = vld [vmem:[%s5599_s0 + $0x38] sm:$0xff]  }
   0xf   :  { %208 = vrot.lane.b32.xlu1 %v3438_v13, %s3699_s22  ;;  %497 = vmatprep.subr.bf16.mxu1 %v3442_v15 }
  0x12   :  { %498 = vmatpush1.bf16.msra.mxu1 %v3444_v16 }
  0x13   :  { %499 = vmatprep.subr.bf16.mxu1 %v3445_v17 }
  0x16   :  { %500 = vmatpush1.bf16.msra.mxu1 %v3447_v18 }
  0x17   :  { %501 = vmatprep.subr.bf16.mxu1 %v3448_v19 }
  0x1a   :  { %502 = vmatpush1.bf16.msra.mxu1 %v3450_v20 }
  0x1b   :  { %503 = vmatprep.subr.bf16.mxu1 %v3451_v21 }
  0x1e   :  { %504 = vmatpush1.bf16.msra.mxu1 %v3453_v23 }
  0x1f   :  { %505 = vmatprep.subr.bf16.mxu1 %v3454_v24 }
  0x22   :  { %506 = vmatpush1.bf16.msra.mxu1 %v3456_v25 }
  0x25   :  { %524 = vmatmul.mubr.bf16.vlgmr.msra.gmra.mrb[0].mxu1 %v3457_v26  ;;  %v5606_v26 = vmov 1  }
  0x26   :  { %533 = vmatprep.mubr.bf16.mxu1 %v5604_v1 }
  0x2d   :  { %534 = vmatmul.mubr.bf16.gmra.mrb[4].mxu1 %v3458_v27 }
  0x2e   :  { %543 = vmatprep.mubr.bf16.mxu1 %v5604_v1 }
  0x35   :  { %544 = vmatmul.mubr.bf16.gmra.mrb[8].mxu1 %v3459_v28 }
  0x36   :  { %553 = vmatprep.mubr.bf16.mxu1 %v5604_v1 }
  0x3d   :  { %554 = vmatmul.mubr.bf16.gmra.mrb[12].mxu1 %v3460_v29 }
  0x3e   :  { %563 = vmatprep.mubr.bf16.mxu1 %v5604_v1 }
  0x45   :  { %564 = vmatmul.mubr.bf16.gmra.mrb[16].mxu1 %v3461_v30 }
  0x46   :  { %573 = vmatprep.mubr.bf16.mxu1 %v5604_v1 }
  0x4d   :  { %574 = vmatmul.mubr.bf16.gmra.mrb[20].mxu1 %v3462_v31 }
  0x4e   :  { %583 = vmatprep.mubr.bf16.mxu1 %v5604_v1 }
  0x55   :  { %584 = vmatmul.mubr.bf16.gmra.mrb[24].mxu1 %v3463_v32 }
  0x56   :  { %593 = vmatprep.mubr.bf16.mxu1 %v5604_v1 }
  0x5d   :  { %594 = vmatmul.mubr.bf16.gmra.mrb[28].mxu1 %v3464_v33 }
  0x74   :  { %v195_v34 = vpop.permute.xlu0 %194 }
  0x75   :  { %3244 = vmatprep.subr.bf16.mxu0 %v195_v34  ;;  %v199_v35 = vpop.permute.xlu1 %198 }
  0x76   :  { %3245 = vmatpush3.bf16.msra.mxu0 %v195_v34 }
  0x78   :  { %v197_v36 = vpop.permute.xlu0 %196 }
  0x79   :  { %3246 = vmatprep.subr.bf16.mxu0 %v197_v36  ;;  %v201_v37 = vpop.permute.xlu1 %200 }
  0x7a   :  { %3247 = vmatpush3.bf16.msra.mxu0 %v197_v36 }
  0x7b   :  { %3248 = vmatprep.subr.bf16.mxu0 %v199_v35 }
  0x7c   :  { %v203_v38 = vpop.permute.xlu0 %202 }
  0x7d   :  { %v205_v39 = vpop.permute.xlu1 %204 }
  0x7e   :  { %3249 = vmatpush3.bf16.msra.mxu0 %v199_v35 }
  0x7f   :  { %3250 = vmatprep.subr.bf16.mxu0 %v201_v37 }
  0x80   :  { %v207_v40 = vpop.permute.xlu0 %206 }
  0x81   :  { %v209_v41 = vpop.permute.xlu1 %208 }
  0x82   :  { %3251 = vmatpush3.bf16.msra.mxu0 %v201_v37 }
  0x83   :  { %3252 = vmatprep.subr.bf16.mxu0 %v203_v38 }
  0x86   :  { %3253 = vmatpush3.bf16.msra.mxu0 %v203_v38 }
  0x87   :  { %3254 = vmatprep.subr.bf16.mxu0 %v205_v39 }
  0x8a   :  { %3255 = vmatpush3.bf16.msra.mxu0 %v205_v39 }
  0x8b   :  { %3256 = vmatprep.subr.bf16.mxu0 %v207_v40 }
  0x8e   :  { %3257 = vmatpush3.bf16.msra.mxu0 %v207_v40 }
  0x8f   :  { %3258 = vmatprep.subr.bf16.mxu0 %v209_v41 }
  0x92   :  { %3259 = vmatpush3.bf16.msra.mxu0 %v209_v41 }
  0x95   :  { %3261 = vmatmul.mubr.bf16.vlgmr.msra.gmra.mrb[0].mxu0 %v3466_v42 }
  0x96   :  { %3264 = vmatprep.mubr.bf16.mxu0 %v3467_v43 }
  0x9d   :  { %3265 = vmatmul.mubr.bf16.gmra.mrb[4].mxu0 %v3468_v44 }
  0x9e   :  { %3268 = vmatprep.mubr.bf16.mxu0 %v3469_v45 }
  0xa5   :  { %3269 = vmatmul.mubr.bf16.gmra.mrb[8].mxu0 %v3470_v46 }
  0xa6   :  { %3272 = vmatprep.mubr.bf16.mxu0 %v3471_v47 }
  0xad   :  { %3273 = vmatmul.mubr.bf16.gmra.mrb[12].mxu0 %v3472_v48 }
  0xf8   :  { %v525_v49 = vpop.f32.mrb[0].mxu1 }
  0xf9   :  { %v527_v50 = vpop.f32.mrb[1].mxu1 }
  0xfa   :  { %612 = vxpose.xlu0.b32.start [1/16] (narrow) %v527_v50, 8  ;;  %v529_v51 = vpop.f32.mrb[2].mxu1 }
  0xfb   :  { %v604_v52 = vpack.c.bf16 %v529_v51, %v525_v49  ;;  %v531_v53 = vpop.f32.mrb[3].mxu1 }
  0xfd   :  { %2184 = vrot.lane.b32.xlu1 %v604_v52, %s3700_s23  ;;  %3276 = vmatprep.subr.bf16.mxu0 %v604_v52 }
  0xfe   :  { %613 = vxpose.xlu0.b32.cont [2/16] (narrow) %v531_v53, 8  ;;  %3277 = vmatpush3.bf16.msra.mxu0 %v604_v52 }
 0x100   :  { %v535_v54 = vpop.f32.mrb[4].mxu1 }
 0x101   :  { %v537_v55 = vpop.f32.mrb[5].mxu1 }
 0x102   :  { %614 = vxpose.xlu0.b32.cont [3/16] (narrow) %v537_v55, 8  ;;  %v539_v56 = vpop.f32.mrb[6].mxu1 }
 0x103   :  { %v605_v57 = vpack.c.bf16 %v539_v56, %v535_v54  ;;  %v541_v58 = vpop.f32.mrb[7].mxu1 }
 0x105   :  { %2186 = vrot.lane.b32.xlu1 %v605_v57, %s3700_s23  ;;  %3278 = vmatprep.subr.bf16.mxu0 %v605_v57 }
 0x106   :  { %615 = vxpose.xlu0.b32.cont [4/16] (narrow) %v541_v58, 8  ;;  %3279 = vmatpush3.bf16.msra.mxu0 %v605_v57 }
 0x108   :  { %v545_v59 = vpop.f32.mrb[8].mxu1 }
 0x109   :  { %v547_v60 = vpop.f32.mrb[9].mxu1 }
 0x10a   :  { %616 = vxpose.xlu0.b32.cont [5/16] (narrow) %v547_v60, 8  ;;  %v549_v61 = vpop.f32.mrb[10].mxu1 }
 0x10b   :  { %v606_v62 = vpack.c.bf16 %v549_v61, %v545_v59  ;;  %v551_v63 = vpop.f32.mrb[11].mxu1  ;;  %v5603_v61 = vlaneseq }
 0x10d   :  { %2188 = vrot.lane.b32.xlu1 %v606_v62, %s3700_s23  ;;  %3280 = vmatprep.subr.bf16.mxu0 %v606_v62 }
 0x10e   :  { %617 = vxpose.xlu0.b32.cont [6/16] (narrow) %v551_v63, 8  ;;  %3281 = vmatpush3.bf16.msra.mxu0 %v606_v62  ;;  %v3165_v62 = vld [vmem:[%s5600_s2] sm:$0xff]   ;;  %v821_v63 = vshrl.u32 %v5603_v61, 7 }
 0x110   :  { %v555_v0 = vpop.f32.mrb[12].mxu1 }
 0x111   :  { %v557_v2 = vpop.f32.mrb[13].mxu1 }
 0x112   :  { %618 = vxpose.xlu0.b32.cont [7/16] (narrow) %v557_v2, 8  ;;  %v559_v3 = vpop.f32.mrb[14].mxu1 }
 0x113   :  { %v3867_v4 = vpack.c.bf16 %v559_v3, %v555_v0  ;;  %v561_v5 = vpop.f32.mrb[15].mxu1  ;;  %v3166_v0 = vunpack.c.0.s8 %v3165_v62  ;;  %v1621_v3 = vsub.s32 1, %v821_v63 }
 0x115   :  { %3282 = vmatprep.subr.bf16.mxu0 %v3867_v4 }
 0x116   :  { %619 = vxpose.xlu0.b32.cont [8/16] (narrow) %v561_v5, 8  ;;  %3283 = vmatpush3.bf16.msra.mxu0 %v3867_v4 }
 0x118   :  { %v565_v6 = vpop.f32.mrb[16].mxu1 }
 0x119   :  { %v567_v7 = vpop.f32.mrb[17].mxu1 }
 0x11a   :  { %620 = vxpose.xlu0.b32.cont [9/16] (narrow) %v567_v7, 8  ;;  %v569_v8 = vpop.f32.mrb[18].mxu1 }
 0x11b   :  { %v3871_v9 = vpack.c.bf16 %v569_v8, %v565_v6  ;;  %v571_v10 = vpop.f32.mrb[19].mxu1  ;;  %v3942_v6 = vcvt.s32.f32 %v3166_v0  ;;  %v3991_v0 = vld [vmem:[%s5600_s2 + $0xc] sm:$0xff]  }
 0x11d   :  { %3284 = vmatprep.subr.bf16.mxu0 %v3871_v9  ;;  %5712 = vst [vmem:[#allocation9_spill] sm:$0xff] %v3942_v6  ;;  %v3147_v8 = vadd.f32 -1.0, %v3942_v6 }
 0x11e   :  { %621 = vxpose.xlu0.b32.cont [10/16] (narrow) %v571_v10, 8  ;;  %3285 = vmatpush3.bf16.msra.mxu0 %v3871_v9 }
 0x120   :  { %v575_v11 = vpop.f32.mrb[20].mxu1 }
 0x121   :  { %v577_v12 = vpop.f32.mrb[21].mxu1 }
 0x122   :  { %622 = vxpose.xlu0.b32.cont [11/16] (narrow) %v577_v12, 8  ;;  %v579_v13 = vpop.f32.mrb[22].mxu1 }
 0x123   :  { %v3875_v14 = vpack.c.bf16 %v579_v13, %v575_v11  ;;  %v581_v15 = vpop.f32.mrb[23].mxu1  ;;  %v3950_v13 = vmul.f32 1e+30, %v3147_v8 }
 0x125   :  { %3286 = vmatprep.subr.bf16.mxu0 %v3875_v14 }
 0x126   :  { %623 = vxpose.xlu0.b32.cont [12/16] (narrow) %v581_v15, 8  ;;  %3287 = vmatpush3.bf16.msra.mxu0 %v3875_v14 }
 0x128   :  { %v585_v16 = vpop.f32.mrb[24].mxu1 }
 0x129   :  { %v587_v17 = vpop.f32.mrb[25].mxu1 }
 0x12a   :  { %624 = vxpose.xlu0.b32.cont [13/16] (narrow) %v587_v17, 8  ;;  %v589_v18 = vpop.f32.mrb[26].mxu1 }
 0x12b   :  { %v3879_v19 = vpack.c.bf16 %v589_v18, %v585_v16  ;;  %v591_v20 = vpop.f32.mrb[27].mxu1 }
 0x12d   :  { %3288 = vmatprep.subr.bf16.mxu0 %v3879_v19 }
 0x12e   :  { %625 = vxpose.xlu0.b32.cont [14/16] (narrow) %v591_v20, 8  ;;  %3289 = vmatpush3.bf16.msra.mxu0 %v3879_v19 }
 0x130   :  { %v595_v21 = vpop.f32.mrb[28].mxu1 }
 0x131   :  { %v597_v22 = vpop.f32.mrb[29].mxu1 }
 0x132   :  { %626 = vxpose.xlu0.b32.cont [15/16] (narrow) %v597_v22, 8  ;;  %v599_v23 = vpop.f32.mrb[30].mxu1  ;;  %v822_v22 = vsub.s32 0, %v821_v63 }
 0x133   :  { %v3883_v24 = vpack.c.bf16 %v599_v23, %v595_v21  ;;  %v601_v25 = vpop.f32.mrb[31].mxu1  ;;  %v3171_v21 = vunpack.c.3.s8 %v3165_v62 }
 0x135   :  { %3290 = vmatprep.subr.bf16.mxu0 %v3883_v24 }
 0x136   :  { %627 = vxpose.xlu0.b32.end [16/16] (narrow) %v601_v25, 8  ;;  %3291 = vmatpush3.bf16.msra.mxu0 %v3883_v24  ;;  %v3167_v25 = vunpack.c.1.s8 %v3165_v62 }
 0x15f   :  { %3373 = vset.pattern.permute.xlu0 %v5606_v26 }
 0x168   :  { %v3262_v27 = vpop.f32.mrb[0].mxu0 }
 0x169   :  { %317 = vst.msk [vmem:[#allocation2 + $0x10] sm:$0xff] %vm25_vm0, %v3262_v27  ;;  %v252_v28 = vpop.f32.mrb[1].mxu0  ;;  %v3956_v27 = vcvt.s32.f32 %v3171_v21 }
 0x16a   :  { %315 = vst.msk [vmem:[#allocation2] sm:$0xff] %vm25_vm0, %v252_v28  ;;  %v3263_v29 = vpop.f32.mrb[2].mxu0  ;;  %v3170_v28 = vunpack.c.2.s8 %v3165_v62 }
 0x16b   :  { %318 = vst.msk [vmem:[#allocation2 + $0x18] sm:$0xff] %vm25_vm0, %v3263_v29  ;;  %v255_v30 = vpop.f32.mrb[3].mxu0  ;;  %5714 = vst [vmem:[#allocation11_spill] sm:$0xff] %v3956_v27 }
 0x16c   :  { %316 = vst.msk [vmem:[#allocation2 + $0x8] sm:$0xff] %vm25_vm0, %v255_v30  ;;  %v3960_v30 = vcvt.s32.f32 %v3167_v25  ;;  %v4026_v25 = vld [vmem:[%s5600_s2 + $0x8] ss:$20 sps:$4 sm:$0xff]  }
 0x16e   :  { %5715 = vst [vmem:[#allocation12_spill] sm:$0xff] %v3960_v30 }
 0x16f   :  { %v3894_v36 = vpop.permute.xlu1 %2184 }
 0x170   :  { %v726_v31 = vld [vmem:[#allocation2 + $0x10] sm:$0xff]  ;;  %v3266_v32 = vpop.f32.mrb[4].mxu0  ;;  %5709 = vst [vmem:[#allocation6_spill] sm:$0xff] %v3894_v36  ;;  %3340 = vmatprep.subr.bf16.mxu1 %v3894_v36  ;;  %3308 = vmatprep.subr.bf16.mxu0 %v3894_v36 }
 0x171   :  { %752 = vperm.xlu1 %3370, %v726_v31   ;;  %v1523_v33 = vld [vmem:[#allocation2] sm:$0xff]  ;;  %321 = vst.msk [vmem:[#allocation2 + $0x30] sm:$0xff] %vm25_vm0, %v3266_v32  ;;  %v268_v34 = vpop.f32.mrb[5].mxu0  ;;  %3348 = vmatpush3.bf16.msra.mxu1 %v3894_v36  ;;  %v3150_v32 = vadd.f32 -1.0, %v3956_v27 }
 0x172   :  { %1541 = vperm.xlu0 %3373, %v1523_v33   ;;  %319 = vst.msk [vmem:[#allocation2 + $0x20] sm:$0xff] %vm25_vm0, %v268_v34  ;;  %v3267_v35 = vpop.f32.mrb[6].mxu0  ;;  %v727_v45 = vld [vmem:[#allocation2 + $0x18] sm:$0xff]  ;;  %v3964_v34 = vcvt.s32.f32 %v3170_v28 }
 0x173   :  { %322 = vst.msk [vmem:[#allocation2 + $0x38] sm:$0xff] %vm25_vm0, %v3267_v35  ;;  %v271_v37 = vpop.f32.mrb[7].mxu0  ;;  %v725_v51 = vld [vmem:[#allocation2 + $0x8] sm:$0xff] }
 0x174   :  { %320 = vst.msk [vmem:[#allocation2 + $0x28] sm:$0xff] %vm25_vm0, %v271_v37  ;;  %5716 = vst [vmem:[#allocation13_spill] sm:$0xff] %v3964_v34 }
 0x175   :  { %3371 = vset.pattern.permute.xlu1 %v5606_v26 }
 0x176   :  { %1551 = vperm.xlu1 %3371, %v726_v31  }
 0x177   :  { %v3905_v43 = vpop.permute.xlu1 %2186 }
 0x178   :  { %v1529_v38 = vld [vmem:[#allocation2 + $0x30] sm:$0xff]  ;;  %v3270_v39 = vpop.f32.mrb[8].mxu0  ;;  %5710 = vst [vmem:[#allocation7_spill] sm:$0xff] %v3905_v43  ;;  %3341 = vmatprep.subr.bf16.mxu1 %v3905_v43 }
 0x179   :  { %1571 = vperm.xlu0 %3373, %v1529_v38   ;;  %325 = vst.msk [vmem:[#allocation2 + $0x50] sm:$0xff] %vm25_vm0, %v3270_v39  ;;  %v284_v40 = vpop.f32.mrb[9].mxu0  ;;  %v1527_v41 = vld [vmem:[#allocation2 + $0x20] sm:$0xff]  ;;  %3349 = vmatpush3.bf16.msra.mxu1 %v3905_v43  ;;  %v3968_v39 = vmul.f32 1e+30, %v3150_v32 }
 0x17a   :  { %3372 = vset.pattern.permute.xlu1 %v5604_v1  ;;  %323 = vst.msk [vmem:[#allocation2 + $0x40] sm:$0xff] %vm25_vm0, %v284_v40  ;;  %v3271_v42 = vpop.f32.mrb[10].mxu0  ;;  %v731_v54 = vld [vmem:[#allocation2 + $0x38] sm:$0xff]  ;;  %v628_v5 = vpop.trf.xlu0 }
 0x17b   :  { %742 = vperm.xlu1 %3372, %v1523_v33   ;;  %326 = vst.msk [vmem:[#allocation2 + $0x58] sm:$0xff] %vm25_vm0, %v3271_v42  ;;  %v287_v44 = vpop.f32.mrb[11].mxu0  ;;  %v729_v55 = vld [vmem:[#allocation2 + $0x28] sm:$0xff]  ;;  %v3945_v7 = vrot.slane %v628_v5, %v1621_v3  ;;  %v3958_v29 = vrot.slane %v628_v5, %v822_v22  ;;  %v3149_v42 = vadd.f32 -1.0, %v3964_v34 }
 0x17c   :  { %324 = vst.msk [vmem:[#allocation2 + $0x48] sm:$0xff] %vm25_vm0, %v287_v44 }
 0x17d   :  { %1561 = vperm.xlu0 %3373, %v1527_v41  }
 0x17f   :  { %757 = vperm.xlu1 %3372, %v727_v45   ;;  %v3913_v49 = vpop.permute.xlu1 %2188 }
 0x180   :  { %v3274_v46 = vpop.f32.mrb[12].mxu0  ;;  %5711 = vst [vmem:[#allocation8_spill] sm:$0xff] %v3913_v49  ;;  %3342 = vmatprep.subr.bf16.mxu1 %v3913_v49  ;;  %v734_v56 = vld [vmem:[#allocation2 + $0x50] sm:$0xff] }
 0x181   :  { %329 = vst.msk [vmem:[#allocation2 + $0x70] sm:$0xff] %vm25_vm0, %v3274_v46  ;;  %v300_v47 = vpop.f32.mrb[13].mxu0  ;;  %3350 = vmatpush3.bf16.msra.mxu1 %v3913_v49  ;;  %v732_v57 = vld [vmem:[#allocation2 + $0x40] sm:$0xff] }
 0x182   :  { %327 = vst.msk [vmem:[#allocation2 + $0x60] sm:$0xff] %vm25_vm0, %v300_v47  ;;  %v3275_v48 = vpop.f32.mrb[14].mxu0  ;;  %v735_v58 = vld [vmem:[#allocation2 + $0x58] sm:$0xff] }
 0x183   :  { %3374 = vset.pattern.permute.xlu1 %v5606_v26  ;;  %330 = vst.msk [vmem:[#allocation2 + $0x78] sm:$0xff] %vm25_vm0, %v3275_v48  ;;  %v303_v50 = vpop.f32.mrb[15].mxu0  ;;  %v733_v59 = vld [vmem:[#allocation2 + $0x48] sm:$0xff] }
 0x184   :  { %1556 = vperm.xlu1 %3374, %v727_v45   ;;  %328 = vst.msk [vmem:[#allocation2 + $0x68] sm:$0xff] %vm25_vm0, %v303_v50 }
 0x188   :  { %3375 = vset.pattern.permute.xlu1 %v5604_v1  ;;  %v1537_v52 = vld [vmem:[#allocation2 + $0x70] sm:$0xff] }
 0x189   :  { %747 = vperm.xlu1 %3375, %v725_v51   ;;  %1611 = vperm.xlu0 %3373, %v1537_v52   ;;  %v1535_v53 = vld [vmem:[#allocation2 + $0x60] sm:$0xff] }
 0x18a   :  { %v739_v60 = vld [vmem:[#allocation2 + $0x78] sm:$0xff] }
 0x18b   :  { %v737_v2 = vld [vmem:[#allocation2 + $0x68] sm:$0xff] }
 0x18d   :  { %3376 = vset.pattern.permute.xlu1 %v5606_v26  ;;  %1601 = vperm.xlu0 %3373, %v1535_v53  }
 0x18e   :  { %1546 = vperm.xlu1 %3376, %v725_v51   ;;  %v710_v51 = vmul.f32 1e+30, %v3149_v42 }
 0x191   :  { %3394 = vset.pattern.permute.xlu0 %v5604_v1 }
 0x192   :  { %3377 = vset.pattern.permute.xlu1 %v5604_v1 }
 0x193   :  { %772 = vperm.xlu1 %3377, %v1529_v38   ;;  %v3148_v38 = vadd.f32 -1.0, %v3960_v30 }
 0x195   :  { %v3976_v48 = vmul.f32 1e+30, %v3148_v38 }
 0x197   :  { %762 = vperm.xlu1 %3377, %v1527_v41  }
 0x19b   :  { %777 = vperm.xlu1 %3377, %v731_v54  }
 0x19f   :  { %3378 = vset.pattern.permute.xlu1 %v5606_v26 }
 0x1a0   :  { %1576 = vperm.xlu1 %3378, %v731_v54  }
 0x1a4   :  { %3379 = vset.pattern.permute.xlu1 %v5604_v1 }
 0x1a5   :  { %767 = vperm.xlu1 %3379, %v729_v55  }
 0x1a9   :  { %3380 = vset.pattern.permute.xlu1 %v5606_v26 }
 0x1aa   :  { %1566 = vperm.xlu1 %3380, %v729_v55  }
 0x1ae   :  { %3381 = vset.pattern.permute.xlu1 %v5604_v1 }
 0x1af   :  { %792 = vperm.xlu1 %3381, %v734_v56  }
 0x1b3   :  { %3382 = vset.pattern.permute.xlu1 %v5606_v26 }
 0x1b4   :  { %1591 = vperm.xlu1 %3382, %v734_v56  }
 0x1b8   :  { %3383 = vset.pattern.permute.xlu1 %v5604_v1 }
 0x1b9   :  { %782 = vperm.xlu1 %3383, %v732_v57  }
 0x1bd   :  { %3384 = vset.pattern.permute.xlu1 %v5606_v26 }
 0x1be   :  { %1581 = vperm.xlu1 %3384, %v732_v57  }
 0x1c2   :  { %3385 = vset.pattern.permute.xlu1 %v5604_v1 }
 0x1c3   :  { %797 = vperm.xlu1 %3385, %v735_v58  }
 0x1c7   :  { %3386 = vset.pattern.permute.xlu1 %v5606_v26 }
 0x1c8   :  { %1596 = vperm.xlu1 %3386, %v735_v58  }
 0x1cc   :  { %3387 = vset.pattern.permute.xlu1 %v5604_v1 }
 0x1cd   :  { %787 = vperm.xlu1 %3387, %v733_v59  }
 0x1d1   :  { %3388 = vset.pattern.permute.xlu1 %v5606_v26 }
 0x1d2   :  { %1586 = vperm.xlu1 %3388, %v733_v59  }
 0x1d6   :  { %3389 = vset.pattern.permute.xlu1 %v5604_v1 }
 0x1d7   :  { %812 = vperm.xlu1 %3389, %v1537_v52  }
 0x1db   :  { %802 = vperm.xlu1 %3389, %v1535_v53  }
 0x1df   :  { %817 = vperm.xlu1 %3389, %v739_v60  }
 0x1e3   :  { %3390 = vset.pattern.permute.xlu1 %v5606_v26 }
 0x1e4   :  { %1616 = vperm.xlu1 %3390, %v739_v60  }
 0x1e8   :  { %3391 = vset.pattern.permute.xlu1 %v5604_v1 }
 0x1e9   :  { %807 = vperm.xlu1 %3391, %v737_v2  }
 0x1ed   :  { %3392 = vset.pattern.permute.xlu1 %v5606_v26 }
 0x1ee   :  { %1606 = vperm.xlu1 %3392, %v737_v2  }
 0x1f0   :  { %v753_v10 = vpop.permute.xlu1 %752 }
 0x1f1   :  { %v1542_v11 = vpop.permute.xlu0 %1541  ;;  %v826_v35 = vadd.f32 %v3958_v29, %v753_v10 }
 0x1f2   :  { %v1623_v12 = vadd.f32 %v3945_v7, %v1542_v11  ;;  %3393 = vset.pattern.permute.xlu1 %v5604_v1  ;;  %v3178_v11 = vunpack.c.0.s8 %v3991_v0 }
 0x1f3   :  { %v858_v44 = vmul.f32 0.2, %v826_v35  ;;  %vm842_vm3 = vcmp.gt.f32.partialorder %v826_v35, 0.0 }
 0x1f4   :  { %v1655_v15 = vmul.f32 0.2, %v1623_v12  ;;  %vm1639_vm1 = vcmp.gt.f32.partialorder %v1623_v12, 0.0 }
 0x1f5   :  { %v1552_v16 = vpop.permute.xlu1 %1551  ;;  %v874_v56 = vsel %vm842_vm3, %v826_v35, %v858_v44 }
 0x1f6   :  { %v1671_v17 = vsel %vm1639_vm1, %v1623_v12, %v1655_v15  ;;  %v1625_v45 = vadd.f32 %v3945_v7, %v1552_v16  ;;  %v3984_v58 = vadd.f32 %v874_v56, %v710_v51  ;;  %v3702_v12 = vmov -1e+30  }
 0x1f7   :  { %v3953_v18 = vadd.f32 %v1671_v17, %v3950_v13  ;;  %27 = vst.msk [vmem:[#allocation3 + $0x8] sm:$0xff] %vm25_vm0, %v3702_v12  ;;  %26 = vst.msk [vmem:[#allocation3] sm:$0xff] %vm25_vm0, %v3702_v12  ;;  %v3179_v15 = vunpack.c.1.s8 %v3991_v0 }
 0x1f8   :  { %v1657_v52 = vmul.f32 0.2, %v1625_v45  ;;  %vm1641_vm5 = vcmp.gt.f32.partialorder %v1625_v45, 0.0  ;;  %28 = vst.msk [vmem:[#allocation3 + $0x10] sm:$0xff] %vm25_vm0, %v3702_v12  ;;  %29 = vst.msk [vmem:[#allocation3 + $0x18] sm:$0xff] %vm25_vm0, %v3702_v12 }
 0x1f9   :  { %5713 = vst [vmem:[#allocation10_spill] sm:$0xff] %v3953_v18  ;;  %1719 = vmax.xlane.f32.xlu0 %v3953_v18  ;;  %30 = vst.msk [vmem:[#allocation3 + $0x20] sm:$0xff] %vm25_vm0, %v3702_v12  ;;  %v4028_v28 = vcvt.s32.f32 %v3179_v15 }
 0x1fa   :  { %v743_v20 = vpop.permute.xlu1 %742  ;;  %v1673_v62 = vsel %vm1641_vm5, %v1625_v45, %v1657_v52  ;;  %31 = vst.msk [vmem:[#allocation3 + $0x28] sm:$0xff] %vm25_vm0, %v3702_v12  ;;  %32 = vst.msk [vmem:[#allocation3 + $0x30] sm:$0xff] %vm25_vm0, %v3702_v12 }
 0x1fb   :  { %v824_v53 = vadd.f32 %v3958_v29, %v743_v20  ;;  %v3993_v2 = vadd.f32 %v1673_v62, %v710_v51  ;;  %33 = vst.msk [vmem:[#allocation3 + $0x38] sm:$0xff] %vm25_vm0, %v3702_v12  ;;  %34 = vst.msk [vmem:[#allocation3 + $0x40] sm:$0xff] %vm25_vm0, %v3702_v12 }
 0x1fc   :  { %35 = vst.msk [vmem:[#allocation3 + $0x48] sm:$0xff] %vm25_vm0, %v3702_v12  ;;  %36 = vst.msk [vmem:[#allocation3 + $0x50] sm:$0xff] %vm25_vm0, %v3702_v12 }
 0x1fd   :  { %v856_v59 = vmul.f32 0.2, %v824_v53  ;;  %vm840_vm6 = vcmp.gt.f32.partialorder %v824_v53, 0.0  ;;  %5718 = vst [vmem:[#allocation15_spill] sm:$0xff] %v3993_v2  ;;  %37 = vst.msk [vmem:[#allocation3 + $0x58] sm:$0xff] %vm25_vm0, %v3702_v12 }
 0x1fe   :  { %v758_v23 = vpop.permute.xlu1 %757  ;;  %38 = vst.msk [vmem:[#allocation3 + $0x60] sm:$0xff] %vm25_vm0, %v3702_v12  ;;  %39 = vst.msk [vmem:[#allocation3 + $0x68] sm:$0xff] %vm25_vm0, %v3702_v12 }
 0x1ff   :  { %v827_v60 = vadd.f32 %v3958_v29, %v758_v23  ;;  %v872_v8 = vsel %vm840_vm6, %v824_v53, %v856_v59  ;;  %40 = vst.msk [vmem:[#allocation3 + $0x70] sm:$0xff] %vm25_vm0, %v3702_v12  ;;  %41 = vst.msk [vmem:[#allocation3 + $0x78] sm:$0xff] %vm25_vm0, %v3702_v12  ;;  %v4021_v23 = vcvt.s32.f32 %v3178_v11 }
 0x200   :  { %v4016_v16 = vadd.f32 %v872_v8, %v3950_v13  ;;  %5720 = vst [vmem:[#allocation17_spill] sm:$0xff] %v4028_v28  ;;  %v1572_v13 = vpop.permute.xlu0 %1571 }
 0x201   :  { %v859_v3 = vmul.f32 0.2, %v827_v60  ;;  %vm843_vm7 = vcmp.gt.f32.partialorder %v827_v60, 0.0  ;;  %5719 = vst [vmem:[#allocation16_spill] sm:$0xff] %v4021_v23  ;;  %v1629_v32 = vadd.f32 %v3945_v7, %v1572_v13  ;;  %v3153_v38 = vadd.f32 -1.0, %v4021_v23 }
 0x202   :  { %v4358_v18 = vld [vmem:[#allocation3 + $0x40] sm:$0xff] }
 0x203   :  { %v1557_v31 = vpop.permute.xlu1 %1556  ;;  %v875_v21 = vsel %vm843_vm7, %v827_v60, %v859_v3  ;;  %v1661_v45 = vmul.f32 0.2, %v1629_v32  ;;  %vm1645_vm11 = vcmp.gt.f32.partialorder %v1629_v32, 0.0 }
 0x204   :  { %v1626_v33 = vadd.f32 %v3945_v7, %v1557_v31  ;;  %v4031_v31 = vadd.f32 %v875_v21, %v3968_v39  ;;  %v1562_v52 = vpop.permute.xlu0 %1561  ;;  %v3703_v21 = vmov 0.0  }
 0x205   :  { %v1627_v62 = vadd.f32 %v3945_v7, %v1562_v52  ;;  %59 = vst [vmem:[#allocation5 + $0x8] sm:$0xff] %v3703_v21  ;;  %42 = vst.msk [vmem:[#allocation4] sm:$0xff] %vm25_vm0, %v3703_v21 }
 0x206   :  { %v1658_v37 = vmul.f32 0.2, %v1626_v33  ;;  %vm1642_vm2 = vcmp.gt.f32.partialorder %v1626_v33, 0.0  ;;  %43 = vst.msk [vmem:[#allocation4 + $0x8] sm:$0xff] %vm25_vm0, %v3703_v21  ;;  %44 = vst.msk [vmem:[#allocation4 + $0x10] sm:$0xff] %vm25_vm0, %v3703_v21 }
 0x207   :  { %v1659_v11 = vmul.f32 0.2, %v1627_v62  ;;  %45 = vst.msk [vmem:[#allocation4 + $0x18] sm:$0xff] %vm25_vm0, %v3703_v21  ;;  %46 = vst.msk [vmem:[#allocation4 + $0x20] sm:$0xff] %vm25_vm0, %v3703_v21  ;;  %vm1643_vm13 = vcmp.gt.f32.partialorder %v1627_v62, 0.0 }
 0x208   :  { %v748_v40 = vpop.permute.xlu1 %747  ;;  %v1674_v41 = vsel %vm1642_vm2, %v1626_v33, %v1658_v37  ;;  %v3174_v37 = vunpack.c.0.s8 %v4026_v25  ;;  %47 = vst.msk [vmem:[#allocation4 + $0x28] sm:$0xff] %vm25_vm0, %v3703_v21  ;;  %48 = vst.msk [vmem:[#allocation4 + $0x30] sm:$0xff] %vm25_vm0, %v3703_v21 }
 0x209   :  { %v825_v46 = vadd.f32 %v3958_v29, %v748_v40  ;;  %v3974_v47 = vadd.f32 %v1674_v41, %v3968_v39  ;;  %v3154_v41 = vadd.f32 -1.0, %v4028_v28  ;;  %v3175_v39 = vunpack.c.1.s8 %v4026_v25  ;;  %49 = vst.msk [vmem:[#allocation4 + $0x38] sm:$0xff] %vm25_vm0, %v3703_v21  ;;  %50 = vst.msk [vmem:[#allocation4 + $0x40] sm:$0xff] %vm25_vm0, %v3703_v21 }
 0x20a   :  { %v4044_v51 = vcvt.s32.f32 %v3174_v37  ;;  %51 = vst.msk [vmem:[#allocation4 + $0x48] sm:$0xff] %vm25_vm0, %v3703_v21  ;;  %52 = vst.msk [vmem:[#allocation4 + $0x50] sm:$0xff] %vm25_vm0, %v3703_v21 }
 0x20b   :  { %5717 = vst [vmem:[#allocation14_spill] sm:$0xff] %v3974_v47  ;;  %v857_v50 = vmul.f32 0.2, %v825_v46  ;;  %1725 = vmax.xlane.f32.xlu0 %v3974_v47  ;;  %vm841_vm4 = vcmp.gt.f32.partialorder %v825_v46, 0.0  ;;  %v4051_v60 = vcvt.s32.f32 %v3175_v39  ;;  %53 = vst.msk [vmem:[#allocation4 + $0x58] sm:$0xff] %vm25_vm0, %v3703_v21  ;;  %v4314_v47 = vld [vmem:[#allocation3 + $0x28] sm:$0xff] }
 0x20c   :  { %5722 = vst [vmem:[#allocation19_spill] sm:$0xff] %v4044_v51  ;;  %v3151_v8 = vadd.f32 -1.0, %v4044_v51  ;;  %54 = vst.msk [vmem:[#allocation4 + $0x60] sm:$0xff] %vm25_vm0, %v3703_v21 }
 0x20d   :  { %v1547_v54 = vpop.permute.xlu1 %1546  ;;  %v873_v55 = vsel %vm841_vm4, %v825_v46, %v857_v50  ;;  %5724 = vst [vmem:[#allocation21_spill] sm:$0xff] %v4051_v60  ;;  %55 = vst.msk [vmem:[#allocation4 + $0x68] sm:$0xff] %vm25_vm0, %v3703_v21 }
 0x20e   :  { %v3981_v57 = vadd.f32 %v873_v55, %v3976_v48  ;;  %v1624_v5 = vadd.f32 %v3945_v7, %v1547_v54  ;;  %v714_v54 = vmul.f32 1e+30, %v3153_v38  ;;  %v4047_v55 = vmul.f32 1e+30, %v3154_v41  ;;  %56 = vst.msk [vmem:[#allocation4 + $0x70] sm:$0xff] %vm25_vm0, %v3703_v21  ;;  %57 = vst.msk [vmem:[#allocation4 + $0x78] sm:$0xff] %vm25_vm0, %v3703_v21 }
 0x20f   :  { %58 = vst [vmem:[#allocation5] sm:$0xff] %v3703_v21  ;;  %60 = vst [vmem:[#allocation5 + $0x10] sm:$0xff] %v3703_v21  ;;  %v712_v13 = vmul.f32 1e+30, %v3151_v8 }
 0x210   :  { %922 = vmax.xlane.f32.xlu0 %v3981_v57  ;;  %v1656_v17 = vmul.f32 0.2, %v1624_v5  ;;  %vm1640_vm8 = vcmp.gt.f32.partialorder %v1624_v5, 0.0  ;;  %61 = vst [vmem:[#allocation5 + $0x18] sm:$0xff] %v3703_v21  ;;  %62 = vst [vmem:[#allocation5 + $0x20] sm:$0xff] %v3703_v21 }
 0x211   :  { %63 = vst [vmem:[#allocation5 + $0x28] sm:$0xff] %v3703_v21  ;;  %64 = vst [vmem:[#allocation5 + $0x30] sm:$0xff] %v3703_v21 }
 0x212   :  { %v773_v63 = vpop.permute.xlu1 %772  ;;  %924 = vmax.xlane.f32.xlu1 %v3984_v58  ;;  %v1672_v35 = vsel %vm1640_vm8, %v1624_v5, %v1656_v17  ;;  %v1677_v5 = vsel %vm1645_vm11, %v1629_v32, %v1661_v45  ;;  %65 = vst [vmem:[#allocation5 + $0x38] sm:$0xff] %v3703_v21  ;;  %66 = vst [vmem:[#allocation5 + $0x40] sm:$0xff] %v3703_v21  ;;  %v4085_v32 = vld [vmem:[%s5600_s2 + $0x14] sm:$0xff]   ;;  %s3704_s2 = smov 16  }
 0x213   :  { %v830_v20 = vadd.f32 %v3958_v29, %v773_v63  ;;  %v4040_v44 = vadd.f32 %v1672_v35, %v3976_v48  ;;  %67 = vst [vmem:[#allocation5 + $0x48] sm:$0xff] %v3703_v21  ;;  %68 = vst [vmem:[#allocation5 + $0x50] sm:$0xff] %v3703_v21  ;;  %v3186_v37 = vunpack.c.0.s8 %v4085_v32 }
 0x214   :  { %69 = vst [vmem:[#allocation5 + $0x58] sm:$0xff] %v3703_v21  ;;  %70 = vst [vmem:[#allocation5 + $0x60] sm:$0xff] %v3703_v21 }
 0x215   :  { %v862_v33 = vmul.f32 0.2, %v830_v20  ;;  %vm846_vm9 = vcmp.gt.f32.partialorder %v830_v20, 0.0  ;;  %5721 = vst [vmem:[#allocation18_spill] sm:$0xff] %v4040_v44  ;;  %71 = vst [vmem:[#allocation5 + $0x68] sm:$0xff] %v3703_v21  ;;  %v4096_v52 = vcvt.s32.f32 %v3186_v37 }
 0x216   :  { %v763_v10 = vpop.permute.xlu1 %762  ;;  %1723 = vmax.xlane.f32.xlu1 %v3993_v2  ;;  %72 = vst [vmem:[#allocation5 + $0x70] sm:$0xff] %v3703_v21  ;;  %73 = vst [vmem:[#allocation5 + $0x78] sm:$0xff] %v3703_v21 }
 0x217   :  { %v828_v46 = vadd.f32 %v3958_v29, %v763_v10  ;;  %v878_v50 = vsel %vm846_vm9, %v830_v20, %v862_v33  ;;  %v4060_v10 = vadd.f32 %v1677_v5, %v714_v54  ;;  %v3152_v20 = vadd.f32 -1.0, %v4051_v60  ;;  %5730 = vst [vmem:[#allocation27_spill] sm:$0xff] %v4096_v52 }
 0x218   :  { %v4049_v48 = vadd.f32 %v878_v50, %v714_v54  ;;  %v3157_v5 = vadd.f32 -1.0, %v4096_v52 }
 0x219   :  { %v860_v63 = vmul.f32 0.2, %v828_v46  ;;  %vm844_vm12 = vcmp.gt.f32.partialorder %v828_v46, 0.0  ;;  %5726 = vst [vmem:[#allocation23_spill] sm:$0xff] %v4060_v10  ;;  %v713_v41 = vmul.f32 1e+30, %v3152_v20 }
 0x21a   :  { %v778_v22 = vpop.permute.xlu1 %777  ;;  %920 = vmax.xlane.f32.xlu1 %v4016_v16  ;;  %5723 = vst [vmem:[#allocation20_spill] sm:$0xff] %v4049_v48  ;;  %v718_v21 = vmul.f32 1e+30, %v3157_v5 }
 0x21b   :  { %v831_v12 = vadd.f32 %v3958_v29, %v778_v22  ;;  %v876_v17 = vsel %vm844_vm12, %v828_v46, %v860_v63 }
 0x21c   :  { %v4087_v35 = vadd.f32 %v876_v17, %v712_v13 }
 0x21d   :  { %v863_v38 = vmul.f32 0.2, %v831_v12  ;;  %vm847_vm15 = vcmp.gt.f32.partialorder %v831_v12, 0.0 }
 0x21e   :  { %926 = vmax.xlane.f32.xlu1 %v4031_v31  ;;  %5727 = vst [vmem:[#allocation24_spill] sm:$0xff] %v4087_v35 }
 0x21f   :  { %v1577_v40 = vpop.permute.xlu1 %1576 }
 0x220   :  { %v1630_v42 = vadd.f32 %v3945_v7, %v1577_v40 }
 0x222   :  { %v1662_v53 = vmul.f32 0.2, %v1630_v42  ;;  %1721 = vmax.xlane.f32.xlu1 %v4040_v44  ;;  %vm1646_vm10 = vcmp.gt.f32.partialorder %v1630_v42, 0.0 }
 0x224   :  { %v768_v56 = vpop.permute.xlu1 %767  ;;  %v1678_v59 = vsel %vm1646_vm10, %v1630_v42, %v1662_v53  ;;  %v1675_v42 = vsel %vm1643_vm13, %v1627_v62, %v1659_v11  ;;  %v3182_v62 = vunpack.c.2.s8 %v3991_v0 }
 0x225   :  { %v4055_v3 = vadd.f32 %v1678_v59, %v4047_v55  ;;  %v829_v40 = vadd.f32 %v3958_v29, %v768_v56  ;;  %v4094_v50 = vadd.f32 %v1675_v42, %v712_v13  ;;  %v879_v59 = vsel %vm847_vm15, %v831_v12, %v863_v38 }
 0x226   :  { %932 = vmax.xlane.f32.xlu1 %v4049_v48  ;;  %v4103_v63 = vadd.f32 %v879_v59, %v4047_v55  ;;  %v4108_v17 = vcvt.s32.f32 %v3182_v62 }
 0x227   :  { %5725 = vst [vmem:[#allocation22_spill] sm:$0xff] %v4055_v3  ;;  %1733 = vmax.xlane.f32.xlu0 %v4055_v3  ;;  %5729 = vst [vmem:[#allocation26_spill] sm:$0xff] %v4094_v50  ;;  %v861_v53 = vmul.f32 0.2, %v829_v40  ;;  %vm845_vm0 = vcmp.gt.f32.partialorder %v829_v40, 0.0 }
 0x228   :  { %5731 = vst [vmem:[#allocation28_spill] sm:$0xff] %v4103_v63  ;;  %5732 = vst [vmem:[#allocation29_spill] sm:$0xff] %v4108_v17  ;;  %v3155_v37 = vadd.f32 -1.0, %v4108_v17 }
 0x229   :  { %v1567_v15 = vpop.permute.xlu1 %1566 }
 0x22a   :  { %v1628_v22 = vadd.f32 %v3945_v7, %v1567_v15  ;;  %1731 = vmax.xlane.f32.xlu1 %v4060_v10  ;;  %v877_v15 = vsel %vm845_vm0, %v829_v40, %v861_v53  ;;  %v716_v53 = vmul.f32 1e+30, %v3155_v37  ;;  %vm1240_vm0 = vcmask 7168  }
 0x22b   :  { %v4110_v20 = vadd.f32 %v877_v15, %v713_v41  ;;  %v3183_v15 = vunpack.c.3.s8 %v3991_v0 }
 0x22c   :  { %v1660_v33 = vmul.f32 0.2, %v1628_v22  ;;  %vm1644_vm14 = vcmp.gt.f32.partialorder %v1628_v22, 0.0 }
 0x22d   :  { %5733 = vst [vmem:[#allocation30_spill] sm:$0xff] %v4110_v20 }
 0x22e   :  { %v793_v39 = vpop.permute.xlu1 %792  ;;  %928 = vmax.xlane.f32.xlu1 %v4087_v35  ;;  %v1676_v45 = vsel %vm1644_vm14, %v1628_v22, %v1660_v33  ;;  %v3187_v22 = vunpack.c.1.s8 %v4085_v32  ;;  %v4456_v35 = vld [vmem:[#allocation3 + $0x60] sm:$0xff] }
 0x22f   :  { %v4092_v46 = vadd.f32 %v1676_v45, %v713_v41  ;;  %v834_v54 = vadd.f32 %v3958_v29, %v793_v39  ;;  %5768 = vst [vmem:[#allocation63_spill] sm:$0xff] %v4456_v35 }
 0x230   :  { %v4118_v40 = vcvt.s32.f32 %v3187_v22 }
 0x231   :  { %5728 = vst [vmem:[#allocation25_spill] sm:$0xff] %v4092_v46  ;;  %1729 = vmax.xlane.f32.xlu0 %v4092_v46  ;;  %v866_v8 = vmul.f32 0.2, %v834_v54  ;;  %vm850_vm1 = vcmp.gt.f32.partialorder %v834_v54, 0.0 }
 0x232   :  { %1727 = vmax.xlane.f32.xlu1 %v4094_v50  ;;  %5735 = vst [vmem:[#allocation32_spill] sm:$0xff] %v4118_v40 }
 0x233   :  { %v1592_v56 = vpop.permute.xlu1 %1591  ;;  %v882_v33 = vsel %vm850_vm1, %v834_v54, %v866_v8 }
 0x234   :  { %v1633_v11 = vadd.f32 %v3945_v7, %v1592_v56  ;;  %v4116_v38 = vadd.f32 %v882_v33, %v718_v21  ;;  %v3158_v56 = vadd.f32 -1.0, %v4118_v40 }
 0x236   :  { %934 = vmax.xlane.f32.xlu1 %v4103_v63  ;;  %v1665_v13 = vmul.f32 0.2, %v1633_v11  ;;  %vm1649_vm2 = vcmp.gt.f32.partialorder %v1633_v11, 0.0  ;;  %5734 = vst [vmem:[#allocation31_spill] sm:$0xff] %v4116_v38 }
 0x238   :  { %v783_v12 = vpop.permute.xlu1 %782  ;;  %v1681_v41 = vsel %vm1649_vm2, %v1633_v11, %v1665_v13  ;;  %v719_v13 = vmul.f32 1e+30, %v3158_v56  ;;  %vm2039_vm2 = vcmask 15368  }
 0x239   :  { %v832_v55 = vadd.f32 %v3958_v29, %v783_v12  ;;  %v4122_v54 = vadd.f32 %v1681_v41, %v718_v21  ;;  %v4134_v21 = vcvt.s32.f32 %v3183_v15 }
 0x23a   :  { %930 = vmax.xlane.f32.xlu1 %v4110_v20 }
 0x23b   :  { %v864_v42 = vmul.f32 0.2, %v832_v55  ;;  %vm848_vm3 = vcmp.gt.f32.partialorder %v832_v55, 0.0  ;;  %5736 = vst [vmem:[#allocation33_spill] sm:$0xff] %v4122_v54  ;;  %5739 = vst [vmem:[#allocation36_spill] sm:$0xff] %v4134_v21  ;;  %v3156_v41 = vadd.f32 -1.0, %v4134_v21 }
 0x23d   :  { %v1582_v39 = vpop.permute.xlu1 %1581  ;;  %v880_v62 = vsel %vm848_vm3, %v832_v55, %v864_v42  ;;  %vm1490_vm3 = vcmask 130048  }
 0x23e   :  { %v1631_v45 = vadd.f32 %v3945_v7, %v1582_v39  ;;  %940 = vmax.xlane.f32.xlu1 %v4116_v38  ;;  %v4130_v22 = vadd.f32 %v880_v62, %v716_v53  ;;  %v717_v62 = vmul.f32 1e+30, %v3156_v41 }
 0x240   :  { %v1663_v59 = vmul.f32 0.2, %v1631_v45  ;;  %vm1647_vm4 = vcmp.gt.f32.partialorder %v1631_v45, 0.0  ;;  %5738 = vst [vmem:[#allocation35_spill] sm:$0xff] %v4130_v22 }
 0x242   :  { %v798_v5 = vpop.permute.xlu1 %797  ;;  %1739 = vmax.xlane.f32.xlu1 %v4122_v54  ;;  %v1679_v8 = vsel %vm1647_vm4, %v1631_v45, %v1663_v59  ;;  %vm2385_vm4 = vcmask 261248  }
 0x243   :  { %v835_v11 = vadd.f32 %v3958_v29, %v798_v5  ;;  %v4128_v12 = vadd.f32 %v1679_v8, %v716_v53  ;;  %v3194_v5 = vunpack.c.2.s8 %v4026_v25 }
 0x245   :  { %5737 = vst [vmem:[#allocation34_spill] sm:$0xff] %v4128_v12  ;;  %v867_v33 = vmul.f32 0.2, %v835_v11  ;;  %1735 = vmax.xlane.f32.xlu0 %v4128_v12  ;;  %vm851_vm5 = vcmp.gt.f32.partialorder %v835_v11, 0.0 }
 0x246   :  { %936 = vmax.xlane.f32.xlu1 %v4130_v22 }
 0x247   :  { %v1597_v55 = vpop.permute.xlu1 %1596  ;;  %v883_v37 = vsel %vm851_vm5, %v835_v11, %v867_v33 }
 0x248   :  { %v1634_v42 = vadd.f32 %v3945_v7, %v1597_v55  ;;  %v4137_v0 = vadd.f32 %v883_v37, %v719_v13  ;;  %v4149_v37 = vcvt.s32.f32 %v3194_v5 }
 0x24a   :  { %5740 = vst [vmem:[#allocation37_spill] sm:$0xff] %v4137_v0  ;;  %v1666_v39 = vmul.f32 0.2, %v1634_v42  ;;  %942 = vmax.xlane.f32.xlu0 %v4137_v0  ;;  %vm1650_vm6 = vcmp.gt.f32.partialorder %v1634_v42, 0.0  ;;  %5743 = vst [vmem:[#allocation40_spill] sm:$0xff] %v4149_v37  ;;  %v3161_v61 = vadd.f32 -1.0, %v4149_v37 }
 0x24c   :  { %v788_v45 = vpop.permute.xlu1 %787  ;;  %v1682_v53 = vsel %vm1650_vm6, %v1634_v42, %v1666_v39  ;;  %v1612_v42 = vpop.permute.xlu0 %1611  ;;  %v722_v26 = vmul.f32 1e+30, %v3161_v61  ;;  %v3191_v61 = vunpack.c.3.s8 %v4085_v32 }
 0x24d   :  { %v833_v59 = vadd.f32 %v3958_v29, %v788_v45  ;;  %v4142_v56 = vadd.f32 %v1682_v53, %v719_v13  ;;  %v3195_v13 = vunpack.c.3.s8 %v4026_v25  ;;  %v1637_v41 = vadd.f32 %v3945_v7, %v1612_v42 }
 0x24f   :  { %5741 = vst [vmem:[#allocation38_spill] sm:$0xff] %v4142_v56  ;;  %v865_v8 = vmul.f32 0.2, %v833_v59  ;;  %1741 = vmax.xlane.f32.xlu0 %v4142_v56  ;;  %vm849_vm7 = vcmp.gt.f32.partialorder %v833_v59, 0.0  ;;  %v4159_v5 = vcvt.s32.f32 %v3195_v13  ;;  %vm1653_vm10 = vcmp.gt.f32.partialorder %v1637_v41, 0.0 }
 0x250   :  { %v1602_v25 = vpop.permute.xlu0 %1601 }
 0x251   :  { %v1587_v15 = vpop.permute.xlu1 %1586  ;;  %v881_v11 = vsel %vm849_vm7, %v833_v59, %v865_v8  ;;  %v3190_v59 = vunpack.c.2.s8 %v4085_v32  ;;  %5745 = vst [vmem:[#allocation42_spill] sm:$0xff] %v4159_v5  ;;  %v1635_v13 = vadd.f32 %v3945_v7, %v1602_v25 }
 0x252   :  { %v1632_v33 = vadd.f32 %v3945_v7, %v1587_v15  ;;  %v4147_v55 = vadd.f32 %v881_v11, %v717_v62  ;;  %v1669_v11 = vmul.f32 0.2, %v1637_v41 }
 0x253   :  { %vm1651_vm13 = vcmp.gt.f32.partialorder %v1635_v13, 0.0 }
 0x254   :  { %5742 = vst [vmem:[#allocation39_spill] sm:$0xff] %v4147_v55  ;;  %v1664_v39 = vmul.f32 0.2, %v1632_v33  ;;  %938 = vmax.xlane.f32.xlu1 %v4147_v55  ;;  %vm1648_vm8 = vcmp.gt.f32.partialorder %v1632_v33, 0.0  ;;  %v5757_v55 = vmov 0  }
 0x256   :  { %v813_v45 = vpop.permute.xlu1 %812  ;;  %v1680_v53 = vsel %vm1648_vm8, %v1632_v33, %v1664_v39  ;;  %v4162_v33 = vcvt.s32.f32 %v3190_v59 }
 0x257   :  { %v838_v8 = vadd.f32 %v3958_v29, %v813_v45  ;;  %v4157_v15 = vadd.f32 %v1680_v53, %v717_v62  ;;  %v3162_v62 = vadd.f32 -1.0, %v4159_v5  ;;  %v1685_v53 = vsel %vm1653_vm10, %v1637_v41, %v1669_v11 }
 0x258   :  { %5746 = vst [vmem:[#allocation43_spill] sm:$0xff] %v4162_v33  ;;  %v3159_v10 = vadd.f32 -1.0, %v4162_v33  ;;  %v4176_v11 = vcvt.s32.f32 %v3191_v61  ;;  %v4287_v33 = vld [vmem:[#allocation3 + $0x20] sm:$0xff] }
 0x259   :  { %5744 = vst [vmem:[#allocation41_spill] sm:$0xff] %v4157_v15  ;;  %vm854_vm9 = vcmp.gt.f32.partialorder %v838_v8, 0.0  ;;  %v870_v1 = vmul.f32 0.2, %v838_v8  ;;  %1737 = vmax.xlane.f32.xlu0 %v4157_v15 }
 0x25a   :  { %v803_v42 = vpop.permute.xlu1 %802  ;;  %v720_v41 = vmul.f32 1e+30, %v3159_v10  ;;  %5749 = vst [vmem:[#allocation46_spill] sm:$0xff] %v4176_v11 }
 0x25b   :  { %v836_v39 = vadd.f32 %v3958_v29, %v803_v42  ;;  %v886_v54 = vsel %vm854_vm9, %v838_v8, %v870_v1  ;;  %v4173_v42 = vadd.f32 %v1685_v53, %v722_v26  ;;  %v723_v1 = vmul.f32 1e+30, %v3162_v62 }
 0x25c   :  { %v4165_v56 = vadd.f32 %v886_v54, %v722_v26  ;;  %v1667_v54 = vmul.f32 0.2, %v1635_v13 }
 0x25d   :  { %v868_v45 = vmul.f32 0.2, %v836_v39  ;;  %vm852_vm11 = vcmp.gt.f32.partialorder %v836_v39, 0.0  ;;  %5748 = vst [vmem:[#allocation45_spill] sm:$0xff] %v4173_v42 }
 0x25e   :  { %5747 = vst [vmem:[#allocation44_spill] sm:$0xff] %v4165_v56  ;;  %v818_v50 = vpop.permute.xlu1 %817  ;;  %948 = vmax.xlane.f32.xlu1 %v4165_v56  ;;  %v1683_v26 = vsel %vm1651_vm13, %v1635_v13, %v1667_v54 }
 0x25f   :  { %v839_v59 = vadd.f32 %v3958_v29, %v818_v50  ;;  %v884_v46 = vsel %vm852_vm11, %v836_v39, %v868_v45  ;;  %v3160_v39 = vadd.f32 -1.0, %v4176_v11  ;;  %v4186_v45 = vadd.f32 %v1683_v26, %v720_v41 }
 0x260   :  { %v4181_v50 = vadd.f32 %v884_v46, %v720_v41  ;;  %v4199_v41 = vld [vmem:[#allocation3 + $0x8] sm:$0xff] }
 0x261   :  { %v871_v8 = vmul.f32 0.2, %v839_v59  ;;  %vm855_vm12 = vcmp.gt.f32.partialorder %v839_v59, 0.0  ;;  %5752 = vst [vmem:[#allocation49_spill] sm:$0xff] %v4186_v45 }
 0x262   :  { %1747 = vmax.xlane.f32.xlu1 %v4173_v42  ;;  %5751 = vst [vmem:[#allocation48_spill] sm:$0xff] %v4181_v50 }
 0x263   :  { %v1617_v25 = vpop.permute.xlu1 %1616  ;;  %v887_v3 = vsel %vm855_vm12, %v839_v59, %v871_v8 }
 0x264   :  { %v1638_v2 = vadd.f32 %v3945_v7, %v1617_v25  ;;  %v4179_v32 = vadd.f32 %v887_v3, %v723_v1  ;;  %v721_v3 = vmul.f32 1e+30, %v3160_v39 }
 0x266   :  { %5750 = vst [vmem:[#allocation47_spill] sm:$0xff] %v4179_v32  ;;  %v1670_v62 = vmul.f32 0.2, %v1638_v2  ;;  %950 = vmax.xlane.f32.xlu0 %v4179_v32  ;;  %944 = vmax.xlane.f32.xlu1 %v4181_v50  ;;  %vm1654_vm14 = vcmp.gt.f32.partialorder %v1638_v2, 0.0  ;;  %v5756_v32 = vmov 1  }
 0x268   :  { %v808_v10 = vpop.permute.xlu1 %807  ;;  %v1686_v53 = vsel %vm1654_vm14, %v1638_v2, %v1670_v62  ;;  %v4201_v62 = vld [vmem:[#allocation3 + $0x10] sm:$0xff] }
 0x269   :  { %v837_v61 = vadd.f32 %v3958_v29, %v808_v10  ;;  %v4189_v59 = vadd.f32 %v1686_v53, %v723_v1 }
 0x26a   :  { %1743 = vmax.xlane.f32.xlu1 %v4186_v45 }
 0x26b   :  { %5753 = vst [vmem:[#allocation50_spill] sm:$0xff] %v4189_v59  ;;  %v869_v46 = vmul.f32 0.2, %v837_v61  ;;  %1749 = vmax.xlane.f32.xlu0 %v4189_v59  ;;  %vm853_vm15 = vcmp.gt.f32.partialorder %v837_v61, 0.0 }
 0x26d   :  { %v885_v13 = vsel %vm853_vm15, %v837_v61, %v869_v46  ;;  %v1607_v8 = vpop.permute.xlu1 %1606 }
 0x26e   :  { %v4193_v54 = vadd.f32 %v885_v13, %v721_v3  ;;  %v1636_v29 = vadd.f32 %v3945_v7, %v1607_v8  ;;  %v4221_v8 = vld [vmem:[#allocation3] sm:$0xff] }
 0x270   :  { %5754 = vst [vmem:[#allocation51_spill] sm:$0xff] %v4193_v54  ;;  %946 = vmax.xlane.f32.xlu0 %v4193_v54  ;;  %v1668_v25 = vmul.f32 0.2, %v1636_v29  ;;  %vm1652_vm1 = vcmp.gt.f32.partialorder %v1636_v29, 0.0 }
 0x272   :  { %v1684_v53 = vsel %vm1652_vm1, %v1636_v29, %v1668_v25  ;;  %v4228_v25 = vld [vmem:[#allocation3 + $0x18] sm:$0xff] }
 0x273   :  { %v4218_v13 = vadd.f32 %v1684_v53, %v721_v3 }
 0x275   :  { %5755 = vst [vmem:[#allocation52_spill] sm:$0xff] %v4218_v13 }
 0x286   :  { %2190 = vrot.lane.b32.xlu0 %v3867_v4, %s3700_s23  ;;  %v1720_v2 = vpop.xlane.xlu0 %1719 }
 0x298   :  { %v1726_v1 = vpop.xlane.xlu0 %1725 }
 0x29d   :  { %v923_v26 = vpop.xlane.xlu0 %922 }
 0x29e   :  { %v4204_v39 = vmax.f32 %v4199_v41, %v923_v26 }
 0x29f   :  { %v925_v10 = vpop.xlane.xlu1 %924 }
 0x2a0   :  { %1508 = vst.msk [vmem:[#allocation3 + $0x8] sm:$0xff] %vm1240_vm0, %v4204_v39  ;;  %v4211_v7 = vmax.f32 %v4201_v62, %v925_v10 }
 0x2a2   :  { %1509 = vst.msk [vmem:[#allocation3 + $0x10] sm:$0xff] %vm1240_vm0, %v4211_v7  ;;  %980 = vperm.xlu1 %3393, %v4211_v7  }
 0x2a3   :  { %v1724_v46 = vpop.xlane.xlu1 %1723 }
 0x2a5   :  { %1745 = vmax.xlane.f32.xlu0 %v4218_v13 }
 0x2a7   :  { %v921_v26 = vpop.xlane.xlu1 %920  ;;  %v4250_v3 = vld [vmem:[#allocation3 + $0x8] sm:$0xff] }
 0x2a8   :  { %v4224_v10 = vmax.f32 %v4221_v8, %v921_v26  ;;  %v4255_v26 = vld [vmem:[#allocation3 + $0x30] sm:$0xff] }
 0x2a9   :  { %v4226_v29 = vld [vmem:[#allocation3 + $0x10] sm:$0xff] }
 0x2aa   :  { %v4231_v61 = vmax.f32 %v4226_v29, %v1724_v46  ;;  %1507 = vst.msk [vmem:[#allocation3] sm:$0xff] %vm1240_vm0, %v4224_v10  ;;  %970 = vperm.xlu1 %3393, %v4224_v10  }
 0x2ab   :  { %v927_v53 = vpop.xlane.xlu1 %926 }
 0x2ac   :  { %2404 = vst.msk [vmem:[#allocation3 + $0x10] sm:$0xff] %vm2039_vm2, %v4231_v61  ;;  %v4243_v4 = vmax.f32 %v4228_v25, %v927_v53 }
 0x2ae   :  { %1510 = vst.msk [vmem:[#allocation3 + $0x18] sm:$0xff] %vm1240_vm0, %v4243_v4  ;;  %985 = vperm.xlu1 %3393, %v4243_v4  }
 0x2af   :  { %v1722_v59 = vpop.xlane.xlu1 %1721 }
 0x2b0   :  { %v4253_v42 = vmax.f32 %v4250_v3, %v1722_v59 }
 0x2b1   :  { %v4257_v13 = vld [vmem:[#allocation3] sm:$0xff] }
 0x2b2   :  { %2403 = vst.msk [vmem:[#allocation3 + $0x8] sm:$0xff] %vm2039_vm2, %v4253_v42  ;;  %v4264_v46 = vmax.f32 %v4257_v13, %v1720_v2 }
 0x2b3   :  { %v933_v45 = vpop.xlane.xlu1 %932 }
 0x2b4   :  { %v4267_v37 = vmax.f32 %v4255_v26, %v933_v45  ;;  %2402 = vst.msk [vmem:[#allocation3] sm:$0xff] %vm2039_vm2, %v4264_v46  ;;  %v1734_v56 = vpop.xlane.xlu0 %1733 }
 0x2b5   :  { %v4273_v11 = vld [vmem:[#allocation3 + $0x18] sm:$0xff] }
 0x2b6   :  { %1513 = vst.msk [vmem:[#allocation3 + $0x30] sm:$0xff] %vm1240_vm0, %v4267_v37  ;;  %1000 = vperm.xlu1 %3393, %v4267_v37   ;;  %v4281_v2 = vmax.f32 %v4273_v11, %v1726_v1 }
 0x2b7   :  { %v1732_v45 = vpop.xlane.xlu1 %1731 }
 0x2b8   :  { %2405 = vst.msk [vmem:[#allocation3 + $0x18] sm:$0xff] %vm2039_vm2, %v4281_v2 }
 0x2bb   :  { %975 = vperm.xlu0 %3394, %v4204_v39   ;;  %v929_v53 = vpop.xlane.xlu1 %928 }
 0x2bc   :  { %v4291_v5 = vmax.f32 %v4287_v33, %v929_v53  ;;  %v4307_v53 = vld [vmem:[#allocation3 + $0x38] sm:$0xff] }
 0x2bd   :  { %v4293_v15 = vld [vmem:[#allocation3 + $0x30] sm:$0xff] }
 0x2be   :  { %v4296_v1 = vmax.f32 %v4293_v15, %v1732_v45  ;;  %1511 = vst.msk [vmem:[#allocation3 + $0x20] sm:$0xff] %vm1240_vm0, %v4291_v5  ;;  %990 = vperm.xlu1 %3393, %v4291_v5  }
 0x2bf   :  { %v1728_v59 = vpop.xlane.xlu1 %1727 }
 0x2c0   :  { %2408 = vst.msk [vmem:[#allocation3 + $0x30] sm:$0xff] %vm2039_vm2, %v4296_v1 }
 0x2c3   :  { %v935_v52 = vpop.xlane.xlu1 %934 }
 0x2c4   :  { %v4310_v45 = vmax.f32 %v4307_v53, %v935_v52 }
 0x2c5   :  { %v4312_v54 = vld [vmem:[#allocation3 + $0x20] sm:$0xff] }
 0x2c6   :  { %v4317_v21 = vmax.f32 %v4312_v54, %v1728_v59  ;;  %1514 = vst.msk [vmem:[#allocation3 + $0x38] sm:$0xff] %vm1240_vm0, %v4310_v45  ;;  %1005 = vperm.xlu1 %3393, %v4310_v45   ;;  %v4331_v59 = vld [vmem:[#allocation3 + $0x50] sm:$0xff] }
 0x2c7   :  { %v931_v12 = vpop.xlane.xlu1 %930 }
 0x2c8   :  { %2406 = vst.msk [vmem:[#allocation3 + $0x20] sm:$0xff] %vm2039_vm2, %v4317_v21  ;;  %v4329_v40 = vmax.f32 %v4314_v47, %v931_v12  ;;  %v1730_v12 = vpop.xlane.xlu0 %1729 }
 0x2ca   :  { %1512 = vst.msk [vmem:[#allocation3 + $0x28] sm:$0xff] %vm1240_vm0, %v4329_v40  ;;  %3395 = vset.pattern.permute.xlu1 %v5756_v32 }
 0x2cb   :  { %1779 = vperm.xlu1 %3395, %v4231_v61   ;;  %v941_v52 = vpop.xlane.xlu1 %940 }
 0x2cc   :  { %v4340_v50 = vmax.f32 %v4331_v59, %v941_v52 }
 0x2cd   :  { %v4342_v44 = vld [vmem:[#allocation3 + $0x38] sm:$0xff] }
 0x2ce   :  { %1517 = vst.msk [vmem:[#allocation3 + $0x50] sm:$0xff] %vm1240_vm0, %v4340_v50  ;;  %1020 = vperm.xlu0 %3394, %v4340_v50   ;;  %v4350_v17 = vmax.f32 %v4342_v44, %v1734_v56 }
 0x2cf   :  { %3396 = vset.pattern.permute.xlu1 %v5757_v55  ;;  %v1740_v38 = vpop.xlane.xlu1 %1739 }
 0x2d0   :  { %995 = vperm.xlu1 %3396, %v4329_v40   ;;  %2409 = vst.msk [vmem:[#allocation3 + $0x38] sm:$0xff] %vm2039_vm2, %v4350_v17 }
 0x2d1   :  { %v4360_v22 = vld [vmem:[#allocation3 + $0x28] sm:$0xff] }
 0x2d2   :  { %v1736_v0 = vpop.xlane.xlu0 %1735  ;;  %3402 = vset.pattern.permute.xlu0 %v5756_v32  ;;  %v4364_v56 = vmax.f32 %v4360_v22, %v1730_v12  ;;  %v4378_v12 = vld [vmem:[#allocation3 + $0x58] sm:$0xff] }
 0x2d3   :  { %v937_v23 = vpop.xlane.xlu1 %936  ;;  %5759 = vst [vmem:[#allocation54_spill] sm:$0xff] %v4378_v12 }
 0x2d4   :  { %v4367_v60 = vmax.f32 %v4358_v18, %v937_v23  ;;  %3397 = vset.pattern.permute.xlu1 %v5756_v32  ;;  %2407 = vst.msk [vmem:[#allocation3 + $0x28] sm:$0xff] %vm2039_vm2, %v4364_v56  ;;  %1794 = vperm.xlu0 %3402, %v4364_v56  }
 0x2d5   :  { %v4375_v51 = vld [vmem:[#allocation3 + $0x50] sm:$0xff]  ;;  %1769 = vperm.xlu1 %3397, %v4264_v46  }
 0x2d6   :  { %5758 = vst [vmem:[#allocation53_spill] sm:$0xff] %v4375_v51  ;;  %v4381_v28 = vmax.f32 %v4375_v51, %v1740_v38  ;;  %1515 = vst.msk [vmem:[#allocation3 + $0x40] sm:$0xff] %vm1240_vm0, %v4367_v60  ;;  %v4406_v51 = vld [vmem:[#allocation3 + $0x48] sm:$0xff] }
 0x2d7   :  { %v943_v52 = vpop.xlane.xlu0 %942  ;;  %5763 = vst [vmem:[#allocation58_spill] sm:$0xff] %v4406_v51 }
 0x2d8   :  { %2412 = vst.msk [vmem:[#allocation3 + $0x50] sm:$0xff] %vm2039_vm2, %v4381_v28  ;;  %v4392_v43 = vmax.f32 %v4378_v12, %v943_v52  ;;  %3403 = vset.pattern.permute.xlu0 %v5757_v55  ;;  %v4488_v12 = vld [vmem:[#allocation3 + $0x68] sm:$0xff] }
 0x2d9   :  { %1784 = vperm.xlu1 %3397, %v4281_v2  }
 0x2da   :  { %5760 = vst [vmem:[#allocation55_spill] sm:$0xff] %v4392_v43  ;;  %1518 = vst.msk [vmem:[#allocation3 + $0x58] sm:$0xff] %vm1240_vm0, %v4392_v43 }
 0x2dc   :  { %v1742_v38 = vpop.xlane.xlu0 %1741 }
 0x2dd   :  { %1774 = vperm.xlu1 %3397, %v4253_v42   ;;  %v4401_v23 = vld [vmem:[#allocation3 + $0x40] sm:$0xff] }
 0x2de   :  { %5761 = vst [vmem:[#allocation56_spill] sm:$0xff] %v4401_v23  ;;  %v4404_v49 = vmax.f32 %v4401_v23, %v1736_v0 }
 0x2e0   :  { %5762 = vst [vmem:[#allocation57_spill] sm:$0xff] %v4404_v49  ;;  %2410 = vst.msk [vmem:[#allocation3 + $0x40] sm:$0xff] %vm2039_vm2, %v4404_v49 }
 0x2e1   :  { %v4412_v36 = vld [vmem:[#allocation3 + $0x58] sm:$0xff]  ;;  %3398 = vset.pattern.permute.xlu1 %v5757_v55  ;;  %v939_v20 = vpop.xlane.xlu1 %938 }
 0x2e2   :  { %5764 = vst [vmem:[#allocation59_spill] sm:$0xff] %v4412_v36  ;;  %v4416_v34 = vmax.f32 %v4412_v36, %v1742_v38  ;;  %v4419_v0 = vmax.f32 %v4406_v51, %v939_v20  ;;  %1010 = vperm.xlu1 %3398, %v4367_v60   ;;  %v4431_v38 = vld [vmem:[#allocation3 + $0x70] sm:$0xff] }
 0x2e4   :  { %5765 = vst [vmem:[#allocation60_spill] sm:$0xff] %v4419_v0  ;;  %2413 = vst.msk [vmem:[#allocation3 + $0x58] sm:$0xff] %vm2039_vm2, %v4416_v34 }
 0x2e5   :  { %1516 = vst.msk [vmem:[#allocation3 + $0x48] sm:$0xff] %vm1240_vm0, %v4419_v0 }
 0x2e6   :  { %1025 = vperm.xlu1 %3398, %v4392_v43   ;;  %v1738_v20 = vpop.xlane.xlu0 %1737 }
 0x2ea   :  { %3399 = vset.pattern.permute.xlu1 %v5756_v32 }
 0x2eb   :  { %1799 = vperm.xlu1 %3399, %v4296_v1   ;;  %v949_v52 = vpop.xlane.xlu1 %948 }
 0x2ec   :  { %v4434_v48 = vld [vmem:[#allocation3 + $0x48] sm:$0xff]  ;;  %v4441_v23 = vmax.f32 %v4431_v38, %v949_v52  ;;  %v4454_v52 = vld [vmem:[#allocation3 + $0x78] sm:$0xff] }
 0x2ed   :  { %5766 = vst [vmem:[#allocation61_spill] sm:$0xff] %v4434_v48  ;;  %v4438_v36 = vmax.f32 %v4434_v48, %v1738_v20  ;;  %5767 = vst [vmem:[#allocation62_spill] sm:$0xff] %v4454_v52 }
 0x2ee   :  { %1521 = vst.msk [vmem:[#allocation3 + $0x70] sm:$0xff] %vm1240_vm0, %v4441_v23  ;;  %1040 = vperm.xlu0 %3403, %v4441_v23  }
 0x2ef   :  { %2411 = vst.msk [vmem:[#allocation3 + $0x48] sm:$0xff] %vm2039_vm2, %v4438_v36  ;;  %3400 = vset.pattern.permute.xlu1 %v5757_v55  ;;  %v1748_v20 = vpop.xlane.xlu1 %1747 }
 0x2f0   :  { %1015 = vperm.xlu1 %3400, %v4419_v0  }
 0x2f3   :  { %v951_v51 = vpop.xlane.xlu0 %950  ;;  %v945_v48 = vpop.xlane.xlu1 %944 }
 0x2f4   :  { %v4459_v27 = vmax.f32 %v4454_v52, %v951_v51  ;;  %v4462_v30 = vmax.f32 %v4456_v35, %v945_v48  ;;  %3401 = vset.pattern.permute.xlu1 %v5756_v32 }
 0x2f5   :  { %v4465_v43 = vld [vmem:[#allocation3 + $0x70] sm:$0xff]  ;;  %1789 = vperm.xlu1 %3401, %v4317_v21  }
 0x2f6   :  { %5769 = vst [vmem:[#allocation64_spill] sm:$0xff] %v4459_v27  ;;  %5770 = vst [vmem:[#allocation65_spill] sm:$0xff] %v4462_v30  ;;  %v4469_v0 = vmax.f32 %v4465_v43, %v1748_v20  ;;  %1030 = vperm.xlu0 %3403, %v4462_v30  }
 0x2f7   :  { %5771 = vst [vmem:[#allocation66_spill] sm:$0xff] %v4465_v43  ;;  %1522 = vst.msk [vmem:[#allocation3 + $0x78] sm:$0xff] %vm1240_vm0, %v4459_v27  ;;  %v1744_v52 = vpop.xlane.xlu1 %1743 }
 0x2f8   :  { %1519 = vst.msk [vmem:[#allocation3 + $0x60] sm:$0xff] %vm1240_vm0, %v4462_v30  ;;  %v1750_v20 = vpop.xlane.xlu0 %1749 }
 0x2f9   :  { %2416 = vst.msk [vmem:[#allocation3 + $0x70] sm:$0xff] %vm2039_vm2, %v4469_v0  ;;  %3405 = vset.pattern.permute.xlu1 %v5757_v55 }
 0x2fa   :  { %1045 = vperm.xlu1 %3405, %v4459_v27   ;;  %3404 = vset.pattern.permute.xlu0 %v5756_v32 }
 0x2fb   :  { %1804 = vperm.xlu0 %3404, %v4350_v17  }
 0x2fd   :  { %v947_v48 = vpop.xlane.xlu0 %946 }
 0x2fe   :  { %v4492_v30 = vld [vmem:[#allocation3 + $0x78] sm:$0xff]  ;;  %v4501_v27 = vmax.f32 %v4488_v12, %v947_v48 }
 0x2ff   :  { %v4490_v51 = vld [vmem:[#allocation3 + $0x60] sm:$0xff]  ;;  %v4498_v35 = vmax.f32 %v4492_v30, %v1750_v20  ;;  %1819 = vperm.xlu0 %3404, %v4381_v28   ;;  %v5773_v20 = vsub.f32 %v4199_v41, %v4204_v39 }
 0x300   :  { %5772 = vst [vmem:[#allocation67_spill] sm:$0xff] %v4490_v51  ;;  %v4495_v43 = vmax.f32 %v4490_v51, %v1744_v52  ;;  %1520 = vst.msk [vmem:[#allocation3 + $0x68] sm:$0xff] %vm1240_vm0, %v4501_v27  ;;  %1035 = vperm.xlu1 %3405, %v4501_v27   ;;  %v5774_v52 = vsub.f32 %v4228_v25, %v4243_v4  ;;  %v5775_v51 = vsub.f32 %v4287_v33, %v4291_v5 }
 0x301   :  { %2417 = vst.msk [vmem:[#allocation3 + $0x78] sm:$0xff] %vm2039_vm2, %v4498_v35  ;;  %v4517_v48 = vpop.permute.xlu0 %2190  ;;  %v1130_v6 = vmul.f32 1.442695, %v5773_v20  ;;  %v5779_v4 = vsub.f32 %v4250_v3, %v4253_v42  ;;  %v5781_v42 = vsub.f32 %v4273_v11, %v4281_v2  ;;  %v5784_v11 = vsub.f32 %v4312_v54, %v4317_v21 }
 0x302   :  { %2414 = vst.msk [vmem:[#allocation3 + $0x60] sm:$0xff] %vm2039_vm2, %v4495_v43  ;;  %3343 = vmatprep.subr.bf16.mxu1 %v4517_v48  ;;  %v1134_v63 = vmul.f32 1.442695, %v5774_v52 }
 0x303   :  { %3351 = vmatpush3.bf16.msra.mxu1 %v4517_v48  ;;  %3473 = vpow2.f32 %v1130_v6  ;;  %v5776_v6 = vsub.f32 %v4255_v26, %v4267_v37  ;;  %v1933_v3 = vmul.f32 1.442695, %v5781_v42 }
 0x304   :  { %3406 = vset.pattern.permute.xlu1 %v5756_v32  ;;  %3475 = vpow2.f32 %v1134_v63 }
 0x305   :  { %1809 = vperm.xlu1 %3406, %v4404_v49   ;;  %v1136_v49 = vmul.f32 1.442695, %v5775_v51  ;;  %v1140_v41 = vmul.f32 1.442695, %v5776_v6 }
 0x307   :  { %3477 = vpow2.f32 %v1136_v49  ;;  %v4571_v52 = vld [vmem:[#allocation3 + $0x68] sm:$0xff] }
 0x308   :  { %3479 = vpow2.f32 %v1140_v41 }
 0x309   :  { %1824 = vperm.xlu1 %3406, %v4416_v34  }
 0x30d   :  { %1814 = vperm.xlu1 %3406, %v4438_v36   ;;  %v4544_v39 = vpop.eup %3473 }
 0x30e   :  { %v4550_v5 = vpop.eup %3475 }
 0x311   :  { %1839 = vperm.xlu1 %3406, %v4469_v0   ;;  %v4556_v37 = vpop.eup %3477 }
 0x315   :  { %1829 = vperm.xlu1 %3406, %v4495_v43  }
 0x319   :  { %2192 = vrot.lane.b32.xlu1 %v3871_v9, %s3700_s23  ;;  %v5777_v9 = vsub.f32 %v4358_v18, %v4367_v60  ;;  %v1929_v18 = vmul.f32 1.442695, %v5779_v4  ;;  %v4562_v60 = vpop.eup %3479  ;;  %v5787_v4 = vsub.f32 %v4201_v62, %v4211_v7  ;;  %v5789_v62 = vsub.f32 %v4314_v47, %v4329_v40 }
 0x31a   :  { %3407 = vset.pattern.permute.xlu1 %v5757_v55 }
 0x31b   :  { %v1144_v63 = vmul.f32 1.442695, %v5777_v9 }
 0x31d   :  { %2196 = vrot.lane.b32.xlu1 %v3879_v19, %s3700_s23  ;;  %v5778_v19 = vsub.f32 %v4331_v59, %v4340_v50  ;;  %3481 = vpow2.f32 %v1144_v63  ;;  %v5780_v50 = vsub.f32 %v4226_v29, %v4231_v61  ;;  %v5782_v61 = vsub.f32 %v4221_v8, %v4224_v10 }
 0x31e   :  { %v5783_v63 = vsub.f32 %v4257_v13, %v4264_v46  ;;  %v1935_v8 = vmul.f32 1.442695, %v5784_v11 }
 0x31f   :  { %v1148_v33 = vmul.f32 1.442695, %v5778_v19  ;;  %v1931_v26 = vmul.f32 1.442695, %v5780_v50  ;;  %v1128_v29 = vmul.f32 1.442695, %v5782_v61 }
 0x320   :  { %v1927_v19 = vmul.f32 1.442695, %v5783_v63  ;;  %v5795_v63 = vld [vmem:[#allocation28_spill] sm:$0xff] }
 0x321   :  { %1280 = vperm.xlu1 %3407, %v4544_v39   ;;  %v981_v49 = vpop.permute.xlu1 %980  ;;  %3483 = vpow2.f32 %v1148_v33 }
 0x322   :  { %3485 = vpow2.f32 %v1929_v18  ;;  %v1050_v10 = vsub.f32 %v3984_v58, %v981_v49  ;;  %v1132_v18 = vmul.f32 1.442695, %v5787_v4 }
 0x323   :  { %3487 = vpow2.f32 %v1931_v26 }
 0x324   :  { %3489 = vpow2.f32 %v1933_v3  ;;  %v1068_v21 = vmul.f32 1.442695, %v1050_v10  ;;  %v5798_v10 = vld [vmem:[#allocation55_spill] sm:$0xff] }
 0x325   :  { %1290 = vperm.xlu1 %3407, %v4550_v5   ;;  %3491 = vpow2.f32 %v1128_v29  ;;  %v5793_v29 = vsub.f32 %v4307_v53, %v4310_v45  ;;  %v5800_v45 = vld [vmem:[#allocation11_spill] sm:$0xff] }
 0x326   :  { %3493 = vpow2.f32 %v1927_v19 }
 0x327   :  { %v4568_v59 = vpop.eup %3481  ;;  %3495 = vpow2.f32 %v1935_v8  ;;  %v1142_v47 = vmul.f32 1.442695, %v5793_v29  ;;  %v5797_v8 = vld [vmem:[#allocation54_spill] sm:$0xff] }
 0x329   :  { %1295 = vperm.xlu1 %3407, %v4556_v37   ;;  %v971_v25 = vpop.permute.xlu1 %970 }
 0x32a   :  { %v1048_v9 = vsub.f32 %v4016_v16, %v971_v25  ;;  %v5785_v16 = vsub.f32 %v4360_v22, %v4364_v56  ;;  %v5788_v25 = vsub.f32 %v4293_v15, %v4296_v1  ;;  %v1138_v15 = vmul.f32 1.442695, %v5789_v62  ;;  %v5807_v62 = vld [vmem:[#allocation63_spill] sm:$0xff] }
 0x32b   :  { %v4579_v41 = vpop.eup %3483  ;;  %v5791_v1 = vsub.f32 %v4342_v44, %v4350_v17  ;;  %v5794_v44 = vsub.f32 %v4431_v38, %v4441_v23  ;;  %v5802_v38 = vld [vmem:[#allocation12_spill] sm:$0xff] }
 0x32c   :  { %v1937_v13 = vmul.f32 1.442695, %v5785_v16  ;;  %v4600_v46 = vpop.eup %3485  ;;  %v5799_v16 = vsub.f32 %v5797_v8, %v5798_v10  ;;  %v5815_v10 = vld [vmem:[#allocation59_spill] sm:$0xff] }
 0x32d   :  { %1305 = vperm.xlu1 %3407, %v4562_v60   ;;  %v986_v51 = vpop.permute.xlu1 %985  ;;  %5786 = vst [vmem:[#allocation68_spill] sm:$0xff] %v4600_v46  ;;  %v4606_v22 = vpop.eup %3487  ;;  %v1156_v17 = vmul.f32 1.442695, %v5794_v44  ;;  %v5812_v44 = vld [vmem:[#allocation30_spill] sm:$0xff] }
 0x32e   :  { %v1051_v33 = vsub.f32 %v4031_v31, %v986_v51  ;;  %v1064_v31 = vmul.f32 1.442695, %v1048_v9  ;;  %3497 = vpow2.f32 %v1937_v13  ;;  %v4617_v50 = vpop.eup %3489  ;;  %v1150_v53 = vmul.f32 1.442695, %v5799_v16 }
 0x32f   :  { %v4621_v51 = vpop.eup %3491  ;;  %v5816_v16 = vsub.f32 %v5815_v10, %v4416_v34  ;;  %v5821_v34 = vld [vmem:[#allocation61_spill] sm:$0xff] }
 0x330   :  { %v1070_v2 = vmul.f32 1.442695, %v1051_v33  ;;  %3499 = vpow2.f32 %v1064_v31  ;;  %v5796_v33 = vld [vmem:[#allocation9_spill] sm:$0xff]  ;;  %v5801_v31 = vld [vmem:[#allocation24_spill] sm:$0xff] }
 0x331   :  { %1315 = vperm.xlu1 %3407, %v4568_v59  }
 0x332   :  { %v1746_v20 = vpop.xlane.xlu0 %1745  ;;  %3501 = vpow2.f32 %v1070_v2 }
 0x333   :  { %v4577_v6 = vmax.f32 %v4571_v52, %v1746_v20  ;;  %3503 = vpow2.f32 %v1068_v21  ;;  %v1941_v20 = vmul.f32 1.442695, %v5791_v1 }
 0x335   :  { %2415 = vst.msk [vmem:[#allocation3 + $0x68] sm:$0xff] %vm2039_vm2, %v4577_v6  ;;  %1834 = vperm.xlu0 %3404, %v4577_v6   ;;  %1325 = vperm.xlu1 %3407, %v4579_v41   ;;  %v1001_v56 = vpop.permute.xlu1 %1000 }
 0x339   :  { %1844 = vperm.xlu0 %3404, %v4498_v35   ;;  %3409 = vset.pattern.permute.xlu1 %v5756_v32 }
 0x33a   :  { %v976_v54 = vpop.permute.xlu0 %975  ;;  %2079 = vperm.xlu1 %3409, %v4600_v46  }
 0x33b   :  { %v1049_v58 = vsub.f32 %v3981_v57, %v976_v54  ;;  %v1939_v57 = vmul.f32 1.442695, %v5788_v25  ;;  %v5803_v54 = vld [vmem:[#allocation58_spill] sm:$0xff] }
 0x33d   :  { %v1066_v49 = vmul.f32 1.442695, %v1049_v58  ;;  %2194 = vrot.lane.b32.xlu0 %v3875_v14, %s3700_s23  ;;  %v991_v26 = vpop.permute.xlu1 %990  ;;  %v4624_v14 = vpop.eup %3493  ;;  %v5804_v58 = vld [vmem:[#allocation60_spill] sm:$0xff] }
 0x33e   :  { %2084 = vperm.xlu1 %3409, %v4606_v22   ;;  %v4629_v7 = vpop.eup %3495  ;;  %v1052_v2 = vsub.f32 %v5801_v31, %v991_v26  ;;  %v5808_v26 = vld [vmem:[#allocation65_spill] sm:$0xff] }
 0x33f   :  { %3505 = vpow2.f32 %v1066_v49  ;;  %5790 = vst [vmem:[#allocation69_spill] sm:$0xff] %v4629_v7  ;;  %v4634_v42 = vpop.eup %3497  ;;  %v5805_v49 = vsub.f32 %v5803_v54, %v5804_v58  ;;  %v5818_v54 = vld [vmem:[#allocation62_spill] sm:$0xff]  ;;  %v5819_v58 = vld [vmem:[#allocation64_spill] sm:$0xff] }
 0x340   :  { %3507 = vpow2.f32 %v1132_v18  ;;  %5792 = vst [vmem:[#allocation70_spill] sm:$0xff] %v4634_v42  ;;  %v3500_v3 = vpop.eup %3499  ;;  %v5806_v18 = vld [vmem:[#allocation20_spill] sm:$0xff] }
 0x341   :  { %2198 = vrot.lane.b32.xlu0 %v3883_v24, %s3700_s23  ;;  %3509 = vpow2.f32 %v1939_v57  ;;  %v3502_v61 = vpop.eup %3501  ;;  %v4647_v11 = vmul.f32 %v3500_v3, %v5796_v33  ;;  %v1146_v4 = vmul.f32 1.442695, %v5805_v49  ;;  %v1054_v25 = vsub.f32 %v5806_v18, %v1001_v56 }
 0x342   :  { %2089 = vperm.xlu1 %3409, %v4617_v50   ;;  %3511 = vpow2.f32 %v1138_v15  ;;  %v3504_v40 = vpop.eup %3503  ;;  %v4653_v13 = vmul.f32 %v3502_v61, %v5800_v45  ;;  %v5809_v15 = vsub.f32 %v5807_v62, %v5808_v26  ;;  %v5820_v49 = vsub.f32 %v5818_v54, %v5819_v58  ;;  %v5833_v54 = vld [vmem:[#allocation19_spill] sm:$0xff] }
 0x343   :  { %3513 = vpow2.f32 %v1941_v20  ;;  %v5810_v20 = vld [vmem:[#allocation13_spill] sm:$0xff]  ;;  %v5822_v62 = vsub.f32 %v5821_v34, %v4438_v36 }
 0x344   :  { %3515 = vpow2.f32 %v1142_v47  ;;  %v1152_v1 = vmul.f32 1.442695, %v5809_v15  ;;  %v1072_v47 = vmul.f32 1.442695, %v1052_v2  ;;  %v5817_v2 = vld [vmem:[#allocation7_spill] sm:$0xff]  ;;  %v5823_v15 = vld [vmem:[#allocation8_spill] sm:$0xff] }
 0x345   :  { %2074 = vperm.xlu0 %3404, %v4624_v14   ;;  %v1006_v24 = vpop.permute.xlu1 %1005  ;;  %3517 = vpow2.f32 %v1156_v17  ;;  %v5813_v17 = vld [vmem:[#allocation6_spill] sm:$0xff]  ;;  %v1945_v26 = vmul.f32 1.442695, %v5822_v62 }
 0x346   :  { %2094 = vperm.xlu1 %3409, %v4629_v7   ;;  %v1055_v19 = vsub.f32 %v5795_v63, %v1006_v24  ;;  %v4673_v24 = vmul.f32 %v3504_v40, %v5810_v20  ;;  %3519 = vpow2.f32 %v1150_v53  ;;  %v1949_v53 = vmul.f32 1.442695, %v5816_v16 }
 0x347   :  { %3521 = vpow2.f32 %v1146_v4  ;;  %v1158_v4 = vmul.f32 1.442695, %v5820_v49  ;;  %v5834_v49 = vld [vmem:[#allocation21_spill] sm:$0xff] }
 0x348   :  { %v1078_v29 = vmul.f32 1.442695, %v1055_v19  ;;  %v1370_v56 = vpack.c.bf16 %v4653_v13, %v4673_v24  ;;  %3523 = vpow2.f32 %v1152_v1 }
 0x349   :  { %v3506_v9 = vpop.eup %3505  ;;  %3408 = vset.pattern.permute.xlu0 %v5757_v55 }
 0x34a   :  { %1275 = vperm.xlu0 %3408, %v4621_v51   ;;  %2099 = vperm.xlu1 %3409, %v4634_v42   ;;  %v4658_v23 = vpop.permute.xlu1 %1779  ;;  %v4661_v21 = vmul.f32 %v3506_v9, %v5802_v38  ;;  %v4667_v57 = vpop.eup %3507  ;;  %v1076_v9 = vmul.f32 1.442695, %v1054_v25  ;;  %3525 = vpow2.f32 %v1078_v29  ;;  %v5826_v29 = vld [vmem:[#allocation53_spill] sm:$0xff] }
 0x34b   :  { %v4677_v61 = vpop.eup %3509  ;;  %3527 = vpow2.f32 %v1072_v47  ;;  %v5827_v47 = vsub.f32 %v5826_v29, %v4381_v28  ;;  %v5839_v29 = vld [vmem:[#allocation57_spill] sm:$0xff] }
 0x34c   :  { %v1369_v3 = vpack.c.bf16 %v4661_v21, %v4647_v11  ;;  %5811 = vst [vmem:[#allocation28_spill] sm:$0xff] %v4677_v61  ;;  %v4684_v8 = vpop.eup %3511  ;;  %3529 = vpow2.f32 %v1076_v9  ;;  %v5869_v42 = vld [vmem:[#allocation41_spill] sm:$0xff] }
 0x34d   :  { %v4687_v19 = vpop.eup %3513 }
 0x34e   :  { %1285 = vperm.xlu0 %3408, %v4667_v57   ;;  %2104 = vperm.xlu1 %3409, %v4677_v61   ;;  %5814 = vst [vmem:[#allocation9_spill] sm:$0xff] %v4687_v19  ;;  %v4700_v25 = vpop.eup %3515 }
 0x34f   :  { %3292 = vmatprep.mubr.bf16.mxu0 %v1369_v3  ;;  %v996_v40 = vpop.permute.xlu1 %995  ;;  %v4708_v1 = vpop.eup %3517 }
 0x350   :  { %3293 = vmatmul.mubr.bf16.vlgmr.msra.gmra.mrb[16].mxu0 %v1370_v56  ;;  %v1053_v63 = vsub.f32 %v5812_v44, %v996_v40  ;;  %5824 = vst [vmem:[#allocation54_spill] sm:$0xff] %v4708_v1  ;;  %v4711_v3 = vpop.eup %3519  ;;  %v1947_v56 = vmul.f32 1.442695, %v5827_v47  ;;  %v5830_v44 = vsub.f32 %v4492_v30, %v4498_v35 }
 0x351   :  { %3309 = vmatpush3.bf16.msra.mxu0 %v5813_v17  ;;  %5825 = vst [vmem:[#allocation55_spill] sm:$0xff] %v4711_v3  ;;  %v4719_v36 = vpop.eup %3521  ;;  %v1924_v17 = vsub.f32 %v4571_v52, %v4577_v6  ;;  %v5832_v6 = vld [vmem:[#allocation17_spill] sm:$0xff] }
 0x352   :  { %v1074_v31 = vmul.f32 1.442695, %v1053_v63  ;;  %3310 = vmatprep.subr.bf16.mxu0 %v5817_v2  ;;  %1300 = vperm.xlu0 %3408, %v4684_v8   ;;  %5828 = vst [vmem:[#allocation11_spill] sm:$0xff] %v4719_v36  ;;  %v4722_v40 = vpop.eup %3523  ;;  %v1957_v63 = vmul.f32 1.442695, %v5830_v44 }
 0x353   :  { %2109 = vperm.xlu1 %3409, %v4687_v19   ;;  %5829 = vst [vmem:[#allocation24_spill] sm:$0xff] %v4722_v40  ;;  %v1953_v52 = vmul.f32 1.442695, %v1924_v17  ;;  %v5873_v19 = vld [vmem:[#allocation40_spill] sm:$0xff] }
 0x354   :  { %3531 = vpow2.f32 %v1074_v31  ;;  %v4698_v18 = vpop.permute.xlu1 %1769  ;;  %v3526_v28 = vpop.eup %3525  ;;  %v5831_v31 = vsub.f32 %v4488_v12, %v4501_v27  ;;  %v5836_v27 = vld [vmem:[#allocation16_spill] sm:$0xff] }
 0x355   :  { %3311 = vmatpush3.bf16.msra.mxu0 %v5817_v2  ;;  %3533 = vpow2.f32 %v1949_v53  ;;  %v3528_v10 = vpop.eup %3527  ;;  %v4740_v2 = vmul.f32 %v3526_v28, %v5832_v6 }
 0x356   :  { %3312 = vmatprep.subr.bf16.mxu0 %v5823_v15  ;;  %1310 = vperm.xlu0 %3408, %v4700_v25   ;;  %3535 = vpow2.f32 %v1158_v4  ;;  %v3530_v53 = vpop.eup %3529  ;;  %v1154_v30 = vmul.f32 1.442695, %v5831_v31  ;;  %v4743_v58 = vmul.f32 %v3528_v10, %v5833_v54  ;;  %v5843_v10 = vld [vmem:[#allocation66_spill] sm:$0xff] }
 0x357   :  { %3410 = vset.pattern.permute.xlu1 %v5757_v55  ;;  %3537 = vpow2.f32 %v1945_v26  ;;  %v4752_v12 = vmul.f32 %v3530_v53, %v5836_v27  ;;  %v5844_v53 = vsub.f32 %v5843_v10, %v4469_v0 }
 0x358   :  { %1345 = vperm.xlu1 %3410, %v4708_v1   ;;  %v4717_v9 = vpop.permute.xlu1 %1784  ;;  %3539 = vpow2.f32 %v1947_v56 }
 0x359   :  { %3313 = vmatpush3.bf16.msra.mxu0 %v5823_v15  ;;  %3541 = vpow2.f32 %v1957_v63  ;;  %v5838_v15 = vld [vmem:[#allocation56_spill] sm:$0xff]  ;;  %v1372_v44 = vpack.c.bf16 %v4740_v2, %v4752_v12  ;;  %v1955_v31 = vmul.f32 1.442695, %v5844_v53  ;;  %v5851_v53 = vld [vmem:[#allocation31_spill] sm:$0xff] }
 0x35a   :  { %3314 = vmatprep.subr.bf16.mxu0 %v4517_v48  ;;  %1320 = vperm.xlu0 %3408, %v4719_v36   ;;  %3543 = vpow2.f32 %v1154_v30  ;;  %v5840_v47 = vsub.f32 %v5838_v15, %v5839_v29  ;;  %v5847_v15 = vld [vmem:[#allocation67_spill] sm:$0xff] }
 0x35b   :  { %3545 = vpow2.f32 %v1953_v52  ;;  %v5846_v52 = vld [vmem:[#allocation37_spill] sm:$0xff]  ;;  %v5848_v29 = vsub.f32 %v5847_v15, %v4495_v43 }
 0x35c   :  { %1335 = vperm.xlu1 %3410, %v4722_v40   ;;  %v4732_v16 = vpop.permute.xlu1 %1774  ;;  %v1943_v56 = vmul.f32 1.442695, %v5840_v47 }
 0x35d   :  { %3315 = vmatpush3.bf16.msra.mxu0 %v4517_v48  ;;  %v1951_v47 = vmul.f32 1.442695, %v5848_v29  ;;  %v5854_v29 = vld [vmem:[#allocation39_spill] sm:$0xff] }
 0x35e   :  { %v3532_v35 = vpop.eup %3531  ;;  %1330 = vperm.xlu0 %3408, %v4711_v3   ;;  %3547 = vpow2.f32 %v1943_v56  ;;  %v5871_v3 = vld [vmem:[#allocation43_spill] sm:$0xff] }
 0x35f   :  { %v4746_v4 = vmul.f32 %v3532_v35, %v5834_v49  ;;  %v4748_v34 = vpop.eup %3533  ;;  %v1021_v35 = vpop.permute.xlu0 %1020  ;;  %3549 = vpow2.f32 %v1955_v31 }
 0x360   :  { %5835 = vst [vmem:[#allocation12_spill] sm:$0xff] %v4748_v34  ;;  %3414 = vset.pattern.permute.xlu1 %v5756_v32  ;;  %v4754_v48 = vpop.eup %3535  ;;  %3551 = vpow2.f32 %v1951_v47 }
 0x361   :  { %5837 = vst [vmem:[#allocation58_spill] sm:$0xff] %v4754_v48  ;;  %2129 = vperm.xlu1 %3414, %v4748_v34   ;;  %v1011_v62 = vpop.permute.xlu1 %1010  ;;  %v1371_v26 = vpack.c.bf16 %v4746_v4, %v4743_v58  ;;  %v4765_v63 = vpop.eup %3537 }
 0x362   :  { %1350 = vperm.xlu0 %3408, %v4754_v48   ;;  %5841 = vst [vmem:[#allocation60_spill] sm:$0xff] %v4765_v63  ;;  %v4768_v28 = vpop.eup %3539 }
 0x363   :  { %3296 = vmatprep.mubr.bf16.mxu0 %v1371_v26  ;;  %5842 = vst [vmem:[#allocation20_spill] sm:$0xff] %v4768_v28  ;;  %v4775_v30 = vpop.eup %3541 }
 0x364   :  { %3297 = vmatmul.mubr.bf16.gmra.mrb[20].mxu0 %v1372_v44  ;;  %5845 = vst [vmem:[#allocation63_spill] sm:$0xff] %v4775_v30  ;;  %v5849_v44 = vld [vmem:[#allocation35_spill] sm:$0xff]  ;;  %v4785_v56 = vpop.eup %3543 }
 0x365   :  { %2119 = vperm.xlu1 %3414, %v4765_v63   ;;  %v1026_v17 = vpop.permute.xlu1 %1025  ;;  %v1056_v0 = vsub.f32 %v5849_v44, %v1011_v62  ;;  %5850 = vst [vmem:[#allocation65_spill] sm:$0xff] %v4785_v56  ;;  %v1058_v63 = vsub.f32 %v5851_v53, %v1021_v35 }
 0x366   :  { %3411 = vset.pattern.permute.xlu0 %v5756_v32  ;;  %v1059_v26 = vsub.f32 %v5846_v52, %v1026_v17  ;;  %v4793_v52 = vpop.permute.xlu0 %1794 }
 0x367   :  { %2124 = vperm.xlu0 %3411, %v4768_v28   ;;  %v4789_v28 = vpop.eup %3545  ;;  %v1080_v43 = vmul.f32 1.442695, %v1056_v0  ;;  %v1084_v31 = vmul.f32 1.442695, %v1058_v63  ;;  %v5856_v0 = vld [vmem:[#allocation10_spill] sm:$0xff] }
 0x368   :  { %5852 = vst [vmem:[#allocation13_spill] sm:$0xff] %v4789_v28  ;;  %v1086_v17 = vmul.f32 1.442695, %v1059_v26  ;;  %v4795_v15 = vpop.eup %3547  ;;  %v1847_v53 = vsub.f32 %v5856_v0, %v4698_v18 }
 0x369   :  { %2149 = vperm.xlu1 %3414, %v4775_v30   ;;  %5853 = vst [vmem:[#allocation30_spill] sm:$0xff] %v4795_v15  ;;  %v4801_v47 = vpop.eup %3549 }
 0x36a   :  { %v4783_v10 = vpop.permute.xlu1 %1799  ;;  %3553 = vpow2.f32 %v1086_v17  ;;  %5855 = vst [vmem:[#allocation6_spill] sm:$0xff] %v4801_v47  ;;  %v4808_v17 = vpop.eup %3551 }
 0x36b   :  { %3412 = vset.pattern.permute.xlu0 %v5757_v55  ;;  %3555 = vpow2.f32 %v1080_v43  ;;  %5857 = vst [vmem:[#allocation59_spill] sm:$0xff] %v4808_v17 }
 0x36c   :  { %1340 = vperm.xlu0 %3412, %v4785_v56   ;;  %3557 = vpow2.f32 %v1084_v31  ;;  %v5859_v31 = vld [vmem:[#allocation48_spill] sm:$0xff]  ;;  %v1863_v56 = vmul.f32 1.442695, %v1847_v53 }
 0x36d   :  { %2139 = vperm.xlu1 %3414, %v4789_v28   ;;  %v1041_v26 = vpop.permute.xlu0 %1040  ;;  %v5864_v53 = vld [vmem:[#allocation36_spill] sm:$0xff] }
 0x36f   :  { %v1016_v62 = vpop.permute.xlu1 %1015 }
 0x370   :  { %v1057_v44 = vsub.f32 %v5854_v29, %v1016_v62  ;;  %3413 = vset.pattern.permute.xlu0 %v5756_v32  ;;  %v5858_v29 = vld [vmem:[#allocation18_spill] sm:$0xff]  ;;  %v5861_v32 = vld [vmem:[#allocation44_spill] sm:$0xff] }
 0x371   :  { %2114 = vperm.xlu0 %3413, %v4795_v15   ;;  %3415 = vset.pattern.permute.xlu1 %v5757_v55  ;;  %v1848_v28 = vsub.f32 %v5858_v29, %v4732_v16  ;;  %v5860_v15 = vld [vmem:[#allocation47_spill] sm:$0xff]  ;;  %v5862_v16 = vld [vmem:[#allocation32_spill] sm:$0xff] }
 0x372   :  { %v1082_v35 = vmul.f32 1.442695, %v1057_v44 }
 0x373   :  { %v1865_v7 = vmul.f32 1.442695, %v1848_v28 }
 0x374   :  { %3559 = vpow2.f32 %v1082_v35  ;;  %v4803_v63 = vpop.permute.xlu1 %1789  ;;  %v3554_v30 = vpop.eup %3553 }
 0x375   :  { %2144 = vperm.xlu0 %3413, %v4801_v47   ;;  %v1031_v62 = vpop.permute.xlu0 %1030  ;;  %v1062_v47 = vsub.f32 %v5861_v32, %v1041_v26  ;;  %v3556_v34 = vpop.eup %3555  ;;  %v4818_v29 = vmul.f32 %v3554_v30, %v5862_v16  ;;  %3561 = vpow2.f32 %v1863_v56  ;;  %v5865_v32 = vld [vmem:[#allocation51_spill] sm:$0xff] }
 0x376   :  { %v1060_v44 = vsub.f32 %v5859_v31, %v1031_v62  ;;  %v3558_v18 = vpop.eup %3557  ;;  %v5863_v31 = vld [vmem:[#allocation29_spill] sm:$0xff]  ;;  %3563 = vpow2.f32 %v1865_v7  ;;  %v5866_v26 = vld [vmem:[#allocation27_spill] sm:$0xff]  ;;  %v5867_v7 = vld [vmem:[#allocation34_spill] sm:$0xff] }
 0x378   :  { %v1088_v36 = vmul.f32 1.442695, %v1060_v44 }
 0x379   :  { %2134 = vperm.xlu0 %3413, %v4808_v17   ;;  %v1046_v43 = vpop.permute.xlu1 %1045  ;;  %v1092_v17 = vmul.f32 1.442695, %v1062_v47 }
 0x37a   :  { %v1063_v35 = vsub.f32 %v5860_v15, %v1046_v43  ;;  %v4821_v15 = vmul.f32 %v3556_v34, %v5863_v31 }
 0x37c   :  { %v1094_v0 = vmul.f32 1.442695, %v1063_v35  ;;  %v4828_v35 = vmul.f32 %v3558_v18, %v5866_v26 }
 0x37d   :  { %3417 = vset.pattern.permute.xlu0 %v5757_v55 }
 0x37e   :  { %v3560_v48 = vpop.eup %3559  ;;  %3565 = vpow2.f32 %v1094_v0  ;;  %v1374_v47 = vpack.c.bf16 %v4818_v29, %v4828_v35  ;;  %v5868_v0 = vld [vmem:[#allocation14_spill] sm:$0xff] }
 0x37f   :  { %v1036_v62 = vpop.permute.xlu1 %1035  ;;  %v4824_v43 = vmul.f32 %v3560_v48, %v5864_v53  ;;  %3567 = vpow2.f32 %v1088_v36  ;;  %v3562_v18 = vpop.eup %3561 }
 0x380   :  { %v1061_v28 = vsub.f32 %v5865_v32, %v1036_v62  ;;  %3569 = vpow2.f32 %v1092_v17  ;;  %v3564_v62 = vpop.eup %3563  ;;  %v1850_v32 = vsub.f32 %v5868_v0, %v4717_v9  ;;  %v5872_v9 = vld [vmem:[#allocation46_spill] sm:$0xff] }
 0x381   :  { %v1373_v30 = vpack.c.bf16 %v4824_v43, %v4821_v15 }
 0x382   :  { %v1090_v56 = vmul.f32 1.442695, %v1061_v28 }
 0x383   :  { %3300 = vmatprep.mubr.bf16.mxu0 %v1373_v30 }
 0x384   :  { %3571 = vpow2.f32 %v1090_v56  ;;  %3301 = vmatmul.mubr.bf16.gmra.mrb[24].mxu0 %v1374_v47  ;;  %v1810_v34 = vpop.permute.xlu1 %1809  ;;  %v1869_v56 = vmul.f32 1.442695, %v1850_v32  ;;  %v5870_v47 = vld [vmem:[#allocation42_spill] sm:$0xff] }
 0x385   :  { %v1855_v48 = vsub.f32 %v5867_v7, %v1810_v34  ;;  %v4844_v34 = vmul.f32 %v3564_v62, %v5802_v38  ;;  %v1895_v62 = vmul.f32 %v3562_v18, %v5796_v33 }
 0x387   :  { %v1879_v36 = vmul.f32 1.442695, %v1855_v48 }
 0x388   :  { %v4835_v44 = vpop.permute.xlu1 %1824  ;;  %v3566_v55 = vpop.eup %3565 }
 0x389   :  { %v3568_v28 = vpop.eup %3567  ;;  %v4841_v1 = vmul.f32 %v3566_v55, %v5870_v47  ;;  %3573 = vpow2.f32 %v1879_v36  ;;  %v1805_v36 = vpop.permute.xlu0 %1804 }
 0x38a   :  { %v3570_v61 = vpop.eup %3569  ;;  %v4847_v46 = vmul.f32 %v3568_v28, %v5871_v3 }
 0x38c   :  { %v1815_v40 = vpop.permute.xlu1 %1814 }
 0x38d   :  { %v1856_v17 = vsub.f32 %v5869_v42, %v1815_v40  ;;  %v4855_v42 = vmul.f32 %v3570_v61, %v5873_v19  ;;  %v5874_v40 = vld [vmem:[#allocation15_spill] sm:$0xff]  ;;  %v2168_v61 = vpack.c.bf16 %v4844_v34, %v1895_v62 }
 0x38e   :  { %v3572_v30 = vpop.eup %3571  ;;  %v1849_v55 = vsub.f32 %v5874_v40, %v4658_v23 }
 0x38f   :  { %v1881_v7 = vmul.f32 1.442695, %v1856_v17  ;;  %v4850_v48 = vmul.f32 %v3572_v30, %v5872_v9  ;;  %v1376_v32 = vpack.c.bf16 %v4841_v1, %v4855_v42  ;;  %v5876_v30 = vld [vmem:[#allocation25_spill] sm:$0xff] }
 0x390   :  { %v4852_v0 = vpop.permute.xlu1 %1839  ;;  %v1867_v23 = vmul.f32 1.442695, %v1849_v55 }
 0x391   :  { %3575 = vpow2.f32 %v1881_v7  ;;  %1194 = vadd.xlane.f32.xlu1 %v4661_v21  ;;  %v1375_v38 = vpack.c.bf16 %v4850_v48, %v4847_v46  ;;  %v5875_v21 = vld [vmem:[#allocation22_spill] sm:$0xff] }
 0x392   :  { %3577 = vpow2.f32 %v1869_v56  ;;  %v1854_v17 = vsub.f32 %v5875_v21, %v1805_v36  ;;  %v1852_v56 = vsub.f32 %v5876_v30, %v4793_v52 }
 0x393   :  { %3304 = vmatprep.mubr.bf16.mxu0 %v1375_v38  ;;  %v3574_v18 = vpop.eup %3573  ;;  %3579 = vpow2.f32 %v1867_v23 }
 0x394   :  { %3305 = vmatmul.mubr.bf16.gmra.mrb[28].mxu0 %v1376_v32  ;;  %v4866_v28 = vpop.permute.xlu1 %1829  ;;  %v1877_v7 = vmul.f32 1.442695, %v1854_v17  ;;  %v4876_v55 = vmul.f32 %v3574_v18, %v5863_v31  ;;  %v5880_v17 = vld [vmem:[#allocation33_spill] sm:$0xff] }
 0x395   :  { %1204 = vadd.xlane.f32.xlu1 %v4752_v12  ;;  %3324 = vmatprep.mubr.bf16.mxu0 %v2168_v61  ;;  %v1820_v61 = vpop.permute.xlu0 %1819 }
 0x396   :  { %3581 = vpow2.f32 %v1877_v7 }
 0x398   :  { %1196 = vadd.xlane.f32.xlu0 %v4673_v24  ;;  %v2193_v33 = vpop.permute.xlu1 %2192 }
 0x399   :  { %1200 = vadd.xlane.f32.xlu1 %v4743_v58  ;;  %3316 = vmatprep.subr.bf16.mxu0 %v2193_v33  ;;  %v1873_v58 = vmul.f32 1.442695, %v1852_v56 }
 0x39a   :  { %3344 = vmatprep.subr.bf16.mxu1 %v2193_v33  ;;  %3317 = vmatpush3.bf16.msra.mxu0 %v2193_v33 }
 0x39b   :  { %v3576_v40 = vpop.eup %3575  ;;  %3352 = vmatpush3.bf16.msra.mxu1 %v2193_v33  ;;  %3583 = vpow2.f32 %v1873_v58  ;;  %v1857_v33 = vsub.f32 %v5880_v17, %v1820_v61 }
 0x39c   :  { %v3578_v12 = vpop.eup %3577  ;;  %1192 = vadd.xlane.f32.xlu0 %v4647_v11  ;;  %v4879_v24 = vmul.f32 %v3576_v40, %v5864_v53  ;;  %v5877_v11 = vld [vmem:[#allocation23_spill] sm:$0xff]  ;;  %v4895_v36 = vpop.permute.xlu1 %2196  ;;  %v5882_v40 = vld [vmem:[#allocation52_spill] sm:$0xff] }
 0x39d   :  { %1991 = vadd.xlane.f32.xlu1 %v1895_v62  ;;  %v4884_v38 = vmul.f32 %v3578_v12, %v5800_v45  ;;  %v1853_v32 = vsub.f32 %v5877_v11, %v4783_v10  ;;  %v3580_v31 = vpop.eup %3579 }
 0x39e   :  { %v2172_v52 = vpack.c.bf16 %v4879_v24, %v4876_v55  ;;  %v4893_v62 = vmul.f32 %v3580_v31, %v5810_v20 }
 0x39f   :  { %v1875_v53 = vmul.f32 1.442695, %v1853_v32  ;;  %v5884_v32 = vld [vmem:[#allocation50_spill] sm:$0xff] }
 0x3a0   :  { %1198 = vadd.xlane.f32.xlu0 %v4653_v13  ;;  %3332 = vmatprep.mubr.bf16.mxu1 %v2172_v52  ;;  %v3582_v45 = vpop.eup %3581  ;;  %v5878_v13 = vld [vmem:[#allocation26_spill] sm:$0xff]  ;;  %v4909_v30 = vpop.permute.xlu1 %1280 }
 0x3a1   :  { %1997 = vadd.xlane.f32.xlu1 %v4884_v38  ;;  %3585 = vpow2.f32 %v1875_v53  ;;  %v1851_v10 = vsub.f32 %v5878_v13, %v4803_v63 }
 0x3a3   :  { %v1871_v21 = vmul.f32 1.442695, %v1851_v10 }
 0x3a4   :  { %1206 = vadd.xlane.f32.xlu0 %v4740_v2  ;;  %v5879_v2 = vld [vmem:[#allocation38_spill] sm:$0xff]  ;;  %v4918_v56 = vpop.permute.xlu1 %1290 }
 0x3a5   :  { %1212 = vadd.xlane.f32.xlu1 %v4828_v35  ;;  %v1858_v23 = vsub.f32 %v5879_v2, %v4835_v44  ;;  %v4904_v35 = vmul.f32 %v3582_v45, %v5832_v6  ;;  %v3584_v20 = vpop.eup %3583  ;;  %3587 = vpow2.f32 %v1871_v21  ;;  %v5881_v6 = vld [vmem:[#allocation49_spill] sm:$0xff]  ;;  %v2169_v21 = vpack.c.bf16 %v4884_v38, %v4893_v62 }
 0x3a6   :  { %v4912_v63 = vmul.f32 %v3584_v20, %v5834_v49 }
 0x3a7   :  { %v1885_v18 = vmul.f32 1.442695, %v1858_v23 }
 0x3a8   :  { %1995 = vadd.xlane.f32.xlu0 %v4893_v62 }
 0x3a9   :  { %1208 = vadd.xlane.f32.xlu1 %v4821_v15  ;;  %v1883_v15 = vmul.f32 1.442695, %v1857_v33  ;;  %3589 = vpow2.f32 %v1885_v18 }
 0x3ab   :  { %v3586_v44 = vpop.eup %3585  ;;  %3591 = vpow2.f32 %v1883_v15 }
 0x3ac   :  { %1202 = vadd.xlane.f32.xlu0 %v4746_v4  ;;  %v1859_v4 = vsub.f32 %v5881_v6, %v4866_v28  ;;  %v4924_v12 = vmul.f32 %v3586_v44, %v5836_v27  ;;  %v5883_v28 = vld [vmem:[#allocation45_spill] sm:$0xff] }
 0x3ad   :  { %2005 = vadd.xlane.f32.xlu1 %v4904_v35  ;;  %v1861_v11 = vsub.f32 %v5883_v28, %v4852_v0 }
 0x3af   :  { %v1891_v13 = vmul.f32 1.442695, %v1861_v11 }
 0x3b0   :  { %1993 = vadd.xlane.f32.xlu0 %v4844_v34  ;;  %v1887_v34 = vmul.f32 1.442695, %v1859_v4 }
 0x3b1   :  { %2001 = vadd.xlane.f32.xlu1 %v4912_v63 }
 0x3b4   :  { %v1835_v7 = vpop.permute.xlu0 %1834  ;;  %1214 = vadd.xlane.f32.xlu0 %v4818_v29  ;;  %v4931_v29 = vpop.permute.xlu1 %1295 }
 0x3b5   :  { %v1860_v49 = vsub.f32 %v5882_v40, %v1835_v7  ;;  %1220 = vadd.xlane.f32.xlu1 %v4855_v42  ;;  %v3588_v42 = vpop.eup %3587 }
 0x3b6   :  { %v3590_v45 = vpop.eup %3589  ;;  %v1899_v0 = vmul.f32 %v3588_v42, %v5833_v54 }
 0x3b7   :  { %v1889_v58 = vmul.f32 1.442695, %v1860_v49  ;;  %v3592_v10 = vpop.eup %3591 }
 0x3b8   :  { %v1845_v52 = vpop.permute.xlu0 %1844  ;;  %2003 = vadd.xlane.f32.xlu0 %v4924_v12  ;;  %v4938_v61 = vpop.permute.xlu1 %1305 }
 0x3b9   :  { %3593 = vpow2.f32 %v1889_v58  ;;  %v1862_v31 = vsub.f32 %v5884_v32, %v1845_v52  ;;  %1216 = vadd.xlane.f32.xlu1 %v4847_v46  ;;  %v1906_v46 = vmul.f32 %v3590_v45, %v5862_v16 }
 0x3ba   :  { %3595 = vpow2.f32 %v1887_v34 }
 0x3bb   :  { %v1893_v53 = vmul.f32 1.442695, %v1862_v31 }
 0x3bc   :  { %v2195_v27 = vpop.permute.xlu0 %2194  ;;  %1210 = vadd.xlane.f32.xlu0 %v4824_v43  ;;  %v4946_v23 = vpop.permute.xlu1 %1315 }
 0x3bd   :  { %3597 = vpow2.f32 %v1893_v53  ;;  %1222 = vadd.xlane.f32.xlu1 %v4841_v1  ;;  %3318 = vmatprep.subr.bf16.mxu0 %v2195_v27  ;;  %v1905_v1 = vmul.f32 %v3592_v10, %v5866_v26 }
 0x3be   :  { %3345 = vmatprep.subr.bf16.mxu1 %v2195_v27  ;;  %3319 = vmatpush3.bf16.msra.mxu0 %v2195_v27  ;;  %3599 = vpow2.f32 %v1891_v13 }
 0x3bf   :  { %3353 = vmatpush3.bf16.msra.mxu1 %v2195_v27  ;;  %3320 = vmatprep.subr.bf16.mxu0 %v4895_v36  ;;  %v2173_v17 = vpack.c.bf16 %v1906_v46, %v1905_v1  ;;  %v1161_v27 = vld [vmem:[#allocation4 + $0x8] sm:$0xff] }
 0x3c0   :  { %3346 = vmatprep.subr.bf16.mxu1 %v4895_v36  ;;  %1999 = vadd.xlane.f32.xlu0 %v1899_v0  ;;  %v2199_v43 = vpop.permute.xlu0 %2198  ;;  %v4954_v18 = vpop.permute.xlu1 %1325 }
 0x3c1   :  { %2013 = vadd.xlane.f32.xlu1 %v1906_v46  ;;  %v1166_v46 = vld [vmem:[#allocation4 + $0x30] sm:$0xff] }
 0x3c2   :  { %3321 = vmatpush3.bf16.msra.mxu0 %v4895_v36 }
 0x3c3   :  { %v3594_v2 = vpop.eup %3593  ;;  %3354 = vmatpush3.bf16.msra.mxu1 %v4895_v36  ;;  %3322 = vmatprep.subr.bf16.mxu0 %v2199_v43 }
 0x3c4   :  { %v3596_v54 = vpop.eup %3595  ;;  %3347 = vmatprep.subr.bf16.mxu1 %v2199_v43  ;;  %2011 = vadd.xlane.f32.xlu0 %v1905_v1  ;;  %v1908_v16 = vmul.f32 %v3594_v2, %v5872_v9  ;;  %v4960_v38 = vpop.permute.xlu1 %2079  ;;  %v1182_v2 = vmul.f32 %v4562_v60, %v1166_v46 }
 0x3c5   :  { %2009 = vadd.xlane.f32.xlu1 %v4879_v24  ;;  %v1907_v26 = vmul.f32 %v3596_v54, %v5871_v3  ;;  %v2170_v24 = vpack.c.bf16 %v4912_v63, %v1899_v0  ;;  %v4964_v63 = vpop.permute.xlu0 %2074  ;;  %v1177_v0 = vmul.f32 %v4544_v39, %v1161_v27  ;;  %v1162_v54 = vld [vmem:[#allocation4 + $0x10] sm:$0xff]  ;;  %v1160_v27 = vld [vmem:[#allocation4] sm:$0xff] }
 0x3c6   :  { %3323 = vmatpush3.bf16.msra.mxu0 %v2199_v43 }
 0x3c7   :  { %v3598_v20 = vpop.eup %3597  ;;  %3355 = vmatpush3.bf16.msra.mxu1 %v2199_v43  ;;  %v2174_v33 = vpack.c.bf16 %v1908_v16, %v1907_v26 }
 0x3c8   :  { %1218 = vadd.xlane.f32.xlu0 %v4850_v48  ;;  %v1910_v36 = vmul.f32 %v3598_v20, %v5870_v47  ;;  %v3600_v9 = vpop.eup %3599  ;;  %v2171_v48 = vpack.c.bf16 %v4904_v35, %v4924_v12  ;;  %v4962_v62 = vpop.permute.xlu1 %2084 }
 0x3c9   :  { %3325 = vmatmul.mubr.bf16.vlgmr.msra.gmra.mrb[32].mxu0 %v2169_v21  ;;  %v1909_v3 = vmul.f32 %v3600_v9, %v5873_v19 }
 0x3ca   :  { %3333 = vmatmul.mubr.bf16.vlgmr.msra.gmra.mrb[32].mxu1 %v2173_v17  ;;  %2021 = vadd.xlane.f32.xlu1 %v1910_v36 }
 0x3cb   :  { %3328 = vmatprep.mubr.bf16.mxu0 %v2170_v24  ;;  %3336 = vmatprep.mubr.bf16.mxu1 %v2174_v33  ;;  %v2175_v47 = vpack.c.bf16 %v1910_v36, %v1909_v3 }
 0x3cc   :  { %2007 = vadd.xlane.f32.xlu0 %v4876_v55  ;;  %v4966_v15 = vpop.permute.xlu1 %2089  ;;  %v1276_v55 = vpop.permute.xlu0 %1275 }
 0x3ce   :  { %2017 = vadd.xlane.f32.xlu1 %v1908_v16  ;;  %v5011_v16 = vld [vmem:[#allocation5 + $0x8] sm:$0xff] }
 0x3cf   :  { %v1353_v17 = vmul.f32 %v5011_v16, %v1276_v55  ;;  %v1356_v24 = vmul.f32 %v5011_v16, %v4918_v56  ;;  %v1354_v60 = vmul.f32 %v5011_v16, %v4909_v30  ;;  %v1176_v30 = vmul.f32 %v4621_v51, %v1160_v27 }
 0x3d0   :  { %2019 = vadd.xlane.f32.xlu0 %v1909_v3  ;;  %v4968_v6 = vpop.permute.xlu1 %2094  ;;  %v1286_v19 = vpop.permute.xlu0 %1285  ;;  %v1178_v3 = vmul.f32 %v4667_v57, %v1162_v54 }
 0x3d1   :  { %3329 = vmatmul.mubr.bf16.gmra.mrb[36].mxu0 %v2171_v48  ;;  %v1355_v20 = vmul.f32 %v5011_v16, %v1286_v19 }
 0x3d2   :  { %3337 = vmatmul.mubr.bf16.gmra.mrb[36].mxu1 %v2175_v47 }
 0x3d4   :  { %2015 = vadd.xlane.f32.xlu0 %v1907_v26  ;;  %v4970_v4 = vpop.permute.xlu1 %2099  ;;  %v4972_v35 = vpop.permute.xlu0 %1300  ;;  %v1164_v26 = vld [vmem:[#allocation4 + $0x20] sm:$0xff] }
 0x3d5   :  { %v1180_v55 = vmul.f32 %v4556_v37, %v1164_v26 }
 0x3d8   :  { %v4974_v44 = vpop.permute.xlu1 %2104  ;;  %v4976_v7 = vpop.permute.xlu0 %1310 }
 0x3dc   :  { %v4978_v40 = vpop.permute.xlu1 %2109  ;;  %v4980_v49 = vpop.permute.xlu0 %1320 }
 0x3e0   :  { %v4982_v34 = vpop.permute.xlu1 %1345  ;;  %v4984_v12 = vpop.permute.xlu0 %1330 }
 0x3e4   :  { %v4986_v58 = vpop.permute.xlu1 %1335  ;;  %v4988_v52 = vpop.permute.xlu0 %1350 }
 0x3e8   :  { %v4990_v28 = vpop.permute.xlu1 %2129  ;;  %v4992_v11 = vpop.permute.xlu0 %2124 }
 0x3ec   :  { %v4994_v32 = vpop.permute.xlu1 %2119  ;;  %v4996_v31 = vpop.permute.xlu0 %1340 }
 0x3f0   :  { %v4998_v42 = vpop.permute.xlu1 %2149  ;;  %v5000_v53 = vpop.permute.xlu0 %2114 }
 0x3f4   :  { %v5002_v45 = vpop.permute.xlu1 %2139  ;;  %v5004_v13 = vpop.permute.xlu0 %2144 }
 0x3f8   :  { %v5007_v1 = vpop.permute.xlu0 %2134 }
 0x41e   :  { %v1195_v10 = vpop.xlane.xlu1 %1194 }
 0x41f   :  { %v1225_v43 = vadd.f32 %v1195_v10, %v1177_v0 }
 0x421   :  { %1242 = vst.msk [vmem:[#allocation4 + $0x8] sm:$0xff] %vm1240_vm0, %v1225_v43 }
 0x422   :  { %v1205_v21 = vpop.xlane.xlu1 %1204 }
 0x423   :  { %v1230_v36 = vadd.f32 %v1205_v21, %v1182_v2  ;;  %v3294_v39 = vpop.f32.mrb[16].mxu0  ;;  %v1163_v2 = vld [vmem:[#allocation4 + $0x18] sm:$0xff] }
 0x424   :  { %v1476_v33 = vadd.f32 %v3294_v39, %v1355_v20  ;;  %v1411_v9 = vpop.f32.mrb[17].mxu0  ;;  %v1179_v21 = vmul.f32 %v4550_v5, %v1163_v2 }
 0x425   :  { %1247 = vst.msk [vmem:[#allocation4 + $0x30] sm:$0xff] %vm1240_vm0, %v1230_v36  ;;  %v1474_v48 = vadd.f32 %v1411_v9, %v1353_v17  ;;  %v3295_v47 = vpop.f32.mrb[18].mxu0  ;;  %v1197_v19 = vpop.xlane.xlu0 %1196  ;;  %v1167_v17 = vld [vmem:[#allocation4 + $0x38] sm:$0xff] }
 0x426   :  { %1493 = vst.msk [vmem:[#allocation5 + $0x10] sm:$0xff] %vm1490_vm3, %v1476_v33  ;;  %v1477_v0 = vadd.f32 %v3295_v47, %v1356_v24  ;;  %v1226_v10 = vadd.f32 %v1197_v19, %v1178_v3  ;;  %v1414_v56 = vpop.f32.mrb[19].mxu0  ;;  %v1201_v46 = vpop.xlane.xlu1 %1200  ;;  %v1170_v24 = vld [vmem:[#allocation4 + $0x50] sm:$0xff]  ;;  %v1183_v51 = vmul.f32 %v4700_v25, %v1167_v17  ;;  %v1168_v47 = vld [vmem:[#allocation4 + $0x40] sm:$0xff] }
 0x427   :  { %1491 = vst.msk [vmem:[#allocation5] sm:$0xff] %vm1490_vm3, %v1474_v48  ;;  %v1475_v57 = vadd.f32 %v1414_v56, %v1354_v60  ;;  %v1228_v43 = vadd.f32 %v1201_v46, %v1180_v55  ;;  %v1186_v9 = vmul.f32 %v4579_v41, %v1170_v24  ;;  %v1184_v25 = vmul.f32 %v4568_v59, %v1168_v47 }
 0x428   :  { %1494 = vst.msk [vmem:[#allocation5 + $0x18] sm:$0xff] %vm1490_vm3, %v1477_v0  ;;  %v1359_v41 = vmul.f32 %v5011_v16, %v4938_v61  ;;  %v1960_v17 = vld [vmem:[#allocation4 + $0x8] sm:$0xff] }
 0x429   :  { %1243 = vst.msk [vmem:[#allocation4 + $0x10] sm:$0xff] %vm1240_vm0, %v1226_v10  ;;  %1245 = vst.msk [vmem:[#allocation4 + $0x20] sm:$0xff] %vm1240_vm0, %v1228_v43  ;;  %v1193_v37 = vpop.xlane.xlu0 %1192  ;;  %v1165_v10 = vld [vmem:[#allocation4 + $0x28] sm:$0xff]  ;;  %v1357_v43 = vmul.f32 %v5011_v16, %v4931_v29 }
 0x42a   :  { %1492 = vst.msk [vmem:[#allocation5 + $0x8] sm:$0xff] %vm1490_vm3, %v1475_v57  ;;  %v1224_v54 = vadd.f32 %v1193_v37, %v1176_v30  ;;  %v1992_v20 = vpop.xlane.xlu1 %1991 }
 0x42c   :  { %1241 = vst.msk [vmem:[#allocation4] sm:$0xff] %vm1240_vm0, %v1224_v54  ;;  %v1181_v54 = vmul.f32 %v4684_v8, %v1165_v10 }
 0x42d   :  { %v1199_v26 = vpop.xlane.xlu0 %1198 }
 0x42e   :  { %v1227_v36 = vadd.f32 %v1199_v26, %v1179_v21  ;;  %v1998_v39 = vpop.xlane.xlu1 %1997 }
 0x430   :  { %1244 = vst.msk [vmem:[#allocation4 + $0x18] sm:$0xff] %vm1240_vm0, %v1227_v36  ;;  %v1961_v3 = vld [vmem:[#allocation4 + $0x10] sm:$0xff] }
 0x431   :  { %v1207_v33 = vpop.xlane.xlu0 %1206  ;;  %v1977_v27 = vmul.f32 %v4606_v22, %v1961_v3  ;;  %v1360_v22 = vmul.f32 %v5011_v16, %v4976_v7  ;;  %v5886_v3 = vld [vmem:[#allocation68_spill] sm:$0xff] }
 0x432   :  { %v1231_v60 = vadd.f32 %v1207_v33, %v1183_v51  ;;  %v1213_v48 = vpop.xlane.xlu1 %1212 }
 0x433   :  { %v1959_v19 = vld [vmem:[#allocation4] sm:$0xff]  ;;  %v1234_v55 = vadd.f32 %v1213_v48, %v1186_v9  ;;  %v1171_v48 = vld [vmem:[#allocation4 + $0x58] sm:$0xff] }
 0x434   :  { %v1975_v5 = vmul.f32 %v4624_v14, %v1959_v19  ;;  %1248 = vst.msk [vmem:[#allocation4 + $0x38] sm:$0xff] %vm1240_vm0, %v1231_v60 }
 0x435   :  { %1251 = vst.msk [vmem:[#allocation4 + $0x50] sm:$0xff] %vm1240_vm0, %v1234_v55  ;;  %v1996_v0 = vpop.xlane.xlu0 %1995 }
 0x436   :  { %v2023_v56 = vadd.f32 %v1992_v20, %v1975_v5  ;;  %v2025_v46 = vadd.f32 %v1996_v0, %v1977_v27  ;;  %v1209_v57 = vpop.xlane.xlu1 %1208  ;;  %v1358_v20 = vmul.f32 %v5011_v16, %v4972_v35  ;;  %v5885_v35 = vld [vmem:[#allocation9_spill] sm:$0xff]  ;;  %v1174_v5 = vld [vmem:[#allocation4 + $0x70] sm:$0xff] }
 0x437   :  { %v1962_v14 = vld [vmem:[#allocation4 + $0x18] sm:$0xff]  ;;  %v1232_v30 = vadd.f32 %v1209_v57, %v1184_v25  ;;  %v3298_v37 = vpop.f32.mrb[20].mxu0  ;;  %v5887_v25 = vld [vmem:[#allocation55_spill] sm:$0xff]  ;;  %v1965_v57 = vld [vmem:[#allocation4 + $0x30] sm:$0xff] }
 0x438   :  { %2040 = vst.msk [vmem:[#allocation4] sm:$0xff] %vm2039_vm2, %v2023_v56  ;;  %v1978_v59 = vmul.f32 %v4617_v50, %v1962_v14  ;;  %2042 = vst.msk [vmem:[#allocation4 + $0x10] sm:$0xff] %vm2039_vm2, %v2025_v46  ;;  %v1480_v2 = vadd.f32 %v3298_v37, %v1359_v41  ;;  %v1427_v61 = vpop.f32.mrb[21].mxu0  ;;  %v1187_v10 = vmul.f32 %v5887_v25, %v1171_v48  ;;  %v5888_v56 = vld [vmem:[#allocation54_spill] sm:$0xff] }
 0x439   :  { %1249 = vst.msk [vmem:[#allocation4 + $0x40] sm:$0xff] %vm1240_vm0, %v1232_v30  ;;  %v1478_v29 = vadd.f32 %v1427_v61, %v1357_v43  ;;  %v1203_v21 = vpop.xlane.xlu0 %1202  ;;  %v3299_v26 = vpop.f32.mrb[22].mxu0  ;;  %v1190_v46 = vmul.f32 %v5888_v56, %v1174_v5  ;;  %v1172_v30 = vld [vmem:[#allocation4 + $0x60] sm:$0xff] }
 0x43a   :  { %v2026_v7 = vadd.f32 %v1998_v39, %v1978_v59  ;;  %1497 = vst.msk [vmem:[#allocation5 + $0x30] sm:$0xff] %vm1490_vm3, %v1480_v2  ;;  %v1229_v36 = vadd.f32 %v1203_v21, %v1181_v54  ;;  %v1481_v50 = vadd.f32 %v3299_v26, %v1360_v22  ;;  %v2006_v24 = vpop.xlane.xlu1 %2005  ;;  %v1430_v51 = vpop.f32.mrb[23].mxu0  ;;  %v1976_v39 = vmul.f32 %v5886_v3, %v1960_v17  ;;  %v5889_v2 = vld [vmem:[#allocation70_spill] sm:$0xff]  ;;  %v5890_v54 = vld [vmem:[#allocation28_spill] sm:$0xff]  ;;  %v1169_v17 = vld [vmem:[#allocation4 + $0x48] sm:$0xff] }
 0x43b   :  { %1495 = vst.msk [vmem:[#allocation5 + $0x20] sm:$0xff] %vm1490_vm3, %v1478_v29  ;;  %v1966_v33 = vld [vmem:[#allocation4 + $0x38] sm:$0xff]  ;;  %v1479_v8 = vadd.f32 %v1430_v51, %v1358_v20  ;;  %v1981_v20 = vmul.f32 %v5890_v54, %v1965_v57  ;;  %v5891_v21 = vld [vmem:[#allocation24_spill] sm:$0xff]  ;;  %v5893_v3 = vld [vmem:[#allocation58_spill] sm:$0xff] }
 0x43c   :  { %2043 = vst.msk [vmem:[#allocation4 + $0x18] sm:$0xff] %vm2039_vm2, %v2026_v7  ;;  %v1982_v9 = vmul.f32 %v5885_v35, %v1966_v33  ;;  %v1188_v26 = vmul.f32 %v5891_v21, %v1172_v30  ;;  %v1173_v54 = vld [vmem:[#allocation4 + $0x68] sm:$0xff] }
 0x43d   :  { %1246 = vst.msk [vmem:[#allocation4 + $0x28] sm:$0xff] %vm1240_vm0, %v1229_v36  ;;  %v1994_v60 = vpop.xlane.xlu0 %1993 }
 0x43e   :  { %1498 = vst.msk [vmem:[#allocation5 + $0x38] sm:$0xff] %vm1490_vm3, %v1481_v50  ;;  %1496 = vst.msk [vmem:[#allocation5 + $0x28] sm:$0xff] %vm1490_vm3, %v1479_v8  ;;  %v2030_v47 = vadd.f32 %v2006_v24, %v1982_v9  ;;  %v2024_v19 = vadd.f32 %v1994_v60, %v1976_v39  ;;  %v2002_v55 = vpop.xlane.xlu1 %2001  ;;  %v1175_v24 = vld [vmem:[#allocation4 + $0x78] sm:$0xff]  ;;  %v5892_v8 = vld [vmem:[#allocation11_spill] sm:$0xff] }
 0x43f   :  { %v2437_v27 = vld [vmem:[#allocation4] sm:$0xff]  ;;  %v2439_v0 = vld [vmem:[#allocation4 + $0x10] sm:$0xff]  ;;  %v1185_v35 = vmul.f32 %v5892_v8, %v1169_v17  ;;  %v1191_v39 = vmul.f32 %v5893_v3, %v1175_v24  ;;  %v1363_v8 = vmul.f32 %v5011_v16, %v4954_v18  ;;  %v5900_v3 = vld [vmem:[#allocation63_spill] sm:$0xff] }
 0x440   :  { %3601 = vrcp.f32 %v2437_v27  ;;  %2047 = vst.msk [vmem:[#allocation4 + $0x38] sm:$0xff] %vm2039_vm2, %v2030_v47  ;;  %2041 = vst.msk [vmem:[#allocation4 + $0x8] sm:$0xff] %vm2039_vm2, %v2024_v19  ;;  %v1963_v60 = vld [vmem:[#allocation4 + $0x20] sm:$0xff]  ;;  %v5898_v17 = vld [vmem:[#allocation60_spill] sm:$0xff] }
 0x441   :  { %3603 = vrcp.f32 %v2439_v0  ;;  %v1215_v41 = vpop.xlane.xlu0 %1214  ;;  %v5894_v0 = vld [vmem:[#allocation69_spill] sm:$0xff] }
 0x442   :  { %v1235_v43 = vadd.f32 %v1215_v41, %v1187_v10  ;;  %v1221_v14 = vpop.xlane.xlu1 %1220  ;;  %v1979_v25 = vmul.f32 %v5894_v0, %v1963_v60  ;;  %v5895_v10 = vld [vmem:[#allocation12_spill] sm:$0xff]  ;;  %v1361_v60 = vmul.f32 %v5011_v16, %v4946_v23  ;;  %v5901_v0 = vld [vmem:[#allocation30_spill] sm:$0xff] }
 0x443   :  { %v2440_v37 = vld [vmem:[#allocation4 + $0x18] sm:$0xff]  ;;  %v1238_v59 = vadd.f32 %v1221_v14, %v1190_v46  ;;  %v1969_v46 = vld [vmem:[#allocation4 + $0x50] sm:$0xff] }
 0x444   :  { %v1964_v22 = vld [vmem:[#allocation4 + $0x28] sm:$0xff]  ;;  %3605 = vrcp.f32 %v2440_v37  ;;  %1252 = vst.msk [vmem:[#allocation4 + $0x58] sm:$0xff] %vm1240_vm0, %v1235_v43 }
 0x445   :  { %v1980_v61 = vmul.f32 %v5889_v2, %v1964_v22  ;;  %1255 = vst.msk [vmem:[#allocation4 + $0x70] sm:$0xff] %vm1240_vm0, %v1238_v59  ;;  %v2004_v29 = vpop.xlane.xlu0 %2003  ;;  %v5896_v22 = vmov 1   ;;  %v5897_v59 = vld [vmem:[#allocation20_spill] sm:$0xff] }
 0x446   :  { %v2029_v36 = vadd.f32 %v2004_v29, %v1981_v20  ;;  %v1217_v50 = vpop.xlane.xlu1 %1216  ;;  %v1985_v2 = vmul.f32 %v5897_v59, %v1969_v46 }
 0x447   :  { %v2028_v7 = vadd.f32 %v2002_v55, %v1980_v61  ;;  %v2438_v51 = vld [vmem:[#allocation4 + $0x8] sm:$0xff]  ;;  %v1236_v33 = vadd.f32 %v1217_v50, %v1188_v26  ;;  %v2444_v46 = vld [vmem:[#allocation4 + $0x38] sm:$0xff] }
 0x448   :  { %2046 = vst.msk [vmem:[#allocation4 + $0x30] sm:$0xff] %vm2039_vm2, %v2029_v36  ;;  %3607 = vrcp.f32 %v2438_v51  ;;  %v5899_v36 = vld [vmem:[#allocation65_spill] sm:$0xff] }
 0x449   :  { %2045 = vst.msk [vmem:[#allocation4 + $0x28] sm:$0xff] %vm2039_vm2, %v2028_v7  ;;  %v1211_v9 = vpop.xlane.xlu0 %1210  ;;  %v1189_v50 = vmul.f32 %v5899_v36, %v1173_v54  ;;  %v5905_v36 = vld [vmem:[#allocation59_spill] sm:$0xff] }
 0x44a   :  { %1253 = vst.msk [vmem:[#allocation4 + $0x60] sm:$0xff] %vm1240_vm0, %v1236_v33  ;;  %v3602_v48 = vpop.eup %3601  ;;  %v1233_v47 = vadd.f32 %v1211_v9, %v1185_v35  ;;  %v1223_v19 = vpop.xlane.xlu1 %1222  ;;  %v1967_v33 = vld [vmem:[#allocation4 + $0x40] sm:$0xff] }
 0x44b   :  { %v3604_v55 = vpop.eup %3603  ;;  %v1239_v5 = vadd.f32 %v1223_v19, %v1191_v39  ;;  %2471 = vperm.xlu0 %3417, %v3602_v48   ;;  %v1970_v27 = vld [vmem:[#allocation4 + $0x58] sm:$0xff] }
 0x44c   :  { %1250 = vst.msk [vmem:[#allocation4 + $0x48] sm:$0xff] %vm1240_vm0, %v1233_v47  ;;  %2481 = vperm.xlu1 %3415, %v3604_v55   ;;  %v1986_v41 = vmul.f32 %v5895_v10, %v1970_v27  ;;  %v1364_v47 = vmul.f32 %v5011_v16, %v4984_v12  ;;  %v1362_v10 = vmul.f32 %v5011_v16, %v4980_v49  ;;  %v5902_v49 = vld [vmem:[#allocation6_spill] sm:$0xff] }
 0x44d   :  { %1256 = vst.msk [vmem:[#allocation4 + $0x78] sm:$0xff] %vm1240_vm0, %v1239_v5  ;;  %v2000_v56 = vpop.xlane.xlu0 %1999 }
 0x44e   :  { %v3606_v57 = vpop.eup %3605  ;;  %v2027_v43 = vadd.f32 %v2000_v56, %v1979_v25  ;;  %v2014_v14 = vpop.xlane.xlu1 %2013  ;;  %v1983_v25 = vmul.f32 %v5901_v0, %v1967_v33  ;;  %v1973_v56 = vld [vmem:[#allocation4 + $0x70] sm:$0xff] }
 0x44f   :  { %v2443_v30 = vld [vmem:[#allocation4 + $0x30] sm:$0xff]  ;;  %v2034_v37 = vadd.f32 %v2014_v14, %v1986_v41  ;;  %2486 = vperm.xlu0 %3417, %v3606_v57  }
 0x450   :  { %2044 = vst.msk [vmem:[#allocation4 + $0x20] sm:$0xff] %vm2039_vm2, %v2027_v43  ;;  %3416 = vset.pattern.permute.xlu1 %v5896_v22  ;;  %3609 = vrcp.f32 %v2443_v30 }
 0x451   :  { %2051 = vst.msk [vmem:[#allocation4 + $0x58] sm:$0xff] %vm2039_vm2, %v2034_v37  ;;  %2641 = vperm.xlu1 %3416, %v3604_v55   ;;  %v2012_v61 = vpop.xlane.xlu0 %2011  ;;  %v1971_v54 = vld [vmem:[#allocation4 + $0x60] sm:$0xff] }
 0x452   :  { %v2033_v20 = vadd.f32 %v2012_v61, %v1985_v2  ;;  %v3608_v29 = vpop.eup %3607  ;;  %v2010_v26 = vpop.xlane.xlu1 %2009  ;;  %v5903_v2 = vmov 0  }
 0x453   :  { %v1968_v21 = vld [vmem:[#allocation4 + $0x48] sm:$0xff]  ;;  %3419 = vset.pattern.permute.xlu0 %v5896_v22 }
 0x454   :  { %2050 = vst.msk [vmem:[#allocation4 + $0x50] sm:$0xff] %vm2039_vm2, %v2033_v20  ;;  %v1984_v7 = vmul.f32 %v5898_v17, %v1968_v21  ;;  %2636 = vperm.xlu0 %3419, %v3608_v29   ;;  %v1974_v24 = vld [vmem:[#allocation4 + $0x78] sm:$0xff]  ;;  %v2442_v20 = vld [vmem:[#allocation4 + $0x28] sm:$0xff] }
 0x455   :  { %2631 = vperm.xlu1 %3416, %v3602_v48   ;;  %v1219_v51 = vpop.xlane.xlu0 %1218  ;;  %v1990_v39 = vmul.f32 %v5900_v3, %v1974_v24  ;;  %v5904_v17 = vld [vmem:[#allocation13_spill] sm:$0xff]  ;;  %v1367_v3 = vmul.f32 %v5011_v16, %v4982_v34 }
 0x456   :  { %v2032_v35 = vadd.f32 %v2010_v26, %v1984_v7  ;;  %v1237_v9 = vadd.f32 %v1219_v51, %v1189_v50  ;;  %v1987_v50 = vmul.f32 %v5905_v36, %v1971_v54 }
 0x457   :  { %v2441_v19 = vld [vmem:[#allocation4 + $0x20] sm:$0xff]  ;;  %v3302_v55 = vpop.f32.mrb[24].mxu0  ;;  %v2022_v5 = vpop.xlane.xlu1 %2021 }
 0x458   :  { %3611 = vrcp.f32 %v2441_v19  ;;  %2049 = vst.msk [vmem:[#allocation4 + $0x48] sm:$0xff] %vm2039_vm2, %v2032_v35  ;;  %v1484_v48 = vadd.f32 %v3302_v55, %v1363_v8  ;;  %v2038_v18 = vadd.f32 %v2022_v5, %v1990_v39  ;;  %v1443_v27 = vpop.f32.mrb[25].mxu0  ;;  %v2448_v8 = vld [vmem:[#allocation4 + $0x58] sm:$0xff]  ;;  %v1368_v55 = vmul.f32 %v5011_v16, %v4988_v52 }
 0x459   :  { %1254 = vst.msk [vmem:[#allocation4 + $0x68] sm:$0xff] %vm1240_vm0, %v1237_v9  ;;  %v1482_v23 = vadd.f32 %v1443_v27, %v1361_v60  ;;  %2646 = vperm.xlu1 %3416, %v3606_v57   ;;  %v3303_v41 = vpop.f32.mrb[26].mxu0  ;;  %v2008_v12 = vpop.xlane.xlu0 %2007  ;;  %v1989_v57 = vmul.f32 %v5902_v49, %v1973_v56  ;;  %3613 = vrcp.f32 %v2444_v46 }
 0x45a   :  { %1501 = vst.msk [vmem:[#allocation5 + $0x50] sm:$0xff] %vm1490_vm3, %v1484_v48  ;;  %v1485_v43 = vadd.f32 %v3303_v41, %v1364_v47  ;;  %v2031_v14 = vadd.f32 %v2008_v12, %v1983_v25  ;;  %v1446_v30 = vpop.f32.mrb[27].mxu0  ;;  %v3610_v37 = vpop.eup %3609  ;;  %3615 = vrcp.f32 %v2442_v20  ;;  %v1365_v47 = vmul.f32 %v5011_v16, %v4986_v58 }
 0x45b   :  { %2055 = vst.msk [vmem:[#allocation4 + $0x78] sm:$0xff] %vm2039_vm2, %v2038_v18  ;;  %v1483_v59 = vadd.f32 %v1446_v30, %v1362_v10  ;;  %2661 = vperm.xlu0 %3419, %v3610_v37   ;;  %v2018_v24 = vpop.xlane.xlu1 %2017  ;;  %3617 = vrcp.f32 %v2448_v8  ;;  %v1366_v18 = vmul.f32 %v5011_v16, %v4996_v31 }
 0x45c   :  { %1499 = vst.msk [vmem:[#allocation5 + $0x40] sm:$0xff] %vm1490_vm3, %v1482_v23  ;;  %1502 = vst.msk [vmem:[#allocation5 + $0x58] sm:$0xff] %vm1490_vm3, %v1485_v43 }
 0x45d   :  { %2048 = vst.msk [vmem:[#allocation4 + $0x40] sm:$0xff] %vm2039_vm2, %v2031_v14  ;;  %3418 = vset.pattern.permute.xlu1 %v5903_v2  ;;  %v2020_v61 = vpop.xlane.xlu0 %2019 }
 0x45e   :  { %1500 = vst.msk [vmem:[#allocation5 + $0x48] sm:$0xff] %vm1490_vm3, %v1483_v59  ;;  %v2037_v21 = vadd.f32 %v2020_v61, %v1989_v57  ;;  %2476 = vperm.xlu1 %3418, %v3608_v29   ;;  %v2447_v29 = vld [vmem:[#allocation4 + $0x50] sm:$0xff] }
 0x45f   :  { %v2446_v39 = vld [vmem:[#allocation4 + $0x48] sm:$0xff]  ;;  %3619 = vrcp.f32 %v2447_v29 }
 0x460   :  { %v1972_v26 = vld [vmem:[#allocation4 + $0x68] sm:$0xff]  ;;  %2054 = vst.msk [vmem:[#allocation4 + $0x70] sm:$0xff] %vm2039_vm2, %v2037_v21  ;;  %3621 = vrcp.f32 %v2446_v39 }
 0x461   :  { %v1988_v7 = vmul.f32 %v5904_v17, %v1972_v26  ;;  %v2016_v51 = vpop.xlane.xlu0 %2015 }
 0x462   :  { %v3612_v33 = vpop.eup %3611  ;;  %v2035_v9 = vadd.f32 %v2016_v51, %v1987_v50  ;;  %2501 = vperm.xlu1 %3418, %v3610_v37   ;;  %v2452_v34 = vld [vmem:[#allocation4 + $0x78] sm:$0xff] }
 0x463   :  { %v2036_v35 = vadd.f32 %v2018_v24, %v1988_v7  ;;  %2651 = vperm.xlu0 %3419, %v3612_v33   ;;  %v3614_v60 = vpop.eup %3613  ;;  %3623 = vrcp.f32 %v2452_v34 }
 0x464   :  { %2052 = vst.msk [vmem:[#allocation4 + $0x60] sm:$0xff] %vm2039_vm2, %v2035_v9  ;;  %v2445_v25 = vld [vmem:[#allocation4 + $0x40] sm:$0xff]  ;;  %v3616_v23 = vpop.eup %3615 }
 0x465   :  { %2053 = vst.msk [vmem:[#allocation4 + $0x68] sm:$0xff] %vm2039_vm2, %v2036_v35  ;;  %3625 = vrcp.f32 %v2445_v25  ;;  %v3618_v41 = vpop.eup %3617 }
 0x466   :  { %2491 = vperm.xlu1 %3418, %v3612_v33  }
 0x467   :  { %v3306_v19 = vpop.f32.mrb[28].mxu0  ;;  %3420 = vset.pattern.permute.xlu0 %v5903_v2  ;;  %v2451_v31 = vld [vmem:[#allocation4 + $0x70] sm:$0xff] }
 0x468   :  { %v1488_v5 = vadd.f32 %v3306_v19, %v1367_v3  ;;  %v1459_v48 = vpop.f32.mrb[29].mxu0  ;;  %2506 = vperm.xlu0 %3420, %v3614_v60   ;;  %3627 = vrcp.f32 %v2451_v31 }
 0x469   :  { %v1486_v27 = vadd.f32 %v1459_v48, %v1365_v47  ;;  %v3307_v0 = vpop.f32.mrb[30].mxu0  ;;  %v3620_v12 = vpop.eup %3619 }
 0x46a   :  { %1505 = vst.msk [vmem:[#allocation5 + $0x70] sm:$0xff] %vm1490_vm3, %v1488_v5  ;;  %v1489_v58 = vadd.f32 %v3307_v0, %v1368_v55  ;;  %3421 = vset.pattern.permute.xlu1 %v5896_v22  ;;  %v1462_v10 = vpop.f32.mrb[31].mxu0  ;;  %v3622_v46 = vpop.eup %3621 }
 0x46b   :  { %1503 = vst.msk [vmem:[#allocation5 + $0x60] sm:$0xff] %vm1490_vm3, %v1486_v27  ;;  %v1487_v52 = vadd.f32 %v1462_v10, %v1366_v18  ;;  %2666 = vperm.xlu1 %3421, %v3614_v60   ;;  %v2449_v56 = vld [vmem:[#allocation4 + $0x60] sm:$0xff] }
 0x46c   :  { %1506 = vst.msk [vmem:[#allocation5 + $0x78] sm:$0xff] %vm1490_vm3, %v1489_v58  ;;  %2496 = vperm.xlu0 %3420, %v3616_v23   ;;  %v2450_v16 = vld [vmem:[#allocation4 + $0x68] sm:$0xff] }
 0x46d   :  { %1504 = vst.msk [vmem:[#allocation5 + $0x68] sm:$0xff] %vm1490_vm3, %v1487_v52  ;;  %3629 = vrcp.f32 %v2450_v16  ;;  %v3624_v43 = vpop.eup %3623 }
 0x46e   :  { %3631 = vrcp.f32 %v2449_v56  ;;  %v2067_v56 = vld [vmem:[#allocation5 + $0x58] sm:$0xff] }
 0x46f   :  { %2656 = vperm.xlu1 %3421, %v3616_v23   ;;  %v3626_v14 = vpop.eup %3625 }
 0x470   :  { %2526 = vperm.xlu0 %3420, %v3618_v41  }
 0x472   :  { %v3628_v30 = vpop.eup %3627 }
 0x473   :  { %3422 = vset.pattern.permute.xlu1 %v5903_v2 }
 0x474   :  { %2521 = vperm.xlu1 %3422, %v3620_v12   ;;  %2516 = vperm.xlu0 %3420, %v3622_v46  }
 0x477   :  { %v3630_v37 = vpop.eup %3629 }
 0x478   :  { %2511 = vperm.xlu1 %3422, %v3626_v14   ;;  %2546 = vperm.xlu0 %3420, %v3624_v43   ;;  %v3632_v59 = vpop.eup %3631 }
 0x47c   :  { %2541 = vperm.xlu1 %3422, %v3628_v30   ;;  %2536 = vperm.xlu0 %3420, %v3630_v37  }
 0x480   :  { %2531 = vperm.xlu1 %3422, %v3632_v59   ;;  %3423 = vset.pattern.permute.xlu0 %v5896_v22 }
 0x484   :  { %3424 = vset.pattern.permute.xlu1 %v5896_v22 }
 0x49c   :  { %v3326_v49 = vpop.f32.mrb[32].mxu0 }
 0x49d   :  { %v3334_v57 = vpop.f32.mrb[32].mxu1  ;;  %v2242_v2 = vpop.f32.mrb[33].mxu0 }
 0x49e   :  { %v2274_v61 = vpop.f32.mrb[33].mxu1  ;;  %2341 = vrot.lane.b32.xlu0 %v3334_v57, %s3704_s2  ;;  %v3327_v54 = vpop.f32.mrb[34].mxu0 }
 0x49f   :  { %v3335_v20 = vpop.f32.mrb[34].mxu1  ;;  %v2245_v21 = vpop.f32.mrb[35].mxu0 }
 0x4a0   :  { %v2277_v26 = vpop.f32.mrb[35].mxu1  ;;  %2343 = vrot.lane.b32.xlu1 %v3335_v20, %s3704_s2 }
 0x4a2   :  { %2337 = vrot.lane.b32.xlu0 %v2274_v61, %s3704_s2 }
 0x4a4   :  { %2339 = vrot.lane.b32.xlu1 %v2277_v26, %s3704_s2  ;;  %v3330_v17 = vpop.f32.mrb[36].mxu0  ;;  %v2059_v26 = vld [vmem:[#allocation5 + $0x18] sm:$0xff] }
 0x4a5   :  { %v3338_v7 = vpop.f32.mrb[36].mxu1  ;;  %v2258_v36 = vpop.f32.mrb[37].mxu0 }
 0x4a6   :  { %v2290_v50 = vpop.f32.mrb[37].mxu1  ;;  %2325 = vrot.lane.b32.xlu0 %v3326_v49, %s3704_s2  ;;  %v3331_v24 = vpop.f32.mrb[38].mxu0  ;;  %v2065_v49 = vld [vmem:[#allocation5 + $0x48] sm:$0xff] }
 0x4a7   :  { %v3339_v22 = vpop.f32.mrb[38].mxu1  ;;  %v2261_v51 = vpop.f32.mrb[39].mxu0 }
 0x4a8   :  { %v2293_v33 = vpop.f32.mrb[39].mxu1  ;;  %2327 = vrot.lane.b32.xlu1 %v3327_v54, %s3704_s2  ;;  %v2058_v54 = vld [vmem:[#allocation5 + $0x10] sm:$0xff] }
 0x4aa   :  { %2321 = vrot.lane.b32.xlu0 %v2242_v2, %s3704_s2 }
 0x4ac   :  { %2323 = vrot.lane.b32.xlu1 %v2245_v21, %s3704_s2 }
 0x4ae   :  { %2349 = vrot.lane.b32.xlu0 %v3338_v7, %s3704_s2 }
 0x4b0   :  { %2351 = vrot.lane.b32.xlu1 %v3339_v22, %s3704_s2  ;;  %v2057_v22 = vld [vmem:[#allocation5 + $0x8] sm:$0xff] }
 0x4b2   :  { %2345 = vrot.lane.b32.xlu0 %v2290_v50, %s3704_s2 }
 0x4b4   :  { %2347 = vrot.lane.b32.xlu1 %v2293_v33, %s3704_s2 }
 0x4b6   :  { %2333 = vrot.lane.b32.xlu0 %v3330_v17, %s3704_s2 }
 0x4b8   :  { %2335 = vrot.lane.b32.xlu1 %v3331_v24, %s3704_s2 }
 0x4ba   :  { %2329 = vrot.lane.b32.xlu0 %v2258_v36, %s3704_s2  ;;  %v2056_v36 = vld [vmem:[#allocation5] sm:$0xff] }
 0x4bb   :  { %v2152_v33 = vmul.f32 %v4964_v63, %v2056_v36 }
 0x4bc   :  { %2331 = vrot.lane.b32.xlu1 %v2261_v51, %s3704_s2 }
 0x4be   :  { %2671 = vperm.xlu0 %3423, %v3626_v14   ;;  %v2064_v14 = vld [vmem:[#allocation5 + $0x40] sm:$0xff] }
 0x4bf   :  { %v2160_v2 = vmul.f32 %v5000_v53, %v2064_v14  ;;  %v2155_v53 = vmul.f32 %v4966_v15, %v2059_v26  ;;  %v2153_v14 = vmul.f32 %v4960_v38, %v2057_v22 }
 0x4c0   :  { %2676 = vperm.xlu1 %3424, %v3622_v46  }
 0x4c2   :  { %2681 = vperm.xlu0 %3423, %v3620_v12  }
 0x4c4   :  { %2686 = vperm.xlu1 %3424, %v3618_v41   ;;  %v2066_v41 = vld [vmem:[#allocation5 + $0x50] sm:$0xff] }
 0x4c5   :  { %v2162_v46 = vmul.f32 %v4992_v11, %v2066_v41  ;;  %v2161_v11 = vmul.f32 %v4994_v32, %v2065_v49 }
 0x4c6   :  { %2691 = vperm.xlu0 %3423, %v3632_v59  }
 0x4c8   :  { %2696 = vperm.xlu1 %3424, %v3630_v37   ;;  %v2163_v37 = vmul.f32 %v4990_v28, %v2067_v56  ;;  %v2154_v28 = vmul.f32 %v4962_v62, %v2058_v54 }
 0x4ca   :  { %2701 = vperm.xlu0 %3423, %v3628_v30   ;;  %v5132_v9 = vpop.permute.xlu0 %2471 }
 0x4cb   :  { %v5128_v8 = vpop.permute.xlu1 %2481 }
 0x4cc   :  { %2706 = vperm.xlu1 %3424, %v3624_v43  }
 0x4ce   :  { %v5138_v39 = vpop.permute.xlu0 %2486 }
 0x4d0   :  { %v5130_v35 = vpop.permute.xlu1 %2641 }
 0x4d3   :  { %v5142_v47 = vpop.permute.xlu0 %2636 }
 0x4d4   :  { %v5134_v29 = vpop.permute.xlu1 %2631 }
 0x4d8   :  { %v5136_v3 = vpop.permute.xlu1 %2646 }
 0x4da   :  { %v5144_v19 = vpop.permute.xlu0 %2661 }
 0x4dd   :  { %v5140_v60 = vpop.permute.xlu1 %2476 }
 0x4e1   :  { %v5146_v55 = vpop.permute.xlu1 %2501 }
 0x4e2   :  { %v5148_v5 = vpop.permute.xlu0 %2651 }
 0x4e5   :  { %v5150_v48 = vpop.permute.xlu1 %2491 }
 0x4e7   :  { %v5152_v18 = vpop.permute.xlu0 %2506 }
 0x4ea   :  { %v5154_v34 = vpop.permute.xlu1 %2666 }
 0x4eb   :  { %v5156_v27 = vpop.permute.xlu0 %2496 }
 0x4ee   :  { %v5158_v0 = vpop.permute.xlu1 %2656 }
 0x4ef   :  { %v2527_v25 = vpop.permute.xlu0 %2526 }
 0x4f3   :  { %v2522_v58 = vpop.permute.xlu1 %2521  ;;  %v5160_v10 = vpop.permute.xlu0 %2516 }
 0x4f7   :  { %v2512_v23 = vpop.permute.xlu1 %2511  ;;  %v5162_v52 = vpop.permute.xlu0 %2546 }
 0x4fb   :  { %v5164_v31 = vpop.permute.xlu1 %2541  ;;  %v5166_v16 = vpop.permute.xlu0 %2536 }
 0x4ff   :  { %v5168_v12 = vpop.permute.xlu1 %2531 }
 0x510   :  { %v2342_v43 = vpop.permute.xlu0 %2341 }
 0x511   :  { %v2379_v30 = vadd.f32 %v2342_v43, %v2162_v46  ;;  %v2070_v46 = vld [vmem:[#allocation5 + $0x70] sm:$0xff] }
 0x512   :  { %v2344_v59 = vpop.permute.xlu1 %2343  ;;  %v2166_v63 = vmul.f32 %v5004_v13, %v2070_v46  ;;  %v2061_v46 = vld [vmem:[#allocation5 + $0x28] sm:$0xff] }
 0x513   :  { %2396 = vst.msk [vmem:[#allocation5 + $0x50] sm:$0xff] %vm2385_vm4, %v2379_v30  ;;  %v2380_v57 = vadd.f32 %v2344_v59, %v2163_v37  ;;  %v2071_v37 = vld [vmem:[#allocation5 + $0x78] sm:$0xff] }
 0x514   :  { %v2338_v61 = vpop.permute.xlu0 %2337  ;;  %v2167_v54 = vmul.f32 %v4998_v42, %v2071_v37  ;;  %v2157_v37 = vmul.f32 %v4970_v4, %v2061_v46 }
 0x515   :  { %2397 = vst.msk [vmem:[#allocation5 + $0x58] sm:$0xff] %vm2385_vm4, %v2380_v57  ;;  %v2377_v20 = vadd.f32 %v2338_v61, %v2160_v2  ;;  %v2068_v2 = vld [vmem:[#allocation5 + $0x60] sm:$0xff] }
 0x516   :  { %v2340_v21 = vpop.permute.xlu1 %2339  ;;  %v2164_v26 = vmul.f32 %v5007_v1, %v2068_v2 }
 0x517   :  { %2394 = vst.msk [vmem:[#allocation5 + $0x40] sm:$0xff] %vm2385_vm4, %v2377_v20  ;;  %v2378_v17 = vadd.f32 %v2340_v21, %v2161_v11  ;;  %v2069_v21 = vld [vmem:[#allocation5 + $0x68] sm:$0xff] }
 0x518   :  { %v2326_v7 = vpop.permute.xlu0 %2325  ;;  %v2165_v36 = vmul.f32 %v5002_v45, %v2069_v21 }
 0x519   :  { %2395 = vst.msk [vmem:[#allocation5 + $0x48] sm:$0xff] %vm2385_vm4, %v2378_v17  ;;  %v2371_v50 = vadd.f32 %v2326_v7, %v2154_v28  ;;  %v2062_v7 = vld [vmem:[#allocation5 + $0x30] sm:$0xff] }
 0x51a   :  { %v2328_v24 = vpop.permute.xlu1 %2327  ;;  %v2431_v51 = vld [vmem:[#allocation5 + $0x50] sm:$0xff]  ;;  %v2158_v22 = vmul.f32 %v4974_v44, %v2062_v7 }
 0x51b   :  { %2388 = vst.msk [vmem:[#allocation5 + $0x10] sm:$0xff] %vm2385_vm4, %v2371_v50  ;;  %v2372_v32 = vadd.f32 %v2328_v24, %v2155_v53  ;;  %v2559_v41 = vmul.f32 %v2522_v58, %v2431_v51  ;;  %v2063_v53 = vld [vmem:[#allocation5 + $0x38] sm:$0xff] }
 0x51c   :  { %v2322_v56 = vpop.permute.xlu0 %2321  ;;  %v2432_v43 = vld [vmem:[#allocation5 + $0x58] sm:$0xff] }
 0x51d   :  { %2389 = vst.msk [vmem:[#allocation5 + $0x18] sm:$0xff] %vm2385_vm4, %v2372_v32  ;;  %v2369_v62 = vadd.f32 %v2322_v56, %v2152_v33  ;;  %v2560_v15 = vmul.f32 %v2527_v25, %v2432_v43 }
 0x51e   :  { %2575 = vst.msk [vmem:[#allocation5 + $0x50] sm:$0xff] %vm1490_vm3, %v2559_v41  ;;  %v2324_v30 = vpop.permute.xlu1 %2323  ;;  %v2429_v59 = vld [vmem:[#allocation5 + $0x40] sm:$0xff]  ;;  %v2159_v41 = vmul.f32 %v4978_v40, %v2063_v53 }
 0x51f   :  { %2386 = vst.msk [vmem:[#allocation5] sm:$0xff] %vm2385_vm4, %v2369_v62  ;;  %v2370_v49 = vadd.f32 %v2324_v30, %v2153_v14  ;;  %v2557_v58 = vmul.f32 %v2512_v23, %v2429_v59 }
 0x520   :  { %2576 = vst.msk [vmem:[#allocation5 + $0x58] sm:$0xff] %vm1490_vm3, %v2560_v15  ;;  %v2350_v57 = vpop.permute.xlu0 %2349  ;;  %v2430_v61 = vld [vmem:[#allocation5 + $0x48] sm:$0xff] }
 0x521   :  { %2387 = vst.msk [vmem:[#allocation5 + $0x8] sm:$0xff] %vm2385_vm4, %v2370_v49  ;;  %v2383_v38 = vadd.f32 %v2350_v57, %v2166_v63  ;;  %v2558_v25 = vmul.f32 %v5160_v10, %v2430_v61 }
 0x522   :  { %2573 = vst.msk [vmem:[#allocation5 + $0x40] sm:$0xff] %vm1490_vm3, %v2557_v58  ;;  %v2423_v20 = vld [vmem:[#allocation5 + $0x10] sm:$0xff]  ;;  %v2352_v11 = vpop.permute.xlu1 %2351 }
 0x523   :  { %v2551_v13 = vmul.f32 %v5128_v8, %v2423_v20  ;;  %2400 = vst.msk [vmem:[#allocation5 + $0x70] sm:$0xff] %vm2385_vm4, %v2383_v38  ;;  %v2384_v23 = vadd.f32 %v2352_v11, %v2167_v54 }
 0x524   :  { %2574 = vst.msk [vmem:[#allocation5 + $0x48] sm:$0xff] %vm1490_vm3, %v2558_v25  ;;  %v2424_v17 = vld [vmem:[#allocation5 + $0x18] sm:$0xff]  ;;  %v2346_v28 = vpop.permute.xlu0 %2345 }
 0x525   :  { %2567 = vst.msk [vmem:[#allocation5 + $0x10] sm:$0xff] %vm1490_vm3, %v2551_v13  ;;  %v2552_v42 = vmul.f32 %v5138_v39, %v2424_v17  ;;  %v2381_v10 = vadd.f32 %v2346_v28, %v2164_v26  ;;  %v2060_v39 = vld [vmem:[#allocation5 + $0x20] sm:$0xff] }
 0x526   :  { %2401 = vst.msk [vmem:[#allocation5 + $0x78] sm:$0xff] %vm2385_vm4, %v2384_v23  ;;  %v2421_v8 = vld [vmem:[#allocation5] sm:$0xff]  ;;  %v2348_v50 = vpop.permute.xlu1 %2347  ;;  %v2156_v43 = vmul.f32 %v4968_v6, %v2060_v39 }
 0x527   :  { %2568 = vst.msk [vmem:[#allocation5 + $0x18] sm:$0xff] %vm1490_vm3, %v2552_v42  ;;  %v2549_v1 = vmul.f32 %v5132_v9, %v2421_v8  ;;  %v2382_v24 = vadd.f32 %v2348_v50, %v2165_v36 }
 0x528   :  { %2398 = vst.msk [vmem:[#allocation5 + $0x60] sm:$0xff] %vm2385_vm4, %v2381_v10  ;;  %v2422_v51 = vld [vmem:[#allocation5 + $0x8] sm:$0xff]  ;;  %v2334_v32 = vpop.permute.xlu0 %2333 }
 0x529   :  { %2565 = vst.msk [vmem:[#allocation5] sm:$0xff] %vm1490_vm3, %v2549_v1  ;;  %v2550_v33 = vmul.f32 %v5140_v60, %v2422_v51  ;;  %v2375_v45 = vadd.f32 %v2334_v32, %v2158_v22  ;;  %v2589_v1 = vld [vmem:[#allocation5 + $0x40] sm:$0xff] }
 0x52a   :  { %2399 = vst.msk [vmem:[#allocation5 + $0x68] sm:$0xff] %vm2385_vm4, %v2382_v24  ;;  %v2336_v56 = vpop.permute.xlu1 %2335  ;;  %v2435_v9 = vld [vmem:[#allocation5 + $0x70] sm:$0xff] }
 0x52b   :  { %2566 = vst.msk [vmem:[#allocation5 + $0x8] sm:$0xff] %vm1490_vm3, %v2550_v33  ;;  %v2376_v44 = vadd.f32 %v2336_v56, %v2159_v41  ;;  %v2563_v62 = vmul.f32 %v5164_v31, %v2435_v9  ;;  %v2590_v32 = vld [vmem:[#allocation5 + $0x48] sm:$0xff] }
 0x52c   :  { %2392 = vst.msk [vmem:[#allocation5 + $0x30] sm:$0xff] %vm2385_vm4, %v2375_v45  ;;  %v2583_v14 = vld [vmem:[#allocation5 + $0x10] sm:$0xff]  ;;  %v2330_v15 = vpop.permute.xlu0 %2329 }
 0x52d   :  { %v2436_v60 = vld [vmem:[#allocation5 + $0x78] sm:$0xff]  ;;  %v2711_v30 = vmul.f32 %v5130_v35, %v2583_v14  ;;  %2393 = vst.msk [vmem:[#allocation5 + $0x38] sm:$0xff] %vm2385_vm4, %v2376_v44  ;;  %v2373_v40 = vadd.f32 %v2330_v15, %v2156_v43  ;;  %v2591_v44 = vld [vmem:[#allocation5 + $0x50] sm:$0xff] }
 0x52e   :  { %2579 = vst.msk [vmem:[#allocation5 + $0x70] sm:$0xff] %vm1490_vm3, %v2563_v62  ;;  %v2564_v59 = vmul.f32 %v5162_v52, %v2436_v60  ;;  %v2584_v49 = vld [vmem:[#allocation5 + $0x18] sm:$0xff]  ;;  %v2332_v63 = vpop.permute.xlu1 %2331 }
 0x52f   :  { %v2433_v58 = vld [vmem:[#allocation5 + $0x60] sm:$0xff]  ;;  %2727 = vst.msk [vmem:[#allocation5 + $0x10] sm:$0xff] %vm2385_vm4, %v2711_v30  ;;  %v2712_v6 = vmul.f32 %v5136_v3, %v2584_v49  ;;  %2390 = vst.msk [vmem:[#allocation5 + $0x20] sm:$0xff] %vm2385_vm4, %v2373_v40  ;;  %v2374_v31 = vadd.f32 %v2332_v63, %v2157_v37 }
 0x530   :  { %v2561_v35 = vmul.f32 %v5168_v12, %v2433_v58  ;;  %2580 = vst.msk [vmem:[#allocation5 + $0x78] sm:$0xff] %vm1490_vm3, %v2564_v59  ;;  %v2581_v57 = vld [vmem:[#allocation5] sm:$0xff] }
 0x531   :  { %v2434_v4 = vld [vmem:[#allocation5 + $0x68] sm:$0xff]  ;;  %2728 = vst.msk [vmem:[#allocation5 + $0x18] sm:$0xff] %vm2385_vm4, %v2712_v6  ;;  %v2709_v52 = vmul.f32 %v5134_v29, %v2581_v57  ;;  %2391 = vst.msk [vmem:[#allocation5 + $0x28] sm:$0xff] %vm2385_vm4, %v2374_v31  ;;  %v5234_v29 = vld [vmem:[%s5601_s4] ss:$0 sm:$0xff] }
 0x532   :  { %2577 = vst.msk [vmem:[#allocation5 + $0x60] sm:$0xff] %vm1490_vm3, %v2561_v35  ;;  %v2562_v2 = vmul.f32 %v5166_v16, %v2434_v4  ;;  %v2582_v3 = vld [vmem:[#allocation5 + $0x8] sm:$0xff] }
 0x533   :  { %v2427_v61 = vld [vmem:[#allocation5 + $0x30] sm:$0xff]  ;;  %2725 = vst.msk [vmem:[#allocation5] sm:$0xff] %vm2385_vm4, %v2709_v52  ;;  %v2710_v12 = vmul.f32 %v5142_v47, %v2582_v3 }
 0x534   :  { %v2555_v38 = vmul.f32 %v5146_v55, %v2427_v61  ;;  %2578 = vst.msk [vmem:[#allocation5 + $0x68] sm:$0xff] %vm1490_vm3, %v2562_v2  ;;  %v2428_v54 = vld [vmem:[#allocation5 + $0x38] sm:$0xff] }
 0x535   :  { %2726 = vst.msk [vmem:[#allocation5 + $0x8] sm:$0xff] %vm2385_vm4, %v2710_v12  ;;  %v2556_v16 = vmul.f32 %v5152_v18, %v2428_v54  ;;  %v5906_v54 = vlaneseq }
 0x536   :  { %2571 = vst.msk [vmem:[#allocation5 + $0x30] sm:$0xff] %vm1490_vm3, %v2555_v38  ;;  %v2743_v25 = vld [vmem:[#allocation5 + $0x10] sm:$0xff]  ;;  %v2425_v20 = vld [vmem:[#allocation5 + $0x20] sm:$0xff] }
 0x537   :  { %v5240_v47 = vadd.f32 %v5234_v29, %v2743_v25  ;;  %2572 = vst.msk [vmem:[#allocation5 + $0x38] sm:$0xff] %vm1490_vm3, %v2556_v16  ;;  %v2553_v55 = vmul.f32 %v5150_v48, %v2425_v20  ;;  %v5282_v16 = vand.u32 127, %v5906_v54 }
 0x538   :  { %v2744_v11 = vld [vmem:[#allocation5 + $0x18] sm:$0xff]  ;;  %v2426_v21 = vld [vmem:[#allocation5 + $0x28] sm:$0xff] }
 0x539   :  { %v2833_v13 = vand.u32 2147483647, %v5240_v47  ;;  %v5246_v23 = vadd.f32 %v5234_v29, %v2744_v11  ;;  %2569 = vst.msk [vmem:[#allocation5 + $0x20] sm:$0xff] %vm1490_vm3, %v2553_v55  ;;  %v2554_v18 = vmul.f32 %v5156_v27, %v2426_v21  ;;  %v2593_v59 = vld [vmem:[#allocation5 + $0x60] sm:$0xff]  ;;  %vm2782_vm5 = vcmp.lt.s32.totalorder %v5282_v16, 16 }
 0x53a   :  { %v2741_v26 = vld [vmem:[#allocation5] sm:$0xff]  ;;  %vm2801_vm7 = vcmp.ne.f32.partialorder %v5240_v47, %v5240_v47 }
 0x53b   :  { %v2849_v17 = vsub.f32 0.0, %v2833_v13  ;;  %v2834_v28 = vand.u32 2147483647, %v5246_v23  ;;  %v5252_v7 = vadd.f32 %v5234_v29, %v2741_v26  ;;  %2570 = vst.msk [vmem:[#allocation5 + $0x28] sm:$0xff] %vm1490_vm3, %v2554_v18  ;;  %v2594_v6 = vld [vmem:[#allocation5 + $0x68] sm:$0xff]  ;;  %vm2802_vm9 = vcmp.ne.f32.partialorder %v5246_v23, %v5246_v23 }
 0x53c   :  { %v2742_v42 = vld [vmem:[#allocation5 + $0x8] sm:$0xff] }
 0x53d   :  { %v2587_v48 = vld [vmem:[#allocation5 + $0x30] sm:$0xff]  ;;  %v2867_v10 = vmul.f32 1.442695, %v2849_v17  ;;  %v2850_v36 = vsub.f32 0.0, %v2834_v28  ;;  %v5256_v8 = vadd.f32 %v5234_v29, %v2742_v42  ;;  %v2672_v53 = vpop.permute.xlu0 %2671  ;;  %v2831_v27 = vand.u32 2147483647, %v5252_v7 }
 0x53e   :  { %v2715_v50 = vmul.f32 %v5144_v19, %v2587_v48  ;;  %v2588_v24 = vld [vmem:[#allocation5 + $0x38] sm:$0xff]  ;;  %v2717_v22 = vmul.f32 %v2672_v53, %v2589_v1  ;;  %vm2799_vm12 = vcmp.ne.f32.partialorder %v5252_v7, %v5252_v7 }
 0x53f   :  { %3633 = vpow2.f32 %v2867_v10  ;;  %v2869_v51 = vmul.f32 1.442695, %v2850_v36  ;;  %v2677_v39 = vpop.permute.xlu1 %2676  ;;  %v2847_v33 = vsub.f32 0.0, %v2831_v27  ;;  %v2832_v45 = vand.u32 2147483647, %v5256_v8 }
 0x540   :  { %2731 = vst.msk [vmem:[#allocation5 + $0x30] sm:$0xff] %vm2385_vm4, %v2715_v50  ;;  %v2716_v41 = vmul.f32 %v5154_v34, %v2588_v24  ;;  %v2585_v56 = vld [vmem:[#allocation5 + $0x20] sm:$0xff]  ;;  %2733 = vst.msk [vmem:[#allocation5 + $0x40] sm:$0xff] %vm2385_vm4, %v2717_v22  ;;  %v2718_v19 = vmul.f32 %v2677_v39, %v2590_v32  ;;  %v2592_v34 = vld [vmem:[#allocation5 + $0x58] sm:$0xff]  ;;  %v2785_v36 = vmax.f32 %v5240_v47, 0.0  ;;  %v2786_v50 = vmax.f32 %v5246_v23, 0.0 }
 0x541   :  { %3635 = vpow2.f32 %v2869_v51  ;;  %v2713_v46 = vmul.f32 %v5148_v5, %v2585_v56  ;;  %v2682_v9 = vpop.permute.xlu0 %2681  ;;  %v2863_v43 = vmul.f32 1.442695, %v2847_v33  ;;  %v2848_v62 = vsub.f32 0.0, %v2832_v45 }
 0x542   :  { %2732 = vst.msk [vmem:[#allocation5 + $0x38] sm:$0xff] %vm2385_vm4, %v2716_v41  ;;  %2734 = vst.msk [vmem:[#allocation5 + $0x48] sm:$0xff] %vm2385_vm4, %v2718_v19  ;;  %v2719_v14 = vmul.f32 %v2682_v9, %v2591_v44  ;;  %v2586_v15 = vld [vmem:[#allocation5 + $0x28] sm:$0xff]  ;;  %v2783_v22 = vmax.f32 %v5252_v7, 0.0  ;;  %vm2800_vm13 = vcmp.ne.f32.partialorder %v5256_v8, %v5256_v8 }
 0x543   :  { %2729 = vst.msk [vmem:[#allocation5 + $0x20] sm:$0xff] %vm2385_vm4, %v2713_v46  ;;  %v2687_v60 = vpop.permute.xlu1 %2686  ;;  %3637 = vpow2.f32 %v2863_v43  ;;  %v2865_v30 = vmul.f32 1.442695, %v2848_v62  ;;  %v2714_v40 = vmul.f32 %v5158_v0, %v2586_v15  ;;  %v2784_v15 = vmax.f32 %v5256_v8, 0.0 }
 0x544   :  { %2735 = vst.msk [vmem:[#allocation5 + $0x50] sm:$0xff] %vm2385_vm4, %v2719_v14  ;;  %v2720_v5 = vmul.f32 %v2687_v60, %v2592_v34 }
 0x545   :  { %v2692_v37 = vpop.permute.xlu0 %2691  ;;  %3639 = vpow2.f32 %v2865_v30  ;;  %2730 = vst.msk [vmem:[#allocation5 + $0x28] sm:$0xff] %vm2385_vm4, %v2714_v40 }
 0x546   :  { %2736 = vst.msk [vmem:[#allocation5 + $0x58] sm:$0xff] %vm2385_vm4, %v2720_v5  ;;  %v2721_v63 = vmul.f32 %v2692_v37, %v2593_v59 }
 0x547   :  { %v2747_v49 = vld [vmem:[#allocation5 + $0x30] sm:$0xff]  ;;  %v2697_v31 = vpop.permute.xlu1 %2696  ;;  %v2749_v20 = vld [vmem:[#allocation5 + $0x40] sm:$0xff] }
 0x548   :  { %v5273_v58 = vadd.f32 %v5234_v29, %v2747_v49  ;;  %2737 = vst.msk [vmem:[#allocation5 + $0x60] sm:$0xff] %vm2385_vm4, %v2721_v63  ;;  %v2722_v0 = vmul.f32 %v2697_v31, %v2594_v6  ;;  %v5291_v10 = vadd.f32 %v5234_v29, %v2749_v20 }
 0x549   :  { %v3634_v35 = vpop.eup %3633  ;;  %v2748_v4 = vld [vmem:[#allocation5 + $0x38] sm:$0xff]  ;;  %v2750_v32 = vld [vmem:[#allocation5 + $0x48] sm:$0xff] }
 0x54a   :  { %v2837_v57 = vand.u32 2147483647, %v5273_v58  ;;  %v2913_v52 = vadd.f32 1.0, %v3634_v35  ;;  %v5278_v2 = vadd.f32 %v5234_v29, %v2748_v4  ;;  %2738 = vst.msk [vmem:[#allocation5 + $0x68] sm:$0xff] %vm2385_vm4, %v2722_v0  ;;  %v2745_v38 = vld [vmem:[#allocation5 + $0x20] sm:$0xff]  ;;  %v2916_v11 = vmul.f32 -0.5, %v3634_v35 }
 0x54b   :  { %v3636_v3 = vpop.eup %3635  ;;  %v2919_v21 = vand.u32 2147483647, %v3634_v35  ;;  %v5286_v17 = vadd.f32 %v5234_v29, %v2745_v38  ;;  %v2839_v46 = vand.u32 2147483647, %v5291_v10  ;;  %v5317_v43 = vadd.f32 %v5234_v29, %v2750_v32 }
 0x54c   :  { %v2853_v61 = vsub.f32 0.0, %v2837_v57  ;;  %3641 = vlog2.f32 %v2913_v52  ;;  %v2922_v12 = vadd.f32 1.0, %v3636_v3  ;;  %v2838_v13 = vand.u32 2147483647, %v5278_v2  ;;  %v2746_v1 = vld [vmem:[#allocation5 + $0x28] sm:$0xff] }
 0x54d   :  { %v3638_v55 = vpop.eup %3637  ;;  %v2925_v26 = vmul.f32 -0.5, %v3636_v3  ;;  %v2928_v42 = vand.u32 2147483647, %v3636_v3  ;;  %v2917_v27 = vadd.f32 1.0, %v2916_v11  ;;  %vm5297_vm6 = vcmp.lt.f32.partialorder %v2919_v21, 0.0004427343 }
 0x54e   :  { %v2875_v25 = vmul.f32 1.442695, %v2853_v61  ;;  %3643 = vlog2.f32 %v2922_v12  ;;  %v2895_v18 = vadd.f32 1.0, %v3638_v55  ;;  %v2854_v48 = vsub.f32 0.0, %v2838_v13 }
 0x54f   :  { %v5288_v28 = vpop.eup %3639  ;;  %v2898_v51 = vmul.f32 -0.5, %v3638_v55  ;;  %v2926_v39 = vadd.f32 1.0, %v2925_v26  ;;  %v2835_v45 = vand.u32 2147483647, %v5286_v17  ;;  %vm5305_vm8 = vcmp.lt.f32.partialorder %v2928_v42, 0.0004427343 }
 0x550   :  { %3645 = vpow2.f32 %v2875_v25  ;;  %v2904_v53 = vadd.f32 1.0, %v5288_v28  ;;  %v2877_v33 = vmul.f32 1.442695, %v2854_v48  ;;  %v2901_v56 = vand.u32 2147483647, %v3638_v55 }
 0x551   :  { %3647 = vlog2.f32 %v2895_v18  ;;  %v5310_v19 = vadd.f32 %v5234_v29, %v2746_v1  ;;  %v2907_v9 = vmul.f32 -0.5, %v5288_v28  ;;  %v2851_v44 = vsub.f32 0.0, %v2835_v45 }
 0x552   :  { %3649 = vlog2.f32 %v2904_v53  ;;  %v2899_v14 = vadd.f32 1.0, %v2898_v51  ;;  %v2910_v34 = vand.u32 2147483647, %v5288_v28  ;;  %v2918_v40 = vmul.f32 %v3634_v35, %v2917_v27 }
 0x553   :  { %3651 = vpow2.f32 %v2877_v33  ;;  %v2836_v60 = vand.u32 2147483647, %v5310_v19  ;;  %v2871_v5 = vmul.f32 1.442695, %v2851_v44  ;;  %v2855_v37 = vsub.f32 0.0, %v2839_v46  ;;  %v2752_v33 = vld [vmem:[#allocation5 + $0x58] sm:$0xff] }
 0x554   :  { %v2927_v49 = vmul.f32 %v3636_v3, %v2926_v39  ;;  %vm5322_vm10 = vcmp.lt.f32.partialorder %v2901_v56, 0.0004427343  ;;  %v2840_v31 = vand.u32 2147483647, %v5317_v43  ;;  %v2908_v4 = vadd.f32 1.0, %v2907_v9  ;;  %v2751_v3 = vld [vmem:[#allocation5 + $0x50] sm:$0xff] }
 0x555   :  { %v2852_v6 = vsub.f32 0.0, %v2836_v60  ;;  %3653 = vpow2.f32 %v2871_v5  ;;  %v2900_v61 = vmul.f32 %v3638_v55, %v2899_v14  ;;  %v2879_v38 = vmul.f32 1.442695, %v2855_v37 }
 0x556   :  { %v3642_v62 = vpop.eup %3641  ;;  %vm5333_vm11 = vcmp.lt.f32.partialorder %v2910_v34, 0.0004427343  ;;  %v2856_v21 = vsub.f32 0.0, %v2840_v31  ;;  %v2909_v48 = vmul.f32 %v5288_v28, %v2908_v4  ;;  %v2789_v34 = vmax.f32 %v5273_v58, 0.0 }
 0x557   :  { %v2915_v30 = vmul.f32 0.6931472, %v3642_v62  ;;  %v2873_v12 = vmul.f32 1.442695, %v2852_v6  ;;  %v5385_v62 = vadd.f32 %v5234_v29, %v2752_v33  ;;  %vm2805_vm14 = vcmp.ne.f32.partialorder %v5273_v58, %v5273_v58 }
 0x558   :  { %v3644_v59 = vpop.eup %3643  ;;  %v2881_v51 = vmul.f32 1.442695, %v2856_v21  ;;  %vm2806_vm0 = vcmp.ne.f32.partialorder %v5278_v2, %v5278_v2  ;;  %vm2803_vm2 = vcmp.ne.f32.partialorder %v5286_v17, %v5286_v17 }
 0x559   :  { %v2921_v0 = vsel %vm5297_vm6, %v2918_v40, %v2915_v30  ;;  %v2924_v57 = vmul.f32 0.6931472, %v3644_v59  ;;  %3655 = vpow2.f32 %v2873_v12  ;;  %v2842_v5 = vand.u32 2147483647, %v5385_v62 }
 0x55a   :  { %v5329_v52 = vpop.eup %3645  ;;  %v3041_v35 = vadd.f32 %v2921_v0, %v2785_v36  ;;  %v5347_v36 = vadd.f32 %v5234_v29, %v2751_v3  ;;  %vm2804_vm6 = vcmp.ne.f32.partialorder %v5310_v19, %v5310_v19 }
 0x55b   :  { %v3648_v54 = vpop.eup %3647  ;;  %v2930_v25 = vsel %vm5305_vm8, %v2927_v49, %v2924_v57  ;;  %v2949_v11 = vadd.f32 1.0, %v5329_v52  ;;  %v2952_v24 = vmul.f32 -0.5, %v5329_v52  ;;  %v2955_v60 = vand.u32 2147483647, %v5329_v52 }
 0x55c   :  { %v3057_v13 = vsel %vm2801_vm7, %v5240_v47, %v3041_v35  ;;  %v3042_v55 = vadd.f32 %v2930_v25, %v2786_v50  ;;  %v2897_v26 = vmul.f32 0.6931472, %v3648_v54  ;;  %v3650_v18 = vpop.eup %3649  ;;  %v2790_v49 = vmax.f32 %v5278_v2, 0.0  ;;  %v2753_v35 = vld [vmem:[#allocation5 + $0x60] sm:$0xff] }
 0x55d   :  { %v3073_v42 = vsel %vm2782_vm5, %v5240_v47, %v3057_v13  ;;  %3657 = vlog2.f32 %v2949_v11  ;;  %v2906_v1 = vmul.f32 0.6931472, %v3650_v18  ;;  %v3652_v47 = vpop.eup %3651  ;;  %v2953_v9 = vadd.f32 1.0, %v2952_v24 }
 0x55e   :  { %3089 = vst [vmem:[%s5602_s5 + $0x10] sm:$0xff] %v3073_v42  ;;  %v3058_v50 = vsel %vm2802_vm9, %v5246_v23, %v3042_v55  ;;  %v2903_v53 = vsel %vm5322_vm10, %v2900_v61, %v2897_v26  ;;  %3659 = vpow2.f32 %v2879_v38  ;;  %v2958_v39 = vadd.f32 1.0, %v3652_v47 }
 0x55f   :  { %v3074_v28 = vsel %vm2782_vm5, %v5246_v23, %v3058_v50  ;;  %v3039_v27 = vadd.f32 %v2903_v53, %v2783_v22  ;;  %v2912_v32 = vsel %vm5333_vm11, %v2909_v48, %v2906_v1  ;;  %3661 = vpow2.f32 %v2881_v51  ;;  %v5378_v56 = vpop.eup %3653  ;;  %v2754_v48 = vld [vmem:[#allocation5 + $0x68] sm:$0xff] }
 0x560   :  { %3090 = vst [vmem:[%s5602_s5 + $0x18] sm:$0xff] %v3074_v28  ;;  %v3040_v45 = vadd.f32 %v2912_v32, %v2784_v15  ;;  %v2841_v22 = vand.u32 2147483647, %v5347_v36  ;;  %3663 = vlog2.f32 %v2958_v39  ;;  %v2961_v14 = vmul.f32 -0.5, %v3652_v47  ;;  %v2707_v28 = vpop.permute.xlu1 %2706 }
 0x561   :  { %v3055_v23 = vsel %vm2799_vm12, %v5252_v7, %v3039_v27  ;;  %v2931_v15 = vadd.f32 1.0, %v5378_v56  ;;  %v2954_v59 = vmul.f32 %v5329_v52, %v2953_v9  ;;  %v2964_v63 = vand.u32 2147483647, %v3652_v47 }
 0x562   :  { %v3071_v41 = vsel %vm2782_vm5, %v5252_v7, %v3055_v23  ;;  %v3056_v46 = vsel %vm2800_vm13, %v5256_v8, %v3040_v45  ;;  %v2857_v44 = vsub.f32 0.0, %v2841_v22  ;;  %v2962_v57 = vadd.f32 1.0, %v2961_v14  ;;  %v2596_v45 = vld [vmem:[#allocation5 + $0x78] sm:$0xff] }
 0x563   :  { %3087 = vst [vmem:[%s5602_s5] sm:$0xff] %v3071_v41  ;;  %v3072_v7 = vsel %vm2782_vm5, %v5256_v8, %v3056_v46  ;;  %v5396_v40 = vpop.eup %3655  ;;  %3665 = vlog2.f32 %v2931_v15  ;;  %v2791_v8 = vmax.f32 %v5291_v10, 0.0  ;;  %v2858_v4 = vsub.f32 0.0, %v2842_v5 }
 0x564   :  { %3088 = vst [vmem:[%s5602_s5 + $0x8] sm:$0xff] %v3072_v7  ;;  %v2883_v30 = vmul.f32 1.442695, %v2857_v44  ;;  %v2940_v6 = vadd.f32 1.0, %v5396_v40  ;;  %vm2956_vm15 = vcmp.lt.f32.partialorder %v2955_v60, 0.0004427343  ;;  %v5417_v21 = vadd.f32 %v5234_v29, %v2753_v35 }
 0x565   :  { %v2934_v61 = vmul.f32 -0.5, %v5378_v56  ;;  %v2787_v38 = vmax.f32 %v5286_v17, 0.0  ;;  %v2937_v3 = vand.u32 2147483647, %v5378_v56  ;;  %v2885_v54 = vmul.f32 1.442695, %v2858_v4 }
 0x566   :  { %3667 = vpow2.f32 %v2883_v30  ;;  %v2943_v11 = vmul.f32 -0.5, %v5396_v40  ;;  %v2963_v55 = vmul.f32 %v3652_v47, %v2962_v57  ;;  %vm5419_vm1 = vcmp.lt.f32.partialorder %v2964_v63, 0.0004427343  ;;  %v2702_v47 = vpop.permute.xlu0 %2701 }
 0x567   :  { %v3658_v37 = vpop.eup %3657  ;;  %3669 = vlog2.f32 %v2940_v6  ;;  %v2788_v18 = vmax.f32 %v5310_v19, 0.0  ;;  %v2935_v1 = vadd.f32 1.0, %v2934_v61  ;;  %vm5434_vm3 = vcmp.lt.f32.partialorder %v2937_v3, 0.0004427343 }
 0x568   :  { %v5405_v31 = vpop.eup %3659  ;;  %v2951_v0 = vmul.f32 0.6931472, %v3658_v37  ;;  %v2944_v39 = vadd.f32 1.0, %v2943_v11  ;;  %v2843_v33 = vand.u32 2147483647, %v5417_v21  ;;  %v5446_v23 = vadd.f32 %v5234_v29, %v2754_v48 }
 0x569   :  { %v2967_v52 = vadd.f32 1.0, %v5405_v31  ;;  %v5413_v25 = vpop.eup %3661  ;;  %v2970_v51 = vmul.f32 -0.5, %v5405_v31  ;;  %v2724_v44 = vmul.f32 %v2707_v28, %v2596_v45  ;;  %v2936_v14 = vmul.f32 %v5378_v56, %v2935_v1 }
 0x56a   :  { %v2957_v12 = vsel %vm2956_vm15, %v2954_v59, %v2951_v0  ;;  %v3664_v13 = vpop.eup %3663  ;;  %v2976_v42 = vadd.f32 1.0, %v5413_v25  ;;  %v2979_v46 = vmul.f32 -0.5, %v5413_v25  ;;  %v2946_v15 = vand.u32 2147483647, %v5396_v40 }
 0x56b   :  { %v3045_v20 = vadd.f32 %v2957_v12, %v2789_v34  ;;  %3671 = vlog2.f32 %v2967_v52  ;;  %v2960_v53 = vmul.f32 0.6931472, %v3664_v13  ;;  %v2859_v34 = vsub.f32 0.0, %v2843_v33  ;;  %2740 = vst.msk [vmem:[#allocation5 + $0x78] sm:$0xff] %vm2385_vm4, %v2724_v44 }
 0x56c   :  { %3673 = vpow2.f32 %v2885_v54  ;;  %vm2807_vm7 = vcmp.ne.f32.partialorder %v5291_v10, %v5291_v10  ;;  %v2971_v5 = vadd.f32 1.0, %v2970_v51  ;;  %v2973_v37 = vand.u32 2147483647, %v5405_v31 }
 0x56d   :  { %v3061_v50 = vsel %vm2805_vm14, %v5273_v58, %v3045_v20  ;;  %3675 = vlog2.f32 %v2976_v42  ;;  %v2966_v32 = vsel %vm5419_vm1, %v2963_v55, %v2960_v53  ;;  %v3666_v22 = vpop.eup %3665  ;;  %v2844_v59 = vand.u32 2147483647, %v5446_v23 }
 0x56e   :  { %v3077_v27 = vsel %vm2782_vm5, %v5273_v58, %v3061_v50  ;;  %v2595_v58 = vld [vmem:[#allocation5 + $0x70] sm:$0xff]  ;;  %v3046_v41 = vadd.f32 %v2966_v32, %v2790_v49  ;;  %v2933_v7 = vmul.f32 0.6931472, %v3666_v22  ;;  %v2945_v6 = vmul.f32 %v5396_v40, %v2944_v39 }
 0x56f   :  { %3093 = vst [vmem:[%s5602_s5 + $0x30] sm:$0xff] %v3077_v27  ;;  %v2723_v9 = vmul.f32 %v2702_v47, %v2595_v58  ;;  %v2980_v35 = vadd.f32 1.0, %v2979_v46  ;;  %v2887_v61 = vmul.f32 1.442695, %v2859_v34  ;;  %v2982_v12 = vand.u32 2147483647, %v5413_v25 }
 0x570   :  { %v5453_v60 = vpop.eup %3667  ;;  %v3062_v30 = vsel %vm2806_vm0, %v5278_v2, %v3046_v41  ;;  %v2939_v63 = vsel %vm5434_vm3, %v2936_v14, %v2933_v7  ;;  %v2972_v20 = vmul.f32 %v5405_v31, %v2971_v5  ;;  %vm2974_vm8 = vcmp.lt.f32.partialorder %v2973_v37, 0.0004427343 }
 0x571   :  { %2739 = vst.msk [vmem:[#allocation5 + $0x70] sm:$0xff] %vm2385_vm4, %v2723_v9  ;;  %v3670_v56 = vpop.eup %3669  ;;  %v3078_v49 = vsel %vm2782_vm5, %v5278_v2, %v3062_v30  ;;  %v2985_v0 = vadd.f32 1.0, %v5453_v60  ;;  %v3043_v57 = vadd.f32 %v2939_v63, %v2787_v38  ;;  %vm2947_vm4 = vcmp.lt.f32.partialorder %v2946_v15, 0.0004427343 }
 0x572   :  { %3094 = vst [vmem:[%s5602_s5 + $0x38] sm:$0xff] %v3078_v49  ;;  %v2942_v4 = vmul.f32 0.6931472, %v3670_v56  ;;  %v2860_v2 = vsub.f32 0.0, %v2844_v59  ;;  %v2981_v42 = vmul.f32 %v5413_v25, %v2980_v35  ;;  %v2988_v48 = vmul.f32 -0.5, %v5453_v60  ;;  %v2756_v47 = vld [vmem:[#allocation5 + $0x78] sm:$0xff] }
 0x573   :  { %3677 = vlog2.f32 %v2985_v0  ;;  %v3059_v40 = vsel %vm2803_vm2, %v5286_v17, %v3043_v57  ;;  %v2792_v28 = vmax.f32 %v5317_v43, 0.0  ;;  %vm2983_vm9 = vcmp.lt.f32.partialorder %v2982_v12, 0.0004427343 }
 0x574   :  { %v2948_v3 = vsel %vm2947_vm4, %v2945_v6, %v2942_v4  ;;  %v3075_v38 = vsel %vm2782_vm5, %v5286_v17, %v3059_v40  ;;  %3679 = vpow2.f32 %v2887_v61  ;;  %v2889_v53 = vmul.f32 1.442695, %v2860_v2 }
 0x575   :  { %v3672_v52 = vpop.eup %3671  ;;  %v3044_v13 = vadd.f32 %v2948_v3, %v2788_v18  ;;  %3091 = vst [vmem:[%s5602_s5 + $0x20] sm:$0xff] %v3075_v38  ;;  %v2989_v32 = vadd.f32 1.0, %v2988_v48  ;;  %v5516_v39 = vadd.f32 %v5234_v29, %v2756_v47  ;;  %vm2808_vm10 = vcmp.ne.f32.partialorder %v5317_v43, %v5317_v43 }
 0x576   :  { %v2969_v54 = vmul.f32 0.6931472, %v3672_v52  ;;  %v5481_v11 = vpop.eup %3673  ;;  %v2991_v33 = vand.u32 2147483647, %v5453_v60  ;;  %v2793_v15 = vmax.f32 %v5347_v36, 0.0  ;;  %vm2809_vm12 = vcmp.ne.f32.partialorder %v5347_v36, %v5347_v36 }
 0x577   :  { %v3676_v55 = vpop.eup %3675  ;;  %v2994_v31 = vadd.f32 1.0, %v5481_v11  ;;  %v3060_v17 = vsel %vm2804_vm6, %v5310_v19, %v3044_v13  ;;  %v2997_v58 = vmul.f32 -0.5, %v5481_v11  ;;  %v2846_v22 = vand.u32 2147483647, %v5516_v39 }
 0x578   :  { %v2975_v26 = vsel %vm2974_vm8, %v2972_v20, %v2969_v54  ;;  %v2978_v50 = vmul.f32 0.6931472, %v3676_v55  ;;  %v2755_v1 = vld [vmem:[#allocation5 + $0x70] sm:$0xff]  ;;  %v3076_v25 = vsel %vm2782_vm5, %v5310_v19, %v3060_v17  ;;  %v2990_v44 = vmul.f32 %v5453_v60, %v2989_v32 }
 0x579   :  { %v3047_v18 = vadd.f32 %v2975_v26, %v2791_v8  ;;  %3681 = vlog2.f32 %v2994_v31  ;;  %3092 = vst [vmem:[%s5602_s5 + $0x28] sm:$0xff] %v3076_v25  ;;  %v5510_v24 = vadd.f32 %v5234_v29, %v2755_v1  ;;  %v2862_v7 = vsub.f32 0.0, %v2846_v22 }
 0x57a   :  { %v2984_v27 = vsel %vm2983_vm9, %v2981_v42, %v2978_v50  ;;  %3683 = vpow2.f32 %v2889_v53  ;;  %vm2992_vm11 = vcmp.lt.f32.partialorder %v2991_v33, 0.0004427343  ;;  %v2998_v34 = vadd.f32 1.0, %v2997_v58 }
 0x57b   :  { %v3063_v8 = vsel %vm2807_vm7, %v5291_v10, %v3047_v18  ;;  %v3048_v51 = vadd.f32 %v2984_v27, %v2792_v28  ;;  %v2845_v45 = vand.u32 2147483647, %v5510_v24  ;;  %v3000_v37 = vand.u32 2147483647, %v5481_v11 }
 0x57c   :  { %v3079_v19 = vsel %vm2782_vm5, %v5291_v10, %v3063_v8  ;;  %v2893_v56 = vmul.f32 1.442695, %v2862_v7  ;;  %v2999_v0 = vmul.f32 %v5481_v11, %v2998_v34  ;;  %v2794_v4 = vmax.f32 %v5385_v62, 0.0 }
 0x57d   :  { %3095 = vst [vmem:[%s5602_s5 + $0x40] sm:$0xff] %v3079_v19  ;;  %v3064_v10 = vsel %vm2808_vm10, %v5317_v43, %v3048_v51  ;;  %v3678_v41 = vpop.eup %3677  ;;  %v2861_v46 = vsub.f32 0.0, %v2845_v45  ;;  %vm3001_vm13 = vcmp.lt.f32.partialorder %v3000_v37, 0.0004427343  ;;  %vm2810_vm14 = vcmp.ne.f32.partialorder %v5385_v62, %v5385_v62 }
 0x57e   :  { %v3080_v29 = vsel %vm2782_vm5, %v5317_v43, %v3064_v10  ;;  %v2987_v9 = vmul.f32 0.6931472, %v3678_v41  ;;  %v3680_v14 = vpop.eup %3679  ;;  %v2795_v55 = vmax.f32 %v5417_v21, 0.0  ;;  %vm2811_vm0 = vcmp.ne.f32.partialorder %v5417_v21, %v5417_v21 }
 0x57f   :  { %3096 = vst [vmem:[%s5602_s5 + $0x48] sm:$0xff] %v3080_v29  ;;  %v2891_v30 = vmul.f32 1.442695, %v2861_v46  ;;  %v3003_v59 = vadd.f32 1.0, %v3680_v14  ;;  %v3006_v52 = vmul.f32 -0.5, %v3680_v14  ;;  %v2796_v28 = vmax.f32 %v5446_v23, 0.0 }
 0x580   :  { %v2993_v5 = vsel %vm2992_vm11, %v2990_v44, %v2987_v9  ;;  %v3009_v54 = vand.u32 2147483647, %v3680_v14  ;;  %vm2812_vm2 = vcmp.ne.f32.partialorder %v5446_v23, %v5446_v23  ;;  %v2797_v9 = vmax.f32 %v5510_v24, 0.0 }
 0x581   :  { %v3049_v43 = vadd.f32 %v2993_v5, %v2793_v15  ;;  %3685 = vpow2.f32 %v2891_v30  ;;  %v3007_v40 = vadd.f32 1.0, %v3006_v52  ;;  %v2798_v34 = vmax.f32 %v5516_v39, 0.0 }
 0x582   :  { %3687 = vlog2.f32 %v3003_v59  ;;  %vm3010_vm15 = vcmp.lt.f32.partialorder %v3009_v54, 0.0004427343  ;;  %vm2813_vm7 = vcmp.ne.f32.partialorder %v5510_v24, %v5510_v24  ;;  %vm2814_vm4 = vcmp.ne.f32.partialorder %v5516_v39, %v5516_v39 }
 0x583   :  { %v3682_v49 = vpop.eup %3681  ;;  %v3065_v63 = vsel %vm2809_vm12, %v5347_v36, %v3049_v43  ;;  %3689 = vpow2.f32 %v2893_v56  ;;  %v3008_v42 = vmul.f32 %v3680_v14, %v3007_v40 }
 0x584   :  { %v3684_v60 = vpop.eup %3683  ;;  %v2996_v6 = vmul.f32 0.6931472, %v3682_v49  ;;  %v3081_v57 = vsel %vm2782_vm5, %v5347_v36, %v3065_v63 }
 0x585   :  { %v3012_v35 = vadd.f32 1.0, %v3684_v60  ;;  %3097 = vst [vmem:[%s5602_s5 + $0x50] sm:$0xff] %v3081_v57  ;;  %v3015_v3 = vmul.f32 -0.5, %v3684_v60  ;;  %v3018_v31 = vand.u32 2147483647, %v3684_v60 }
 0x586   :  { %v3002_v61 = vsel %vm3001_vm13, %v2999_v0, %v2996_v6 }
 0x587   :  { %v3050_v12 = vadd.f32 %v3002_v61, %v2794_v4  ;;  %3691 = vlog2.f32 %v3012_v35  ;;  %v3016_v48 = vadd.f32 1.0, %v3015_v3  ;;  %vm3019_vm1 = vcmp.lt.f32.partialorder %v3018_v31, 0.0004427343 }
 0x589   :  { %v3066_v2 = vsel %vm2810_vm14, %v5385_v62, %v3050_v12  ;;  %v3017_v1 = vmul.f32 %v3684_v60, %v3016_v48 }
 0x58a   :  { %v3082_v36 = vsel %vm2782_vm5, %v5385_v62, %v3066_v2 }
 0x58b   :  { %3098 = vst [vmem:[%s5602_s5 + $0x58] sm:$0xff] %v3082_v36  ;;  %v3686_v20 = vpop.eup %3685 }
 0x58c   :  { %v3688_v11 = vpop.eup %3687  ;;  %v3021_v38 = vadd.f32 1.0, %v3686_v20  ;;  %v3024_v47 = vmul.f32 -0.5, %v3686_v20  ;;  %v3027_v58 = vand.u32 2147483647, %v3686_v20 }
 0x58d   :  { %v3690_v13 = vpop.eup %3689  ;;  %v3005_v26 = vmul.f32 0.6931472, %v3688_v11 }
 0x58e   :  { %3693 = vlog2.f32 %v3021_v38  ;;  %v3030_v62 = vadd.f32 1.0, %v3690_v13  ;;  %v3033_v19 = vmul.f32 -0.5, %v3690_v13  ;;  %v3025_v32 = vadd.f32 1.0, %v3024_v47 }
 0x58f   :  { %v3011_v17 = vsel %vm3010_vm15, %v3008_v42, %v3005_v26  ;;  %v3036_v22 = vand.u32 2147483647, %v3690_v13  ;;  %vm3028_vm3 = vcmp.lt.f32.partialorder %v3027_v58, 0.0004427343 }
 0x590   :  { %v3051_v50 = vadd.f32 %v3011_v17, %v2795_v55  ;;  %3695 = vlog2.f32 %v3030_v62  ;;  %v3034_v10 = vadd.f32 1.0, %v3033_v19  ;;  %v3026_v29 = vmul.f32 %v3686_v20, %v3025_v32 }
 0x591   :  { %v3692_v18 = vpop.eup %3691  ;;  %vm3037_vm6 = vcmp.lt.f32.partialorder %v3036_v22, 0.0004427343 }
 0x592   :  { %v3014_v53 = vmul.f32 0.6931472, %v3692_v18  ;;  %v3067_v25 = vsel %vm2811_vm0, %v5417_v21, %v3051_v50  ;;  %v3035_v14 = vmul.f32 %v3690_v13, %v3034_v10 }
 0x593   :  { %v3083_v8 = vsel %vm2782_vm5, %v5417_v21, %v3067_v25 }
 0x594   :  { %v3020_v27 = vsel %vm3019_vm1, %v3017_v1, %v3014_v53  ;;  %3099 = vst [vmem:[%s5602_s5 + $0x60] sm:$0xff] %v3083_v8 }
 0x595   :  { %v3052_v51 = vadd.f32 %v3020_v27, %v2796_v28 }
 0x597   :  { %v3068_v33 = vsel %vm2812_vm2, %v5446_v23, %v3052_v51 }
 0x598   :  { %v3084_v45 = vsel %vm2782_vm5, %v5446_v23, %v3068_v33  ;;  %v3694_v21 = vpop.eup %3693 }
 0x599   :  { %3100 = vst [vmem:[%s5602_s5 + $0x68] sm:$0xff] %v3084_v45  ;;  %v3023_v41 = vmul.f32 0.6931472, %v3694_v21 }
 0x59a   :  { %v3696_v46 = vpop.eup %3695 }
 0x59b   :  { %v3029_v44 = vsel %vm3028_vm3, %v3026_v29, %v3023_v41  ;;  %v3032_v7 = vmul.f32 0.6931472, %v3696_v46 }
 0x59c   :  { %v3053_v15 = vadd.f32 %v3029_v44, %v2797_v9 }
 0x59d   :  { %v3038_v23 = vsel %vm3037_vm6, %v3035_v14, %v3032_v7 }
 0x59e   :  { %v3069_v30 = vsel %vm2813_vm7, %v5510_v24, %v3053_v15  ;;  %v3054_v5 = vadd.f32 %v3038_v23, %v2798_v34 }
 0x59f   :  { %v3085_v37 = vsel %vm2782_vm5, %v5510_v24, %v3069_v30 }
 0x5a0   :  { %3101 = vst [vmem:[%s5602_s5 + $0x70] sm:$0xff] %v3085_v37  ;;  %v3070_v59 = vsel %vm2814_vm4, %v5516_v39, %v3054_v5 }
 0x5a1   :  { %v3086_v43 = vsel %vm2782_vm5, %v5516_v39, %v3070_v59 }
 0x5a2   :  { %3102 = vst [vmem:[%s5602_s5 + $0x78] sm:$0xff] %v3086_v43 }

// kernel: _lambda_.2
= control target key start
LH: loop header
LB: loop body
LE: loop exit
PB: predicated region body
PF: predicated region fallthrough
CT: control target
= control target key end

     0   :  { %v9024_v1 = vmov 0   ;;  %s5848_s24 = smov 120   ;;  %vm25_vm0 = vcmask 64512   ;;  %s5855_s7 = smov 16   ;;  %s9016_s3 = inlined_call_operand.vmem [shape: bf16[128,144], index: 3, kind: input, shape index: {}]   ;;  %s9017_s1 = inlined_call_operand.vmem [shape: bf16[128,128], index: 1, kind: input, shape index: {}, may-alias: {0,1}]   ;;  %s9018_s0 = inlined_call_operand.vmem [shape: bf16[128,128], index: 0, kind: input, shape index: {}, may-alias: {0,1}]   ;;  %s9019_s2 = inlined_call_operand.vmem [shape: s8[128,128], index: 2, kind: input, shape index: {}]   ;;  %s9020_s4 = inlined_call_operand.vmem [shape: f32[1,128], index: 4, kind: input, shape index: {}]   ;;  %s9021_s5 = inlined_call_operand.vmem [shape: bf16[128,128], index: 5, kind: output, shape index: {}]  }
   0x1   :  { %v5509_v0 = vld [vmem:[%s9016_s3 + $0x4] ss:$8 sps:$4 sm:$0xff]   ;;  %523 = vmatprep.mubr.bf16.mxu1 %v9024_v1  ;;  %5417 = vset.pattern.permute.xlu1 %v9024_v1  ;;  %v5512_v3 = vld [vmem:[%s9016_s3] ss:$8 sps:$4 sm:$0xff]   ;;  %v5513_v4 = vld [vmem:[%s9016_s3 + $0x14] ss:$8 sps:$4 sm:$0xff]  }
   0x2   :  { %v5511_v2 = vld [vmem:[%s9016_s3 + $0x4] ss:$8 sps:$4 sm:$0xff]   ;;  %491 = vmatprep.subr.bf16.mxu1 %v5509_v0  ;;  %v5515_v5 = vld [vmem:[%s9016_s3 + $0x14] ss:$8 sps:$4 sm:$0xff]   ;;  %v5516_v6 = vld [vmem:[%s9016_s3 + $0x10] ss:$8 sps:$4 sm:$0xff]  }
   0x3   :  { %194 = vrot.lane.b32.xlu0 %v5511_v2, %s5848_s24  ;;  %492 = vmatpush1.bf16.msra.mxu1 %v5512_v3  ;;  %v5517_v7 = vld [vmem:[%s9016_s3 + $0x24] ss:$8 sps:$4 sm:$0xff]   ;;  %v5520_v9 = vld [vmem:[%s9016_s3 + $0x20] ss:$8 sps:$4 sm:$0xff]   ;;  %v5523_v10 = vld [vmem:[%s9016_s3 + $0x34] ss:$8 sps:$4 sm:$0xff]  }
   0x4   :  { %493 = vmatprep.subr.bf16.mxu1 %v5513_v4  ;;  %v5519_v8 = vld [vmem:[%s9016_s3 + $0x24] ss:$8 sps:$4 sm:$0xff]   ;;  %v5521_v11 = vld [vmem:[%s9016_s3 + $0x34] ss:$8 sps:$4 sm:$0xff]   ;;  %v5524_v13 = vld [vmem:[%s9016_s3 + $0x30] ss:$8 sps:$4 sm:$0xff]  }
   0x5   :  { %198 = vrot.lane.b32.xlu1 %v5519_v8, %s5848_s24  ;;  %v5527_v12 = vld [vmem:[%s9016_s3 + $0x44] ss:$8 sps:$4 sm:$0xff]   ;;  %v5531_v15 = vld [vmem:[%s9016_s3 + $0x54] ss:$8 sps:$4 sm:$0xff]   ;;  %v5528_v17 = vld [vmem:[%s9016_s3 + $0x40] ss:$8 sps:$4 sm:$0xff]  }
   0x6   :  { %v5525_v14 = vld [vmem:[%s9016_s3 + $0x44] ss:$8 sps:$4 sm:$0xff]   ;;  %v5529_v18 = vld [vmem:[%s9016_s3 + $0x54] ss:$8 sps:$4 sm:$0xff]   ;;  %v5532_v20 = vld [vmem:[%s9016_s3 + $0x50] ss:$8 sps:$4 sm:$0xff]  }
   0x7   :  { %196 = vrot.lane.b32.xlu0 %v5515_v5, %s5848_s24  ;;  %494 = vmatpush1.bf16.msra.mxu1 %v5516_v6  ;;  %v5535_v16 = vld [vmem:[%s9016_s3 + $0x64] ss:$8 sps:$4 sm:$0xff]   ;;  %v5539_v19 = vld [vmem:[%s9016_s3 + $0x74] ss:$8 sps:$4 sm:$0xff]   ;;  %v5536_v22 = vld [vmem:[%s9016_s3 + $0x60] ss:$8 sps:$4 sm:$0xff]  }
   0x8   :  { %495 = vmatprep.subr.bf16.mxu1 %v5517_v7  ;;  %v5533_v21 = vld [vmem:[%s9016_s3 + $0x64] ss:$8 sps:$4 sm:$0xff]   ;;  %v5537_v23 = vld [vmem:[%s9016_s3 + $0x74] ss:$8 sps:$4 sm:$0xff]   ;;  %v5540_v25 = vld [vmem:[%s9016_s3 + $0x70] ss:$8 sps:$4 sm:$0xff]  }
   0x9   :  { %200 = vrot.lane.b32.xlu1 %v5523_v10, %s5848_s24  ;;  %v5549_v24 = vld [vmem:[%s9018_s0] sm:$0xff]   ;;  %v5542_v27 = vld [vmem:[%s9017_s1 + $0x8] sm:$0xff]   ;;  %v5543_v28 = vld [vmem:[%s9017_s1 + $0x10] sm:$0xff]   ;;  %s5856_s8 = smov 8   ;;  %s5857_s9 = smov 104  }
   0xa   :  { %5238 = vmatprep.mubr.bf16.mxu0 %v5549_v24  ;;  %v5541_v26 = vld [vmem:[%s9017_s1] sm:$0xff]   ;;  %v5544_v29 = vld [vmem:[%s9017_s1 + $0x18] sm:$0xff]   ;;  %v5546_v31 = vld [vmem:[%s9017_s1 + $0x28] sm:$0xff]   ;;  %s5858_s10 = smov 24  }
   0xb   :  { %496 = vmatpush1.bf16.msra.mxu1 %v5520_v9  ;;  %202 = vrot.lane.b32.xlu0 %v5527_v12, %s5848_s24  ;;  %v5545_v30 = vld [vmem:[%s9017_s1 + $0x20] sm:$0xff]   ;;  %v5547_v32 = vld [vmem:[%s9017_s1 + $0x30] sm:$0xff]   ;;  %v5548_v33 = vld [vmem:[%s9017_s1 + $0x38] sm:$0xff]  }
   0xc   :  { %497 = vmatprep.subr.bf16.mxu1 %v5521_v11  ;;  %v5550_v42 = vld [vmem:[%s9018_s0 + $0x8] sm:$0xff]   ;;  %v5551_v43 = vld [vmem:[%s9018_s0 + $0x10] sm:$0xff]   ;;  %v5552_v44 = vld [vmem:[%s9018_s0 + $0x18] sm:$0xff]  }
   0xd   :  { %204 = vrot.lane.b32.xlu1 %v5531_v15, %s5848_s24  ;;  %v5553_v45 = vld [vmem:[%s9018_s0 + $0x20] sm:$0xff]   ;;  %v5554_v46 = vld [vmem:[%s9018_s0 + $0x28] sm:$0xff]   ;;  %v5555_v47 = vld [vmem:[%s9018_s0 + $0x30] sm:$0xff]  }
   0xe   :  { %v5556_v48 = vld [vmem:[%s9018_s0 + $0x38] sm:$0xff]  }
   0xf   :  { %498 = vmatpush1.bf16.msra.mxu1 %v5524_v13  ;;  %206 = vrot.lane.b32.xlu0 %v5535_v16, %s5848_s24 }
  0x10   :  { %499 = vmatprep.subr.bf16.mxu1 %v5525_v14 }
  0x11   :  { %208 = vrot.lane.b32.xlu1 %v5539_v19, %s5848_s24 }
  0x13   :  { %500 = vmatpush1.bf16.msra.mxu1 %v5528_v17 }
  0x14   :  { %501 = vmatprep.subr.bf16.mxu1 %v5529_v18 }
  0x17   :  { %502 = vmatpush1.bf16.msra.mxu1 %v5532_v20 }
  0x18   :  { %503 = vmatprep.subr.bf16.mxu1 %v5533_v21 }
  0x1b   :  { %504 = vmatpush1.bf16.msra.mxu1 %v5536_v22 }
  0x1c   :  { %505 = vmatprep.subr.bf16.mxu1 %v5537_v23 }
  0x1f   :  { %506 = vmatpush1.bf16.msra.mxu1 %v5540_v25 }
  0x22   :  { %524 = vmatmul.mubr.bf16.vlgmr.msra.gmra.mrb[0].mxu1 %v5541_v26 }
  0x23   :  { %533 = vmatprep.mubr.bf16.mxu1 %v9024_v1 }
  0x2a   :  { %534 = vmatmul.mubr.bf16.gmra.mrb[4].mxu1 %v5542_v27 }
  0x2b   :  { %543 = vmatprep.mubr.bf16.mxu1 %v9024_v1 }
  0x32   :  { %544 = vmatmul.mubr.bf16.gmra.mrb[8].mxu1 %v5543_v28 }
  0x33   :  { %553 = vmatprep.mubr.bf16.mxu1 %v9024_v1 }
  0x3a   :  { %554 = vmatmul.mubr.bf16.gmra.mrb[12].mxu1 %v5544_v29 }
  0x3b   :  { %563 = vmatprep.mubr.bf16.mxu1 %v9024_v1 }
  0x42   :  { %564 = vmatmul.mubr.bf16.gmra.mrb[16].mxu1 %v5545_v30 }
  0x43   :  { %573 = vmatprep.mubr.bf16.mxu1 %v9024_v1 }
  0x4a   :  { %574 = vmatmul.mubr.bf16.gmra.mrb[20].mxu1 %v5546_v31 }
  0x4b   :  { %583 = vmatprep.mubr.bf16.mxu1 %v9024_v1 }
  0x52   :  { %584 = vmatmul.mubr.bf16.gmra.mrb[24].mxu1 %v5547_v32 }
  0x53   :  { %593 = vmatprep.mubr.bf16.mxu1 %v9024_v1 }
  0x5a   :  { %594 = vmatmul.mubr.bf16.gmra.mrb[28].mxu1 %v5548_v33 }
  0x75   :  { %v195_v34 = vpop.permute.xlu0 %194 }
  0x76   :  { %5222 = vmatprep.subr.bf16.mxu0 %v195_v34 }
  0x77   :  { %5223 = vmatpush3.bf16.msra.mxu0 %v195_v34  ;;  %v199_v36 = vpop.permute.xlu1 %198 }
  0x79   :  { %v197_v35 = vpop.permute.xlu0 %196 }
  0x7a   :  { %5224 = vmatprep.subr.bf16.mxu0 %v197_v35 }
  0x7b   :  { %5225 = vmatpush3.bf16.msra.mxu0 %v197_v35  ;;  %v201_v37 = vpop.permute.xlu1 %200 }
  0x7c   :  { %5226 = vmatprep.subr.bf16.mxu0 %v199_v36 }
  0x7d   :  { %v203_v38 = vpop.permute.xlu0 %202 }
  0x7f   :  { %5227 = vmatpush3.bf16.msra.mxu0 %v199_v36  ;;  %v205_v39 = vpop.permute.xlu1 %204  ;;  %v9026_v36 = vmov 1  }
  0x80   :  { %5228 = vmatprep.subr.bf16.mxu0 %v201_v37 }
  0x81   :  { %v207_v40 = vpop.permute.xlu0 %206 }
  0x83   :  { %5229 = vmatpush3.bf16.msra.mxu0 %v201_v37  ;;  %v209_v41 = vpop.permute.xlu1 %208 }
  0x84   :  { %5230 = vmatprep.subr.bf16.mxu0 %v203_v38 }
  0x87   :  { %5231 = vmatpush3.bf16.msra.mxu0 %v203_v38 }
  0x88   :  { %5232 = vmatprep.subr.bf16.mxu0 %v205_v39 }
  0x8b   :  { %5233 = vmatpush3.bf16.msra.mxu0 %v205_v39  ;;  %v9022_v39 = vmov 2  }
  0x8c   :  { %5234 = vmatprep.subr.bf16.mxu0 %v207_v40 }
  0x8f   :  { %5235 = vmatpush3.bf16.msra.mxu0 %v207_v40 }
  0x90   :  { %5236 = vmatprep.subr.bf16.mxu0 %v209_v41 }
  0x93   :  { %5237 = vmatpush3.bf16.msra.mxu0 %v209_v41 }
  0x96   :  { %5239 = vmatmul.mubr.bf16.vlgmr.msra.gmra.mrb[0].mxu0 %v5550_v42 }
  0x97   :  { %5242 = vmatprep.mubr.bf16.mxu0 %v5551_v43 }
  0x9e   :  { %5243 = vmatmul.mubr.bf16.gmra.mrb[4].mxu0 %v5552_v44 }
  0x9f   :  { %5246 = vmatprep.mubr.bf16.mxu0 %v5553_v45 }
  0xa6   :  { %5247 = vmatmul.mubr.bf16.gmra.mrb[8].mxu0 %v5554_v46 }
  0xa7   :  { %5250 = vmatprep.mubr.bf16.mxu0 %v5555_v47 }
  0xae   :  { %5251 = vmatmul.mubr.bf16.gmra.mrb[12].mxu0 %v5556_v48 }
  0xf5   :  { %v525_v49 = vpop.f32.mrb[0].mxu1 }
  0xf6   :  { %v527_v50 = vpop.f32.mrb[1].mxu1 }
  0xf7   :  { %v529_v51 = vpop.f32.mrb[2].mxu1 }
  0xf8   :  { %v6026_v52 = vpack.c.bf16 %v529_v51, %v525_v49  ;;  %v531_v53 = vpop.f32.mrb[3].mxu1 }
  0xfa   :  { %9264 = vst [vmem:[#allocation6_spill] sm:$0xff] %v6026_v52  ;;  %2184 = vrot.lane.b32.xlu1 %v6026_v52, %s5848_s24  ;;  %5254 = vmatprep.subr.bf16.mxu0 %v6026_v52 }
  0xfb   :  { %5255 = vmatpush3.bf16.msra.mxu0 %v6026_v52 }
  0xfd   :  { %v535_v54 = vpop.f32.mrb[4].mxu1 }
  0xfe   :  { %v537_v55 = vpop.f32.mrb[5].mxu1 }
  0xff   :  { %v539_v56 = vpop.f32.mrb[6].mxu1 }
 0x100   :  { %v6032_v57 = vpack.c.bf16 %v539_v56, %v535_v54  ;;  %v541_v58 = vpop.f32.mrb[7].mxu1 }
 0x102   :  { %9265 = vst [vmem:[#allocation7_spill] sm:$0xff] %v6032_v57  ;;  %2186 = vrot.lane.b32.xlu0 %v6032_v57, %s5848_s24  ;;  %5256 = vmatprep.subr.bf16.mxu0 %v6032_v57 }
 0x103   :  { %5257 = vmatpush3.bf16.msra.mxu0 %v6032_v57 }
 0x105   :  { %v545_v59 = vpop.f32.mrb[8].mxu1 }
 0x106   :  { %v547_v60 = vpop.f32.mrb[9].mxu1 }
 0x107   :  { %v549_v61 = vpop.f32.mrb[10].mxu1 }
 0x108   :  { %v6038_v62 = vpack.c.bf16 %v549_v61, %v545_v59  ;;  %v551_v63 = vpop.f32.mrb[11].mxu1 }
 0x10a   :  { %9266 = vst [vmem:[#allocation8_spill] sm:$0xff] %v6038_v62  ;;  %2188 = vrot.lane.b32.xlu1 %v6038_v62, %s5848_s24  ;;  %5258 = vmatprep.subr.bf16.mxu0 %v6038_v62 }
 0x10b   :  { %5259 = vmatpush3.bf16.msra.mxu0 %v6038_v62 }
 0x10d   :  { %v555_v0 = vpop.f32.mrb[12].mxu1 }
 0x10e   :  { %v557_v2 = vpop.f32.mrb[13].mxu1 }
 0x10f   :  { %v559_v3 = vpop.f32.mrb[14].mxu1 }
 0x110   :  { %v6044_v4 = vpack.c.bf16 %v559_v3, %v555_v0  ;;  %v561_v5 = vpop.f32.mrb[15].mxu1 }
 0x112   :  { %9267 = vst [vmem:[#allocation9_spill] sm:$0xff] %v6044_v4  ;;  %2190 = vrot.lane.b32.xlu0 %v6044_v4, %s5848_s24  ;;  %5260 = vmatprep.subr.bf16.mxu0 %v6044_v4 }
 0x113   :  { %5261 = vmatpush3.bf16.msra.mxu0 %v6044_v4 }
 0x115   :  { %v565_v6 = vpop.f32.mrb[16].mxu1 }
 0x116   :  { %v567_v7 = vpop.f32.mrb[17].mxu1 }
 0x117   :  { %v569_v8 = vpop.f32.mrb[18].mxu1 }
 0x118   :  { %v6050_v9 = vpack.c.bf16 %v569_v8, %v565_v6  ;;  %v571_v10 = vpop.f32.mrb[19].mxu1 }
 0x11a   :  { %9268 = vst [vmem:[#allocation10_spill] sm:$0xff] %v6050_v9  ;;  %2192 = vrot.lane.b32.xlu1 %v6050_v9, %s5848_s24  ;;  %5262 = vmatprep.subr.bf16.mxu0 %v6050_v9 }
 0x11b   :  { %5263 = vmatpush3.bf16.msra.mxu0 %v6050_v9 }
 0x11d   :  { %v575_v11 = vpop.f32.mrb[20].mxu1 }
 0x11e   :  { %v577_v12 = vpop.f32.mrb[21].mxu1 }
 0x11f   :  { %v579_v13 = vpop.f32.mrb[22].mxu1 }
 0x120   :  { %v6056_v14 = vpack.c.bf16 %v579_v13, %v575_v11  ;;  %v6058_v15 = vpop.f32.mrb[23].mxu1 }
 0x122   :  { %9269 = vst [vmem:[#allocation11_spill] sm:$0xff] %v6056_v14  ;;  %2194 = vrot.lane.b32.xlu0 %v6056_v14, %s5848_s24  ;;  %5264 = vmatprep.subr.bf16.mxu0 %v6056_v14 }
 0x123   :  { %5265 = vmatpush3.bf16.msra.mxu0 %v6056_v14 }
 0x125   :  { %v585_v16 = vpop.f32.mrb[24].mxu1 }
 0x126   :  { %v6064_v17 = vpop.f32.mrb[25].mxu1 }
 0x127   :  { %v589_v18 = vpop.f32.mrb[26].mxu1 }
 0x128   :  { %v6066_v19 = vpack.c.bf16 %v589_v18, %v585_v16  ;;  %v6068_v20 = vpop.f32.mrb[27].mxu1  ;;  %v6168_v18 = vld [vmem:[%s9019_s2 + $0x4] sm:$0xff]  }
 0x12a   :  { %9270 = vst [vmem:[#allocation12_spill] sm:$0xff] %v6066_v19  ;;  %2196 = vrot.lane.b32.xlu1 %v6066_v19, %s5848_s24  ;;  %5266 = vmatprep.subr.bf16.mxu0 %v6066_v19 }
 0x12b   :  { %5267 = vmatpush3.bf16.msra.mxu0 %v6066_v19 }
 0x12d   :  { %v595_v21 = vpop.f32.mrb[28].mxu1 }
 0x12e   :  { %v6074_v22 = vpop.f32.mrb[29].mxu1 }
 0x12f   :  { %v599_v23 = vpop.f32.mrb[30].mxu1 }
 0x130   :  { %v6076_v24 = vpack.c.bf16 %v599_v23, %v595_v21  ;;  %v6078_v25 = vpop.f32.mrb[31].mxu1  ;;  %v5116_v23 = vunpack.c.0.s8 %v6168_v18 }
 0x132   :  { %9271 = vst [vmem:[#allocation13_spill] sm:$0xff] %v6076_v24  ;;  %2198 = vrot.lane.b32.xlu0 %v6076_v24, %s5848_s24  ;;  %5268 = vmatprep.subr.bf16.mxu0 %v6076_v24 }
 0x133   :  { %5269 = vmatpush3.bf16.msra.mxu0 %v6076_v24 }
 0x150   :  { %612 = vxpose.xlu0.b32.start [1/16] (narrow) %v527_v50, 8 }
 0x154   :  { %613 = vxpose.xlu0.b32.cont [2/16] (narrow) %v531_v53, 8 }
 0x158   :  { %614 = vxpose.xlu0.b32.cont [3/16] (narrow) %v537_v55, 8 }
 0x15c   :  { %615 = vxpose.xlu0.b32.cont [4/16] (narrow) %v541_v58, 8 }
 0x160   :  { %616 = vxpose.xlu0.b32.cont [5/16] (narrow) %v547_v60, 8 }
 0x164   :  { %617 = vxpose.xlu0.b32.cont [6/16] (narrow) %v551_v63, 8 }
 0x168   :  { %618 = vxpose.xlu0.b32.cont [7/16] (narrow) %v557_v2, 8 }
 0x169   :  { %v5240_v26 = vpop.f32.mrb[0].mxu0 }
 0x16a   :  { %317 = vst.msk [vmem:[#allocation2 + $0x10] sm:$0xff] %vm25_vm0, %v5240_v26  ;;  %v252_v27 = vpop.f32.mrb[1].mxu0 }
 0x16b   :  { %315 = vst.msk [vmem:[#allocation2] sm:$0xff] %vm25_vm0, %v252_v27  ;;  %v5241_v28 = vpop.f32.mrb[2].mxu0 }
 0x16c   :  { %318 = vst.msk [vmem:[#allocation2 + $0x18] sm:$0xff] %vm25_vm0, %v5241_v28  ;;  %v255_v29 = vpop.f32.mrb[3].mxu0  ;;  %v6088_v30 = vpop.permute.xlu1 %2184  ;;  %619 = vxpose.xlu0.b32.cont [8/16] (narrow) %v561_v5, 8  ;;  %v6183_v28 = vcvt.s32.f32 %v5116_v23 }
 0x16d   :  { %316 = vst.msk [vmem:[#allocation2 + $0x8] sm:$0xff] %vm25_vm0, %v255_v29  ;;  %5286 = vmatprep.subr.bf16.mxu0 %v6088_v30  ;;  %v5111_v29 = vld [vmem:[%s9019_s2] sm:$0xf]  }
 0x16e   :  { %9278 = vst [vmem:[#allocation20_spill] sm:$0xff] %v6183_v28 }
 0x170   :  { %620 = vxpose.xlu0.b32.cont [9/16] (narrow) %v567_v7, 8 }
 0x171   :  { %v726_v31 = vld [vmem:[#allocation2 + $0x10] sm:$0xff]  ;;  %v5244_v32 = vpop.f32.mrb[4].mxu0 }
 0x172   :  { %752 = vperm.xlu1 %5417, %v726_v31   ;;  %321 = vst.msk [vmem:[#allocation2 + $0x30] sm:$0xff] %vm25_vm0, %v5244_v32  ;;  %v268_v33 = vpop.f32.mrb[5].mxu0  ;;  %v724_v42 = vld [vmem:[#allocation2] sm:$0xff] }
 0x173   :  { %319 = vst.msk [vmem:[#allocation2 + $0x20] sm:$0xff] %vm25_vm0, %v268_v33  ;;  %v5245_v34 = vpop.f32.mrb[6].mxu0  ;;  %v727_v47 = vld [vmem:[#allocation2 + $0x18] sm:$0xff] }
 0x174   :  { %322 = vst.msk [vmem:[#allocation2 + $0x38] sm:$0xff] %vm25_vm0, %v5245_v34  ;;  %v271_v35 = vpop.f32.mrb[7].mxu0  ;;  %621 = vxpose.xlu0.b32.cont [10/16] (narrow) %v571_v10, 8  ;;  %v725_v48 = vld [vmem:[#allocation2 + $0x8] sm:$0xff]  ;;  %v6148_v5 = vpop.permute.xlu0 %2186  ;;  %v820_v10 = vlaneseq  ;;  %v5016_v34 = vadd.f32 -1.0, %v6183_v28 }
 0x175   :  { %320 = vst.msk [vmem:[#allocation2 + $0x28] sm:$0xff] %vm25_vm0, %v271_v35  ;;  %v5112_v35 = vunpack.c.0.s8 %v5111_v29 }
 0x176   :  { %5418 = vset.pattern.permute.xlu1 %v9026_v36  ;;  %v6157_v13 = vshrl.u32 %v820_v10, 7  ;;  %v6226_v10 = vld [vmem:[%s9019_s2 + $0xc] sm:$0xff]  }
 0x177   :  { %1551 = vperm.xlu1 %5418, %v726_v31  }
 0x178   :  { %622 = vxpose.xlu0.b32.cont [11/16] (narrow) %v577_v12, 8  ;;  %9275 = vst [vmem:[#allocation17_spill] sm:$0xff] %v6157_v13  ;;  %v1621_v16 = vsub.s32 1, %v6157_v13  ;;  %v2516_v21 = vsub.s32 2, %v6157_v13 }
 0x179   :  { %v5248_v37 = vpop.f32.mrb[8].mxu0  ;;  %v730_v49 = vld [vmem:[#allocation2 + $0x30] sm:$0xff] }
 0x17a   :  { %325 = vst.msk [vmem:[#allocation2 + $0x50] sm:$0xff] %vm25_vm0, %v5248_v37  ;;  %v284_v38 = vpop.f32.mrb[9].mxu0  ;;  %v728_v50 = vld [vmem:[#allocation2 + $0x20] sm:$0xff] }
 0x17b   :  { %5419 = vset.pattern.permute.xlu1 %v9022_v39  ;;  %323 = vst.msk [vmem:[#allocation2 + $0x40] sm:$0xff] %vm25_vm0, %v284_v38  ;;  %v5249_v40 = vpop.f32.mrb[10].mxu0  ;;  %v731_v51 = vld [vmem:[#allocation2 + $0x38] sm:$0xff] }
 0x17c   :  { %2446 = vperm.xlu1 %5419, %v726_v31   ;;  %326 = vst.msk [vmem:[#allocation2 + $0x58] sm:$0xff] %vm25_vm0, %v5249_v40  ;;  %v287_v41 = vpop.f32.mrb[11].mxu0  ;;  %623 = vxpose.xlu0.b32.cont [12/16] (narrow) %v6058_v15, 8  ;;  %v729_v53 = vld [vmem:[#allocation2 + $0x28] sm:$0xff]  ;;  %v6136_v59 = vpop.permute.xlu1 %2188 }
 0x17d   :  { %324 = vst.msk [vmem:[#allocation2 + $0x48] sm:$0xff] %vm25_vm0, %v287_v41 }
 0x180   :  { %5420 = vset.pattern.permute.xlu1 %v9024_v1  ;;  %624 = vxpose.xlu0.b32.cont [13/16] (narrow) %v6064_v17, 8 }
 0x181   :  { %742 = vperm.xlu1 %5420, %v724_v42   ;;  %v5252_v43 = vpop.f32.mrb[12].mxu0  ;;  %v734_v54 = vld [vmem:[#allocation2 + $0x50] sm:$0xff] }
 0x182   :  { %329 = vst.msk [vmem:[#allocation2 + $0x70] sm:$0xff] %vm25_vm0, %v5252_v43  ;;  %v300_v44 = vpop.f32.mrb[13].mxu0  ;;  %v732_v55 = vld [vmem:[#allocation2 + $0x40] sm:$0xff]  ;;  %v6196_v43 = vcvt.s32.f32 %v5112_v35 }
 0x183   :  { %327 = vst.msk [vmem:[#allocation2 + $0x60] sm:$0xff] %vm25_vm0, %v300_v44  ;;  %v5253_v45 = vpop.f32.mrb[14].mxu0  ;;  %v735_v56 = vld [vmem:[#allocation2 + $0x58] sm:$0xff]  ;;  %v5117_v44 = vunpack.c.1.s8 %v6168_v18 }
 0x184   :  { %330 = vst.msk [vmem:[#allocation2 + $0x78] sm:$0xff] %vm25_vm0, %v5253_v45  ;;  %v303_v46 = vpop.f32.mrb[15].mxu0  ;;  %625 = vxpose.xlu0.b32.cont [14/16] (narrow) %v6068_v20, 8  ;;  %v1532_v58 = vld [vmem:[#allocation2 + $0x48] sm:$0xff]  ;;  %v6151_v7 = vpop.permute.xlu0 %2190  ;;  %v822_v45 = vsub.s32 0, %v6157_v13 }
 0x185   :  { %5422 = vset.pattern.permute.xlu1 %v9022_v39  ;;  %328 = vst.msk [vmem:[#allocation2 + $0x68] sm:$0xff] %vm25_vm0, %v303_v46 }
 0x186   :  { %2436 = vperm.xlu1 %5422, %v724_v42  }
 0x188   :  { %626 = vxpose.xlu0.b32.cont [15/16] (narrow) %v6074_v22, 8 }
 0x189   :  { %v2432_v60 = vld [vmem:[#allocation2 + $0x70] sm:$0xff] }
 0x18a   :  { %5423 = vset.pattern.permute.xlu1 %v9024_v1  ;;  %v2430_v63 = vld [vmem:[#allocation2 + $0x60] sm:$0xff] }
 0x18b   :  { %757 = vperm.xlu1 %5423, %v727_v47   ;;  %v1538_v2 = vld [vmem:[#allocation2 + $0x78] sm:$0xff] }
 0x18c   :  { %627 = vxpose.xlu0.b32.end [16/16] (narrow) %v6078_v25, 8  ;;  %v6139_v61 = vpop.permute.xlu1 %2192  ;;  %v1536_v6 = vld [vmem:[#allocation2 + $0x68] sm:$0xff] }
 0x18d   :  { %9272 = vst [vmem:[#allocation14_spill] sm:$0xff] %v6139_v61 }
 0x18f   :  { %5424 = vset.pattern.permute.xlu1 %v9022_v39 }
 0x190   :  { %2451 = vperm.xlu1 %5424, %v727_v47  }
 0x194   :  { %5425 = vset.pattern.permute.xlu1 %v9024_v1  ;;  %v6155_v11 = vpop.permute.xlu0 %2194 }
 0x195   :  { %747 = vperm.xlu1 %5425, %v725_v48   ;;  %9274 = vst [vmem:[#allocation16_spill] sm:$0xff] %v6155_v11 }
 0x199   :  { %5426 = vset.pattern.permute.xlu1 %v9026_v36 }
 0x19a   :  { %1546 = vperm.xlu1 %5426, %v725_v48  }
 0x19c   :  { %v6142_v0 = vpop.permute.xlu1 %2196 }
 0x19d   :  { %9273 = vst [vmem:[#allocation15_spill] sm:$0xff] %v6142_v0 }
 0x19e   :  { %5428 = vset.pattern.permute.xlu1 %v9024_v1 }
 0x19f   :  { %772 = vperm.xlu1 %5428, %v730_v49  }
 0x1a3   :  { %5429 = vset.pattern.permute.xlu1 %v9026_v36 }
 0x1a4   :  { %1571 = vperm.xlu1 %5429, %v730_v49   ;;  %v6160_v15 = vpop.permute.xlu0 %2198 }
 0x1a5   :  { %9276 = vst [vmem:[#allocation18_spill] sm:$0xff] %v6160_v15 }
 0x1a8   :  { %5430 = vset.pattern.permute.xlu1 %v9024_v1 }
 0x1a9   :  { %762 = vperm.xlu1 %5430, %v728_v50  }
 0x1ad   :  { %5431 = vset.pattern.permute.xlu1 %v9026_v36 }
 0x1ae   :  { %1561 = vperm.xlu1 %5431, %v728_v50  }
 0x1b2   :  { %5432 = vset.pattern.permute.xlu1 %v9024_v1 }
 0x1b3   :  { %777 = vperm.xlu1 %5432, %v731_v51  }
 0x1b5   :  { %5421 = vset.pattern.permute.xlu0 %v9026_v36 }
 0x1b6   :  { %1541 = vperm.xlu0 %5421, %v724_v42   ;;  %v6194_v42 = vmul.f32 1e+30, %v5016_v34 }
 0x1b7   :  { %5434 = vset.pattern.permute.xlu1 %v9022_v39 }
 0x1b8   :  { %2471 = vperm.xlu1 %5434, %v731_v51   ;;  %9279 = vst [vmem:[#allocation21_spill] sm:$0xff] %v6194_v42 }
 0x1ba   :  { %1556 = vperm.xlu0 %5421, %v727_v47   ;;  %v5113_v47 = vunpack.c.1.s8 %v5111_v29  ;;  %v5124_v29 = vunpack.c.0.s8 %v6226_v10 }
 0x1bc   :  { %5435 = vset.pattern.permute.xlu1 %v9024_v1 }
 0x1bd   :  { %767 = vperm.xlu1 %5435, %v729_v53  }
 0x1be   :  { %5427 = vset.pattern.permute.xlu0 %v9022_v39 }
 0x1bf   :  { %2441 = vperm.xlu0 %5427, %v725_v48  }
 0x1c1   :  { %5436 = vset.pattern.permute.xlu1 %v9022_v39 }
 0x1c2   :  { %2461 = vperm.xlu1 %5436, %v729_v53  }
 0x1c3   :  { %2466 = vperm.xlu0 %5427, %v730_v49  }
 0x1c6   :  { %5437 = vset.pattern.permute.xlu1 %v9024_v1 }
 0x1c7   :  { %792 = vperm.xlu1 %5437, %v734_v54   ;;  %2456 = vperm.xlu0 %5427, %v728_v50  }
 0x1cb   :  { %5438 = vset.pattern.permute.xlu1 %v9026_v36  ;;  %5433 = vset.pattern.permute.xlu0 %v9026_v36 }
 0x1cc   :  { %1591 = vperm.xlu1 %5438, %v734_v54   ;;  %1576 = vperm.xlu0 %5433, %v731_v51  }
 0x1d0   :  { %5440 = vset.pattern.permute.xlu1 %v9024_v1  ;;  %1566 = vperm.xlu0 %5433, %v729_v53   ;;  %v6170_v20 = vpop.trf.xlu0  ;;  %v5014_v53 = vadd.f32 -1.0, %v6196_v43 }
 0x1d1   :  { %782 = vperm.xlu1 %5440, %v732_v55   ;;  %9277 = vst [vmem:[#allocation19_spill] sm:$0xff] %v6170_v20  ;;  %v6175_v22 = vrot.slane %v6170_v20, %v1621_v16  ;;  %v6179_v26 = vrot.slane %v6170_v20, %v2516_v21 }
 0x1d4   :  { %5439 = vset.pattern.permute.xlu0 %v9022_v39 }
 0x1d5   :  { %5441 = vset.pattern.permute.xlu1 %v9026_v36  ;;  %2486 = vperm.xlu0 %5439, %v734_v54   ;;  %v6207_v54 = vcvt.s32.f32 %v5117_v44 }
 0x1d6   :  { %1581 = vperm.xlu1 %5441, %v732_v55  }
 0x1d9   :  { %2476 = vperm.xlu0 %5439, %v732_v55   ;;  %v6210_v55 = vrot.slane %v6170_v20, %v822_v45 }
 0x1da   :  { %5442 = vset.pattern.permute.xlu1 %v9024_v1 }
 0x1db   :  { %797 = vperm.xlu1 %5442, %v735_v56  }
 0x1dd   :  { %5443 = vset.pattern.permute.xlu0 %v9026_v36 }
 0x1de   :  { %1596 = vperm.xlu0 %5443, %v735_v56  }
 0x1df   :  { %5444 = vset.pattern.permute.xlu1 %v9022_v39 }
 0x1e0   :  { %2491 = vperm.xlu1 %5444, %v735_v56  }
 0x1e2   :  { %1586 = vperm.xlu0 %5443, %v1532_v58  }
 0x1e4   :  { %5445 = vset.pattern.permute.xlu1 %v9024_v1 }
 0x1e5   :  { %787 = vperm.xlu1 %5445, %v1532_v58  }
 0x1e6   :  { %5449 = vset.pattern.permute.xlu0 %v9022_v39 }
 0x1e7   :  { %2506 = vperm.xlu0 %5449, %v2432_v60  }
 0x1e9   :  { %5446 = vset.pattern.permute.xlu1 %v9022_v39 }
 0x1ea   :  { %2481 = vperm.xlu1 %5446, %v1532_v58   ;;  %v6215_v58 = vcvt.s32.f32 %v5113_v47 }
 0x1eb   :  { %2496 = vperm.xlu0 %5449, %v2430_v63  }
 0x1ec   :  { %9282 = vst [vmem:[#allocation24_spill] sm:$0xff] %v6215_v58  ;;  %v5015_v21 = vadd.f32 -1.0, %v6215_v58 }
 0x1ee   :  { %5447 = vset.pattern.permute.xlu1 %v9024_v1  ;;  %v6242_v35 = vmul.f32 1e+30, %v5015_v21  ;;  %v5851_v21 = vmov -1e+30  }
 0x1ef   :  { %812 = vperm.xlu1 %5447, %v2432_v60   ;;  %5453 = vset.pattern.permute.xlu0 %v9026_v36  ;;  %27 = vst.msk [vmem:[#allocation3 + $0x8] sm:$0xff] %vm25_vm0, %v5851_v21  ;;  %26 = vst.msk [vmem:[#allocation3] sm:$0xff] %vm25_vm0, %v5851_v21 }
 0x1f0   :  { %1616 = vperm.xlu0 %5453, %v1538_v2   ;;  %9287 = vst [vmem:[#allocation29_spill] sm:$0xff] %v6242_v35  ;;  %28 = vst.msk [vmem:[#allocation3 + $0x10] sm:$0xff] %vm25_vm0, %v5851_v21 }
 0x1f1   :  { %v6146_v3 = vpop.permute.xlu1 %752  ;;  %29 = vst.msk [vmem:[#allocation3 + $0x18] sm:$0xff] %vm25_vm0, %v5851_v21  ;;  %30 = vst.msk [vmem:[#allocation3 + $0x20] sm:$0xff] %vm25_vm0, %v5851_v21 }
 0x1f2   :  { %31 = vst.msk [vmem:[#allocation3 + $0x28] sm:$0xff] %vm25_vm0, %v5851_v21  ;;  %32 = vst.msk [vmem:[#allocation3 + $0x30] sm:$0xff] %vm25_vm0, %v5851_v21 }
 0x1f3   :  { %5448 = vset.pattern.permute.xlu1 %v9026_v36  ;;  %33 = vst.msk [vmem:[#allocation3 + $0x38] sm:$0xff] %vm25_vm0, %v5851_v21  ;;  %34 = vst.msk [vmem:[#allocation3 + $0x40] sm:$0xff] %vm25_vm0, %v5851_v21 }
 0x1f4   :  { %1611 = vperm.xlu1 %5448, %v2432_v60   ;;  %1606 = vperm.xlu0 %5453, %v1536_v6   ;;  %35 = vst.msk [vmem:[#allocation3 + $0x48] sm:$0xff] %vm25_vm0, %v5851_v21  ;;  %36 = vst.msk [vmem:[#allocation3 + $0x50] sm:$0xff] %vm25_vm0, %v5851_v21 }
 0x1f5   :  { %37 = vst.msk [vmem:[#allocation3 + $0x58] sm:$0xff] %vm25_vm0, %v5851_v21  ;;  %38 = vst.msk [vmem:[#allocation3 + $0x60] sm:$0xff] %vm25_vm0, %v5851_v21 }
 0x1f6   :  { %v1552_v8 = vpop.permute.xlu1 %1551  ;;  %39 = vst.msk [vmem:[#allocation3 + $0x68] sm:$0xff] %vm25_vm0, %v5851_v21  ;;  %40 = vst.msk [vmem:[#allocation3 + $0x70] sm:$0xff] %vm25_vm0, %v5851_v21 }
 0x1f7   :  { %v1625_v27 = vadd.f32 %v6175_v22, %v1552_v8  ;;  %v5017_v8 = vadd.f32 -1.0, %v6207_v54  ;;  %41 = vst.msk [vmem:[#allocation3 + $0x78] sm:$0xff] %vm25_vm0, %v5851_v21 }
 0x1f8   :  { %5450 = vset.pattern.permute.xlu1 %v9024_v1  ;;  %5458 = vset.pattern.permute.xlu0 %v9024_v1 }
 0x1f9   :  { %802 = vperm.xlu1 %5450, %v2430_v63   ;;  %v1657_v32 = vmul.f32 0.2, %v1625_v27  ;;  %vm1641_vm1 = vcmp.gt.f32.partialorder %v1625_v27, 0.0 }
 0x1fb   :  { %v2447_v12 = vpop.permute.xlu1 %2446  ;;  %v1673_v41 = vsel %vm1641_vm1, %v1625_v27, %v1657_v32  ;;  %v6235_v32 = vmul.f32 1e+30, %v5017_v8 }
 0x1fc   :  { %v2520_v33 = vadd.f32 %v6179_v26, %v2447_v12  ;;  %v6202_v46 = vadd.f32 %v1673_v41, %v6194_v42 }
 0x1fd   :  { %5451 = vset.pattern.permute.xlu1 %v9026_v36  ;;  %9285 = vst [vmem:[#allocation27_spill] sm:$0xff] %v6235_v32 }
 0x1fe   :  { %1601 = vperm.xlu1 %5451, %v2430_v63   ;;  %v2552_v37 = vmul.f32 0.2, %v2520_v33  ;;  %vm2536_vm2 = vcmp.gt.f32.partialorder %v2520_v33, 0.0  ;;  %9280 = vst [vmem:[#allocation22_spill] sm:$0xff] %v6202_v46 }
 0x200   :  { %v6163_v17 = vpop.permute.xlu1 %742  ;;  %v2568_v50 = vsel %vm2536_vm2, %v2520_v33, %v2552_v37 }
 0x201   :  { %v6213_v56 = vadd.f32 %v2568_v50, %v6194_v42 }
 0x202   :  { %5452 = vset.pattern.permute.xlu1 %v9024_v1 }
 0x203   :  { %817 = vperm.xlu1 %5452, %v1538_v2   ;;  %9281 = vst [vmem:[#allocation23_spill] sm:$0xff] %v6213_v56 }
 0x205   :  { %v2437_v25 = vpop.permute.xlu1 %2436 }
 0x206   :  { %v2518_v38 = vadd.f32 %v6179_v26, %v2437_v25 }
 0x207   :  { %5454 = vset.pattern.permute.xlu1 %v9022_v39 }
 0x208   :  { %2511 = vperm.xlu1 %5454, %v1538_v2   ;;  %v2550_v48 = vmul.f32 0.2, %v2518_v38  ;;  %vm2534_vm3 = vcmp.gt.f32.partialorder %v2518_v38, 0.0 }
 0x20a   :  { %v6188_v31 = vpop.permute.xlu1 %757  ;;  %v2566_v2 = vsel %vm2534_vm3, %v2518_v38, %v2550_v48 }
 0x20b   :  { %v827_v21 = vadd.f32 %v6210_v55, %v6188_v31  ;;  %v5121_v31 = vunpack.c.3.s8 %v6168_v18 }
 0x20c   :  { %5455 = vset.pattern.permute.xlu1 %v9024_v1 }
 0x20d   :  { %807 = vperm.xlu1 %5455, %v1536_v6   ;;  %vm843_vm13 = vcmp.gt.f32.partialorder %v827_v21, 0.0  ;;  %v6326_v13 = vcvt.s32.f32 %v5121_v31 }
 0x20f   :  { %v2452_v40 = vpop.permute.xlu1 %2451  ;;  %9299 = vst [vmem:[#allocation41_spill] sm:$0xff] %v6326_v13 }
 0x210   :  { %v2521_v49 = vadd.f32 %v6179_v26, %v2452_v40  ;;  %v6244_v40 = vcvt.s32.f32 %v5124_v29 }
 0x211   :  { %5456 = vset.pattern.permute.xlu1 %v9022_v39 }
 0x212   :  { %2501 = vperm.xlu1 %5456, %v1536_v6   ;;  %v2553_v60 = vmul.f32 0.2, %v2521_v49  ;;  %v6220_v6 = vmul.f32 1e+30, %v5014_v53  ;;  %vm2537_vm4 = vcmp.gt.f32.partialorder %v2521_v49, 0.0  ;;  %9288 = vst [vmem:[#allocation30_spill] sm:$0xff] %v6244_v40 }
 0x213   :  { %1723 = vmax.xlane.f32.xlu0 %v6202_v46  ;;  %v5020_v47 = vadd.f32 -1.0, %v6244_v40 }
 0x214   :  { %v748_v51 = vpop.permute.xlu1 %747  ;;  %9283 = vst [vmem:[#allocation25_spill] sm:$0xff] %v6220_v6  ;;  %v6229_v16 = vadd.f32 %v2566_v2, %v6220_v6  ;;  %v2569_v27 = vsel %vm2537_vm4, %v2521_v49, %v2553_v60  ;;  %v5120_v49 = vunpack.c.2.s8 %v6168_v18  ;;  %v826_v2 = vadd.f32 %v6210_v55, %v6146_v3 }
 0x215   :  { %v825_v63 = vadd.f32 %v6210_v55, %v748_v51  ;;  %v6240_v34 = vadd.f32 %v2569_v27, %v6235_v32  ;;  %v6257_v53 = vmul.f32 1e+30, %v5020_v47 }
 0x216   :  { %5457 = vset.pattern.permute.xlu1 %v9024_v1  ;;  %9284 = vst [vmem:[#allocation26_spill] sm:$0xff] %v6229_v16  ;;  %v858_v3 = vmul.f32 0.2, %v826_v2  ;;  %vm842_vm8 = vcmp.gt.f32.partialorder %v826_v2, 0.0 }
 0x217   :  { %2618 = vmax.xlane.f32.xlu0 %v6213_v56  ;;  %v857_v23 = vmul.f32 0.2, %v825_v63  ;;  %vm841_vm5 = vcmp.gt.f32.partialorder %v825_v63, 0.0  ;;  %9286 = vst [vmem:[#allocation28_spill] sm:$0xff] %v6240_v34  ;;  %9290 = vst [vmem:[#allocation32_spill] sm:$0xff] %v6257_v53 }
 0x218   :  { %v874_v47 = vsel %vm842_vm8, %v826_v2, %v858_v3 }
 0x219   :  { %v1547_v12 = vpop.permute.xlu1 %1546  ;;  %v873_v38 = vsel %vm841_vm5, %v825_v63, %v857_v23  ;;  %v824_v23 = vadd.f32 %v6210_v55, %v6163_v17 }
 0x21a   :  { %v1624_v25 = vadd.f32 %v6175_v22, %v1547_v12  ;;  %v6248_v41 = vadd.f32 %v873_v38, %v6242_v35  ;;  %v6267_v12 = vcvt.s32.f32 %v5120_v49 }
 0x21b   :  { %2614 = vmax.xlane.f32.xlu0 %v6229_v16  ;;  %vm840_vm10 = vcmp.gt.f32.partialorder %v824_v23, 0.0 }
 0x21c   :  { %v1656_v37 = vmul.f32 0.2, %v1624_v25  ;;  %vm1640_vm6 = vcmp.gt.f32.partialorder %v1624_v25, 0.0  ;;  %9292 = vst [vmem:[#allocation34_spill] sm:$0xff] %v6267_v12  ;;  %v5018_v27 = vadd.f32 -1.0, %v6267_v12  ;;  %v6769_v12 = vld [vmem:[#allocation3 + $0x28] sm:$0xff] }
 0x21e   :  { %v6237_v33 = vpop.permute.xlu1 %772  ;;  %v1672_v45 = vsel %vm1640_vm6, %v1624_v25, %v1656_v37  ;;  %v5125_v37 = vunpack.c.1.s8 %v6226_v10 }
 0x21f   :  { %2620 = vmax.xlane.f32.xlu0 %v6240_v34  ;;  %v6255_v51 = vadd.f32 %v1672_v45, %v6242_v35  ;;  %v6291_v45 = vmul.f32 1e+30, %v5018_v27 }
 0x221   :  { %9289 = vst [vmem:[#allocation31_spill] sm:$0xff] %v6255_v51  ;;  %9293 = vst [vmem:[#allocation35_spill] sm:$0xff] %v6291_v45 }
 0x223   :  { %v1572_v44 = vpop.permute.xlu1 %1571  ;;  %922 = vmax.xlane.f32.xlu0 %v6248_v41 }
 0x224   :  { %v1629_v48 = vadd.f32 %v6175_v22, %v1572_v44  ;;  %v856_v44 = vmul.f32 0.2, %v824_v23 }
 0x226   :  { %v1661_v50 = vmul.f32 0.2, %v1629_v48  ;;  %vm1645_vm7 = vcmp.gt.f32.partialorder %v1629_v48, 0.0 }
 0x227   :  { %1721 = vmax.xlane.f32.xlu0 %v6255_v51 }
 0x228   :  { %v6259_v60 = vpop.permute.xlu1 %762  ;;  %v1677_v63 = vsel %vm1645_vm7, %v1629_v48, %v1661_v50  ;;  %v6298_v50 = vcvt.s32.f32 %v5125_v37 }
 0x229   :  { %v6265_v8 = vadd.f32 %v1677_v63, %v6257_v53  ;;  %v6301_v63 = vadd.f32 %v874_v47, %v6194_v42  ;;  %v859_v47 = vmul.f32 0.2, %v827_v21 }
 0x22a   :  { %9295 = vst [vmem:[#allocation37_spill] sm:$0xff] %v6298_v50 }
 0x22b   :  { %9291 = vst [vmem:[#allocation33_spill] sm:$0xff] %v6265_v8  ;;  %1731 = vmax.xlane.f32.xlu0 %v6265_v8  ;;  %v875_v20 = vsel %vm843_vm13, %v827_v21, %v859_v47  ;;  %v6353_v21 = vld [vmem:[%s9019_s2 + $0x14] sm:$0xff]  }
 0x22c   :  { %v5133_v19 = vunpack.c.1.s8 %v6353_v21 }
 0x22d   :  { %v1562_v25 = vpop.permute.xlu1 %1561 }
 0x22e   :  { %v1627_v29 = vadd.f32 %v6175_v22, %v1562_v25  ;;  %v872_v25 = vsel %vm840_vm10, %v824_v23, %v856_v44 }
 0x230   :  { %v1659_v38 = vmul.f32 0.2, %v1627_v29  ;;  %vm1643_vm9 = vcmp.gt.f32.partialorder %v1627_v29, 0.0 }
 0x232   :  { %v6293_v48 = vpop.permute.xlu1 %777  ;;  %v1675_v49 = vsel %vm1643_vm9, %v1627_v29, %v1659_v38  ;;  %v5021_v29 = vadd.f32 -1.0, %v6298_v50  ;;  %v6311_v38 = vadd.f32 %v872_v25, %v6220_v6 }
 0x233   :  { %v6296_v17 = vadd.f32 %v1675_v49, %v6291_v45 }
 0x234   :  { %v6316_v1 = vmul.f32 1e+30, %v5021_v29  ;;  %v830_v29 = vadd.f32 %v6210_v55, %v6237_v33 }
 0x235   :  { %9294 = vst [vmem:[#allocation36_spill] sm:$0xff] %v6296_v17  ;;  %1727 = vmax.xlane.f32.xlu0 %v6296_v17  ;;  %v1542_v27 = vpop.permute.xlu0 %1541 }
 0x236   :  { %924 = vmax.xlane.f32.xlu1 %v6301_v63  ;;  %v1623_v2 = vadd.f32 %v6175_v22, %v1542_v27  ;;  %9296 = vst [vmem:[#allocation38_spill] sm:$0xff] %v6316_v1  ;;  %v862_v33 = vmul.f32 0.2, %v830_v29  ;;  %vm846_vm2 = vcmp.gt.f32.partialorder %v830_v29, 0.0 }
 0x237   :  { %v2472_v3 = vpop.permute.xlu1 %2471 }
 0x238   :  { %v2525_v37 = vadd.f32 %v6179_v26, %v2472_v3  ;;  %v1655_v49 = vmul.f32 0.2, %v1623_v2  ;;  %vm1639_vm11 = vcmp.gt.f32.partialorder %v1623_v2, 0.0 }
 0x239   :  { %v1557_v23 = vpop.permute.xlu0 %1556 }
 0x23a   :  { %v2557_v39 = vmul.f32 0.2, %v2525_v37  ;;  %920 = vmax.xlane.f32.xlu1 %v6311_v38  ;;  %vm2541_vm12 = vcmp.gt.f32.partialorder %v2525_v37, 0.0  ;;  %v1626_v44 = vadd.f32 %v6175_v22, %v1557_v23  ;;  %v1671_v27 = vsel %vm1639_vm11, %v1623_v2, %v1655_v49 }
 0x23b   :  { %v6321_v25 = vadd.f32 %v1671_v27, %v6220_v6  ;;  %v5852_v2 = vmov 0.0   ;;  %v5019_v49 = vadd.f32 -1.0, %v6326_v13 }
 0x23c   :  { %v6318_v3 = vpop.permute.xlu1 %767  ;;  %v2573_v36 = vsel %vm2541_vm12, %v2525_v37, %v2557_v39  ;;  %v1658_v42 = vmul.f32 0.2, %v1626_v44  ;;  %vm1642_vm14 = vcmp.gt.f32.partialorder %v1626_v44, 0.0  ;;  %60 = vst [vmem:[#allocation5 + $0x10] sm:$0xff] %v5852_v2  ;;  %42 = vst.msk [vmem:[#allocation4] sm:$0xff] %vm25_vm0, %v5852_v2  ;;  %v6348_v39 = vadd.f32 %v875_v20, %v6235_v32 }
 0x23d   :  { %9297 = vst [vmem:[#allocation39_spill] sm:$0xff] %v6321_v25  ;;  %v6324_v18 = vadd.f32 %v2573_v36, %v6316_v1  ;;  %43 = vst.msk [vmem:[#allocation4 + $0x8] sm:$0xff] %vm25_vm0, %v5852_v2 }
 0x23e   :  { %1719 = vmax.xlane.f32.xlu1 %v6321_v25  ;;  %v2442_v23 = vpop.permute.xlu0 %2441  ;;  %44 = vst.msk [vmem:[#allocation4 + $0x10] sm:$0xff] %vm25_vm0, %v5852_v2  ;;  %45 = vst.msk [vmem:[#allocation4 + $0x18] sm:$0xff] %vm25_vm0, %v5852_v2  ;;  %v1674_v47 = vsel %vm1642_vm14, %v1626_v44, %v1658_v42  ;;  %v6366_v42 = vmul.f32 1e+30, %v5019_v49 }
 0x23f   :  { %9298 = vst [vmem:[#allocation40_spill] sm:$0xff] %v6324_v18  ;;  %2628 = vmax.xlane.f32.xlu0 %v6324_v18  ;;  %46 = vst.msk [vmem:[#allocation4 + $0x20] sm:$0xff] %vm25_vm0, %v5852_v2  ;;  %v2519_v36 = vadd.f32 %v6179_v26, %v2442_v23  ;;  %v5132_v23 = vunpack.c.0.s8 %v6353_v21  ;;  %v6363_v6 = vadd.f32 %v1674_v47, %v6235_v32 }
 0x240   :  { %47 = vst.msk [vmem:[#allocation4 + $0x28] sm:$0xff] %vm25_vm0, %v5852_v2  ;;  %48 = vst.msk [vmem:[#allocation4 + $0x30] sm:$0xff] %vm25_vm0, %v5852_v2 }
 0x241   :  { %49 = vst.msk [vmem:[#allocation4 + $0x38] sm:$0xff] %vm25_vm0, %v5852_v2  ;;  %50 = vst.msk [vmem:[#allocation4 + $0x40] sm:$0xff] %vm25_vm0, %v5852_v2  ;;  %v2462_v37 = vpop.permute.xlu1 %2461  ;;  %v2551_v31 = vmul.f32 0.2, %v2519_v36  ;;  %vm2535_vm15 = vcmp.gt.f32.partialorder %v2519_v36, 0.0  ;;  %v6374_v57 = vcvt.s32.f32 %v5132_v23 }
 0x242   :  { %51 = vst.msk [vmem:[#allocation4 + $0x48] sm:$0xff] %vm25_vm0, %v5852_v2  ;;  %52 = vst.msk [vmem:[#allocation4 + $0x50] sm:$0xff] %vm25_vm0, %v5852_v2  ;;  %v2523_v27 = vadd.f32 %v6179_v26, %v2462_v37  ;;  %926 = vmax.xlane.f32.xlu1 %v6348_v39  ;;  %v2467_v20 = vpop.permute.xlu0 %2466 }
 0x243   :  { %53 = vst.msk [vmem:[#allocation4 + $0x58] sm:$0xff] %vm25_vm0, %v5852_v2  ;;  %54 = vst.msk [vmem:[#allocation4 + $0x60] sm:$0xff] %vm25_vm0, %v5852_v2  ;;  %v2524_v24 = vadd.f32 %v6179_v26, %v2467_v20  ;;  %v2567_v44 = vsel %vm2535_vm15, %v2519_v36, %v2551_v31  ;;  %v828_v20 = vadd.f32 %v6210_v55, %v6259_v60 }
 0x244   :  { %55 = vst.msk [vmem:[#allocation4 + $0x68] sm:$0xff] %vm25_vm0, %v5852_v2  ;;  %56 = vst.msk [vmem:[#allocation4 + $0x70] sm:$0xff] %vm25_vm0, %v5852_v2  ;;  %vm2539_vm1 = vcmp.gt.f32.partialorder %v2523_v27, 0.0  ;;  %v6377_v47 = vadd.f32 %v2567_v44, %v6242_v35  ;;  %v878_v36 = vsel %vm846_vm2, %v830_v29, %v862_v33  ;;  %v5128_v44 = vunpack.c.2.s8 %v6226_v10 }
 0x245   :  { %57 = vst.msk [vmem:[#allocation4 + $0x78] sm:$0xff] %vm25_vm0, %v5852_v2  ;;  %58 = vst [vmem:[#allocation5] sm:$0xff] %v5852_v2  ;;  %v2556_v49 = vmul.f32 0.2, %v2524_v24  ;;  %vm2540_vm3 = vcmp.gt.f32.partialorder %v2524_v24, 0.0  ;;  %vm844_vm4 = vcmp.gt.f32.partialorder %v828_v20, 0.0 }
 0x246   :  { %59 = vst [vmem:[#allocation5 + $0x8] sm:$0xff] %v5852_v2  ;;  %61 = vst [vmem:[#allocation5 + $0x18] sm:$0xff] %v5852_v2  ;;  %v6368_v14 = vpop.permute.xlu1 %792  ;;  %1725 = vmax.xlane.f32.xlu1 %v6363_v6  ;;  %v2457_v31 = vpop.permute.xlu0 %2456  ;;  %v860_v35 = vmul.f32 0.2, %v828_v20  ;;  %v6399_v62 = vcvt.s32.f32 %v5128_v44 }
 0x247   :  { %62 = vst [vmem:[#allocation5 + $0x20] sm:$0xff] %v5852_v2  ;;  %63 = vst [vmem:[#allocation5 + $0x28] sm:$0xff] %v5852_v2  ;;  %v2522_v60 = vadd.f32 %v6179_v26, %v2457_v31  ;;  %v2572_v32 = vsel %vm2540_vm3, %v2524_v24, %v2556_v49  ;;  %v831_v24 = vadd.f32 %v6210_v55, %v6293_v48 }
 0x248   :  { %64 = vst [vmem:[#allocation5 + $0x30] sm:$0xff] %v5852_v2  ;;  %65 = vst [vmem:[#allocation5 + $0x38] sm:$0xff] %v5852_v2  ;;  %v876_v52 = vsel %vm844_vm4, %v828_v20, %v860_v35 }
 0x249   :  { %66 = vst [vmem:[#allocation5 + $0x40] sm:$0xff] %v5852_v2  ;;  %67 = vst [vmem:[#allocation5 + $0x48] sm:$0xff] %v5852_v2  ;;  %v2554_v49 = vmul.f32 0.2, %v2522_v60  ;;  %vm2538_vm6 = vcmp.gt.f32.partialorder %v2522_v60, 0.0  ;;  %vm847_vm7 = vcmp.gt.f32.partialorder %v831_v24, 0.0 }
 0x24a   :  { %68 = vst [vmem:[#allocation5 + $0x50] sm:$0xff] %v5852_v2  ;;  %69 = vst [vmem:[#allocation5 + $0x58] sm:$0xff] %v5852_v2  ;;  %2616 = vmax.xlane.f32.xlu1 %v6377_v47 }
 0x24b   :  { %70 = vst [vmem:[#allocation5 + $0x60] sm:$0xff] %v5852_v2  ;;  %71 = vst [vmem:[#allocation5 + $0x68] sm:$0xff] %v5852_v2 }
 0x24c   :  { %72 = vst [vmem:[#allocation5 + $0x70] sm:$0xff] %v5852_v2  ;;  %73 = vst [vmem:[#allocation5 + $0x78] sm:$0xff] %v5852_v2  ;;  %v2555_v2 = vmul.f32 0.2, %v2523_v27 }
 0x24d   :  { %9300 = vst [vmem:[#allocation42_spill] sm:$0xff] %v6363_v6  ;;  %9301 = vst [vmem:[#allocation43_spill] sm:$0xff] %v6366_v42 }
 0x24e   :  { %v2571_v37 = vsel %vm2539_vm1, %v2523_v27, %v2555_v2  ;;  %9303 = vst [vmem:[#allocation45_spill] sm:$0xff] %v6374_v57  ;;  %9304 = vst [vmem:[#allocation46_spill] sm:$0xff] %v6377_v47  ;;  %v1592_v27 = vpop.permute.xlu1 %1591  ;;  %v5024_v2 = vadd.f32 -1.0, %v6374_v57 }
 0x24f   :  { %v6372_v4 = vadd.f32 %v2571_v37, %v6366_v42  ;;  %v1633_v23 = vadd.f32 %v6175_v22, %v1592_v27  ;;  %v6386_v37 = vadd.f32 %v878_v36, %v6257_v53  ;;  %v6397_v36 = vadd.f32 %v2572_v32, %v6257_v53  ;;  %9308 = vst [vmem:[#allocation50_spill] sm:$0xff] %v6399_v62 }
 0x250   :  { %v6391_v33 = vmul.f32 1e+30, %v5024_v2  ;;  %v1577_v2 = vpop.permute.xlu0 %1576  ;;  %v6411_v32 = vadd.f32 %v876_v52, %v6291_v45 }
 0x251   :  { %9302 = vst [vmem:[#allocation44_spill] sm:$0xff] %v6372_v4  ;;  %2624 = vmax.xlane.f32.xlu0 %v6372_v4  ;;  %9305 = vst [vmem:[#allocation47_spill] sm:$0xff] %v6386_v37  ;;  %v1665_v29 = vmul.f32 0.2, %v1633_v23  ;;  %932 = vmax.xlane.f32.xlu1 %v6386_v37  ;;  %vm1649_vm5 = vcmp.gt.f32.partialorder %v1633_v23, 0.0  ;;  %v6408_v4 = vcvt.s32.f32 %v5133_v19  ;;  %v1630_v44 = vadd.f32 %v6175_v22, %v1577_v2 }
 0x252   :  { %9306 = vst [vmem:[#allocation48_spill] sm:$0xff] %v6391_v33  ;;  %v6394_v9 = vpop.permute.xlu1 %782  ;;  %9307 = vst [vmem:[#allocation49_spill] sm:$0xff] %v6397_v36  ;;  %v829_v19 = vadd.f32 %v6210_v55, %v6318_v3 }
 0x253   :  { %v1681_v27 = vsel %vm1649_vm5, %v1633_v23, %v1665_v29  ;;  %9310 = vst [vmem:[#allocation52_spill] sm:$0xff] %v6408_v4  ;;  %9311 = vst [vmem:[#allocation53_spill] sm:$0xff] %v6411_v32  ;;  %v863_v23 = vmul.f32 0.2, %v831_v24  ;;  %v2570_v29 = vsel %vm2538_vm6, %v2522_v60, %v2554_v49  ;;  %v5025_v20 = vadd.f32 -1.0, %v6408_v4 }
 0x254   :  { %v6404_v31 = vadd.f32 %v1681_v27, %v6391_v33  ;;  %v5022_v27 = vadd.f32 -1.0, %v6399_v62  ;;  %v6421_v52 = vadd.f32 %v2570_v29, %v6291_v45  ;;  %v1662_v2 = vmul.f32 0.2, %v1630_v44  ;;  %v1567_v49 = vpop.permute.xlu0 %1566 }
 0x255   :  { %2626 = vmax.xlane.f32.xlu1 %v6397_v36  ;;  %v879_v60 = vsel %vm847_vm7, %v831_v24, %v863_v23  ;;  %vm1646_vm9 = vcmp.gt.f32.partialorder %v1630_v44, 0.0  ;;  %v861_v3 = vmul.f32 0.2, %v829_v19  ;;  %v6433_v45 = vmul.f32 1e+30, %v5025_v20 }
 0x256   :  { %9309 = vst [vmem:[#allocation51_spill] sm:$0xff] %v6404_v31  ;;  %1739 = vmax.xlane.f32.xlu0 %v6404_v31  ;;  %v1582_v48 = vpop.permute.xlu1 %1581  ;;  %9312 = vst [vmem:[#allocation54_spill] sm:$0xff] %v6421_v52  ;;  %v6423_v18 = vmul.f32 1e+30, %v5022_v27  ;;  %v6431_v29 = vadd.f32 %v879_v60, %v6316_v1  ;;  %v1628_v27 = vadd.f32 %v6175_v22, %v1567_v49  ;;  %vm845_vm11 = vcmp.gt.f32.partialorder %v829_v19, 0.0 }
 0x257   :  { %v1631_v35 = vadd.f32 %v6175_v22, %v1582_v48  ;;  %9315 = vst [vmem:[#allocation57_spill] sm:$0xff] %v6433_v45  ;;  %v1678_v23 = vsel %vm1646_vm9, %v1630_v44, %v1662_v2  ;;  %v5129_v60 = vunpack.c.3.s8 %v6226_v10  ;;  %v834_v49 = vadd.f32 %v6210_v55, %v6368_v14 }
 0x258   :  { %9313 = vst [vmem:[#allocation55_spill] sm:$0xff] %v6423_v18  ;;  %v6443_v20 = vadd.f32 %v1678_v23, %v6316_v1  ;;  %v877_v44 = vsel %vm845_vm11, %v829_v19, %v861_v3  ;;  %vm1644_vm12 = vcmp.gt.f32.partialorder %v1628_v27, 0.0  ;;  %v2487_v2 = vpop.permute.xlu0 %2486 }
 0x259   :  { %928 = vmax.xlane.f32.xlu1 %v6411_v32  ;;  %v1663_v53 = vmul.f32 0.2, %v1631_v35  ;;  %vm1647_vm8 = vcmp.gt.f32.partialorder %v1631_v35, 0.0  ;;  %v866_v10 = vmul.f32 0.2, %v834_v49  ;;  %v2528_v14 = vadd.f32 %v6179_v26, %v2487_v2 }
 0x25a   :  { %v798_v36 = vpop.permute.xlu1 %797  ;;  %9317 = vst [vmem:[#allocation59_spill] sm:$0xff] %v6443_v20  ;;  %vm850_vm14 = vcmp.gt.f32.partialorder %v834_v49, 0.0 }
 0x25b   :  { %v1679_v48 = vsel %vm1647_vm8, %v1631_v35, %v1663_v53  ;;  %v835_v6 = vadd.f32 %v6210_v55, %v798_v36  ;;  %vm2544_vm15 = vcmp.gt.f32.partialorder %v2528_v14, 0.0 }
 0x25c   :  { %v6428_v31 = vadd.f32 %v1679_v48, %v6423_v18 }
 0x25d   :  { %2622 = vmax.xlane.f32.xlu1 %v6421_v52  ;;  %v867_v24 = vmul.f32 0.2, %v835_v6  ;;  %vm851_vm10 = vcmp.gt.f32.partialorder %v835_v6, 0.0  ;;  %v1660_v52 = vmul.f32 0.2, %v1628_v27 }
 0x25e   :  { %9314 = vst [vmem:[#allocation56_spill] sm:$0xff] %v6428_v31  ;;  %1735 = vmax.xlane.f32.xlu0 %v6428_v31 }
 0x25f   :  { %v2492_v53 = vpop.permute.xlu1 %2491  ;;  %v883_v36 = vsel %vm851_vm10, %v835_v6, %v867_v24  ;;  %v6451_v24 = vadd.f32 %v877_v44, %v6366_v42  ;;  %v1676_v3 = vsel %vm1644_vm12, %v1628_v27, %v1660_v52  ;;  %v882_v52 = vsel %vm850_vm14, %v834_v49, %v866_v10 }
 0x260   :  { %v2529_v35 = vadd.f32 %v6179_v26, %v2492_v53  ;;  %v6440_v48 = vadd.f32 %v883_v36, %v6433_v45  ;;  %v6453_v53 = vcvt.s32.f32 %v5129_v60  ;;  %v2477_v36 = vpop.permute.xlu0 %2476  ;;  %v6462_v1 = vadd.f32 %v1676_v3, %v6366_v42 }
 0x261   :  { %934 = vmax.xlane.f32.xlu1 %v6431_v29  ;;  %9318 = vst [vmem:[#allocation60_spill] sm:$0xff] %v6451_v24  ;;  %v2560_v60 = vmul.f32 0.2, %v2528_v14  ;;  %v6476_v42 = vadd.f32 %v882_v52, %v6391_v33 }
 0x262   :  { %9316 = vst [vmem:[#allocation58_spill] sm:$0xff] %v6440_v48  ;;  %v2561_v31 = vmul.f32 0.2, %v2529_v35  ;;  %942 = vmax.xlane.f32.xlu0 %v6440_v48  ;;  %vm2545_vm13 = vcmp.gt.f32.partialorder %v2529_v35, 0.0  ;;  %9319 = vst [vmem:[#allocation61_spill] sm:$0xff] %v6453_v53  ;;  %v5023_v27 = vadd.f32 -1.0, %v6453_v53 }
 0x263   :  { %9321 = vst [vmem:[#allocation63_spill] sm:$0xff] %v6462_v1  ;;  %9322 = vst [vmem:[#allocation64_spill] sm:$0xff] %v6476_v42  ;;  %v2576_v49 = vsel %vm2544_vm15, %v2528_v14, %v2560_v60 }
 0x264   :  { %v788_v6 = vpop.permute.xlu1 %787  ;;  %v2577_v23 = vsel %vm2545_vm13, %v2529_v35, %v2561_v31  ;;  %v6467_v31 = vld [vmem:[%s9019_s2 + $0x1c] sm:$0xf]   ;;  %v832_v35 = vadd.f32 %v6210_v55, %v6394_v9  ;;  %v2526_v9 = vadd.f32 %v6179_v26, %v2477_v36  ;;  %v1597_v10 = vpop.permute.xlu0 %1596  ;;  %v6488_v52 = vadd.f32 %v2576_v49, %v6391_v33  ;;  %s5854_s2 = smov 112  }
 0x265   :  { %1733 = vmax.xlane.f32.xlu1 %v6443_v20  ;;  %v6457_v19 = vadd.f32 %v2577_v23, %v6433_v45  ;;  %v5140_v23 = vunpack.c.0.s8 %v6467_v31  ;;  %v6479_v20 = vmul.f32 1e+30, %v5023_v27  ;;  %v1634_v36 = vadd.f32 %v6175_v22, %v1597_v10 }
 0x266   :  { %vm848_vm2 = vcmp.gt.f32.partialorder %v832_v35, 0.0  ;;  %9326 = vst [vmem:[#allocation68_spill] sm:$0xff] %v6488_v52  ;;  %v2558_v57 = vmul.f32 0.2, %v2526_v9  ;;  %vm2542_vm3 = vcmp.gt.f32.partialorder %v2526_v9, 0.0 }
 0x267   :  { %9320 = vst [vmem:[#allocation62_spill] sm:$0xff] %v6457_v19  ;;  %2636 = vmax.xlane.f32.xlu0 %v6457_v19  ;;  %v864_v19 = vmul.f32 0.2, %v832_v35  ;;  %9323 = vst [vmem:[#allocation65_spill] sm:$0xff] %v6479_v20  ;;  %v6485_v34 = vcvt.s32.f32 %v5140_v23  ;;  %v1666_v49 = vmul.f32 0.2, %v1634_v36 }
 0x268   :  { %v2574_v10 = vsel %vm2542_vm3, %v2526_v9, %v2558_v57  ;;  %vm1650_vm4 = vcmp.gt.f32.partialorder %v1634_v36, 0.0  ;;  %v1587_v33 = vpop.permute.xlu0 %1586  ;;  %v5141_v9 = vunpack.c.1.s8 %v6467_v31 }
 0x269   :  { %930 = vmax.xlane.f32.xlu1 %v6451_v24  ;;  %v2482_v44 = vpop.permute.xlu1 %2481  ;;  %9325 = vst [vmem:[#allocation67_spill] sm:$0xff] %v6485_v34  ;;  %v880_v14 = vsel %vm848_vm2, %v832_v35, %v864_v19  ;;  %v5028_v27 = vadd.f32 -1.0, %v6485_v34  ;;  %v1632_v34 = vadd.f32 %v6175_v22, %v1587_v33 }
 0x26a   :  { %v2527_v2 = vadd.f32 %v6179_v26, %v2482_v44  ;;  %v6496_v23 = vadd.f32 %v880_v14, %v6423_v18 }
 0x26b   :  { %v6501_v35 = vmul.f32 1e+30, %v5028_v27  ;;  %vm1648_vm7 = vcmp.gt.f32.partialorder %v1632_v34, 0.0 }
 0x26c   :  { %v2559_v3 = vmul.f32 0.2, %v2527_v2  ;;  %vm2543_vm1 = vcmp.gt.f32.partialorder %v2527_v2, 0.0  ;;  %9327 = vst [vmem:[#allocation69_spill] sm:$0xff] %v6496_v23  ;;  %v2507_v27 = vpop.permute.xlu0 %2506 }
 0x26d   :  { %1729 = vmax.xlane.f32.xlu1 %v6462_v1  ;;  %9328 = vst [vmem:[#allocation70_spill] sm:$0xff] %v6501_v35  ;;  %v2532_v31 = vadd.f32 %v6179_v26, %v2507_v27 }
 0x26e   :  { %v813_v25 = vpop.permute.xlu1 %812  ;;  %v2575_v44 = vsel %vm2543_vm1, %v2527_v2, %v2559_v3  ;;  %v5136_v3 = vunpack.c.2.s8 %v6353_v21 }
 0x26f   :  { %v6483_v1 = vadd.f32 %v2575_v44, %v6479_v20  ;;  %v833_v44 = vadd.f32 %v6210_v55, %v788_v6  ;;  %v1682_v6 = vsel %vm1650_vm4, %v1634_v36, %v1666_v49  ;;  %v6522_v49 = vcvt.s32.f32 %v5141_v9 }
 0x270   :  { %vm2548_vm11 = vcmp.gt.f32.partialorder %v2532_v31, 0.0  ;;  %vm1240_vm4 = vcmask 7168  }
 0x271   :  { %940 = vmax.xlane.f32.xlu1 %v6476_v42  ;;  %9324 = vst [vmem:[#allocation66_spill] sm:$0xff] %v6483_v1  ;;  %2632 = vmax.xlane.f32.xlu0 %v6483_v1  ;;  %v865_v62 = vmul.f32 0.2, %v833_v44  ;;  %vm849_vm6 = vcmp.gt.f32.partialorder %v833_v44, 0.0  ;;  %9333 = vst [vmem:[#allocation75_spill] sm:$0xff] %v6522_v49  ;;  %v5029_v9 = vadd.f32 -1.0, %v6522_v49 }
 0x273   :  { %v1612_v60 = vpop.permute.xlu1 %1611 }
 0x274   :  { %v1637_v2 = vadd.f32 %v6175_v22, %v1612_v60  ;;  %v6504_v60 = vadd.f32 %v2574_v10, %v6423_v18  ;;  %v6516_v10 = vadd.f32 %v1682_v6, %v6433_v45 }
 0x275   :  { %2634 = vmax.xlane.f32.xlu1 %v6488_v52  ;;  %v6506_v52 = vcvt.s32.f32 %v5136_v3  ;;  %v838_v3 = vadd.f32 %v6210_v55, %v813_v25 }
 0x276   :  { %v1669_v19 = vmul.f32 0.2, %v1637_v2  ;;  %vm1653_vm5 = vcmp.gt.f32.partialorder %v1637_v2, 0.0  ;;  %9329 = vst [vmem:[#allocation71_spill] sm:$0xff] %v6504_v60  ;;  %9332 = vst [vmem:[#allocation74_spill] sm:$0xff] %v6516_v10 }
 0x277   :  { %9330 = vst [vmem:[#allocation72_spill] sm:$0xff] %v6506_v52  ;;  %v870_v45 = vmul.f32 0.2, %v838_v3  ;;  %vm854_vm9 = vcmp.gt.f32.partialorder %v838_v3, 0.0 }
 0x278   :  { %v803_v1 = vpop.permute.xlu1 %802  ;;  %v1685_v14 = vsel %vm1653_vm5, %v1637_v2, %v1669_v19  ;;  %v1664_v2 = vmul.f32 0.2, %v1632_v34  ;;  %v881_v19 = vsel %vm849_vm6, %v833_v44, %v865_v62  ;;  %v2497_v44 = vpop.permute.xlu0 %2496  ;;  %vm2039_vm5 = vcmask 15368  }
 0x279   :  { %936 = vmax.xlane.f32.xlu1 %v6496_v23  ;;  %v6510_v57 = vadd.f32 %v1685_v14, %v6501_v35  ;;  %v5026_v14 = vadd.f32 -1.0, %v6506_v52  ;;  %v6526_v6 = vadd.f32 %v881_v19, %v6479_v20  ;;  %v5137_v19 = vunpack.c.3.s8 %v6353_v21 }
 0x27a   :  { %v1680_v62 = vsel %vm1648_vm7, %v1632_v34, %v1664_v2  ;;  %v836_v34 = vadd.f32 %v6210_v55, %v803_v1  ;;  %v2530_v21 = vadd.f32 %v6179_v26, %v2497_v44  ;;  %vm2934_vm6 = vcmask 23568  }
 0x27b   :  { %9331 = vst [vmem:[#allocation73_spill] sm:$0xff] %v6510_v57  ;;  %1747 = vmax.xlane.f32.xlu0 %v6510_v57  ;;  %9334 = vst [vmem:[#allocation76_spill] sm:$0xff] %v6526_v6  ;;  %v6528_v25 = vmul.f32 1e+30, %v5026_v14  ;;  %v6538_v14 = vadd.f32 %v1680_v62, %v6479_v20  ;;  %v6545_v52 = vcvt.s32.f32 %v5137_v19 }
 0x27c   :  { %v1617_v62 = vpop.permute.xlu0 %1616  ;;  %vm852_vm12 = vcmp.gt.f32.partialorder %v836_v34, 0.0  ;;  %vm2546_vm14 = vcmp.gt.f32.partialorder %v2530_v21, 0.0 }
 0x27d   :  { %2630 = vmax.xlane.f32.xlu1 %v6504_v60  ;;  %v1602_v33 = vpop.permute.xlu1 %1601  ;;  %9335 = vst [vmem:[#allocation77_spill] sm:$0xff] %v6528_v25  ;;  %9337 = vst [vmem:[#allocation79_spill] sm:$0xff] %v6538_v14 }
 0x27e   :  { %v1635_v36 = vadd.f32 %v6175_v22, %v1602_v33  ;;  %9339 = vst [vmem:[#allocation81_spill] sm:$0xff] %v6545_v52 }
 0x280   :  { %v1667_v18 = vmul.f32 0.2, %v1635_v36  ;;  %vm1651_vm8 = vcmp.gt.f32.partialorder %v1635_v36, 0.0 }
 0x281   :  { %1741 = vmax.xlane.f32.xlu1 %v6516_v10  ;;  %v2564_v10 = vmul.f32 0.2, %v2532_v31 }
 0x282   :  { %v818_v60 = vpop.permute.xlu1 %817  ;;  %v1683_v33 = vsel %vm1651_vm8, %v1635_v36, %v1667_v18  ;;  %v886_v18 = vsel %vm854_vm9, %v838_v3, %v870_v45  ;;  %v868_v45 = vmul.f32 0.2, %v836_v34 }
 0x283   :  { %v839_v57 = vadd.f32 %v6210_v55, %v818_v60  ;;  %v6534_v27 = vadd.f32 %v1683_v33, %v6528_v25  ;;  %v6543_v60 = vmul.f32 1e+30, %v5029_v9  ;;  %v2580_v3 = vsel %vm2548_vm11, %v2532_v31, %v2564_v10 }
 0x284   :  { %v6558_v19 = vadd.f32 %v2580_v3, %v6501_v35  ;;  %v884_v31 = vsel %vm852_vm12, %v836_v34, %v868_v45 }
 0x285   :  { %938 = vmax.xlane.f32.xlu1 %v6526_v6  ;;  %9336 = vst [vmem:[#allocation78_spill] sm:$0xff] %v6534_v27  ;;  %v871_v2 = vmul.f32 0.2, %v839_v57  ;;  %1743 = vmax.xlane.f32.xlu0 %v6534_v27  ;;  %vm855_vm10 = vcmp.gt.f32.partialorder %v839_v57, 0.0  ;;  %9338 = vst [vmem:[#allocation80_spill] sm:$0xff] %v6543_v60  ;;  %v6553_v27 = vadd.f32 %v886_v18, %v6501_v35 }
 0x286   :  { %9342 = vst [vmem:[#allocation84_spill] sm:$0xff] %v6558_v19  ;;  %v1638_v18 = vadd.f32 %v6175_v22, %v1617_v62 }
 0x287   :  { %v2512_v36 = vpop.permute.xlu1 %2511  ;;  %v887_v33 = vsel %vm855_vm10, %v839_v57, %v871_v2  ;;  %9341 = vst [vmem:[#allocation83_spill] sm:$0xff] %v6553_v27  ;;  %v2562_v57 = vmul.f32 0.2, %v2530_v21 }
 0x288   :  { %v2533_v20 = vadd.f32 %v6179_v26, %v2512_v36  ;;  %v6550_v1 = vadd.f32 %v887_v33, %v6543_v60  ;;  %v5027_v36 = vadd.f32 -1.0, %v6545_v52  ;;  %v1670_v62 = vmul.f32 0.2, %v1638_v18 }
 0x289   :  { %1737 = vmax.xlane.f32.xlu1 %v6538_v14  ;;  %v1607_v14 = vpop.permute.xlu0 %1606  ;;  %vm1654_vm1 = vcmp.gt.f32.partialorder %v1638_v18, 0.0 }
 0x28a   :  { %9340 = vst [vmem:[#allocation82_spill] sm:$0xff] %v6550_v1  ;;  %v2565_v9 = vmul.f32 0.2, %v2533_v20  ;;  %950 = vmax.xlane.f32.xlu0 %v6550_v1  ;;  %vm2549_vm13 = vcmp.gt.f32.partialorder %v2533_v20, 0.0  ;;  %v6571_v3 = vmul.f32 1e+30, %v5027_v36 }
 0x28c   :  { %v808_v44 = vpop.permute.xlu1 %807  ;;  %v2581_v2 = vsel %vm2549_vm13, %v2533_v20, %v2565_v9  ;;  %v6569_v20 = vadd.f32 %v884_v31, %v6528_v25  ;;  %9345 = vst [vmem:[#allocation87_spill] sm:$0xff] %v6571_v3 }
 0x28d   :  { %948 = vmax.xlane.f32.xlu1 %v6553_v27  ;;  %v837_v33 = vadd.f32 %v6210_v55, %v808_v44  ;;  %v6564_v10 = vadd.f32 %v2581_v2, %v6543_v60  ;;  %v1636_v55 = vadd.f32 %v6175_v22, %v1607_v14  ;;  %v2578_v2 = vsel %vm2546_vm14, %v2530_v21, %v2562_v57 }
 0x28e   :  { %9344 = vst [vmem:[#allocation86_spill] sm:$0xff] %v6569_v20  ;;  %v6581_v36 = vadd.f32 %v2578_v2, %v6528_v25  ;;  %v1686_v22 = vsel %vm1654_vm1, %v1638_v18, %v1670_v62  ;;  %v6623_v25 = vld [vmem:[#allocation3] sm:$0xff] }
 0x28f   :  { %9343 = vst [vmem:[#allocation85_spill] sm:$0xff] %v6564_v10  ;;  %v869_v49 = vmul.f32 0.2, %v837_v33  ;;  %2644 = vmax.xlane.f32.xlu0 %v6564_v10  ;;  %vm853_vm15 = vcmp.gt.f32.partialorder %v837_v33, 0.0  ;;  %v1668_v31 = vmul.f32 0.2, %v1636_v55  ;;  %v6588_v14 = vadd.f32 %v1686_v22, %v6543_v60 }
 0x290   :  { %9347 = vst [vmem:[#allocation89_spill] sm:$0xff] %v6581_v36  ;;  %vm1652_vm3 = vcmp.gt.f32.partialorder %v1636_v55, 0.0 }
 0x291   :  { %2642 = vmax.xlane.f32.xlu1 %v6558_v19  ;;  %v2502_v9 = vpop.permute.xlu1 %2501  ;;  %v885_v44 = vsel %vm853_vm15, %v837_v33, %v869_v49  ;;  %9349 = vst [vmem:[#allocation91_spill] sm:$0xff] %v6588_v14  ;;  %v1684_v21 = vsel %vm1652_vm3, %v1636_v55, %v1668_v31 }
 0x292   :  { %v2531_v34 = vadd.f32 %v6179_v26, %v2502_v9  ;;  %v6577_v45 = vadd.f32 %v885_v44, %v6571_v3  ;;  %v6593_v57 = vadd.f32 %v1684_v21, %v6571_v3  ;;  %v6598_v9 = vld [vmem:[#allocation3 + $0x8] sm:$0xff] }
 0x293   :  { %9351 = vst [vmem:[#allocation93_spill] sm:$0xff] %v6598_v9 }
 0x294   :  { %9346 = vst [vmem:[#allocation88_spill] sm:$0xff] %v6577_v45  ;;  %v2563_v35 = vmul.f32 0.2, %v2531_v34  ;;  %946 = vmax.xlane.f32.xlu0 %v6577_v45  ;;  %vm2547_vm2 = vcmp.gt.f32.partialorder %v2531_v34, 0.0  ;;  %9350 = vst [vmem:[#allocation92_spill] sm:$0xff] %v6593_v57 }
 0x295   :  { %944 = vmax.xlane.f32.xlu1 %v6569_v20 }
 0x296   :  { %v2579_v49 = vsel %vm2547_vm2, %v2531_v34, %v2563_v35  ;;  %v9353_v34 = vmov 1  }
 0x297   :  { %v6585_v26 = vadd.f32 %v2579_v49, %v6571_v3 }
 0x299   :  { %2638 = vmax.xlane.f32.xlu1 %v6581_v36  ;;  %9348 = vst [vmem:[#allocation90_spill] sm:$0xff] %v6585_v26  ;;  %2640 = vmax.xlane.f32.xlu0 %v6585_v26  ;;  %v6634_v26 = vld [vmem:[#allocation3 + $0x18] sm:$0xff] }
 0x29d   :  { %1749 = vmax.xlane.f32.xlu1 %v6588_v14 }
 0x2a0   :  { %v1724_v18 = vpop.xlane.xlu0 %1723 }
 0x2a1   :  { %1745 = vmax.xlane.f32.xlu1 %v6593_v57 }
 0x2a4   :  { %v2619_v33 = vpop.xlane.xlu0 %2618 }
 0x2a8   :  { %v2615_v62 = vpop.xlane.xlu0 %2614 }
 0x2ac   :  { %v6596_v35 = vpop.xlane.xlu0 %2620 }
 0x2b0   :  { %v923_v44 = vpop.xlane.xlu0 %922 }
 0x2b1   :  { %v6601_v2 = vmax.f32 %v6598_v9, %v923_v44  ;;  %v6618_v44 = vld [vmem:[#allocation3 + $0x10] sm:$0xff] }
 0x2b3   :  { %9352 = vst [vmem:[#allocation94_spill] sm:$0xff] %v6601_v2  ;;  %1508 = vst.msk [vmem:[#allocation3 + $0x8] sm:$0xff] %vm1240_vm4, %v6601_v2  ;;  %975 = vperm.xlu0 %5458, %v6601_v2  }
 0x2b4   :  { %v1722_v22 = vpop.xlane.xlu0 %1721 }
 0x2b7   :  { %5461 = vset.pattern.permute.xlu0 %v9353_v34 }
 0x2ba   :  { %v6609_v31 = vld [vmem:[#allocation3 + $0x8] sm:$0xff] }
 0x2bb   :  { %v6612_v49 = vmax.f32 %v6609_v31, %v1722_v22 }
 0x2bd   :  { %2403 = vst.msk [vmem:[#allocation3 + $0x8] sm:$0xff] %vm2039_vm5, %v6612_v49 }
 0x2c3   :  { %v925_v55 = vpop.xlane.xlu1 %924 }
 0x2c4   :  { %v6621_v60 = vmax.f32 %v6618_v44, %v925_v55  ;;  %v6661_v14 = vld [vmem:[#allocation3 + $0x8] sm:$0xff] }
 0x2c5   :  { %9356 = vst [vmem:[#allocation97_spill] sm:$0xff] %v6661_v14 }
 0x2c6   :  { %1509 = vst.msk [vmem:[#allocation3 + $0x10] sm:$0xff] %vm1240_vm4, %v6621_v60  ;;  %980 = vperm.xlu1 %5457, %v6621_v60  }
 0x2c7   :  { %v921_v22 = vpop.xlane.xlu1 %920 }
 0x2c8   :  { %v6629_v10 = vmax.f32 %v6623_v25, %v921_v22  ;;  %v1732_v22 = vpop.xlane.xlu0 %1731 }
 0x2ca   :  { %1507 = vst.msk [vmem:[#allocation3] sm:$0xff] %vm1240_vm4, %v6629_v10  ;;  %970 = vperm.xlu1 %5457, %v6629_v10  }
 0x2cb   :  { %v1720_v21 = vpop.xlane.xlu1 %1719 }
 0x2cd   :  { %v6636_v55 = vld [vmem:[#allocation3 + $0x10] sm:$0xff] }
 0x2ce   :  { %v6639_v3 = vmax.f32 %v6636_v55, %v1724_v18 }
 0x2cf   :  { %v927_v2 = vpop.xlane.xlu1 %926 }
 0x2d0   :  { %v6642_v9 = vmax.f32 %v6634_v26, %v927_v2  ;;  %2404 = vst.msk [vmem:[#allocation3 + $0x10] sm:$0xff] %vm2039_vm5, %v6639_v3  ;;  %v6673_v2 = vld [vmem:[#allocation3 + $0x30] sm:$0xff] }
 0x2d1   :  { %v6648_v36 = vld [vmem:[#allocation3] sm:$0xff]  ;;  %9359 = vst [vmem:[#allocation100_spill] sm:$0xff] %v6673_v2 }
 0x2d2   :  { %9354 = vst [vmem:[#allocation95_spill] sm:$0xff] %v6648_v36  ;;  %v6651_v19 = vmax.f32 %v6648_v36, %v1720_v21  ;;  %1510 = vst.msk [vmem:[#allocation3 + $0x18] sm:$0xff] %vm1240_vm4, %v6642_v9  ;;  %985 = vperm.xlu1 %5457, %v6642_v9   ;;  %v1728_v36 = vpop.xlane.xlu0 %1727 }
 0x2d3   :  { %v1726_v18 = vpop.xlane.xlu1 %1725 }
 0x2d4   :  { %9355 = vst [vmem:[#allocation96_spill] sm:$0xff] %v6651_v19  ;;  %2402 = vst.msk [vmem:[#allocation3] sm:$0xff] %vm2039_vm5, %v6651_v19  ;;  %1769 = vperm.xlu0 %5461, %v6651_v19  }
 0x2d7   :  { %v2617_v21 = vpop.xlane.xlu1 %2616  ;;  %v6663_v57 = vld [vmem:[#allocation3 + $0x10] sm:$0xff] }
 0x2d8   :  { %v6666_v52 = vmax.f32 %v6661_v14, %v2617_v21  ;;  %v6669_v45 = vmax.f32 %v6663_v57, %v2619_v33  ;;  %v6697_v14 = vpop.xlane.xlu0 %2628 }
 0x2d9   :  { %v6671_v27 = vld [vmem:[#allocation3 + $0x18] sm:$0xff] }
 0x2da   :  { %9357 = vst [vmem:[#allocation98_spill] sm:$0xff] %v6666_v52  ;;  %9358 = vst [vmem:[#allocation99_spill] sm:$0xff] %v6671_v27  ;;  %v6676_v19 = vmax.f32 %v6671_v27, %v1726_v18 }
 0x2db   :  { %3290 = vst.msk [vmem:[#allocation3 + $0x8] sm:$0xff] %vm2934_vm6, %v6666_v52  ;;  %3291 = vst.msk [vmem:[#allocation3 + $0x10] sm:$0xff] %vm2934_vm6, %v6669_v45  ;;  %v6684_v33 = vld [vmem:[#allocation3] sm:$0xff] }
 0x2dc   :  { %9360 = vst [vmem:[#allocation101_spill] sm:$0xff] %v6676_v19  ;;  %2405 = vst.msk [vmem:[#allocation3 + $0x18] sm:$0xff] %vm2039_vm5, %v6676_v19  ;;  %1784 = vperm.xlu0 %5461, %v6676_v19   ;;  %v6695_v20 = vmax.f32 %v6684_v33, %v2615_v62  ;;  %v6707_v19 = vld [vmem:[#allocation3 + $0x20] sm:$0xff] }
 0x2dd   :  { %9363 = vst [vmem:[#allocation103_spill] sm:$0xff] %v6707_v19 }
 0x2de   :  { %v933_v21 = vpop.xlane.xlu1 %932  ;;  %3289 = vst.msk [vmem:[#allocation3] sm:$0xff] %vm2934_vm6, %v6695_v20  ;;  %v6709_v62 = vpop.xlane.xlu0 %2624 }
 0x2df   :  { %v6691_v18 = vmax.f32 %v6673_v2, %v933_v21  ;;  %v9362_v21 = vmov 0  }
 0x2e0   :  { %5464 = vset.pattern.permute.xlu0 %v9362_v21 }
 0x2e1   :  { %9361 = vst [vmem:[#allocation102_spill] sm:$0xff] %v6691_v18  ;;  %1513 = vst.msk [vmem:[#allocation3 + $0x30] sm:$0xff] %vm1240_vm4, %v6691_v18  ;;  %1000 = vperm.xlu1 %5457, %v6691_v18  }
 0x2e2   :  { %v2627_v1 = vpop.xlane.xlu1 %2626 }
 0x2e3   :  { %v6711_v16 = vld [vmem:[#allocation3 + $0x18] sm:$0xff]  ;;  %v6725_v47 = vpop.xlane.xlu0 %1739 }
 0x2e4   :  { %v6718_v2 = vmax.f32 %v6711_v16, %v6596_v35  ;;  %v1114_v35 = vsub.f32 %v6618_v44, %v6621_v60 }
 0x2e6   :  { %v929_v27 = vpop.xlane.xlu1 %928  ;;  %3292 = vst.msk [vmem:[#allocation3 + $0x18] sm:$0xff] %vm2934_vm6, %v6718_v2  ;;  %v1132_v44 = vmul.f32 1.442695, %v1114_v35 }
 0x2e7   :  { %v6714_v53 = vmax.f32 %v6707_v19, %v929_v27 }
 0x2e8   :  { %v6720_v18 = vld [vmem:[#allocation3 + $0x30] sm:$0xff]  ;;  %5557 = vpow2.f32 %v1132_v44 }
 0x2e9   :  { %9364 = vst [vmem:[#allocation104_spill] sm:$0xff] %v6714_v53  ;;  %v6723_v56 = vmax.f32 %v6720_v18, %v1732_v22  ;;  %1511 = vst.msk [vmem:[#allocation3 + $0x20] sm:$0xff] %vm1240_vm4, %v6714_v53  ;;  %990 = vperm.xlu1 %5457, %v6714_v53   ;;  %v6738_v22 = vld [vmem:[#allocation3 + $0x38] sm:$0xff] }
 0x2ea   :  { %v2623_v27 = vpop.xlane.xlu1 %2622  ;;  %v6747_v53 = vld [vmem:[#allocation3 + $0x58] sm:$0xff] }
 0x2eb   :  { %2408 = vst.msk [vmem:[#allocation3 + $0x30] sm:$0xff] %vm2039_vm5, %v6723_v56  ;;  %v6740_v17 = vpop.xlane.xlu0 %1735 }
 0x2ee   :  { %v935_v4 = vpop.xlane.xlu1 %934 }
 0x2ef   :  { %v6743_v19 = vmax.f32 %v6738_v22, %v935_v4  ;;  %v943_v23 = vpop.xlane.xlu0 %942 }
 0x2f0   :  { %v6745_v6 = vld [vmem:[#allocation3 + $0x20] sm:$0xff] }
 0x2f1   :  { %v6750_v8 = vmax.f32 %v6745_v6, %v1728_v36  ;;  %1514 = vst.msk [vmem:[#allocation3 + $0x38] sm:$0xff] %vm1240_vm4, %v6743_v19  ;;  %1005 = vperm.xlu1 %5457, %v6743_v19   ;;  %v6767_v36 = vmax.f32 %v6747_v53, %v943_v23  ;;  %v1112_v23 = vsub.f32 %v6623_v25, %v6629_v10 }
 0x2f2   :  { %v6757_v42 = vld [vmem:[#allocation3 + $0x30] sm:$0xff]  ;;  %v1734_v4 = vpop.xlane.xlu1 %1733  ;;  %v6837_v44 = vpop.eup %5557 }
 0x2f3   :  { %9365 = vst [vmem:[#allocation105_spill] sm:$0xff] %v6757_v42  ;;  %v6760_v48 = vmax.f32 %v6757_v42, %v2627_v1  ;;  %2406 = vst.msk [vmem:[#allocation3 + $0x20] sm:$0xff] %vm2039_vm5, %v6750_v8  ;;  %v1128_v1 = vmul.f32 1.442695, %v1112_v23 }
 0x2f4   :  { %1518 = vst.msk [vmem:[#allocation3 + $0x58] sm:$0xff] %vm1240_vm4, %v6767_v36  ;;  %9376 = vst [vmem:[#allocation116_spill] sm:$0xff] %v6837_v44 }
 0x2f5   :  { %9366 = vst [vmem:[#allocation106_spill] sm:$0xff] %v6760_v48  ;;  %3295 = vst.msk [vmem:[#allocation3 + $0x30] sm:$0xff] %vm2934_vm6, %v6760_v48  ;;  %5459 = vset.pattern.permute.xlu1 %v9353_v34  ;;  %5559 = vpow2.f32 %v1128_v1 }
 0x2f6   :  { %1779 = vperm.xlu1 %5459, %v6639_v3   ;;  %v931_v40 = vpop.xlane.xlu1 %930 }
 0x2f7   :  { %v6784_v60 = vmax.f32 %v6769_v12, %v931_v40 }
 0x2f8   :  { %v6786_v42 = vld [vmem:[#allocation3 + $0x38] sm:$0xff] }
 0x2f9   :  { %9367 = vst [vmem:[#allocation107_spill] sm:$0xff] %v6786_v42  ;;  %v6789_v13 = vmax.f32 %v6786_v42, %v1734_v4  ;;  %1512 = vst.msk [vmem:[#allocation3 + $0x28] sm:$0xff] %vm1240_vm4, %v6784_v60  ;;  %v6804_v4 = vld [vmem:[#allocation3 + $0x50] sm:$0xff] }
 0x2fa   :  { %v6793_v35 = vld [vmem:[#allocation3 + $0x20] sm:$0xff]  ;;  %5460 = vset.pattern.permute.xlu1 %v9362_v21  ;;  %v1730_v25 = vpop.xlane.xlu1 %1729  ;;  %9371 = vst [vmem:[#allocation111_spill] sm:$0xff] %v6804_v4 }
 0x2fb   :  { %9368 = vst [vmem:[#allocation108_spill] sm:$0xff] %v6789_v13  ;;  %9369 = vst [vmem:[#allocation109_spill] sm:$0xff] %v6793_v35  ;;  %v6797_v10 = vmax.f32 %v6793_v35, %v2623_v27  ;;  %995 = vperm.xlu1 %5460, %v6784_v60   ;;  %v1115_v27 = vsub.f32 %v6634_v26, %v6642_v9  ;;  %v6840_v35 = vld [vmem:[#allocation3 + $0x40] sm:$0xff] }
 0x2fc   :  { %2409 = vst.msk [vmem:[#allocation3 + $0x38] sm:$0xff] %vm2039_vm5, %v6789_v13  ;;  %9377 = vst [vmem:[#allocation117_spill] sm:$0xff] %v6840_v35 }
 0x2fd   :  { %9370 = vst [vmem:[#allocation110_spill] sm:$0xff] %v6797_v10  ;;  %3293 = vst.msk [vmem:[#allocation3 + $0x20] sm:$0xff] %vm2934_vm6, %v6797_v10  ;;  %v1134_v26 = vmul.f32 1.442695, %v1115_v27 }
 0x2fe   :  { %v941_v23 = vpop.xlane.xlu1 %940 }
 0x2ff   :  { %v6813_v40 = vmax.f32 %v6804_v4, %v941_v23  ;;  %5462 = vset.pattern.permute.xlu1 %v9353_v34  ;;  %5561 = vpow2.f32 %v1134_v26  ;;  %v6850_v23 = vpop.eup %5559 }
 0x300   :  { %v6816_v42 = vld [vmem:[#allocation3 + $0x28] sm:$0xff]  ;;  %1774 = vperm.xlu1 %5462, %v6612_v49   ;;  %9379 = vst [vmem:[#allocation119_spill] sm:$0xff] %v6850_v23 }
 0x301   :  { %9372 = vst [vmem:[#allocation112_spill] sm:$0xff] %v6813_v40  ;;  %9373 = vst [vmem:[#allocation113_spill] sm:$0xff] %v6816_v42  ;;  %v6820_v15 = vmax.f32 %v6816_v42, %v1730_v25  ;;  %1020 = vperm.xlu0 %5464, %v6813_v40  }
 0x302   :  { %1517 = vst.msk [vmem:[#allocation3 + $0x50] sm:$0xff] %vm1240_vm4, %v6813_v40  ;;  %v2635_v9 = vpop.xlane.xlu1 %2634  ;;  %v2637_v40 = vpop.xlane.xlu0 %2636 }
 0x303   :  { %9374 = vst [vmem:[#allocation114_spill] sm:$0xff] %v6820_v15  ;;  %v6827_v1 = vld [vmem:[#allocation3 + $0x38] sm:$0xff]  ;;  %2407 = vst.msk [vmem:[#allocation3 + $0x28] sm:$0xff] %vm2039_vm5, %v6820_v15 }
 0x304   :  { %9375 = vst [vmem:[#allocation115_spill] sm:$0xff] %v6827_v1  ;;  %v6835_v25 = vmax.f32 %v6827_v1, %v6697_v14  ;;  %5463 = vset.pattern.permute.xlu1 %v9362_v21 }
 0x305   :  { %1285 = vperm.xlu1 %5463, %v6837_v44   ;;  %5468 = vset.pattern.permute.xlu0 %v9353_v34 }
 0x306   :  { %3296 = vst.msk [vmem:[#allocation3 + $0x38] sm:$0xff] %vm2934_vm6, %v6835_v25  ;;  %1804 = vperm.xlu0 %5468, %v6789_v13   ;;  %v937_v27 = vpop.xlane.xlu1 %936  ;;  %v6874_v44 = vpop.xlane.xlu0 %2632 }
 0x307   :  { %v6848_v14 = vmax.f32 %v6840_v35, %v937_v27  ;;  %v6880_v35 = vld [vmem:[#allocation3 + $0x58] sm:$0xff] }
 0x308   :  { %9383 = vst [vmem:[#allocation122_spill] sm:$0xff] %v6880_v35 }
 0x309   :  { %9378 = vst [vmem:[#allocation118_spill] sm:$0xff] %v6848_v14  ;;  %v6852_v42 = vld [vmem:[#allocation3 + $0x50] sm:$0xff]  ;;  %1515 = vst.msk [vmem:[#allocation3 + $0x40] sm:$0xff] %vm1240_vm4, %v6848_v14  ;;  %1275 = vperm.xlu1 %5463, %v6850_v23   ;;  %v6886_v1 = vpop.eup %5561 }
 0x30a   :  { %9380 = vst [vmem:[#allocation120_spill] sm:$0xff] %v6852_v42  ;;  %v6856_v4 = vmax.f32 %v6852_v42, %v6725_v47  ;;  %1794 = vperm.xlu0 %5468, %v6820_v15   ;;  %v2631_v26 = vpop.xlane.xlu1 %2630  ;;  %v6864_v27 = vld [vmem:[#allocation3 + $0x28] sm:$0xff]  ;;  %v9382_v15 = vmov 2   ;;  %9385 = vst [vmem:[#allocation124_spill] sm:$0xff] %v6886_v1  ;;  %v1748_v42 = vpop.xlane.xlu0 %1747 }
 0x30b   :  { %9381 = vst [vmem:[#allocation121_spill] sm:$0xff] %v6864_v27  ;;  %v6872_v47 = vmax.f32 %v6864_v27, %v6709_v62  ;;  %v6890_v27 = vld [vmem:[#allocation3 + $0x48] sm:$0xff] }
 0x30c   :  { %2412 = vst.msk [vmem:[#allocation3 + $0x50] sm:$0xff] %vm2039_vm5, %v6856_v4 }
 0x30d   :  { %1010 = vperm.xlu1 %5463, %v6848_v14   ;;  %3294 = vst.msk [vmem:[#allocation3 + $0x28] sm:$0xff] %vm2934_vm6, %v6872_v47 }
 0x30e   :  { %5470 = vset.pattern.permute.xlu0 %v9382_v15  ;;  %v1742_v23 = vpop.xlane.xlu1 %1741 }
 0x30f   :  { %v6883_v13 = vmax.f32 %v6880_v35, %v1742_v23  ;;  %2669 = vperm.xlu0 %5470, %v6666_v52   ;;  %v6925_v35 = vld [vmem:[#allocation3 + $0x78] sm:$0xff] }
 0x310   :  { %v6888_v62 = vld [vmem:[#allocation3 + $0x40] sm:$0xff]  ;;  %9389 = vst [vmem:[#allocation128_spill] sm:$0xff] %v6925_v35 }
 0x311   :  { %9384 = vst [vmem:[#allocation123_spill] sm:$0xff] %v6883_v13  ;;  %9386 = vst [vmem:[#allocation125_spill] sm:$0xff] %v6888_v62  ;;  %v6894_v14 = vmax.f32 %v6888_v62, %v6740_v17  ;;  %1290 = vperm.xlu1 %5463, %v6886_v1   ;;  %v6927_v1 = vld [vmem:[#allocation3 + $0x70] sm:$0xff] }
 0x312   :  { %2413 = vst.msk [vmem:[#allocation3 + $0x58] sm:$0xff] %vm2039_vm5, %v6883_v13  ;;  %v939_v52 = vpop.xlane.xlu1 %938  ;;  %v6922_v0 = vpop.xlane.xlu0 %1743  ;;  %9390 = vst [vmem:[#allocation129_spill] sm:$0xff] %v6927_v1 }
 0x313   :  { %v6901_v23 = vld [vmem:[#allocation3 + $0x50] sm:$0xff]  ;;  %2410 = vst.msk [vmem:[#allocation3 + $0x40] sm:$0xff] %vm2039_vm5, %v6894_v14  ;;  %v6911_v17 = vmax.f32 %v6890_v27, %v939_v52  ;;  %5471 = vset.pattern.permute.xlu0 %v9362_v21 }
 0x314   :  { %9387 = vst [vmem:[#allocation126_spill] sm:$0xff] %v6901_v23  ;;  %v6904_v51 = vmax.f32 %v6901_v23, %v2635_v9 }
 0x315   :  { %1516 = vst.msk [vmem:[#allocation3 + $0x48] sm:$0xff] %vm1240_vm4, %v6911_v17  ;;  %1025 = vperm.xlu1 %5463, %v6767_v36  }
 0x316   :  { %9388 = vst [vmem:[#allocation127_spill] sm:$0xff] %v6904_v51  ;;  %3299 = vst.msk [vmem:[#allocation3 + $0x50] sm:$0xff] %vm2934_vm6, %v6904_v51  ;;  %v1738_v52 = vpop.xlane.xlu1 %1737 }
 0x317   :  { %v951_v23 = vpop.xlane.xlu0 %950 }
 0x318   :  { %v6942_v46 = vmax.f32 %v6925_v35, %v951_v23 }
 0x319   :  { %v6929_v62 = vld [vmem:[#allocation3 + $0x58] sm:$0xff]  ;;  %5465 = vset.pattern.permute.xlu1 %v9353_v34 }
 0x31a   :  { %9391 = vst [vmem:[#allocation130_spill] sm:$0xff] %v6929_v62  ;;  %v6933_v50 = vmax.f32 %v6929_v62, %v2637_v40  ;;  %v6935_v9 = vld [vmem:[#allocation3 + $0x40] sm:$0xff]  ;;  %1799 = vperm.xlu1 %5465, %v6723_v56   ;;  %v949_v24 = vpop.xlane.xlu1 %948  ;;  %1522 = vst.msk [vmem:[#allocation3 + $0x78] sm:$0xff] %vm1240_vm4, %v6942_v46 }
 0x31b   :  { %9393 = vst [vmem:[#allocation132_spill] sm:$0xff] %v6935_v9  ;;  %v6939_v11 = vmax.f32 %v6935_v9, %v2631_v26  ;;  %v6945_v61 = vmax.f32 %v6927_v1, %v949_v24  ;;  %v6973_v9 = vld [vmem:[#allocation3 + $0x60] sm:$0xff]  ;;  %v6975_v1 = vld [vmem:[#allocation3 + $0x68] sm:$0xff] }
 0x31c   :  { %9392 = vst [vmem:[#allocation131_spill] sm:$0xff] %v6933_v50  ;;  %3300 = vst.msk [vmem:[#allocation3 + $0x58] sm:$0xff] %vm2934_vm6, %v6933_v50  ;;  %v6949_v40 = vld [vmem:[#allocation3 + $0x48] sm:$0xff]  ;;  %v2645_v23 = vpop.xlane.xlu0 %2644 }
 0x31d   :  { %9394 = vst [vmem:[#allocation133_spill] sm:$0xff] %v6939_v11  ;;  %9395 = vst [vmem:[#allocation134_spill] sm:$0xff] %v6945_v61  ;;  %v6956_v26 = vmax.f32 %v6949_v40, %v1738_v52  ;;  %1040 = vperm.xlu0 %5471, %v6945_v61  }
 0x31e   :  { %9396 = vst [vmem:[#allocation135_spill] sm:$0xff] %v6949_v40  ;;  %3297 = vst.msk [vmem:[#allocation3 + $0x40] sm:$0xff] %vm2934_vm6, %v6939_v11  ;;  %5466 = vset.pattern.permute.xlu1 %v9362_v21  ;;  %v2643_v62 = vpop.xlane.xlu1 %2642 }
 0x31f   :  { %9397 = vst [vmem:[#allocation136_spill] sm:$0xff] %v6956_v26  ;;  %1521 = vst.msk [vmem:[#allocation3 + $0x70] sm:$0xff] %vm1240_vm4, %v6945_v61  ;;  %1015 = vperm.xlu1 %5466, %v6911_v17   ;;  %v1119_v61 = vsub.f32 %v6738_v22, %v6743_v19 }
 0x320   :  { %2411 = vst.msk [vmem:[#allocation3 + $0x48] sm:$0xff] %vm2039_vm5, %v6956_v26  ;;  %9398 = vst [vmem:[#allocation137_spill] sm:$0xff] %v6973_v9 }
 0x321   :  { %v947_v40 = vpop.xlane.xlu0 %946  ;;  %v1142_v32 = vmul.f32 1.442695, %v1119_v61  ;;  %v7015_v61 = vld [vmem:[#allocation3 + $0x78] sm:$0xff] }
 0x322   :  { %v945_v24 = vpop.xlane.xlu1 %944  ;;  %v6994_v19 = vmax.f32 %v6975_v1, %v947_v40  ;;  %9401 = vst [vmem:[#allocation140_spill] sm:$0xff] %v7015_v61 }
 0x323   :  { %v6980_v50 = vmax.f32 %v6973_v9, %v945_v24  ;;  %5467 = vset.pattern.permute.xlu1 %v9353_v34  ;;  %5563 = vpow2.f32 %v1142_v32 }
 0x324   :  { %1789 = vperm.xlu1 %5467, %v6750_v8   ;;  %1520 = vst.msk [vmem:[#allocation3 + $0x68] sm:$0xff] %vm1240_vm4, %v6994_v19 }
 0x325   :  { %9399 = vst [vmem:[#allocation138_spill] sm:$0xff] %v6980_v50  ;;  %1519 = vst.msk [vmem:[#allocation3 + $0x60] sm:$0xff] %vm1240_vm4, %v6980_v50  ;;  %1030 = vperm.xlu0 %5471, %v6980_v50  }
 0x326   :  { %v6983_v52 = vld [vmem:[#allocation3 + $0x70] sm:$0xff]  ;;  %v2639_v22 = vpop.xlane.xlu1 %2638 }
 0x327   :  { %v6987_v35 = vmax.f32 %v6983_v52, %v1748_v42  ;;  %v6997_v24 = vld [vmem:[#allocation3 + $0x48] sm:$0xff] }
 0x328   :  { %9400 = vst [vmem:[#allocation139_spill] sm:$0xff] %v6997_v24  ;;  %v7007_v37 = vmax.f32 %v6997_v24, %v6874_v44  ;;  %5469 = vset.pattern.permute.xlu1 %v9382_v15  ;;  %v9403_v44 = vsub.f32 %v6636_v55, %v6639_v3 }
 0x329   :  { %2416 = vst.msk [vmem:[#allocation3 + $0x70] sm:$0xff] %vm2039_vm5, %v6987_v35  ;;  %2674 = vperm.xlu1 %5469, %v6669_v45   ;;  %5478 = vset.pattern.permute.xlu0 %v9353_v34 }
 0x32a   :  { %3298 = vst.msk [vmem:[#allocation3 + $0x48] sm:$0xff] %vm2934_vm6, %v7007_v37  ;;  %1824 = vperm.xlu0 %5478, %v6883_v13   ;;  %v1750_v40 = vpop.xlane.xlu1 %1749  ;;  %v1931_v50 = vmul.f32 1.442695, %v9403_v44  ;;  %v1117_v44 = vsub.f32 %v6769_v12, %v6784_v60 }
 0x32b   :  { %v7018_v42 = vmax.f32 %v7015_v61, %v1750_v40  ;;  %v7037_v3 = vld [vmem:[#allocation3 + $0x68] sm:$0xff] }
 0x32c   :  { %v7023_v9 = vld [vmem:[#allocation3 + $0x60] sm:$0xff]  ;;  %9405 = vst [vmem:[#allocation143_spill] sm:$0xff] %v7037_v3  ;;  %5565 = vpow2.f32 %v1931_v50  ;;  %v1138_v60 = vmul.f32 1.442695, %v1117_v44 }
 0x32d   :  { %9402 = vst [vmem:[#allocation141_spill] sm:$0xff] %v7018_v42  ;;  %v7027_v24 = vmax.f32 %v7023_v9, %v6922_v0  ;;  %2417 = vst.msk [vmem:[#allocation3 + $0x78] sm:$0xff] %vm2039_vm5, %v7018_v42  ;;  %2664 = vperm.xlu1 %5469, %v6695_v20   ;;  %v7063_v12 = vpop.eup %5563 }
 0x32e   :  { %5479 = vset.pattern.permute.xlu0 %v9382_v15  ;;  %v1746_v55 = vpop.xlane.xlu1 %1745  ;;  %5567 = vpow2.f32 %v1138_v60 }
 0x32f   :  { %2414 = vst.msk [vmem:[#allocation3 + $0x60] sm:$0xff] %vm2039_vm5, %v7027_v24  ;;  %v7045_v0 = vmax.f32 %v7037_v3, %v1746_v55  ;;  %2694 = vperm.xlu0 %5479, %v6760_v48  }
 0x330   :  { %v7034_v32 = vld [vmem:[#allocation3 + $0x70] sm:$0xff] }
 0x331   :  { %9404 = vst [vmem:[#allocation142_spill] sm:$0xff] %v7034_v32  ;;  %v7040_v40 = vmax.f32 %v7034_v32, %v2643_v62  ;;  %9407 = vst [vmem:[#allocation145_spill] sm:$0xff] %v7045_v0  ;;  %2679 = vperm.xlu1 %5469, %v6718_v2   ;;  %v2641_v32 = vpop.xlane.xlu0 %2640 }
 0x332   :  { %2415 = vst.msk [vmem:[#allocation3 + $0x68] sm:$0xff] %vm2039_vm5, %v7045_v0 }
 0x333   :  { %9406 = vst [vmem:[#allocation144_spill] sm:$0xff] %v7040_v40  ;;  %3303 = vst.msk [vmem:[#allocation3 + $0x70] sm:$0xff] %vm2934_vm6, %v7040_v40  ;;  %5480 = vset.pattern.permute.xlu0 %v9353_v34 }
 0x334   :  { %1814 = vperm.xlu0 %5480, %v6956_v26   ;;  %v7061_v50 = vld [vmem:[#allocation3 + $0x78] sm:$0xff] }
 0x335   :  { %5472 = vset.pattern.permute.xlu1 %v9362_v21  ;;  %v7067_v55 = vmax.f32 %v7061_v50, %v2645_v23  ;;  %v976_v60 = vpop.permute.xlu0 %975  ;;  %v9446_v26 = vld [vmem:[#allocation33_spill] sm:$0xff] }
 0x336   :  { %v7069_v13 = vld [vmem:[#allocation3 + $0x60] sm:$0xff]  ;;  %1310 = vperm.xlu1 %5472, %v7063_v12   ;;  %v7088_v44 = vpop.eup %5565  ;;  %v1049_v23 = vsub.f32 %v6248_v41, %v976_v60 }
 0x337   :  { %9408 = vst [vmem:[#allocation146_spill] sm:$0xff] %v7069_v13  ;;  %v7073_v62 = vmax.f32 %v7069_v13, %v2639_v22  ;;  %3304 = vst.msk [vmem:[#allocation3 + $0x78] sm:$0xff] %vm2934_vm6, %v7067_v55  ;;  %v9410_v13 = vsub.f32 %v6609_v31, %v6612_v49 }
 0x338   :  { %5481 = vset.pattern.permute.xlu0 %v9382_v15 }
 0x339   :  { %9409 = vst [vmem:[#allocation147_spill] sm:$0xff] %v7073_v62  ;;  %v7078_v3 = vld [vmem:[#allocation3 + $0x68] sm:$0xff]  ;;  %3301 = vst.msk [vmem:[#allocation3 + $0x60] sm:$0xff] %vm2934_vm6, %v7073_v62  ;;  %2684 = vperm.xlu0 %5481, %v6797_v10   ;;  %v1066_v10 = vmul.f32 1.442695, %v1049_v23 }
 0x33a   :  { %v7086_v22 = vmax.f32 %v7078_v3, %v2641_v32  ;;  %5473 = vset.pattern.permute.xlu1 %v9353_v34  ;;  %v7099_v32 = vpop.eup %5567 }
 0x33b   :  { %2084 = vperm.xlu1 %5473, %v7088_v44  }
 0x33c   :  { %3302 = vst.msk [vmem:[#allocation3 + $0x68] sm:$0xff] %vm2934_vm6, %v7086_v22 }
 0x33d   :  { %5488 = vset.pattern.permute.xlu0 %v9353_v34 }
 0x33e   :  { %1844 = vperm.xlu0 %5488, %v7018_v42   ;;  %v1929_v42 = vmul.f32 1.442695, %v9410_v13 }
 0x33f   :  { %5474 = vset.pattern.permute.xlu1 %v9362_v21 }
 0x340   :  { %1045 = vperm.xlu1 %5474, %v6942_v46   ;;  %5569 = vpow2.f32 %v1929_v42 }
 0x341   :  { %5571 = vpow2.f32 %v1066_v10  ;;  %v9412_v10 = vsub.f32 %v6747_v53, %v6767_v36 }
 0x342   :  { %5489 = vset.pattern.permute.xlu0 %v9382_v15 }
 0x343   :  { %2714 = vperm.xlu0 %5489, %v6904_v51  }
 0x344   :  { %1300 = vperm.xlu1 %5474, %v7099_v32  }
 0x345   :  { %v981_v61 = vpop.permute.xlu1 %980 }
 0x346   :  { %v1050_v13 = vsub.f32 %v6301_v63, %v981_v61  ;;  %v1150_v63 = vmul.f32 1.442695, %v9412_v10 }
 0x347   :  { %5490 = vset.pattern.permute.xlu0 %v9353_v34 }
 0x348   :  { %5475 = vset.pattern.permute.xlu1 %v9353_v34  ;;  %1834 = vperm.xlu0 %5490, %v7045_v0   ;;  %v1068_v49 = vmul.f32 1.442695, %v1050_v13 }
 0x349   :  { %1819 = vperm.xlu1 %5475, %v6856_v4   ;;  %v971_v51 = vpop.permute.xlu1 %970 }
 0x34a   :  { %v1048_v41 = vsub.f32 %v6311_v38, %v971_v51  ;;  %v7122_v38 = vpop.eup %5569 }
 0x34b   :  { %9411 = vst [vmem:[#allocation148_spill] sm:$0xff] %v7122_v38  ;;  %v5572_v23 = vpop.eup %5571 }
 0x34c   :  { %5491 = vset.pattern.permute.xlu0 %v9382_v15  ;;  %v1064_v31 = vmul.f32 1.442695, %v1048_v41  ;;  %v9413_v41 = vsub.f32 %v6720_v18, %v6723_v56  ;;  %v7135_v53 = vmul.f32 %v5572_v23, %v6215_v58 }
 0x34d   :  { %5476 = vset.pattern.permute.xlu1 %v9362_v21  ;;  %2704 = vperm.xlu0 %5491, %v6939_v11  }
 0x34e   :  { %1035 = vperm.xlu1 %5476, %v6994_v19   ;;  %5573 = vpow2.f32 %v1064_v31  ;;  %v9414_v31 = vsub.f32 %v6890_v27, %v6911_v17  ;;  %v9416_v17 = vsub.f32 %v6745_v6, %v6750_v8  ;;  %v2806_v8 = vsub.f32 %v6684_v33, %v6695_v20  ;;  %v9419_v33 = vld [vmem:[#allocation14_spill] sm:$0xff] }
 0x34f   :  { %5575 = vpow2.f32 %v1068_v49 }
 0x350   :  { %v1146_v49 = vmul.f32 1.442695, %v9414_v31  ;;  %v1935_v23 = vmul.f32 1.442695, %v9416_v17  ;;  %v9417_v31 = vld [vmem:[#allocation53_spill] sm:$0xff]  ;;  %v9422_v17 = vld [vmem:[#allocation16_spill] sm:$0xff] }
 0x351   :  { %2734 = vperm.xlu0 %5491, %v7040_v40   ;;  %v986_v42 = vpop.permute.xlu1 %985  ;;  %v9443_v40 = vld [vmem:[#allocation69_spill] sm:$0xff] }
 0x352   :  { %5477 = vset.pattern.permute.xlu1 %v9353_v34  ;;  %v1051_v51 = vsub.f32 %v6348_v39, %v986_v42  ;;  %v1939_v39 = vmul.f32 1.442695, %v9413_v41 }
 0x353   :  { %1809 = vperm.xlu1 %5477, %v6894_v14  }
 0x354   :  { %v1070_v61 = vmul.f32 1.442695, %v1051_v51 }
 0x355   :  { %2724 = vperm.xlu0 %5491, %v7073_v62  }
 0x356   :  { %5577 = vpow2.f32 %v1070_v61 }
 0x357   :  { %2079 = vperm.xlu1 %5477, %v7122_v38   ;;  %5579 = vpow2.f32 %v1150_v63  ;;  %v9487_v38 = vld [vmem:[#allocation72_spill] sm:$0xff] }
 0x358   :  { %v5574_v60 = vpop.eup %5573  ;;  %5581 = vpow2.f32 %v1939_v39  ;;  %v2808_v39 = vsub.f32 %v6663_v57, %v6669_v45  ;;  %v2809_v45 = vsub.f32 %v6711_v16, %v6718_v2  ;;  %v2822_v57 = vmul.f32 1.442695, %v2806_v8 }
 0x359   :  { %v1096_v13 = vmul.f32 %v5574_v60, %v6196_v43  ;;  %v5576_v56 = vpop.eup %5575  ;;  %5583 = vpow2.f32 %v1146_v49 }
 0x35a   :  { %v1098_v51 = vmul.f32 %v5576_v56, %v6183_v28  ;;  %5585 = vpow2.f32 %v1935_v23  ;;  %v9420_v56 = vld [vmem:[#allocation22_spill] sm:$0xff]  ;;  %v2828_v16 = vmul.f32 1.442695, %v2809_v45  ;;  %v9423_v23 = vld [vmem:[#allocation60_spill] sm:$0xff]  ;;  %v9426_v45 = vld [vmem:[#allocation37_spill] sm:$0xff] }
 0x35b   :  { %5482 = vset.pattern.permute.xlu1 %v9382_v15  ;;  %v1369_v36 = vpack.c.bf16 %v7135_v53, %v1096_v13 }
 0x35c   :  { %2699 = vperm.xlu1 %5482, %v6835_v25  }
 0x35d   :  { %5270 = vmatprep.mubr.bf16.mxu0 %v1369_v36 }
 0x360   :  { %2689 = vperm.xlu1 %5482, %v6872_v47   ;;  %v5578_v18 = vpop.eup %5577  ;;  %v1001_v61 = vpop.permute.xlu1 %1000 }
 0x361   :  { %v7142_v42 = vpop.eup %5579  ;;  %v1099_v10 = vmul.f32 %v5578_v18, %v6207_v54 }
 0x362   :  { %v7148_v27 = vpop.eup %5581 }
 0x363   :  { %v1370_v63 = vpack.c.bf16 %v1099_v10, %v1098_v51  ;;  %9415 = vst [vmem:[#allocation149_spill] sm:$0xff] %v7148_v27  ;;  %v7158_v41 = vpop.eup %5583 }
 0x364   :  { %5483 = vset.pattern.permute.xlu1 %v9362_v21 }
 0x365   :  { %1330 = vperm.xlu1 %5483, %v7142_v42   ;;  %5271 = vmatmul.mubr.bf16.vlgmr.msra.gmra.mrb[16].mxu0 %v1370_v63  ;;  %v7179_v63 = vpop.eup %5585 }
 0x366   :  { %5287 = vmatpush3.bf16.msra.mxu0 %v6088_v30  ;;  %9421 = vst [vmem:[#allocation53_spill] sm:$0xff] %v7179_v63 }
 0x367   :  { %5288 = vmatprep.subr.bf16.mxu0 %v6148_v5 }
 0x368   :  { %v991_v60 = vpop.permute.xlu1 %990 }
 0x369   :  { %5484 = vset.pattern.permute.xlu1 %v9353_v34  ;;  %v1052_v49 = vsub.f32 %v9417_v31, %v991_v60  ;;  %v9427_v31 = vld [vmem:[#allocation18_spill] sm:$0xff] }
 0x36a   :  { %2104 = vperm.xlu1 %5484, %v7148_v27   ;;  %5289 = vmatpush3.bf16.msra.mxu0 %v6148_v5  ;;  %v2826_v5 = vmul.f32 1.442695, %v2808_v39 }
 0x36b   :  { %5290 = vmatprep.subr.bf16.mxu0 %v6136_v59 }
 0x36e   :  { %5485 = vset.pattern.permute.xlu1 %v9362_v21  ;;  %5291 = vmatpush3.bf16.msra.mxu0 %v6136_v59 }
 0x36f   :  { %1320 = vperm.xlu1 %5485, %v7158_v41   ;;  %5292 = vmatprep.subr.bf16.mxu0 %v6151_v7 }
 0x370   :  { %v1006_v30 = vpop.permute.xlu1 %1005 }
 0x371   :  { %v1055_v6 = vsub.f32 %v6431_v29, %v1006_v30  ;;  %v9418_v29 = vld [vmem:[#allocation47_spill] sm:$0xff] }
 0x372   :  { %5293 = vmatpush3.bf16.msra.mxu0 %v6151_v7  ;;  %v1054_v20 = vsub.f32 %v9418_v29, %v1001_v61 }
 0x373   :  { %v1078_v36 = vmul.f32 1.442695, %v1055_v6  ;;  %5486 = vset.pattern.permute.xlu1 %v9353_v34  ;;  %5294 = vmatprep.subr.bf16.mxu0 %v9419_v33 }
 0x374   :  { %1839 = vperm.xlu1 %5486, %v6987_v35   ;;  %1196 = vadd.xlane.f32.xlu0 %v1098_v51  ;;  %v1072_v51 = vmul.f32 1.442695, %v1052_v49  ;;  %v1076_v7 = vmul.f32 1.442695, %v1054_v20 }
 0x375   :  { %5587 = vpow2.f32 %v1078_v36  ;;  %v1780_v59 = vpop.permute.xlu1 %1779 }
 0x376   :  { %5589 = vpow2.f32 %v2826_v5  ;;  %v1849_v18 = vsub.f32 %v9420_v56, %v1780_v59  ;;  %5295 = vmatpush3.bf16.msra.mxu0 %v9419_v33  ;;  %v9425_v5 = vld [vmem:[#allocation31_spill] sm:$0xff] }
 0x377   :  { %5591 = vpow2.f32 %v2822_v57  ;;  %5296 = vmatprep.subr.bf16.mxu0 %v9422_v17 }
 0x378   :  { %v1867_v2 = vmul.f32 1.442695, %v1849_v18  ;;  %2094 = vperm.xlu1 %5486, %v7179_v63   ;;  %1192 = vadd.xlane.f32.xlu0 %v1096_v13  ;;  %v9424_v13 = vld [vmem:[#allocation15_spill] sm:$0xff]  ;;  %v9430_v18 = vld [vmem:[#allocation128_spill] sm:$0xff] }
 0x379   :  { %v9475_v63 = vld [vmem:[#allocation88_spill] sm:$0xff] }
 0x37a   :  { %5593 = vpow2.f32 %v1867_v2  ;;  %v996_v61 = vpop.permute.xlu1 %995  ;;  %5297 = vmatpush3.bf16.msra.mxu0 %v9422_v17 }
 0x37b   :  { %v1053_v60 = vsub.f32 %v9423_v23, %v996_v61  ;;  %5595 = vpow2.f32 %v2828_v16  ;;  %5298 = vmatprep.subr.bf16.mxu0 %v9424_v13  ;;  %v9431_v16 = vsub.f32 %v9430_v18, %v6942_v46  ;;  %v7214_v61 = vpop.permute.xlu0 %1769  ;;  %v9432_v23 = vld [vmem:[#allocation41_spill] sm:$0xff]  ;;  %v9435_v46 = vld [vmem:[#allocation120_spill] sm:$0xff] }
 0x37c   :  { %1829 = vperm.xlu1 %5486, %v7027_v24   ;;  %1198 = vadd.xlane.f32.xlu0 %v1099_v10  ;;  %5597 = vpow2.f32 %v1072_v51 }
 0x37d   :  { %v1074_v39 = vmul.f32 1.442695, %v1053_v60  ;;  %5599 = vpow2.f32 %v1076_v7  ;;  %v1158_v2 = vmul.f32 1.442695, %v9431_v16 }
 0x37e   :  { %5299 = vmatpush3.bf16.msra.mxu0 %v9424_v13 }
 0x37f   :  { %v5588_v30 = vpop.eup %5587  ;;  %5601 = vpow2.f32 %v1074_v39  ;;  %v1775_v8 = vpop.permute.xlu1 %1774  ;;  %5300 = vmatprep.subr.bf16.mxu0 %v9427_v31  ;;  %v9433_v39 = vld [vmem:[#allocation34_spill] sm:$0xff] }
 0x380   :  { %v7188_v6 = vpop.eup %5589  ;;  %v1848_v36 = vsub.f32 %v9425_v5, %v1775_v8  ;;  %5487 = vset.pattern.permute.xlu1 %v9382_v15  ;;  %v1103_v57 = vmul.f32 %v5588_v30, %v9426_v45  ;;  %v9434_v30 = vld [vmem:[#allocation30_spill] sm:$0xff]  ;;  %v9436_v5 = vsub.f32 %v9435_v46, %v6856_v4  ;;  %v9438_v4 = vsub.f32 %v6975_v1, %v6994_v19  ;;  %v9442_v1 = vld [vmem:[#allocation115_spill] sm:$0xff] }
 0x381   :  { %2979 = vperm.xlu1 %5487, %v7188_v6   ;;  %v7196_v49 = vpop.eup %5591  ;;  %v2813_v19 = vsub.f32 %v9442_v1, %v6835_v25 }
 0x382   :  { %v1865_v10 = vmul.f32 1.442695, %v1848_v36  ;;  %1206 = vadd.xlane.f32.xlu0 %v1103_v57  ;;  %9428 = vst [vmem:[#allocation47_spill] sm:$0xff] %v7196_v49  ;;  %5301 = vmatpush3.bf16.msra.mxu0 %v9427_v31  ;;  %v1947_v36 = vmul.f32 1.442695, %v9436_v5  ;;  %v9439_v5 = vld [vmem:[#allocation58_spill] sm:$0xff] }
 0x384   :  { %v5594_v59 = vpop.eup %5593  ;;  %5603 = vpow2.f32 %v1865_v10  ;;  %v7198_v29 = vpop.permute.xlu1 %1285 }
 0x385   :  { %2969 = vperm.xlu1 %5487, %v7196_v49   ;;  %v7203_v20 = vmul.f32 %v5594_v59, %v6183_v28  ;;  %v7205_v33 = vpop.eup %5595  ;;  %5605 = vpow2.f32 %v1158_v2  ;;  %v9437_v59 = vld [vmem:[#allocation131_spill] sm:$0xff] }
 0x386   :  { %9429 = vst [vmem:[#allocation14_spill] sm:$0xff] %v7205_v33  ;;  %v5598_v56 = vpop.eup %5597  ;;  %5607 = vpow2.f32 %v1947_v36  ;;  %v9440_v36 = vld [vmem:[#allocation125_spill] sm:$0xff] }
 0x387   :  { %1995 = vadd.xlane.f32.xlu0 %v7203_v20  ;;  %v5600_v51 = vpop.eup %5599  ;;  %v7218_v13 = vmul.f32 %v5598_v56, %v9433_v39 }
 0x388   :  { %v7211_v7 = vpop.permute.xlu1 %1275  ;;  %v7221_v8 = vmul.f32 %v5600_v51, %v9434_v30  ;;  %v1154_v51 = vmul.f32 1.442695, %v9438_v4 }
 0x389   :  { %v5602_v17 = vpop.eup %5601  ;;  %2984 = vperm.xlu1 %5487, %v7205_v33  }
 0x38a   :  { %v1101_v60 = vmul.f32 %v5602_v17, %v9432_v23  ;;  %v1372_v18 = vpack.c.bf16 %v1103_v57, %v7221_v8  ;;  %v7229_v17 = vpop.permute.xlu0 %1784  ;;  %5609 = vpow2.f32 %v1154_v51 }
 0x38c   :  { %1202 = vadd.xlane.f32.xlu0 %v1101_v60  ;;  %v1011_v10 = vpop.permute.xlu1 %1010  ;;  %v1371_v31 = vpack.c.bf16 %v1101_v60, %v7218_v13 }
 0x38d   :  { %2719 = vperm.xlu1 %5487, %v9437_v59   ;;  %v1056_v11 = vsub.f32 %v9443_v40, %v1011_v10 }
 0x38e   :  { %v5604_v16 = vpop.eup %5603  ;;  %5274 = vmatprep.mubr.bf16.mxu0 %v1371_v31  ;;  %v1021_v57 = vpop.permute.xlu0 %1020 }
 0x38f   :  { %5275 = vmatmul.mubr.bf16.gmra.mrb[20].mxu0 %v1372_v18  ;;  %v7232_v56 = vmul.f32 %v5604_v16, %v6215_v58  ;;  %v7241_v46 = vpop.eup %5605  ;;  %v9441_v18 = vsub.f32 %v9440_v36, %v6894_v14  ;;  %v2836_v36 = vmul.f32 1.442695, %v2813_v19 }
 0x390   :  { %v7234_v2 = vpop.permute.xlu1 %1290  ;;  %v7254_v0 = vpop.eup %5607 }
 0x391   :  { %2709 = vperm.xlu1 %5487, %v7007_v37   ;;  %1993 = vadd.xlane.f32.xlu0 %v7232_v56  ;;  %v1943_v16 = vmul.f32 1.442695, %v9441_v18  ;;  %9444 = vst [vmem:[#allocation22_spill] sm:$0xff] %v7254_v0 }
 0x392   :  { %v7251_v62 = vpop.permute.xlu0 %1804 }
 0x394   :  { %v1026_v60 = vpop.permute.xlu1 %1025  ;;  %v7262_v10 = vpop.eup %5609 }
 0x395   :  { %v1059_v31 = vsub.f32 %v9439_v5, %v1026_v60  ;;  %5492 = vset.pattern.permute.xlu1 %v9362_v21  ;;  %v9445_v60 = vld [vmem:[#allocation64_spill] sm:$0xff] }
 0x396   :  { %1350 = vperm.xlu1 %5492, %v7241_v46   ;;  %v1058_v5 = vsub.f32 %v9445_v60, %v1021_v57  ;;  %v7260_v1 = vpop.permute.xlu0 %1794 }
 0x397   :  { %v1086_v4 = vmul.f32 1.442695, %v1059_v31  ;;  %v1080_v31 = vmul.f32 1.442695, %v1056_v11 }
 0x398   :  { %v1084_v18 = vmul.f32 1.442695, %v1058_v5 }
 0x399   :  { %5611 = vpow2.f32 %v1086_v4  ;;  %v1800_v51 = vpop.permute.xlu1 %1799  ;;  %v9448_v4 = vld [vmem:[#allocation76_spill] sm:$0xff] }
 0x39a   :  { %5613 = vpow2.f32 %v1943_v16  ;;  %v1853_v14 = vsub.f32 %v9446_v26, %v1800_v51  ;;  %5493 = vset.pattern.permute.xlu1 %v9353_v34  ;;  %v9447_v16 = vld [vmem:[#allocation121_spill] sm:$0xff] }
 0x39b   :  { %2124 = vperm.xlu1 %5493, %v7254_v0   ;;  %v2811_v57 = vsub.f32 %v9447_v16, %v6872_v47  ;;  %v9451_v47 = vld [vmem:[#allocation52_spill] sm:$0xff] }
 0x39c   :  { %v1875_v25 = vmul.f32 1.442695, %v1853_v14  ;;  %v2670_v14 = vpop.permute.xlu0 %2669 }
 0x39d   :  { %v2832_v51 = vmul.f32 1.442695, %v2811_v57  ;;  %v1925_v57 = vsub.f32 %v6983_v52, %v6987_v35  ;;  %v1923_v52 = vsub.f32 %v7023_v9, %v7027_v24 }
 0x39e   :  { %5615 = vpow2.f32 %v1875_v25  ;;  %v1016_v40 = vpop.permute.xlu1 %1015 }
 0x39f   :  { %5617 = vpow2.f32 %v2836_v36  ;;  %v1057_v26 = vsub.f32 %v9448_v4, %v1016_v40  ;;  %5494 = vset.pattern.permute.xlu1 %v9362_v21  ;;  %v9450_v36 = vld [vmem:[#allocation36_spill] sm:$0xff]  ;;  %v1955_v35 = vmul.f32 1.442695, %v1925_v57  ;;  %v1951_v57 = vmul.f32 1.442695, %v1923_v52  ;;  %v9462_v52 = vld [vmem:[#allocation139_spill] sm:$0xff] }
 0x3a0   :  { %1340 = vperm.xlu1 %5494, %v7262_v10   ;;  %5619 = vpow2.f32 %v1080_v31  ;;  %v9452_v31 = vld [vmem:[#allocation46_spill] sm:$0xff]  ;;  %v2815_v33 = vsub.f32 %v9462_v52, %v7007_v37 }
 0x3a1   :  { %v1082_v19 = vmul.f32 1.442695, %v1057_v26  ;;  %5621 = vpow2.f32 %v1084_v18  ;;  %v2743_v18 = vsub.f32 %v9452_v31, %v2670_v14  ;;  %v9467_v52 = vld [vmem:[#allocation82_spill] sm:$0xff] }
 0x3a3   :  { %v5612_v11 = vpop.eup %5611  ;;  %5623 = vpow2.f32 %v1082_v19  ;;  %v1790_v60 = vpop.permute.xlu1 %1789 }
 0x3a4   :  { %v7269_v5 = vpop.eup %5613  ;;  %v1851_v25 = vsub.f32 %v9450_v36, %v1790_v60  ;;  %5495 = vset.pattern.permute.xlu1 %v9353_v34  ;;  %v1107_v40 = vmul.f32 %v5612_v11, %v9451_v47  ;;  %5625 = vpow2.f32 %v2832_v51  ;;  %v9454_v60 = vld [vmem:[#allocation23_spill] sm:$0xff] }
 0x3a5   :  { %9449 = vst [vmem:[#allocation16_spill] sm:$0xff] %v7269_v5  ;;  %2114 = vperm.xlu1 %5495, %v7269_v5  }
 0x3a6   :  { %v1871_v16 = vmul.f32 1.442695, %v1851_v25  ;;  %1214 = vadd.xlane.f32.xlu0 %v1107_v40  ;;  %v2760_v25 = vmul.f32 1.442695, %v2743_v18 }
 0x3a8   :  { %v5616_v4 = vpop.eup %5615  ;;  %5627 = vpow2.f32 %v1871_v16  ;;  %v2675_v26 = vpop.permute.xlu1 %2674 }
 0x3a9   :  { %v7278_v19 = vpop.eup %5617  ;;  %v2744_v36 = vsub.f32 %v9454_v60, %v2675_v26  ;;  %5496 = vset.pattern.permute.xlu1 %v9382_v15  ;;  %v7283_v11 = vmul.f32 %v5616_v4, %v9434_v30  ;;  %v9455_v26 = vld [vmem:[#allocation26_spill] sm:$0xff]  ;;  %v9456_v4 = vld [vmem:[#allocation61_spill] sm:$0xff] }
 0x3aa   :  { %9453 = vst [vmem:[#allocation60_spill] sm:$0xff] %v7278_v19  ;;  %3004 = vperm.xlu1 %5496, %v7278_v19   ;;  %v5620_v51 = vpop.eup %5619  ;;  %v9457_v19 = vld [vmem:[#allocation50_spill] sm:$0xff] }
 0x3ab   :  { %v2762_v14 = vmul.f32 1.442695, %v2744_v36  ;;  %2003 = vadd.xlane.f32.xlu0 %v7283_v11  ;;  %v5622_v31 = vpop.eup %5621  ;;  %v7293_v5 = vmul.f32 %v5620_v51, %v9457_v19  ;;  %v9458_v36 = vld [vmem:[#allocation45_spill] sm:$0xff] }
 0x3ac   :  { %v2665_v16 = vpop.permute.xlu1 %2664  ;;  %v7296_v0 = vmul.f32 %v5622_v31, %v9458_v36 }
 0x3ad   :  { %v5624_v21 = vpop.eup %5623  ;;  %5629 = vpow2.f32 %v2762_v14  ;;  %v2742_v60 = vsub.f32 %v9455_v26, %v2665_v16  ;;  %v9460_v16 = vld [vmem:[#allocation130_spill] sm:$0xff] }
 0x3ae   :  { %2739 = vperm.xlu1 %5496, %v7067_v55   ;;  %v1105_v48 = vmul.f32 %v5624_v21, %v9456_v4  ;;  %5631 = vpow2.f32 %v2760_v25  ;;  %v7299_v14 = vpop.eup %5625  ;;  %v2817_v26 = vsub.f32 %v9460_v16, %v9437_v59  ;;  %v9461_v21 = vld [vmem:[#allocation28_spill] sm:$0xff]  ;;  %v1374_v25 = vpack.c.bf16 %v1107_v40, %v7296_v0 }
 0x3af   :  { %v2758_v18 = vmul.f32 1.442695, %v2742_v60  ;;  %5633 = vpow2.f32 %v1955_v35  ;;  %9459 = vst [vmem:[#allocation15_spill] sm:$0xff] %v7299_v14 }
 0x3b0   :  { %1210 = vadd.xlane.f32.xlu0 %v1105_v48  ;;  %v2680_v9 = vpop.permute.xlu1 %2679  ;;  %v1373_v24 = vpack.c.bf16 %v1105_v48, %v7293_v5  ;;  %v2844_v48 = vmul.f32 1.442695, %v2817_v26  ;;  %v1041_v26 = vpop.permute.xlu0 %1040 }
 0x3b1   :  { %5635 = vpow2.f32 %v2758_v18  ;;  %v2745_v51 = vsub.f32 %v9461_v21, %v2680_v9 }
 0x3b2   :  { %v5628_v60 = vpop.eup %5627  ;;  %2994 = vperm.xlu1 %5496, %v7299_v14   ;;  %5278 = vmatprep.mubr.bf16.mxu0 %v1373_v24  ;;  %5637 = vpow2.f32 %v1951_v57  ;;  %v2840_v24 = vmul.f32 1.442695, %v2815_v33 }
 0x3b3   :  { %v2764_v31 = vmul.f32 1.442695, %v2745_v51  ;;  %5279 = vmatmul.mubr.bf16.gmra.mrb[24].mxu0 %v1374_v25  ;;  %v7307_v35 = vmul.f32 %v5628_v60, %v9433_v39 }
 0x3b5   :  { %5639 = vpow2.f32 %v2764_v31  ;;  %1999 = vadd.xlane.f32.xlu0 %v7307_v35  ;;  %v7312_v59 = vpop.permute.xlu1 %1310  ;;  %v1031_v31 = vpop.permute.xlu0 %1030 }
 0x3b6   :  { %2729 = vperm.xlu1 %5496, %v7086_v22   ;;  %5641 = vpow2.f32 %v2844_v48 }
 0x3b7   :  { %v5630_v40 = vpop.eup %5629  ;;  %5643 = vpow2.f32 %v2840_v24 }
 0x3b8   :  { %v7316_v18 = vmul.f32 %v5630_v40, %v6183_v28  ;;  %v5632_v9 = vpop.eup %5631  ;;  %v9473_v28 = vld [vmem:[#allocation83_spill] sm:$0xff] }
 0x3b9   :  { %v7318_v16 = vpop.eup %5633  ;;  %v7327_v51 = vmul.f32 %v5632_v9, %v6215_v58  ;;  %v9472_v9 = vld [vmem:[#allocation86_spill] sm:$0xff]  ;;  %v1062_v58 = vsub.f32 %v9473_v28, %v1041_v26  ;;  %v9479_v26 = vld [vmem:[#allocation56_spill] sm:$0xff] }
 0x3ba   :  { %9463 = vst [vmem:[#allocation31_spill] sm:$0xff] %v7316_v18  ;;  %9464 = vst [vmem:[#allocation18_spill] sm:$0xff] %v7318_v16  ;;  %5497 = vset.pattern.permute.xlu1 %v9353_v34  ;;  %2890 = vadd.xlane.f32.xlu0 %v7316_v18  ;;  %v7322_v37 = vpop.permute.xlu1 %2084 }
 0x3bb   :  { %9465 = vst [vmem:[#allocation128_spill] sm:$0xff] %v7322_v37  ;;  %v5636_v57 = vpop.eup %5635  ;;  %2144 = vperm.xlu1 %5497, %v7318_v16   ;;  %v1060_v37 = vsub.f32 %v9472_v9, %v1031_v31  ;;  %v1092_v14 = vmul.f32 1.442695, %v1062_v58 }
 0x3bc   :  { %v2790_v21 = vmul.f32 %v5636_v57, %v6196_v43  ;;  %v7329_v25 = vpop.eup %5637 }
 0x3bd   :  { %9466 = vst [vmem:[#allocation34_spill] sm:$0xff] %v7329_v25  ;;  %v1088_v16 = vmul.f32 1.442695, %v1060_v37 }
 0x3be   :  { %2886 = vadd.xlane.f32.xlu0 %v2790_v21  ;;  %v3063_v33 = vpack.c.bf16 %v7327_v51, %v2790_v21 }
 0x3bf   :  { %v5640_v60 = vpop.eup %5639  ;;  %2134 = vperm.xlu1 %5497, %v7329_v25   ;;  %v1046_v48 = vpop.permute.xlu1 %1045 }
 0x3c0   :  { %v1063_v40 = vsub.f32 %v9467_v52, %v1046_v48  ;;  %5334 = vmatprep.mubr.bf16.mxu1 %v3063_v33  ;;  %v7335_v34 = vmul.f32 %v5640_v60, %v6207_v54  ;;  %v7340_v24 = vpop.eup %5641  ;;  %v7346_v48 = vpop.permute.xlu0 %1824  ;;  %v9204_v33 = vmov 3   ;;  %v9471_v52 = vld [vmem:[#allocation39_spill] sm:$0xff] }
 0x3c1   :  { %9469 = vst [vmem:[#allocation131_spill] sm:$0xff] %v7340_v24  ;;  %5499 = vset.pattern.permute.xlu0 %v9204_v33  ;;  %v7349_v60 = vpop.eup %5643 }
 0x3c2   :  { %9468 = vst [vmem:[#allocation120_spill] sm:$0xff] %v7335_v34  ;;  %v1094_v57 = vmul.f32 1.442695, %v1063_v40  ;;  %2892 = vadd.xlane.f32.xlu0 %v7335_v34  ;;  %9470 = vst [vmem:[#allocation58_spill] sm:$0xff] %v7349_v60  ;;  %v1847_v40 = vsub.f32 %v9471_v52, %v7214_v61  ;;  %v9476_v61 = vld [vmem:[#allocation75_spill] sm:$0xff]  ;;  %v9477_v52 = vld [vmem:[#allocation42_spill] sm:$0xff] }
 0x3c3   :  { %5498 = vset.pattern.permute.xlu1 %v9382_v15  ;;  %v7343_v21 = vpop.permute.xlu1 %1300  ;;  %v1850_v28 = vsub.f32 %v9477_v52, %v7229_v17  ;;  %v9482_v17 = vld [vmem:[#allocation59_spill] sm:$0xff] }
 0x3c4   :  { %5645 = vpow2.f32 %v1094_v57  ;;  %3024 = vperm.xlu1 %5498, %v7340_v24   ;;  %v9474_v57 = vld [vmem:[#allocation51_spill] sm:$0xff]  ;;  %v1863_v34 = vmul.f32 1.442695, %v1847_v40  ;;  %v2695_v24 = vpop.permute.xlu0 %2694 }
 0x3c5   :  { %v1869_v40 = vmul.f32 1.442695, %v1850_v28 }
 0x3c8   :  { %3014 = vperm.xlu1 %5498, %v7349_v60   ;;  %v1820_v15 = vpop.permute.xlu1 %1819 }
 0x3c9   :  { %v1857_v18 = vsub.f32 %v9474_v57, %v1820_v15  ;;  %v1815_v15 = vpop.permute.xlu0 %1814 }
 0x3cb   :  { %v1883_v25 = vmul.f32 1.442695, %v1857_v18  ;;  %v9478_v18 = vld [vmem:[#allocation63_spill] sm:$0xff] }
 0x3cc   :  { %v1852_v37 = vsub.f32 %v9478_v18, %v7260_v1 }
 0x3cd   :  { %5647 = vpow2.f32 %v1883_v25  ;;  %v1036_v33 = vpop.permute.xlu1 %1035  ;;  %v2685_v57 = vpop.permute.xlu0 %2684 }
 0x3ce   :  { %v5646_v49 = vpop.eup %5645  ;;  %v1061_v27 = vsub.f32 %v9475_v63, %v1036_v33  ;;  %5649 = vpow2.f32 %v1863_v34  ;;  %v1873_v34 = vmul.f32 1.442695, %v1852_v37  ;;  %v9480_v33 = vld [vmem:[#allocation49_spill] sm:$0xff] }
 0x3cf   :  { %v1111_v31 = vmul.f32 %v5646_v49, %v9476_v61  ;;  %5651 = vpow2.f32 %v1088_v16  ;;  %v2748_v49 = vsub.f32 %v9480_v33, %v2695_v24 }
 0x3d0   :  { %v1090_v9 = vmul.f32 1.442695, %v1061_v27  ;;  %5653 = vpow2.f32 %v1092_v14  ;;  %v1854_v14 = vsub.f32 %v9482_v17, %v7251_v62  ;;  %v9485_v17 = vld [vmem:[#allocation40_spill] sm:$0xff] }
 0x3d1   :  { %1222 = vadd.xlane.f32.xlu0 %v1111_v31  ;;  %v2770_v37 = vmul.f32 1.442695, %v2748_v49  ;;  %v9488_v49 = vld [vmem:[#allocation67_spill] sm:$0xff] }
 0x3d2   :  { %5655 = vpow2.f32 %v1090_v9  ;;  %v1810_v58 = vpop.permute.xlu1 %1809  ;;  %v9483_v9 = vld [vmem:[#allocation79_spill] sm:$0xff] }
 0x3d3   :  { %v1855_v25 = vsub.f32 %v9479_v26, %v1810_v58  ;;  %v1856_v18 = vsub.f32 %v9483_v9, %v1815_v15  ;;  %v9484_v58 = vld [vmem:[#allocation54_spill] sm:$0xff] }
 0x3d4   :  { %v2746_v24 = vsub.f32 %v9484_v58, %v2685_v57  ;;  %v7383_v57 = vpop.permute.xlu0 %1844 }
 0x3d5   :  { %v1879_v63 = vmul.f32 1.442695, %v1855_v25  ;;  %v1877_v25 = vmul.f32 1.442695, %v1854_v14 }
 0x3d6   :  { %v7365_v16 = vpop.permute.xlu1 %2079  ;;  %v2766_v15 = vmul.f32 1.442695, %v2746_v24 }
 0x3d7   :  { %9481 = vst [vmem:[#allocation125_spill] sm:$0xff] %v7365_v16  ;;  %v5648_v27 = vpop.eup %5647  ;;  %5657 = vpow2.f32 %v1879_v63  ;;  %v1881_v16 = vmul.f32 1.442695, %v1856_v18 }
 0x3d8   :  { %v7370_v52 = vmul.f32 %v5648_v27, %v9458_v36  ;;  %v5650_v1 = vpop.eup %5649  ;;  %5659 = vpow2.f32 %v1869_v40  ;;  %v9486_v27 = vld [vmem:[#allocation81_spill] sm:$0xff] }
 0x3d9   :  { %v5652_v28 = vpop.eup %5651  ;;  %5661 = vpow2.f32 %v1873_v34  ;;  %v7387_v18 = vmul.f32 %v5650_v1, %v6196_v43 }
 0x3da   :  { %2011 = vadd.xlane.f32.xlu0 %v7370_v52  ;;  %v5654_v26 = vpop.eup %5653  ;;  %v7378_v40 = vmul.f32 %v5652_v28, %v9487_v38  ;;  %5663 = vpow2.f32 %v2770_v37 }
 0x3db   :  { %v2700_v33 = vpop.permute.xlu1 %2699  ;;  %v7381_v9 = vmul.f32 %v5654_v26, %v9488_v49  ;;  %5665 = vpow2.f32 %v1877_v25  ;;  %v2168_v25 = vpack.c.bf16 %v7232_v56, %v7387_v18 }
 0x3dc   :  { %v5656_v62 = vpop.eup %5655  ;;  %v2749_v63 = vsub.f32 %v9485_v17, %v2700_v33  ;;  %v9489_v33 = vld [vmem:[#allocation44_spill] sm:$0xff] }
 0x3dd   :  { %v1109_v60 = vmul.f32 %v5656_v62, %v9486_v27  ;;  %v1376_v37 = vpack.c.bf16 %v1111_v31, %v7381_v9  ;;  %v9490_v62 = vld [vmem:[#allocation74_spill] sm:$0xff] }
 0x3de   :  { %v2772_v34 = vmul.f32 1.442695, %v2749_v63  ;;  %v1858_v26 = vsub.f32 %v9490_v62, %v7346_v48 }
 0x3df   :  { %1218 = vadd.xlane.f32.xlu0 %v1109_v60  ;;  %v2690_v14 = vpop.permute.xlu1 %2689  ;;  %v1375_v58 = vpack.c.bf16 %v1109_v60, %v7378_v40 }
 0x3e0   :  { %5667 = vpow2.f32 %v2772_v34  ;;  %v2747_v28 = vsub.f32 %v9489_v33, %v2690_v14  ;;  %v1885_v34 = vmul.f32 1.442695, %v1858_v26  ;;  %v7398_v14 = vpop.permute.xlu0 %2714 }
 0x3e1   :  { %v5658_v24 = vpop.eup %5657  ;;  %5669 = vpow2.f32 %v1881_v16  ;;  %5282 = vmatprep.mubr.bf16.mxu0 %v1375_v58 }
 0x3e2   :  { %5671 = vpow2.f32 %v2766_v15  ;;  %v2768_v17 = vmul.f32 1.442695, %v2747_v28  ;;  %5283 = vmatmul.mubr.bf16.gmra.mrb[28].mxu0 %v1376_v37  ;;  %v1903_v60 = vmul.f32 %v5658_v24, %v9457_v19  ;;  %v5660_v1 = vpop.eup %5659 }
 0x3e3   :  { %5302 = vmatprep.mubr.bf16.mxu0 %v2168_v25  ;;  %v5662_v63 = vpop.eup %5661  ;;  %v1898_v48 = vmul.f32 %v5660_v1, %v6207_v54 }
 0x3e4   :  { %5673 = vpow2.f32 %v2768_v17  ;;  %2007 = vadd.xlane.f32.xlu0 %v1903_v60  ;;  %v7396_v31 = vpop.permute.xlu1 %1330  ;;  %v7402_v16 = vmul.f32 %v5662_v63, %v9432_v23  ;;  %v5664_v56 = vpop.eup %5663 }
 0x3e5   :  { %v2169_v15 = vpack.c.bf16 %v1898_v48, %v7203_v20  ;;  %v5666_v58 = vpop.eup %5665  ;;  %5675 = vpow2.f32 %v1885_v34  ;;  %v1835_v62 = vpop.permute.xlu0 %1834  ;;  %v7413_v25 = vmul.f32 %v5664_v56, %v9434_v30  ;;  %v9492_v20 = vld [vmem:[#allocation73_spill] sm:$0xff]  ;;  %v9494_v30 = vld [vmem:[#allocation91_spill] sm:$0xff] }
 0x3e6   :  { %v2170_v28 = vpack.c.bf16 %v7402_v16, %v7307_v35  ;;  %v1902_v63 = vmul.f32 %v5666_v58, %v9426_v45 }
 0x3e9   :  { %v7405_v33 = vpop.permute.xlu1 %2104 }
 0x3ea   :  { %9491 = vst [vmem:[#allocation115_spill] sm:$0xff] %v7405_v33  ;;  %v5668_v37 = vpop.eup %5667  ;;  %5303 = vmatmul.mubr.bf16.vlgmr.msra.gmra.mrb[32].mxu0 %v2169_v15 }
 0x3eb   :  { %v5670_v24 = vpop.eup %5669  ;;  %5306 = vmatprep.mubr.bf16.mxu0 %v2170_v28  ;;  %v7410_v26 = vmul.f32 %v5668_v37, %v9426_v45  ;;  %v7433_v28 = vpop.permute.xlu0 %2704 }
 0x3ec   :  { %v5672_v17 = vpop.eup %5671  ;;  %1194 = vadd.xlane.f32.xlu1 %v7135_v53  ;;  %v7426_v15 = vmul.f32 %v5670_v24, %v9456_v4  ;;  %v2171_v53 = vpack.c.bf16 %v1902_v63, %v7283_v11 }
 0x3ed   :  { %2900 = vadd.xlane.f32.xlu0 %v7410_v26  ;;  %v7429_v56 = vmul.f32 %v5672_v17, %v9433_v39 }
 0x3ee   :  { %v5674_v35 = vpop.eup %5673  ;;  %v7419_v1 = vpop.permute.xlu1 %1320  ;;  %v2172_v37 = vpack.c.bf16 %v7426_v15, %v1903_v60  ;;  %v1862_v60 = vsub.f32 %v9494_v30, %v7383_v57  ;;  %v1162_v30 = vld [vmem:[#allocation4 + $0x10] sm:$0xff] }
 0x3ef   :  { %v7423_v34 = vmul.f32 %v5674_v35, %v9432_v23  ;;  %v5676_v35 = vpop.eup %5675  ;;  %v7447_v23 = vpop.permute.xlu0 %2734 }
 0x3f0   :  { %1204 = vadd.xlane.f32.xlu1 %v7221_v8  ;;  %v9493_v8 = vld [vmem:[#allocation92_spill] sm:$0xff]  ;;  %v7443_v45 = vmul.f32 %v5676_v35, %v9451_v47 }
 0x3f1   :  { %2896 = vadd.xlane.f32.xlu0 %v7423_v34  ;;  %v1860_v33 = vsub.f32 %v9493_v8, %v1835_v62  ;;  %v1893_v62 = vmul.f32 1.442695, %v1862_v60  ;;  %v1160_v8 = vld [vmem:[#allocation4] sm:$0xff] }
 0x3f2   :  { %5307 = vmatmul.mubr.bf16.gmra.mrb[36].mxu0 %v2171_v53 }
 0x3f3   :  { %5310 = vmatprep.mubr.bf16.mxu0 %v2172_v37  ;;  %v1840_v24 = vpop.permute.xlu1 %1839  ;;  %v9496_v37 = vld [vmem:[#allocation78_spill] sm:$0xff] }
 0x3f4   :  { %v1861_v17 = vsub.f32 %v9492_v20, %v1840_v24  ;;  %1200 = vadd.xlane.f32.xlu1 %v7218_v13  ;;  %v2173_v20 = vpack.c.bf16 %v7443_v45, %v7370_v52  ;;  %v1889_v13 = vmul.f32 1.442695, %v1860_v33  ;;  %v7455_v24 = vpop.permute.xlu0 %2724 }
 0x3f6   :  { %v1891_v11 = vmul.f32 1.442695, %v1861_v17  ;;  %v9498_v17 = vld [vmem:[#allocation116_spill] sm:$0xff] }
 0x3f7   :  { %v7449_v58 = vpop.permute.xlu1 %2094  ;;  %v1178_v52 = vmul.f32 %v9498_v17, %v1162_v30 }
 0x3f8   :  { %9495 = vst [vmem:[#allocation69_spill] sm:$0xff] %v7449_v58  ;;  %5677 = vpow2.f32 %v1891_v11  ;;  %1991 = vadd.xlane.f32.xlu1 %v7387_v18 }
 0x3f9   :  { %5679 = vpow2.f32 %v1889_v13  ;;  %v9500_v13 = vld [vmem:[#allocation119_spill] sm:$0xff] }
 0x3fa   :  { %5311 = vmatmul.mubr.bf16.gmra.mrb[40].mxu0 %v2173_v20  ;;  %5681 = vpow2.f32 %v1893_v62  ;;  %v1176_v62 = vmul.f32 %v9500_v13, %v1160_v8  ;;  %v9504_v13 = vld [vmem:[#allocation71_spill] sm:$0xff] }
 0x3fb   :  { %v1830_v53 = vpop.permute.xlu1 %1829  ;;  %v2750_v58 = vsub.f32 %v9504_v13, %v7433_v28 }
 0x3fc   :  { %v1859_v35 = vsub.f32 %v9496_v37, %v1830_v53  ;;  %1997 = vadd.xlane.f32.xlu1 %v1898_v48 }
 0x3fe   :  { %v1887_v57 = vmul.f32 1.442695, %v1859_v35  ;;  %v9501_v35 = vld [vmem:[#allocation68_spill] sm:$0xff] }
 0x3ff   :  { %v2752_v30 = vsub.f32 %v9501_v35, %v7398_v14 }
 0x400   :  { %5683 = vpow2.f32 %v1887_v57  ;;  %1212 = vadd.xlane.f32.xlu1 %v7296_v0  ;;  %v7458_v18 = vpop.permute.xlu1 %2979  ;;  %v1163_v0 = vld [vmem:[#allocation4 + $0x18] sm:$0xff] }
 0x401   :  { %9497 = vst [vmem:[#allocation64_spill] sm:$0xff] %v7458_v18  ;;  %v1197_v33 = vpop.xlane.xlu0 %1196  ;;  %v2778_v8 = vmul.f32 1.442695, %v2752_v30 }
 0x402   :  { %v5678_v11 = vpop.eup %5677  ;;  %v1226_v60 = vadd.f32 %v1197_v33, %v1178_v52  ;;  %v9503_v52 = vld [vmem:[#allocation124_spill] sm:$0xff] }
 0x403   :  { %v1909_v20 = vmul.f32 %v5678_v11, %v9488_v49  ;;  %v5680_v57 = vpop.eup %5679  ;;  %v1179_v33 = vmul.f32 %v9503_v52, %v1163_v0  ;;  %5685 = vpow2.f32 %v2778_v8  ;;  %v1165_v8 = vld [vmem:[#allocation4 + $0x28] sm:$0xff] }
 0x404   :  { %1243 = vst.msk [vmem:[#allocation4 + $0x10] sm:$0xff] %vm1240_vm4, %v1226_v60  ;;  %1208 = vadd.xlane.f32.xlu1 %v7293_v5  ;;  %v7464_v48 = vpop.permute.xlu1 %2969  ;;  %v5682_v5 = vpop.eup %5681  ;;  %v7477_v14 = vmul.f32 %v5680_v57, %v9486_v27 }
 0x405   :  { %9499 = vst [vmem:[#allocation33_spill] sm:$0xff] %v7464_v48  ;;  %v1193_v53 = vpop.xlane.xlu0 %1192  ;;  %2019 = vadd.xlane.f32.xlu0 %v1909_v20  ;;  %v1910_v0 = vmul.f32 %v5682_v5, %v9476_v61  ;;  %v9506_v5 = vld [vmem:[#allocation66_spill] sm:$0xff] }
 0x406   :  { %v1224_v37 = vadd.f32 %v1193_v53, %v1176_v62  ;;  %v1167_v53 = vld [vmem:[#allocation4 + $0x38] sm:$0xff] }
 0x407   :  { %v1183_v28 = vmul.f32 %v7063_v12, %v1167_v53  ;;  %v2175_v52 = vpack.c.bf16 %v1910_v0, %v1909_v20 }
 0x408   :  { %1241 = vst.msk [vmem:[#allocation4] sm:$0xff] %vm1240_vm4, %v1224_v37  ;;  %2005 = vadd.xlane.f32.xlu1 %v1902_v63  ;;  %v7470_v17 = vpop.permute.xlu1 %2984  ;;  %v9505_v37 = vld [vmem:[#allocation62_spill] sm:$0xff] }
 0x409   :  { %9502 = vst [vmem:[#allocation121_spill] sm:$0xff] %v7470_v17  ;;  %v1199_v11 = vpop.xlane.xlu0 %1198 }
 0x40a   :  { %v5684_v60 = vpop.eup %5683  ;;  %v1227_v48 = vadd.f32 %v1199_v11, %v1179_v33  ;;  %v2774_v33 = vmul.f32 1.442695, %v2750_v58 }
 0x40b   :  { %v1907_v62 = vmul.f32 %v5684_v60, %v9487_v38 }
 0x40c   :  { %1244 = vst.msk [vmem:[#allocation4 + $0x18] sm:$0xff] %vm1240_vm4, %v1227_v48  ;;  %2001 = vadd.xlane.f32.xlu1 %v7402_v16  ;;  %v2720_v63 = vpop.permute.xlu1 %2719  ;;  %v1961_v48 = vld [vmem:[#allocation4 + $0x10] sm:$0xff] }
 0x40d   :  { %v2753_v35 = vsub.f32 %v9505_v37, %v2720_v63  ;;  %2015 = vadd.xlane.f32.xlu0 %v1907_v62  ;;  %v2174_v30 = vpack.c.bf16 %v7477_v14, %v1907_v62  ;;  %v1977_v12 = vmul.f32 %v7088_v44, %v1961_v48  ;;  %v5686_v53 = vpop.eup %5685 }
 0x40f   :  { %v2780_v11 = vmul.f32 1.442695, %v2753_v35  ;;  %v1207_v57 = vpop.xlane.xlu0 %1206  ;;  %5314 = vmatprep.mubr.bf16.mxu0 %v2174_v30 }
 0x410   :  { %v1231_v60 = vadd.f32 %v1207_v57, %v1183_v28  ;;  %2888 = vadd.xlane.f32.xlu1 %v7327_v51  ;;  %5315 = vmatmul.mubr.bf16.gmra.mrb[44].mxu0 %v2175_v52  ;;  %v2710_v16 = vpop.permute.xlu1 %2709  ;;  %v1181_v51 = vmul.f32 %v7099_v32, %v1165_v8  ;;  %v7535_v8 = vld [vmem:[#allocation5 + $0x10] sm:$0xff]  ;;  %v9526_v52 = vld [vmem:[#allocation93_spill] sm:$0xff] }
 0x411   :  { %5687 = vpow2.f32 %v2780_v11  ;;  %v2751_v13 = vsub.f32 %v9506_v5, %v2710_v16 }
 0x412   :  { %1248 = vst.msk [vmem:[#allocation4 + $0x38] sm:$0xff] %vm1240_vm4, %v1231_v60  ;;  %5689 = vpow2.f32 %v2774_v33  ;;  %v9507_v33 = vld [vmem:[#allocation84_spill] sm:$0xff]  ;;  %v9508_v60 = vld [vmem:[#allocation89_spill] sm:$0xff] }
 0x413   :  { %v2776_v62 = vmul.f32 1.442695, %v2751_v13  ;;  %v2756_v11 = vsub.f32 %v9507_v33, %v7447_v23  ;;  %v2754_v16 = vsub.f32 %v9508_v60, %v7455_v24  ;;  %v1171_v13 = vld [vmem:[#allocation4 + $0x58] sm:$0xff]  ;;  %v9511_v33 = vld [vmem:[#allocation8_spill] sm:$0xff] }
 0x414   :  { %v1996_v20 = vpop.xlane.xlu0 %1995  ;;  %1220 = vadd.xlane.f32.xlu1 %v7381_v9  ;;  %v7499_v9 = vmul.f32 %v5686_v53, %v9458_v36 }
 0x415   :  { %5691 = vpow2.f32 %v2776_v62  ;;  %v2025_v58 = vadd.f32 %v1996_v20, %v1977_v12  ;;  %v2786_v57 = vmul.f32 1.442695, %v2756_v11  ;;  %v2782_v48 = vmul.f32 1.442695, %v2754_v16  ;;  %v7524_v62 = vpop.permute.xlu1 %1350  ;;  %v9509_v20 = vld [vmem:[#allocation6_spill] sm:$0xff] }
 0x416   :  { %v2819_v16 = vsub.f32 %v7078_v3, %v7086_v22  ;;  %v9513_v3 = vld [vmem:[#allocation10_spill] sm:$0xff]  ;;  %v2821_v22 = vsub.f32 %v7061_v50, %v7067_v55  ;;  %v3308_v55 = vld [vmem:[#allocation2 + $0x18] sm:$0xff] }
 0x417   :  { %2042 = vst.msk [vmem:[#allocation4 + $0x10] sm:$0xff] %vm2039_vm5, %v2025_v58  ;;  %5693 = vpow2.f32 %v2786_v57 }
 0x418   :  { %1216 = vadd.xlane.f32.xlu1 %v7378_v40  ;;  %5695 = vpow2.f32 %v2782_v48 }
 0x419   :  { %v1203_v63 = vpop.xlane.xlu0 %1202 }
 0x41a   :  { %v1229_v37 = vadd.f32 %v1203_v63, %v1181_v51  ;;  %v7533_v58 = vpop.permute.xlu1 %2124  ;;  %v1355_v51 = vmul.f32 %v7535_v8, %v7198_v29  ;;  %v1353_v63 = vmul.f32 %v7535_v8, %v7211_v7 }
 0x41b   :  { %v5688_v35 = vpop.eup %5687  ;;  %9510 = vst [vmem:[#allocation76_spill] sm:$0xff] %v7533_v58 }
 0x41c   :  { %1246 = vst.msk [vmem:[#allocation4 + $0x28] sm:$0xff] %vm1240_vm4, %v1229_v37  ;;  %2013 = vadd.xlane.f32.xlu1 %v7443_v45  ;;  %v7496_v44 = vmul.f32 %v5688_v35, %v9451_v47  ;;  %v5690_v30 = vpop.eup %5689  ;;  %v1356_v35 = vmul.f32 %v7535_v8, %v7234_v2 }
 0x41d   :  { %v7509_v45 = vmul.f32 %v5690_v30, %v9457_v19 }
 0x41e   :  { %2908 = vadd.xlane.f32.xlu0 %v7496_v44  ;;  %v7520_v5 = vpop.xlane.xlu0 %1993 }
 0x41f   :  { %v5692_v40 = vpop.eup %5691 }
 0x420   :  { %2898 = vadd.xlane.f32.xlu1 %v7413_v25  ;;  %v7506_v28 = vmul.f32 %v5692_v40, %v9456_v4 }
 0x421   :  { %v5694_v24 = vpop.eup %5693 }
 0x422   :  { %2904 = vadd.xlane.f32.xlu0 %v7506_v28  ;;  %v5696_v53 = vpop.eup %5695 }
 0x424   :  { %2009 = vadd.xlane.f32.xlu1 %v7426_v15  ;;  %v1187_v15 = vmul.f32 %v7142_v42, %v1171_v13  ;;  %v1169_v42 = vld [vmem:[#allocation4 + $0x48] sm:$0xff]  ;;  %v7556_v13 = vmul.f32 %v5696_v53, %v9487_v38 }
 0x425   :  { %v1185_v29 = vmul.f32 %v7158_v41, %v1169_v42  ;;  %v2848_v41 = vmul.f32 1.442695, %v2819_v16  ;;  %v3314_v16 = vld [vmem:[#allocation2 + $0x48] sm:$0xff] }
 0x427   :  { %5697 = vpow2.f32 %v2848_v41  ;;  %v9519_v41 = vmov 3  }
 0x428   :  { %2894 = vadd.xlane.f32.xlu1 %v7429_v56 }
 0x42c   :  { %2021 = vadd.xlane.f32.xlu1 %v1910_v0 }
 0x430   :  { %2906 = vadd.xlane.f32.xlu1 %v7499_v9 }
 0x433   :  { %v1215_v23 = vpop.xlane.xlu0 %1214 }
 0x434   :  { %v1235_v12 = vadd.f32 %v1215_v23, %v1187_v15  ;;  %2017 = vadd.xlane.f32.xlu1 %v7477_v14  ;;  %v7540_v14 = vmul.f32 %v5694_v24, %v9488_v49  ;;  %v7558_v15 = vpop.permute.xlu1 %1340  ;;  %v9514_v24 = vld [vmem:[#allocation12_spill] sm:$0xff]  ;;  %v9641_v49 = vld [vmem:[#allocation38_spill] sm:$0xff] }
 0x436   :  { %1252 = vst.msk [vmem:[#allocation4 + $0x58] sm:$0xff] %vm1240_vm4, %v1235_v12  ;;  %v2856_v12 = vld [vmem:[#allocation4 + $0x10] sm:$0xff] }
 0x437   :  { %v2872_v53 = vmul.f32 %v7188_v6, %v2856_v12  ;;  %v3312_v6 = vld [vmem:[#allocation2 + $0x38] sm:$0xff] }
 0x438   :  { %v7528_v0 = vpop.xlane.xlu0 %2003  ;;  %2902 = vadd.xlane.f32.xlu1 %v7509_v45  ;;  %3071 = vrot.lane.b32.xlu0 %v9509_v20, %s5854_s2  ;;  %v5272_v37 = vpop.f32.mrb[16].mxu0  ;;  %v3316_v12 = vld [vmem:[#allocation2 + $0x58] sm:$0xff] }
 0x439   :  { %v1476_v30 = vadd.f32 %v5272_v37, %v1355_v51  ;;  %v1411_v40 = vpop.f32.mrb[17].mxu0  ;;  %v7572_v42 = vpop.permute.xlu1 %2114  ;;  %v2852_v51 = vmul.f32 1.442695, %v2821_v22  ;;  %v3305_v37 = vld [vmem:[#allocation2] sm:$0xff]  ;;  %v1175_v22 = vld [vmem:[#allocation4 + $0x78] sm:$0xff] }
 0x43a   :  { %v1474_v11 = vadd.f32 %v1411_v40, %v1353_v63  ;;  %v5273_v57 = vpop.f32.mrb[18].mxu0  ;;  %9515 = vst [vmem:[#allocation52_spill] sm:$0xff] %v7572_v42  ;;  %v7578_v40 = vpop.eup %5697  ;;  %v9534_v42 = vld [vmem:[#allocation104_spill] sm:$0xff] }
 0x43b   :  { %1493 = vst.msk [vmem:[#allocation5 + $0x10] sm:$0xff] %vm25_vm0, %v1476_v30  ;;  %v1477_v7 = vadd.f32 %v5273_v57, %v1356_v35  ;;  %v7553_v2 = vpop.f32.mrb[19].mxu0  ;;  %5699 = vpow2.f32 %v2852_v51  ;;  %v3310_v30 = vld [vmem:[#allocation2 + $0x28] sm:$0xff] }
 0x43c   :  { %2914 = vadd.xlane.f32.xlu1 %v7540_v14  ;;  %3075 = vrot.lane.b32.xlu0 %v9511_v33, %s5854_s2  ;;  %9512 = vst [vmem:[#allocation36_spill] sm:$0xff] %v7553_v2  ;;  %1491 = vst.msk [vmem:[#allocation5] sm:$0xff] %vm25_vm0, %v1474_v11 }
 0x43d   :  { %v1211_v60 = vpop.xlane.xlu0 %1210  ;;  %1494 = vst.msk [vmem:[#allocation5 + $0x18] sm:$0xff] %vm25_vm0, %v1477_v7  ;;  %v7576_v50 = vpop.permute.xlu1 %3004  ;;  %v9518_v7 = vld [vmem:[#allocation7_spill] sm:$0xff] }
 0x43e   :  { %v1233_v48 = vadd.f32 %v1211_v60, %v1185_v29  ;;  %9516 = vst [vmem:[#allocation46_spill] sm:$0xff] %v7576_v50  ;;  %v9527_v50 = vld [vmem:[#allocation94_spill] sm:$0xff] }
 0x440   :  { %1250 = vst.msk [vmem:[#allocation4 + $0x48] sm:$0xff] %vm1240_vm4, %v1233_v48  ;;  %2910 = vadd.xlane.f32.xlu1 %v7556_v13  ;;  %3079 = vrot.lane.b32.xlu0 %v9513_v3, %s5854_s2 }
 0x441   :  { %v7580_v29 = vpop.permute.xlu1 %2739 }
 0x442   :  { %v7568_v23 = vpop.xlane.xlu0 %1999 }
 0x444   :  { %3083 = vrot.lane.b32.xlu0 %v9514_v24, %s5854_s2 }
 0x445   :  { %v7583_v11 = vpop.eup %5699  ;;  %v7588_v60 = vpop.permute.xlu1 %2994 }
 0x446   :  { %9517 = vst [vmem:[#allocation23_spill] sm:$0xff] %v7588_v60  ;;  %v9528_v60 = vsub.f32 %v9526_v52, %v9527_v50  ;;  %v3307_v50 = vld [vmem:[#allocation2 + $0x10] sm:$0xff] }
 0x447   :  { %v2891_v63 = vpop.xlane.xlu0 %2890 }
 0x448   :  { %v2920_v35 = vadd.f32 %v2891_v63, %v2872_v53  ;;  %3323 = vperm.xlu0 %5499, %v3305_v37   ;;  %v9520_v53 = vld [vmem:[#allocation9_spill] sm:$0xff]  ;;  %v1191_v63 = vmul.f32 %v7241_v46, %v1175_v22  ;;  %v1358_v46 = vmul.f32 %v7535_v8, %v7343_v21  ;;  %v1130_v17 = vmul.f32 1.442695, %v9528_v60 }
 0x449   :  { %v7595_v51 = vpop.permute.xlu1 %2729 }
 0x44a   :  { %2937 = vst.msk [vmem:[#allocation4 + $0x10] sm:$0xff] %vm2934_vm6, %v2920_v35  ;;  %5701 = vpow2.f32 %v1130_v17  ;;  %v3309_v17 = vld [vmem:[#allocation2 + $0x20] sm:$0xff] }
 0x44b   :  { %v7585_v57 = vpop.xlane.xlu0 %2886 }
 0x44c   :  { %3338 = vperm.xlu0 %5499, %v3308_v55   ;;  %v3318_v55 = vld [vmem:[#allocation2 + $0x68] sm:$0xff] }
 0x44f   :  { %v7592_v48 = vpop.xlane.xlu0 %2892 }
 0x450   :  { %3348 = vperm.xlu0 %5499, %v3310_v30   ;;  %v9521_v30 = vld [vmem:[#allocation11_spill] sm:$0xff] }
 0x451   :  { %3034 = vperm.xlu1 %5498, %v7578_v40  }
 0x454   :  { %3358 = vperm.xlu0 %5499, %v3312_v6  }
 0x455   :  { %3044 = vperm.xlu1 %5498, %v7583_v11  }
 0x458   :  { %3368 = vperm.xlu0 %5499, %v3314_v16   ;;  %v1360_v16 = vmul.f32 %v7535_v8, %v7312_v59 }
 0x459   :  { %3073 = vrot.lane.b32.xlu1 %v9518_v7, %s5854_s2 }
 0x45a   :  { %5500 = vset.pattern.permute.xlu1 %v9519_v41  ;;  %v3306_v41 = vld [vmem:[#allocation2 + $0x8] sm:$0xff] }
 0x45c   :  { %3378 = vperm.xlu0 %5499, %v3316_v12   ;;  %v7607_v12 = vpop.permute.xlu1 %2144 }
 0x45d   :  { %3077 = vrot.lane.b32.xlu1 %v9520_v53, %s5854_s2  ;;  %9523 = vst [vmem:[#allocation61_spill] sm:$0xff] %v7607_v12  ;;  %v1173_v12 = vld [vmem:[#allocation4 + $0x68] sm:$0xff] }
 0x45e   :  { %v1223_v37 = vpop.xlane.xlu0 %1222 }
 0x45f   :  { %v1239_v35 = vadd.f32 %v1223_v37, %v1191_v63 }
 0x460   :  { %3388 = vperm.xlu0 %5499, %v3318_v55   ;;  %v7622_v21 = vpop.permute.xlu1 %2134 }
 0x461   :  { %1256 = vst.msk [vmem:[#allocation4 + $0x78] sm:$0xff] %vm1240_vm4, %v1239_v35  ;;  %3081 = vrot.lane.b32.xlu1 %v9521_v30, %s5854_s2  ;;  %v9525_v35 = vld [vmem:[#allocation13_spill] sm:$0xff]  ;;  %9529 = vst [vmem:[#allocation130_spill] sm:$0xff] %v7622_v21 }
 0x462   :  { %v7603_v6 = vpop.f32.mrb[20].mxu0  ;;  %v9649_v30 = vld [vmem:[#allocation85_spill] sm:$0xff] }
 0x463   :  { %9522 = vst [vmem:[#allocation26_spill] sm:$0xff] %v7603_v6  ;;  %v7609_v32 = vpop.f32.mrb[21].mxu0  ;;  %v2757_v3 = vsub.f32 %v9649_v30, %v7580_v29  ;;  %v9654_v29 = vpack.c.bf16 %v7423_v34, %v7429_v56  ;;  %v9655_v30 = vld [vmem:[#allocation35_spill] sm:$0xff] }
 0x464   :  { %9524 = vst [vmem:[#allocation50_spill] sm:$0xff] %v7609_v32  ;;  %v5277_v22 = vpop.f32.mrb[22].mxu0  ;;  %v7631_v32 = vpop.permute.xlu1 %3024 }
 0x465   :  { %v1481_v63 = vadd.f32 %v5277_v22, %v1360_v16  ;;  %v1430_v37 = vpop.f32.mrb[23].mxu0  ;;  %3085 = vrot.lane.b32.xlu1 %v9525_v35, %s5854_s2  ;;  %v9530_v16 = vld [vmem:[#allocation100_spill] sm:$0xff]  ;;  %v9531_v22 = vld [vmem:[#allocation102_spill] sm:$0xff]  ;;  %9536 = vst [vmem:[#allocation28_spill] sm:$0xff] %v7631_v32 }
 0x466   :  { %v1479_v55 = vadd.f32 %v1430_v37, %v1358_v46  ;;  %v9532_v58 = vsub.f32 %v9530_v16, %v9531_v22  ;;  %v1189_v37 = vmul.f32 %v7262_v10, %v1173_v12  ;;  %v9538_v10 = vld [vmem:[#allocation95_spill] sm:$0xff]  ;;  %v9539_v12 = vld [vmem:[#allocation96_spill] sm:$0xff]  ;;  %v9647_v35 = vld [vmem:[#allocation90_spill] sm:$0xff] }
 0x467   :  { %1498 = vst.msk [vmem:[#allocation5 + $0x38] sm:$0xff] %vm25_vm0, %v1481_v63  ;;  %v7619_v59 = vpop.xlane.xlu0 %2011  ;;  %v9533_v63 = vld [vmem:[#allocation103_spill] sm:$0xff]  ;;  %v9540_v16 = vsub.f32 %v9538_v10, %v9539_v12  ;;  %v1166_v32 = vld [vmem:[#allocation4 + $0x30] sm:$0xff] }
 0x468   :  { %1496 = vst.msk [vmem:[#allocation5 + $0x28] sm:$0xff] %vm25_vm0, %v1479_v55  ;;  %v1140_v46 = vmul.f32 1.442695, %v9532_v58  ;;  %v9535_v55 = vsub.f32 %v9533_v63, %v9534_v42  ;;  %v7634_v58 = vpop.eup %5701  ;;  %v3313_v42 = vld [vmem:[#allocation2 + $0x40] sm:$0xff]  ;;  %v9544_v63 = vld [vmem:[#allocation101_spill] sm:$0xff]  ;;  %v9546_v10 = vld [vmem:[#allocation111_spill] sm:$0xff] }
 0x469   :  { %3328 = vperm.xlu1 %5500, %v3306_v41   ;;  %v3311_v41 = vld [vmem:[#allocation2 + $0x30] sm:$0xff]  ;;  %9537 = vst [vmem:[#allocation139_spill] sm:$0xff] %v7634_v58  ;;  %v1927_v22 = vmul.f32 1.442695, %v9540_v16 }
 0x46a   :  { %5703 = vpow2.f32 %v1140_v46  ;;  %v1136_v6 = vmul.f32 1.442695, %v9535_v55  ;;  %v1161_v46 = vld [vmem:[#allocation4 + $0x8] sm:$0xff]  ;;  %v9547_v12 = vld [vmem:[#allocation112_spill] sm:$0xff] }
 0x46b   :  { %v9548_v16 = vsub.f32 %v9546_v10, %v9547_v12  ;;  %v3317_v10 = vld [vmem:[#allocation2 + $0x60] sm:$0xff] }
 0x46c   :  { %v1219_v52 = vpop.xlane.xlu0 %1218  ;;  %5705 = vpow2.f32 %v1136_v6 }
 0x46d   :  { %v1237_v60 = vadd.f32 %v1219_v52, %v1189_v37  ;;  %3333 = vperm.xlu1 %5500, %v3307_v50   ;;  %v7639_v37 = vpop.permute.xlu1 %3014  ;;  %v1177_v52 = vmul.f32 %v7634_v58, %v1161_v46  ;;  %5707 = vpow2.f32 %v1927_v22 }
 0x46e   :  { %9541 = vst [vmem:[#allocation82_spill] sm:$0xff] %v7639_v37  ;;  %v1148_v37 = vmul.f32 1.442695, %v9548_v16 }
 0x46f   :  { %1254 = vst.msk [vmem:[#allocation4 + $0x68] sm:$0xff] %vm1240_vm4, %v1237_v60  ;;  %v9543_v60 = vld [vmem:[#allocation99_spill] sm:$0xff] }
 0x470   :  { %v9545_v6 = vsub.f32 %v9543_v60, %v9544_v63  ;;  %v1164_v60 = vld [vmem:[#allocation4 + $0x20] sm:$0xff] }
 0x471   :  { %3343 = vperm.xlu1 %5500, %v3309_v17  }
 0x472   :  { %v1933_v55 = vmul.f32 1.442695, %v9545_v6  ;;  %v9551_v6 = vld [vmem:[#allocation118_spill] sm:$0xff] }
 0x474   :  { %v7642_v50 = vpop.eup %5703  ;;  %5709 = vpow2.f32 %v1933_v55 }
 0x475   :  { %3353 = vperm.xlu1 %5500, %v3311_v41   ;;  %9542 = vst [vmem:[#allocation39_spill] sm:$0xff] %v7642_v50  ;;  %v3315_v41 = vld [vmem:[#allocation2 + $0x50] sm:$0xff]  ;;  %v1182_v46 = vmul.f32 %v7642_v50, %v1166_v32  ;;  %5711 = vpow2.f32 %v1148_v37  ;;  %v1959_v32 = vld [vmem:[#allocation4] sm:$0xff] }
 0x476   :  { %v7652_v2 = vpop.eup %5705  ;;  %v3319_v37 = vld [vmem:[#allocation2 + $0x70] sm:$0xff] }
 0x477   :  { %9549 = vst [vmem:[#allocation86_spill] sm:$0xff] %v7652_v2  ;;  %v7659_v50 = vpop.eup %5707 }
 0x478   :  { %9553 = vst [vmem:[#allocation83_spill] sm:$0xff] %v7659_v50 }
 0x479   :  { %3363 = vperm.xlu1 %5500, %v3313_v42   ;;  %v1195_v17 = vpop.xlane.xlu1 %1194  ;;  %v9550_v42 = vld [vmem:[#allocation117_spill] sm:$0xff] }
 0x47a   :  { %v1225_v21 = vadd.f32 %v1195_v17, %v1177_v52  ;;  %v9552_v52 = vsub.f32 %v9550_v42, %v9551_v6  ;;  %v9555_v42 = vld [vmem:[#allocation107_spill] sm:$0xff] }
 0x47c   :  { %1242 = vst.msk [vmem:[#allocation4 + $0x8] sm:$0xff] %vm1240_vm4, %v1225_v21  ;;  %v1144_v17 = vmul.f32 1.442695, %v9552_v52  ;;  %v1180_v21 = vmul.f32 %v7652_v2, %v1164_v60 }
 0x47d   :  { %3373 = vperm.xlu1 %5500, %v3315_v41   ;;  %v1205_v22 = vpop.xlane.xlu1 %1204  ;;  %v1975_v41 = vmul.f32 %v7659_v50, %v1959_v32 }
 0x47e   :  { %v1230_v63 = vadd.f32 %v1205_v22, %v1182_v46  ;;  %5713 = vpow2.f32 %v1144_v17  ;;  %v9554_v46 = vld [vmem:[#allocation148_spill] sm:$0xff] }
 0x480   :  { %1247 = vst.msk [vmem:[#allocation4 + $0x30] sm:$0xff] %vm1240_vm4, %v1230_v63  ;;  %v9556_v63 = vld [vmem:[#allocation108_spill] sm:$0xff] }
 0x481   :  { %3383 = vperm.xlu1 %5500, %v3317_v10   ;;  %v1201_v12 = vpop.xlane.xlu1 %1200  ;;  %v9557_v6 = vsub.f32 %v9555_v42, %v9556_v63  ;;  %v1962_v10 = vld [vmem:[#allocation4 + $0x18] sm:$0xff] }
 0x482   :  { %v1228_v16 = vadd.f32 %v1201_v12, %v1180_v21  ;;  %v7670_v12 = vpop.eup %5709  ;;  %v9561_v42 = vld [vmem:[#allocation149_spill] sm:$0xff] }
 0x483   :  { %v1960_v55 = vld [vmem:[#allocation4 + $0x8] sm:$0xff]  ;;  %v1941_v52 = vmul.f32 1.442695, %v9557_v6  ;;  %9559 = vst [vmem:[#allocation88_spill] sm:$0xff] %v7670_v12  ;;  %v9563_v63 = vld [vmem:[#allocation113_spill] sm:$0xff] }
 0x484   :  { %1245 = vst.msk [vmem:[#allocation4 + $0x20] sm:$0xff] %vm1240_vm4, %v1228_v16  ;;  %v1976_v22 = vmul.f32 %v9554_v46, %v1960_v55  ;;  %v1364_v16 = vmul.f32 %v7535_v8, %v7396_v31  ;;  %v1362_v46 = vmul.f32 %v7535_v8, %v7419_v1  ;;  %v9564_v31 = vld [vmem:[#allocation114_spill] sm:$0xff]  ;;  %v1170_v1 = vld [vmem:[#allocation4 + $0x50] sm:$0xff] }
 0x485   :  { %3393 = vperm.xlu1 %5500, %v3319_v37   ;;  %v1992_v60 = vpop.xlane.xlu1 %1991  ;;  %5715 = vpow2.f32 %v1941_v52  ;;  %v9565_v6 = vsub.f32 %v9563_v63, %v9564_v31 }
 0x486   :  { %v2023_v2 = vadd.f32 %v1992_v60, %v1975_v41  ;;  %v7667_v21 = vpop.f32.mrb[24].mxu0  ;;  %v2024_v17 = vadd.f32 %v7520_v5, %v1976_v22  ;;  %v1978_v41 = vmul.f32 %v7670_v12, %v1962_v10  ;;  %v7682_v22 = vpop.eup %5711 }
 0x487   :  { %9558 = vst [vmem:[#allocation51_spill] sm:$0xff] %v7667_v21  ;;  %v7674_v32 = vpop.f32.mrb[25].mxu0  ;;  %v1965_v55 = vld [vmem:[#allocation4 + $0x30] sm:$0xff]  ;;  %9562 = vst [vmem:[#allocation63_spill] sm:$0xff] %v7682_v22  ;;  %v1937_v60 = vmul.f32 1.442695, %v9565_v6  ;;  %v1186_v52 = vmul.f32 %v7682_v22, %v1170_v1 }
 0x488   :  { %9560 = vst [vmem:[#allocation42_spill] sm:$0xff] %v7674_v32  ;;  %2040 = vst.msk [vmem:[#allocation4] sm:$0xff] %vm2039_vm5, %v2023_v2  ;;  %v5281_v37 = vpop.f32.mrb[26].mxu0  ;;  %v1981_v5 = vmul.f32 %v9561_v42, %v1965_v55  ;;  %v7694_v55 = vpop.eup %5713  ;;  %v9571_v42 = vld [vmem:[#allocation129_spill] sm:$0xff]  ;;  %v9574_v1 = vld [vmem:[#allocation47_spill] sm:$0xff] }
 0x489   :  { %2041 = vst.msk [vmem:[#allocation4 + $0x8] sm:$0xff] %vm2039_vm5, %v2024_v17  ;;  %v1485_v50 = vadd.f32 %v5281_v37, %v1364_v16  ;;  %v1446_v21 = vpop.f32.mrb[27].mxu0  ;;  %v1998_v32 = vpop.xlane.xlu1 %1997  ;;  %v9566_v17 = vld [vmem:[#allocation53_spill] sm:$0xff]  ;;  %9567 = vst [vmem:[#allocation56_spill] sm:$0xff] %v7694_v55  ;;  %5717 = vpow2.f32 %v1937_v60 }
 0x48a   :  { %v1483_v58 = vadd.f32 %v1446_v21, %v1362_v46  ;;  %v2026_v2 = vadd.f32 %v1998_v32, %v1978_v41  ;;  %v2029_v18 = vadd.f32 %v7528_v0, %v1981_v5  ;;  %v9568_v37 = vld [vmem:[#allocation97_spill] sm:$0xff]  ;;  %v9569_v21 = vld [vmem:[#allocation98_spill] sm:$0xff] }
 0x48b   :  { %1502 = vst.msk [vmem:[#allocation5 + $0x58] sm:$0xff] %vm25_vm0, %v1485_v50  ;;  %v1963_v10 = vld [vmem:[#allocation4 + $0x20] sm:$0xff]  ;;  %v9570_v32 = vsub.f32 %v9568_v37, %v9569_v21 }
 0x48c   :  { %1500 = vst.msk [vmem:[#allocation5 + $0x48] sm:$0xff] %vm25_vm0, %v1483_v58  ;;  %v1979_v16 = vmul.f32 %v9566_v17, %v1963_v10  ;;  %v1168_v50 = vld [vmem:[#allocation4 + $0x40] sm:$0xff]  ;;  %v1966_v10 = vld [vmem:[#allocation4 + $0x38] sm:$0xff] }
 0x48d   :  { %2043 = vst.msk [vmem:[#allocation4 + $0x18] sm:$0xff] %vm2039_vm5, %v2026_v2  ;;  %2046 = vst.msk [vmem:[#allocation4 + $0x30] sm:$0xff] %vm2039_vm5, %v2029_v18  ;;  %v2824_v46 = vmul.f32 1.442695, %v9570_v32  ;;  %v1213_v0 = vpop.xlane.xlu1 %1212  ;;  %v9572_v5 = vld [vmem:[#allocation134_spill] sm:$0xff]  ;;  %v1184_v18 = vmul.f32 %v7694_v55, %v1168_v50 }
 0x48e   :  { %v1234_v41 = vadd.f32 %v1213_v0, %v1186_v52  ;;  %v2027_v58 = vadd.f32 %v7568_v23, %v1979_v16  ;;  %v9573_v63 = vsub.f32 %v9571_v42, %v9572_v5  ;;  %v9576_v16 = vld [vmem:[#allocation137_spill] sm:$0xff]  ;;  %v9577_v37 = vld [vmem:[#allocation138_spill] sm:$0xff]  ;;  %v1964_v5 = vld [vmem:[#allocation4 + $0x28] sm:$0xff] }
 0x48f   :  { %v2854_v6 = vld [vmem:[#allocation4] sm:$0xff]  ;;  %5719 = vpow2.f32 %v2824_v46  ;;  %v7708_v23 = vpop.eup %5715  ;;  %v9578_v21 = vsub.f32 %v9576_v16, %v9577_v37 }
 0x490   :  { %v1156_v31 = vmul.f32 1.442695, %v9573_v63  ;;  %1251 = vst.msk [vmem:[#allocation4 + $0x50] sm:$0xff] %vm1240_vm4, %v1234_v41  ;;  %v2870_v2 = vmul.f32 %v9574_v1, %v2854_v6  ;;  %9575 = vst [vmem:[#allocation49_spill] sm:$0xff] %v7708_v23  ;;  %v1982_v50 = vmul.f32 %v7708_v23, %v1966_v10  ;;  %v9579_v46 = vld [vmem:[#allocation14_spill] sm:$0xff]  ;;  %v9583_v10 = vld [vmem:[#allocation123_spill] sm:$0xff] }
 0x491   :  { %2044 = vst.msk [vmem:[#allocation4 + $0x20] sm:$0xff] %vm2039_vm5, %v2027_v58  ;;  %v1209_v60 = vpop.xlane.xlu1 %1208  ;;  %v1152_v32 = vmul.f32 1.442695, %v9578_v21  ;;  %v2008_v58 = vpop.xlane.xlu0 %2007  ;;  %v9581_v1 = vld [vmem:[#allocation22_spill] sm:$0xff]  ;;  %v2855_v21 = vld [vmem:[#allocation4 + $0x8] sm:$0xff] }
 0x492   :  { %v1232_v17 = vadd.f32 %v1209_v60, %v1184_v18  ;;  %v2918_v52 = vadd.f32 %v7585_v57, %v2870_v2  ;;  %5721 = vpow2.f32 %v1156_v31  ;;  %v9582_v60 = vld [vmem:[#allocation122_spill] sm:$0xff] }
 0x493   :  { %v7718_v31 = vpop.eup %5717  ;;  %5723 = vpow2.f32 %v1152_v32 }
 0x494   :  { %v2857_v0 = vld [vmem:[#allocation4 + $0x18] sm:$0xff]  ;;  %1249 = vst.msk [vmem:[#allocation4 + $0x40] sm:$0xff] %vm1240_vm4, %v1232_v17  ;;  %9580 = vst [vmem:[#allocation59_spill] sm:$0xff] %v7718_v31  ;;  %v1980_v18 = vmul.f32 %v7718_v31, %v1964_v5  ;;  %v9584_v17 = vsub.f32 %v9582_v60, %v9583_v10 }
 0x495   :  { %2935 = vst.msk [vmem:[#allocation4] sm:$0xff] %vm2934_vm6, %v2918_v52  ;;  %v2873_v41 = vmul.f32 %v9579_v46, %v2857_v0  ;;  %v2006_v42 = vpop.xlane.xlu1 %2005  ;;  %v2901_v16 = vpop.xlane.xlu0 %2900 }
 0x496   :  { %v2030_v57 = vadd.f32 %v2006_v42, %v1982_v50  ;;  %v1949_v52 = vmul.f32 1.442695, %v9584_v17 }
 0x497   :  { %v2921_v63 = vadd.f32 %v7592_v48, %v2873_v41  ;;  %v1969_v6 = vld [vmem:[#allocation4 + $0x50] sm:$0xff] }
 0x498   :  { %2047 = vst.msk [vmem:[#allocation4 + $0x38] sm:$0xff] %vm2039_vm5, %v2030_v57  ;;  %v1985_v2 = vmul.f32 %v9581_v1, %v1969_v6  ;;  %v9586_v41 = vld [vmem:[#allocation16_spill] sm:$0xff]  ;;  %v9588_v57 = vld [vmem:[#allocation105_spill] sm:$0xff]  ;;  %5725 = vpow2.f32 %v1949_v52 }
 0x499   :  { %2938 = vst.msk [vmem:[#allocation4 + $0x18] sm:$0xff] %vm2934_vm6, %v2921_v63  ;;  %v2002_v37 = vpop.xlane.xlu1 %2001  ;;  %v7728_v32 = vpop.eup %5719  ;;  %v9589_v63 = vld [vmem:[#allocation106_spill] sm:$0xff] }
 0x49a   :  { %v2028_v48 = vadd.f32 %v2002_v37, %v1980_v18  ;;  %v2033_v0 = vadd.f32 %v7619_v59, %v1985_v2  ;;  %9585 = vst [vmem:[#allocation79_spill] sm:$0xff] %v7728_v32  ;;  %v2871_v46 = vmul.f32 %v7728_v32, %v2855_v21  ;;  %v9590_v6 = vsub.f32 %v9588_v57, %v9589_v63  ;;  %v1174_v59 = vld [vmem:[#allocation4 + $0x70] sm:$0xff]  ;;  %v2897_v10 = vpop.xlane.xlu0 %2896 }
 0x49b   :  { %v1967_v50 = vld [vmem:[#allocation4 + $0x40] sm:$0xff]  ;;  %v9591_v21 = vld [vmem:[#allocation60_spill] sm:$0xff] }
 0x49c   :  { %2045 = vst.msk [vmem:[#allocation4 + $0x28] sm:$0xff] %vm2039_vm5, %v2028_v48  ;;  %2050 = vst.msk [vmem:[#allocation4 + $0x50] sm:$0xff] %vm2039_vm5, %v2033_v0  ;;  %v1983_v42 = vmul.f32 %v9586_v41, %v1967_v50  ;;  %v7734_v5 = vpop.eup %5721  ;;  %v2834_v1 = vmul.f32 1.442695, %v9590_v6  ;;  %v9593_v50 = vld [vmem:[#allocation135_spill] sm:$0xff]  ;;  %v9594_v41 = vld [vmem:[#allocation136_spill] sm:$0xff] }
 0x49d   :  { %9587 = vst [vmem:[#allocation54_spill] sm:$0xff] %v7734_v5  ;;  %v2889_v18 = vpop.xlane.xlu1 %2888  ;;  %v1190_v37 = vmul.f32 %v7734_v5, %v1174_v59  ;;  %v7743_v0 = vpop.eup %5723  ;;  %v9595_v52 = vsub.f32 %v9593_v50, %v9594_v41  ;;  %v1970_v41 = vld [vmem:[#allocation4 + $0x58] sm:$0xff] }
 0x49e   :  { %v2919_v2 = vadd.f32 %v2889_v18, %v2871_v46  ;;  %v2031_v60 = vadd.f32 %v2008_v58, %v1983_v42  ;;  %9592 = vst [vmem:[#allocation40_spill] sm:$0xff] %v7743_v0  ;;  %5727 = vpow2.f32 %v2834_v1  ;;  %v1172_v46 = vld [vmem:[#allocation4 + $0x60] sm:$0xff]  ;;  %v2020_v6 = vpop.xlane.xlu0 %2019  ;;  %v9636_v5 = vld [vmem:[#allocation25_spill] sm:$0xff] }
 0x49f   :  { %v2861_v17 = vld [vmem:[#allocation4 + $0x38] sm:$0xff]  ;;  %v1945_v57 = vmul.f32 1.442695, %v9595_v52  ;;  %v1188_v59 = vmul.f32 %v7743_v0, %v1172_v46  ;;  %v9598_v1 = vld [vmem:[#allocation110_spill] sm:$0xff]  ;;  %v9601_v46 = vld [vmem:[#allocation140_spill] sm:$0xff] }
 0x4a0   :  { %2936 = vst.msk [vmem:[#allocation4 + $0x8] sm:$0xff] %vm2934_vm6, %v2919_v2  ;;  %v2877_v48 = vmul.f32 %v9591_v21, %v2861_v17  ;;  %v9596_v2 = vld [vmem:[#allocation15_spill] sm:$0xff]  ;;  %v9597_v17 = vld [vmem:[#allocation109_spill] sm:$0xff] }
 0x4a1   :  { %2048 = vst.msk [vmem:[#allocation4 + $0x40] sm:$0xff] %vm2039_vm5, %v2031_v60  ;;  %v1221_v63 = vpop.xlane.xlu1 %1220  ;;  %v9599_v21 = vsub.f32 %v9597_v17, %v9598_v1  ;;  %5729 = vpow2.f32 %v1945_v57  ;;  %v2860_v57 = vld [vmem:[#allocation4 + $0x30] sm:$0xff] }
 0x4a2   :  { %v1238_v58 = vadd.f32 %v1221_v63, %v1190_v37  ;;  %v2925_v42 = vadd.f32 %v2901_v16, %v2877_v48  ;;  %v7755_v16 = vpop.eup %5725  ;;  %v2016_v48 = vpop.xlane.xlu0 %2015 }
 0x4a3   :  { %v2859_v18 = vld [vmem:[#allocation4 + $0x28] sm:$0xff]  ;;  %v2830_v32 = vmul.f32 1.442695, %v9599_v21  ;;  %9600 = vst [vmem:[#allocation81_spill] sm:$0xff] %v7755_v16  ;;  %v1986_v63 = vmul.f32 %v7755_v16, %v1970_v41  ;;  %v9605_v21 = vld [vmem:[#allocation18_spill] sm:$0xff] }
 0x4a4   :  { %1255 = vst.msk [vmem:[#allocation4 + $0x70] sm:$0xff] %vm1240_vm4, %v1238_v58  ;;  %v2875_v60 = vmul.f32 %v9596_v2, %v2859_v18  ;;  %v9602_v58 = vld [vmem:[#allocation141_spill] sm:$0xff]  ;;  %v9606_v41 = vld [vmem:[#allocation126_spill] sm:$0xff] }
 0x4a5   :  { %2942 = vst.msk [vmem:[#allocation4 + $0x38] sm:$0xff] %vm2934_vm6, %v2925_v42  ;;  %v1217_v50 = vpop.xlane.xlu1 %1216  ;;  %5731 = vpow2.f32 %v2830_v32  ;;  %v9603_v42 = vsub.f32 %v9601_v46, %v9602_v58  ;;  %v1968_v58 = vld [vmem:[#allocation4 + $0x48] sm:$0xff] }
 0x4a6   :  { %v1236_v52 = vadd.f32 %v1217_v50, %v1188_v59  ;;  %v2923_v37 = vadd.f32 %v2897_v10, %v2875_v60 }
 0x4a7   :  { %v1957_v18 = vmul.f32 1.442695, %v9603_v42 }
 0x4a8   :  { %1253 = vst.msk [vmem:[#allocation4 + $0x60] sm:$0xff] %vm1240_vm4, %v1236_v52  ;;  %v7763_v1 = vpop.eup %5727  ;;  %v9607_v52 = vld [vmem:[#allocation127_spill] sm:$0xff] }
 0x4a9   :  { %2940 = vst.msk [vmem:[#allocation4 + $0x28] sm:$0xff] %vm2934_vm6, %v2923_v37  ;;  %v2014_v2 = vpop.xlane.xlu1 %2013  ;;  %9604 = vst [vmem:[#allocation44_spill] sm:$0xff] %v7763_v1  ;;  %v2876_v60 = vmul.f32 %v7763_v1, %v2860_v57  ;;  %v9608_v32 = vsub.f32 %v9606_v41, %v9607_v52  ;;  %5733 = vpow2.f32 %v1957_v18  ;;  %v9610_v57 = vld [vmem:[#allocation34_spill] sm:$0xff]  ;;  %v9612_v41 = vld [vmem:[#allocation145_spill] sm:$0xff] }
 0x4aa   :  { %v2034_v17 = vadd.f32 %v2014_v2, %v1986_v63 }
 0x4ab   :  { %v2909_v10 = vpop.xlane.xlu0 %2908  ;;  %v1973_v59 = vld [vmem:[#allocation4 + $0x70] sm:$0xff]  ;;  %v2842_v37 = vmul.f32 1.442695, %v9608_v32  ;;  %v7771_v63 = vpop.eup %5729 }
 0x4ac   :  { %2051 = vst.msk [vmem:[#allocation4 + $0x58] sm:$0xff] %vm2039_vm5, %v2034_v17  ;;  %v1989_v50 = vmul.f32 %v9605_v21, %v1973_v59  ;;  %9609 = vst [vmem:[#allocation74_spill] sm:$0xff] %v7771_v63  ;;  %v1984_v17 = vmul.f32 %v7771_v63, %v1968_v58  ;;  %v9611_v21 = vld [vmem:[#allocation143_spill] sm:$0xff] }
 0x4ad   :  { %v2899_v46 = vpop.xlane.xlu1 %2898  ;;  %5735 = vpow2.f32 %v2842_v37  ;;  %v9613_v18 = vsub.f32 %v9611_v21, %v9612_v41  ;;  %v9617_v37 = vld [vmem:[#allocation133_spill] sm:$0xff] }
 0x4ae   :  { %v2924_v42 = vadd.f32 %v2899_v46, %v2876_v60  ;;  %v2037_v16 = vadd.f32 %v2020_v6, %v1989_v50  ;;  %v2858_v60 = vld [vmem:[#allocation4 + $0x20] sm:$0xff] }
 0x4af   :  { %v2905_v2 = vpop.xlane.xlu0 %2904  ;;  %v1971_v23 = vld [vmem:[#allocation4 + $0x60] sm:$0xff]  ;;  %v1953_v52 = vmul.f32 1.442695, %v9613_v18  ;;  %v7780_v46 = vpop.eup %5731 }
 0x4b0   :  { %2941 = vst.msk [vmem:[#allocation4 + $0x30] sm:$0xff] %vm2934_vm6, %v2924_v42  ;;  %v1987_v59 = vmul.f32 %v9610_v57, %v1971_v23  ;;  %9614 = vst [vmem:[#allocation73_spill] sm:$0xff] %v7780_v46  ;;  %v9615_v42 = vld [vmem:[#allocation131_spill] sm:$0xff]  ;;  %v2874_v23 = vmul.f32 %v7780_v46, %v2858_v60  ;;  %v1366_v60 = vmul.f32 %v7535_v8, %v7558_v15 }
 0x4b1   :  { %2054 = vst.msk [vmem:[#allocation4 + $0x70] sm:$0xff] %vm2039_vm5, %v2037_v16  ;;  %v2010_v32 = vpop.xlane.xlu1 %2009  ;;  %v9616_v16 = vld [vmem:[#allocation132_spill] sm:$0xff]  ;;  %5737 = vpow2.f32 %v1953_v52 }
 0x4b2   :  { %v2032_v6 = vadd.f32 %v2010_v32, %v1984_v17  ;;  %v2035_v50 = vadd.f32 %v2016_v48, %v1987_v59  ;;  %v9618_v58 = vsub.f32 %v9616_v16, %v9617_v37  ;;  %v1974_v59 = vld [vmem:[#allocation4 + $0x78] sm:$0xff] }
 0x4b3   :  { %v2865_v1 = vld [vmem:[#allocation4 + $0x58] sm:$0xff]  ;;  %v3072_v31 = vpop.permute.xlu0 %3071  ;;  %v7795_v32 = vpop.eup %5733 }
 0x4b4   :  { %v2881_v12 = vmul.f32 %v9615_v42, %v2865_v1  ;;  %2049 = vst.msk [vmem:[#allocation4 + $0x48] sm:$0xff] %vm2039_vm5, %v2032_v6  ;;  %5318 = vmatprep.subr.bf16.mxu1 %v3072_v31  ;;  %2052 = vst.msk [vmem:[#allocation4 + $0x60] sm:$0xff] %vm2039_vm5, %v2035_v50  ;;  %v2838_v57 = vmul.f32 1.442695, %v9618_v58  ;;  %v1368_v1 = vmul.f32 %v7535_v8, %v7524_v62  ;;  %v2864_v58 = vld [vmem:[#allocation4 + $0x50] sm:$0xff] }
 0x4b5   :  { %v7789_v17 = vpop.f32.mrb[28].mxu0  ;;  %5319 = vmatpush3.bf16.msra.mxu1 %v3072_v31  ;;  %v2895_v48 = vpop.xlane.xlu1 %2894  ;;  %9621 = vst [vmem:[#allocation78_spill] sm:$0xff] %v7795_v32  ;;  %v1990_v62 = vmul.f32 %v7795_v32, %v1974_v59  ;;  %v9626_v59 = vld [vmem:[#allocation58_spill] sm:$0xff] }
 0x4b6   :  { %9619 = vst [vmem:[#allocation92_spill] sm:$0xff] %v7789_v17  ;;  %v2929_v21 = vadd.f32 %v2909_v10, %v2881_v12  ;;  %v2922_v41 = vadd.f32 %v2895_v48, %v2874_v23  ;;  %v7793_v18 = vpop.f32.mrb[29].mxu0  ;;  %5739 = vpow2.f32 %v2838_v57  ;;  %v9622_v12 = vld [vmem:[#allocation142_spill] sm:$0xff]  ;;  %v9623_v10 = vld [vmem:[#allocation144_spill] sm:$0xff] }
 0x4b7   :  { %9620 = vst [vmem:[#allocation91_spill] sm:$0xff] %v7793_v18  ;;  %v5285_v6 = vpop.f32.mrb[30].mxu0  ;;  %v7799_v50 = vpop.permute.xlu0 %3075  ;;  %v9624_v42 = vsub.f32 %v9622_v12, %v9623_v10  ;;  %v1972_v12 = vld [vmem:[#allocation4 + $0x68] sm:$0xff] }
 0x4b8   :  { %2946 = vst.msk [vmem:[#allocation4 + $0x58] sm:$0xff] %vm2934_vm6, %v2929_v21  ;;  %2939 = vst.msk [vmem:[#allocation4 + $0x20] sm:$0xff] %vm2934_vm6, %v2922_v41  ;;  %v1489_v31 = vadd.f32 %v5285_v6, %v1368_v1  ;;  %v1462_v52 = vpop.f32.mrb[31].mxu0  ;;  %v7808_v15 = vpop.eup %5735  ;;  %v9627_v41 = vld [vmem:[#allocation146_spill] sm:$0xff] }
 0x4b9   :  { %v2850_v23 = vmul.f32 1.442695, %v9624_v42  ;;  %v1487_v16 = vadd.f32 %v1462_v52, %v1366_v60  ;;  %v2022_v37 = vpop.xlane.xlu1 %2021  ;;  %9625 = vst [vmem:[#allocation116_spill] sm:$0xff] %v7808_v15  ;;  %v2880_v57 = vmul.f32 %v7808_v15, %v2864_v58  ;;  %v9628_v60 = vld [vmem:[#allocation147_spill] sm:$0xff] }
 0x4ba   :  { %1506 = vst.msk [vmem:[#allocation5 + $0x78] sm:$0xff] %vm25_vm0, %v1489_v31  ;;  %v2038_v8 = vadd.f32 %v2022_v37, %v1990_v62  ;;  %v9629_v6 = vsub.f32 %v9627_v41, %v9628_v60  ;;  %v9631_v41 = vld [vmem:[#allocation17_spill] sm:$0xff]  ;;  %v9633_v15 = vld [vmem:[#allocation19_spill] sm:$0xff] }
 0x4bb   :  { %1504 = vst.msk [vmem:[#allocation5 + $0x68] sm:$0xff] %vm25_vm0, %v1487_v16  ;;  %v2863_v48 = vld [vmem:[#allocation4 + $0x48] sm:$0xff]  ;;  %v7812_v1 = vpop.permute.xlu0 %3079  ;;  %5741 = vpow2.f32 %v2850_v23  ;;  %v7823_v37 = vpop.eup %5737 }
 0x4bc   :  { %2055 = vst.msk [vmem:[#allocation4 + $0x78] sm:$0xff] %vm2039_vm5, %v2038_v8  ;;  %v2879_v21 = vmul.f32 %v9626_v59, %v2863_v48  ;;  %v2846_v52 = vmul.f32 1.442695, %v9629_v6  ;;  %9630 = vst [vmem:[#allocation119_spill] sm:$0xff] %v7823_v37  ;;  %v1988_v23 = vmul.f32 %v7823_v37, %v1972_v12  ;;  %v2862_v59 = vld [vmem:[#allocation4 + $0x40] sm:$0xff]  ;;  %v2868_v12 = vld [vmem:[#allocation4 + $0x70] sm:$0xff] }
 0x4bd   :  { %v7819_v31 = vpop.f32.mrb[32].mxu0  ;;  %v2907_v62 = vpop.xlane.xlu1 %2906  ;;  %v2866_v37 = vld [vmem:[#allocation4 + $0x60] sm:$0xff] }
 0x4be   :  { %v2928_v10 = vadd.f32 %v2907_v62, %v2880_v57  ;;  %v7821_v42 = vpop.f32.mrb[33].mxu0  ;;  %v2927_v16 = vadd.f32 %v2905_v2, %v2879_v21  ;;  %5743 = vpow2.f32 %v2846_v52  ;;  %v3403_v57 = vsub.s32 3, %v9631_v41 }
 0x4bf   :  { %v7825_v8 = vpop.f32.mrb[34].mxu0  ;;  %v7835_v2 = vpop.permute.xlu0 %3083 }
 0x4c0   :  { %2945 = vst.msk [vmem:[#allocation4 + $0x50] sm:$0xff] %vm2934_vm6, %v2928_v10  ;;  %v7828_v58 = vpop.f32.mrb[35].mxu0  ;;  %2944 = vst.msk [vmem:[#allocation4 + $0x48] sm:$0xff] %vm2934_vm6, %v2927_v16  ;;  %v7833_v6 = vpop.eup %5739  ;;  %v7842_v16 = vrot.slane %v9633_v15, %v3403_v57 }
 0x4c1   :  { %v2018_v48 = vpop.xlane.xlu1 %2017  ;;  %9632 = vst [vmem:[#allocation68_spill] sm:$0xff] %v7833_v6  ;;  %v2878_v21 = vmul.f32 %v7833_v6, %v2862_v59 }
 0x4c2   :  { %v2036_v60 = vadd.f32 %v2018_v48, %v1988_v23 }
 0x4c4   :  { %2053 = vst.msk [vmem:[#allocation4 + $0x68] sm:$0xff] %vm2039_vm5, %v2036_v60 }
 0x4c5   :  { %v7839_v62 = vpop.f32.mrb[36].mxu0  ;;  %v2903_v10 = vpop.xlane.xlu1 %2902 }
 0x4c6   :  { %v2926_v52 = vadd.f32 %v2903_v10, %v2878_v21  ;;  %v7844_v46 = vpop.f32.mrb[37].mxu0  ;;  %v7846_v41 = vpop.eup %5741 }
 0x4c7   :  { %9634 = vst [vmem:[#allocation124_spill] sm:$0xff] %v7846_v41  ;;  %v7848_v23 = vpop.f32.mrb[38].mxu0  ;;  %v3324_v48 = vpop.permute.xlu0 %3323  ;;  %v2884_v6 = vmul.f32 %v7846_v41, %v2868_v12 }
 0x4c8   :  { %2943 = vst.msk [vmem:[#allocation4 + $0x40] sm:$0xff] %vm2934_vm6, %v2926_v52  ;;  %v3405_v60 = vadd.f32 %v7842_v16, %v3324_v48  ;;  %v7852_v59 = vpop.f32.mrb[39].mxu0  ;;  %v7855_v21 = vpop.eup %5743 }
 0x4c9   :  { %v2915_v32 = vpop.xlane.xlu1 %2914  ;;  %9635 = vst [vmem:[#allocation71_spill] sm:$0xff] %v7855_v21  ;;  %v2882_v52 = vmul.f32 %v7855_v21, %v2866_v37 }
 0x4ca   :  { %vm3421_vm7 = vcmp.gt.f32.partialorder %v3405_v60, 0.0  ;;  %v3437_v15 = vmul.f32 0.2, %v3405_v60  ;;  %v2932_v57 = vadd.f32 %v2915_v32, %v2884_v6 }
 0x4cb   :  { %v3339_v10 = vpop.permute.xlu0 %3338 }
 0x4cc   :  { %2949 = vst.msk [vmem:[#allocation4 + $0x70] sm:$0xff] %vm2934_vm6, %v2932_v57  ;;  %v3408_v63 = vadd.f32 %v7842_v16, %v3339_v10  ;;  %v3453_v17 = vsel %vm3421_vm7, %v3405_v60, %v3437_v15 }
 0x4cd   :  { %v7860_v48 = vpop.f32.mrb[40].mxu0  ;;  %v2911_v18 = vpop.xlane.xlu1 %2910  ;;  %v7863_v12 = vadd.f32 %v3453_v17, %v9636_v5  ;;  %v9638_v5 = vld [vmem:[#allocation27_spill] sm:$0xff] }
 0x4ce   :  { %vm3424_vm8 = vcmp.gt.f32.partialorder %v3408_v63, 0.0  ;;  %v3440_v41 = vmul.f32 0.2, %v3408_v63  ;;  %v2930_v0 = vadd.f32 %v2911_v18, %v2882_v52  ;;  %v7865_v32 = vpop.f32.mrb[41].mxu0 }
 0x4cf   :  { %v7867_v6 = vpop.f32.mrb[42].mxu0  ;;  %3501 = vmax.xlane.f32.xlu1 %v7863_v12  ;;  %v3349_v57 = vpop.permute.xlu0 %3348 }
 0x4d0   :  { %2947 = vst.msk [vmem:[#allocation4 + $0x60] sm:$0xff] %vm2934_vm6, %v2930_v0  ;;  %v3410_v37 = vadd.f32 %v7842_v16, %v3349_v57  ;;  %v7872_v60 = vpop.f32.mrb[43].mxu0  ;;  %v3456_v15 = vsel %vm3424_vm8, %v3408_v63, %v3440_v41  ;;  %v9640_v0 = vld [vmem:[#allocation43_spill] sm:$0xff]  ;;  %vm3821_vm8 = vcmask 31768  }
 0x4d1   :  { %v7874_v10 = vpop.permute.xlu1 %3034  ;;  %v7877_v17 = vadd.f32 %v3456_v15, %v9638_v5 }
 0x4d2   :  { %9637 = vst [vmem:[#allocation62_spill] sm:$0xff] %v7874_v10  ;;  %vm3426_vm9 = vcmp.gt.f32.partialorder %v3410_v37, 0.0  ;;  %v3442_v18 = vmul.f32 0.2, %v3410_v37 }
 0x4d3   :  { %v3359_v52 = vpop.permute.xlu0 %3358  ;;  %3507 = vmax.xlane.f32.xlu1 %v7877_v17 }
 0x4d4   :  { %v3412_v21 = vadd.f32 %v7842_v16, %v3359_v52  ;;  %v3458_v22 = vsel %vm3426_vm9, %v3410_v37, %v3442_v18 }
 0x4d5   :  { %v7881_v55 = vpop.permute.xlu1 %3044  ;;  %v7884_v57 = vadd.f32 %v3458_v22, %v9640_v0 }
 0x4d6   :  { %9639 = vst [vmem:[#allocation66_spill] sm:$0xff] %v7881_v55  ;;  %vm3428_vm10 = vcmp.gt.f32.partialorder %v3412_v21, 0.0  ;;  %v3444_v63 = vmul.f32 0.2, %v3412_v21  ;;  %v9642_v55 = vld [vmem:[#allocation65_spill] sm:$0xff] }
 0x4d7   :  { %v3369_v41 = vpop.permute.xlu0 %3368  ;;  %3511 = vmax.xlane.f32.xlu1 %v7884_v57 }
 0x4d8   :  { %v3414_v15 = vadd.f32 %v7842_v16, %v3369_v41  ;;  %v3460_v5 = vsel %vm3428_vm10, %v3412_v21, %v3444_v63  ;;  %vm3272_vm10 = vcmask 195712  }
 0x4d9   :  { %v3074_v10 = vpop.permute.xlu1 %3073  ;;  %v7889_v38 = vadd.f32 %v3460_v5, %v9641_v49 }
 0x4da   :  { %vm3430_vm11 = vcmp.gt.f32.partialorder %v3414_v15, 0.0  ;;  %v3446_v52 = vmul.f32 0.2, %v3414_v15  ;;  %5320 = vmatprep.subr.bf16.mxu1 %v3074_v10 }
 0x4db   :  { %v3379_v37 = vpop.permute.xlu0 %3378  ;;  %3515 = vmax.xlane.f32.xlu1 %v7889_v38  ;;  %5321 = vmatpush3.bf16.msra.mxu1 %v3074_v10 }
 0x4dc   :  { %v3416_v22 = vadd.f32 %v7842_v16, %v3379_v37  ;;  %5322 = vmatprep.subr.bf16.mxu1 %v7799_v50  ;;  %v3462_v18 = vsel %vm3430_vm11, %v3414_v15, %v3446_v52  ;;  %v9643_v37 = vld [vmem:[#allocation57_spill] sm:$0xff]  ;;  %vm4159_vm11 = vcmask 261312  }
 0x4dd   :  { %v3078_v0 = vpop.permute.xlu1 %3077  ;;  %v7895_v41 = vadd.f32 %v3462_v18, %v9642_v55 }
 0x4de   :  { %vm3432_vm12 = vcmp.gt.f32.partialorder %v3416_v22, 0.0  ;;  %v3448_v21 = vmul.f32 0.2, %v3416_v22 }
 0x4df   :  { %v3389_v49 = vpop.permute.xlu0 %3388  ;;  %3519 = vmax.xlane.f32.xlu1 %v7895_v41  ;;  %5323 = vmatpush3.bf16.msra.mxu1 %v7799_v50 }
 0x4e0   :  { %v3418_v63 = vadd.f32 %v7842_v16, %v3389_v49  ;;  %5324 = vmatprep.subr.bf16.mxu1 %v3078_v0  ;;  %v3464_v10 = vsel %vm3432_vm12, %v3416_v22, %v3448_v21  ;;  %v9645_v22 = vld [vmem:[#allocation87_spill] sm:$0xff] }
 0x4e1   :  { %v3082_v5 = vpop.permute.xlu1 %3081  ;;  %v7901_v36 = vadd.f32 %v3464_v10, %v9643_v37 }
 0x4e2   :  { %vm3434_vm13 = vcmp.gt.f32.partialorder %v3418_v63, 0.0  ;;  %v3450_v15 = vmul.f32 0.2, %v3418_v63 }
 0x4e3   :  { %v7903_v52 = vpop.f32.mrb[44].mxu0  ;;  %3523 = vmax.xlane.f32.xlu1 %v7901_v36  ;;  %5325 = vmatpush3.bf16.msra.mxu1 %v3078_v0 }
 0x4e4   :  { %v7906_v55 = vpop.f32.mrb[45].mxu0  ;;  %5326 = vmatprep.subr.bf16.mxu1 %v7812_v1  ;;  %v3466_v50 = vsel %vm3434_vm13, %v3418_v63, %v3450_v15  ;;  %v2755_v63 = vsub.f32 %v9647_v35, %v7595_v51 }
 0x4e5   :  { %v7909_v18 = vpop.f32.mrb[46].mxu0  ;;  %v3086_v49 = vpop.permute.xlu1 %3085  ;;  %v7912_v21 = vadd.f32 %v3466_v50, %v9645_v22 }
 0x4e6   :  { %9644 = vst [vmem:[#allocation84_spill] sm:$0xff] %v7909_v18  ;;  %v7914_v10 = vpop.f32.mrb[47].mxu0  ;;  %v9648_v18 = vld [vmem:[#allocation29_spill] sm:$0xff]  ;;  %v2784_v24 = vmul.f32 1.442695, %v2755_v63  ;;  %v9651_v63 = vld [vmem:[#allocation120_spill] sm:$0xff] }
 0x4e7   :  { %9646 = vst [vmem:[#allocation89_spill] sm:$0xff] %v7914_v10  ;;  %3527 = vmax.xlane.f32.xlu1 %v7912_v21  ;;  %5327 = vmatpush3.bf16.msra.mxu1 %v7812_v1 }
 0x4e8   :  { %5328 = vmatprep.subr.bf16.mxu1 %v3082_v5  ;;  %5745 = vpow2.f32 %v2784_v24 }
 0x4e9   :  { %v3329_v37 = vpop.permute.xlu1 %3328 }
 0x4ea   :  { %v3406_v0 = vadd.f32 %v7842_v16, %v3329_v37 }
 0x4eb   :  { %5329 = vmatpush3.bf16.msra.mxu1 %v3082_v5 }
 0x4ec   :  { %vm3422_vm14 = vcmp.gt.f32.partialorder %v3406_v0, 0.0  ;;  %v3438_v15 = vmul.f32 0.2, %v3406_v0  ;;  %5330 = vmatprep.subr.bf16.mxu1 %v7835_v2 }
 0x4ed   :  { %v3334_v50 = vpop.permute.xlu1 %3333 }
 0x4ee   :  { %v3407_v22 = vadd.f32 %v7842_v16, %v3334_v50  ;;  %v3454_v10 = vsel %vm3422_vm14, %v3406_v0, %v3438_v15  ;;  %v9650_v0 = vld [vmem:[#allocation21_spill] sm:$0xff]  ;;  %v9652_v50 = vld [vmem:[#allocation31_spill] sm:$0xff] }
 0x4ef   :  { %5331 = vmatpush3.bf16.msra.mxu1 %v7835_v2  ;;  %v7925_v1 = vadd.f32 %v3454_v10, %v9648_v18  ;;  %v9653_v53 = vpack.c.bf16 %v9651_v63, %v9652_v50  ;;  %v9659_v50 = vld [vmem:[#allocation55_spill] sm:$0xff] }
 0x4f0   :  { %vm3423_vm15 = vcmp.gt.f32.partialorder %v3407_v22, 0.0  ;;  %v3439_v37 = vmul.f32 0.2, %v3407_v22  ;;  %5332 = vmatprep.subr.bf16.mxu1 %v3086_v49 }
 0x4f1   :  { %3503 = vmax.xlane.f32.xlu0 %v7925_v1  ;;  %v3344_v51 = vpop.permute.xlu1 %3343 }
 0x4f2   :  { %v3409_v35 = vadd.f32 %v7842_v16, %v3344_v51  ;;  %v3455_v5 = vsel %vm3423_vm15, %v3407_v22, %v3439_v37  ;;  %v2788_v37 = vmul.f32 1.442695, %v2757_v3  ;;  %v5746_v56 = vpop.eup %5745 }
 0x4f3   :  { %5333 = vmatpush3.bf16.msra.mxu1 %v3086_v49  ;;  %v7932_v15 = vadd.f32 %v3455_v5, %v9650_v0 }
 0x4f4   :  { %vm3425_vm1 = vcmp.gt.f32.partialorder %v3409_v35, 0.0  ;;  %v3441_v2 = vmul.f32 0.2, %v3409_v35  ;;  %5747 = vpow2.f32 %v2788_v37 }
 0x4f5   :  { %3505 = vmax.xlane.f32.xlu0 %v7932_v15  ;;  %v3354_v18 = vpop.permute.xlu1 %3353 }
 0x4f6   :  { %v3411_v10 = vadd.f32 %v7842_v16, %v3354_v18  ;;  %5335 = vmatmul.mubr.bf16.vlgmr.msra.gmra.mrb[32].mxu1 %v9653_v53  ;;  %v3457_v22 = vsel %vm3425_vm1, %v3409_v35, %v3441_v2  ;;  %v9656_v18 = vld [vmem:[#allocation32_spill] sm:$0xff]  ;;  %v9657_v2 = vpack.c.bf16 %v7410_v26, %v7413_v25 }
 0x4f7   :  { %5338 = vmatprep.mubr.bf16.mxu1 %v9654_v29  ;;  %v7943_v49 = vadd.f32 %v3457_v22, %v9655_v30  ;;  %v7963_v30 = vmul.f32 %v5746_v56, %v9486_v27  ;;  %v9660_v25 = vld [vmem:[#allocation48_spill] sm:$0xff]  ;;  %v9662_v56 = vld [vmem:[#allocation77_spill] sm:$0xff] }
 0x4f8   :  { %vm3427_vm2 = vcmp.gt.f32.partialorder %v3411_v10, 0.0  ;;  %v3443_v24 = vmul.f32 0.2, %v3411_v10 }
 0x4f9   :  { %3509 = vmax.xlane.f32.xlu0 %v7943_v49  ;;  %v3364_v51 = vpop.permute.xlu1 %3363 }
 0x4fa   :  { %v3413_v5 = vadd.f32 %v7842_v16, %v3364_v51  ;;  %v3459_v0 = vsel %vm3427_vm2, %v3411_v10, %v3443_v24  ;;  %v9658_v10 = vpack.c.bf16 %v7506_v28, %v7509_v45 }
 0x4fb   :  { %v7948_v53 = vadd.f32 %v3459_v0, %v9656_v18  ;;  %v3069_v0 = vpack.c.bf16 %v7963_v30, %v7556_v13 }
 0x4fc   :  { %vm3429_vm3 = vcmp.gt.f32.partialorder %v3413_v5, 0.0  ;;  %v3445_v3 = vmul.f32 0.2, %v3413_v5 }
 0x4fd   :  { %3513 = vmax.xlane.f32.xlu0 %v7948_v53  ;;  %v3374_v34 = vpop.permute.xlu1 %3373 }
 0x4fe   :  { %v3415_v35 = vadd.f32 %v7842_v16, %v3374_v34  ;;  %5339 = vmatmul.mubr.bf16.gmra.mrb[36].mxu1 %v9657_v2  ;;  %v3461_v63 = vsel %vm3429_vm3, %v3413_v5, %v3445_v3  ;;  %v5748_v45 = vpop.eup %5747  ;;  %v9661_v3 = vpack.c.bf16 %v7496_v44, %v7499_v9  ;;  %v3320_v44 = vld [vmem:[#allocation2 + $0x78] sm:$0xff]  ;;  %v7986_v9 = vld [vmem:[#allocation3] sm:$0xff] }
 0x4ff   :  { %5342 = vmatprep.mubr.bf16.mxu1 %v9658_v10  ;;  %v7959_v22 = vadd.f32 %v3461_v63, %v9659_v50  ;;  %v2805_v63 = vmul.f32 %v5748_v45, %v9476_v61  ;;  %v9663_v50 = vld [vmem:[#allocation70_spill] sm:$0xff] }
 0x500   :  { %vm3431_vm4 = vcmp.gt.f32.partialorder %v3415_v35, 0.0  ;;  %v3447_v37 = vmul.f32 0.2, %v3415_v35 }
 0x501   :  { %3517 = vmax.xlane.f32.xlu0 %v7959_v22  ;;  %v3384_v29 = vpop.permute.xlu1 %3383 }
 0x502   :  { %v3417_v24 = vadd.f32 %v7842_v16, %v3384_v29  ;;  %v3463_v26 = vsel %vm3431_vm4, %v3415_v35, %v3447_v37  ;;  %v3070_v37 = vpack.c.bf16 %v2805_v63, %v7540_v14  ;;  %v7996_v14 = vld [vmem:[#allocation3 + $0x18] sm:$0xff] }
 0x503   :  { %v7967_v51 = vadd.f32 %v3463_v26, %v9660_v25  ;;  %9664 = vst [vmem:[#allocation6_spill] sm:$0xff] %v7996_v14 }
 0x504   :  { %vm3433_vm5 = vcmp.gt.f32.partialorder %v3417_v24, 0.0  ;;  %v3449_v28 = vmul.f32 0.2, %v3417_v24 }
 0x505   :  { %3521 = vmax.xlane.f32.xlu0 %v7967_v51  ;;  %v3394_v5 = vpop.permute.xlu1 %3393 }
 0x506   :  { %v3419_v18 = vadd.f32 %v7842_v16, %v3394_v5  ;;  %5343 = vmatmul.mubr.bf16.gmra.mrb[40].mxu1 %v9661_v3  ;;  %v3465_v34 = vsel %vm3433_vm5, %v3417_v24, %v3449_v28  ;;  %v8006_v5 = vld [vmem:[#allocation3 + $0x28] sm:$0xff] }
 0x507   :  { %5346 = vmatprep.mubr.bf16.mxu1 %v3069_v0  ;;  %v7977_v35 = vadd.f32 %v3465_v34, %v9662_v56  ;;  %9666 = vst [vmem:[#allocation7_spill] sm:$0xff] %v8006_v5  ;;  %v8015_v34 = vld [vmem:[#allocation3 + $0x38] sm:$0xff] }
 0x508   :  { %vm3435_vm7 = vcmp.gt.f32.partialorder %v3419_v18, 0.0  ;;  %v3451_v2 = vmul.f32 0.2, %v3419_v18  ;;  %9668 = vst [vmem:[#allocation94_spill] sm:$0xff] %v8015_v34 }
 0x509   :  { %3525 = vmax.xlane.f32.xlu0 %v7977_v35 }
 0x50a   :  { %v3467_v10 = vsel %vm3435_vm7, %v3419_v18, %v3451_v2 }
 0x50b   :  { %v7982_v13 = vadd.f32 %v3467_v10, %v9663_v50  ;;  %v8024_v50 = vld [vmem:[#allocation3 + $0x48] sm:$0xff] }
 0x50c   :  { %9669 = vst [vmem:[#allocation100_spill] sm:$0xff] %v8024_v50 }
 0x50d   :  { %3529 = vmax.xlane.f32.xlu0 %v7982_v13 }
 0x50e   :  { %5347 = vmatmul.mubr.bf16.gmra.mrb[44].mxu1 %v3070_v37 }
 0x523   :  { %3398 = vperm.xlu0 %5499, %v3320_v44  }
 0x55c   :  { %v3502_v29 = vpop.xlane.xlu1 %3501 }
 0x55d   :  { %v7989_v24 = vmax.f32 %v7986_v9, %v3502_v29 }
 0x55f   :  { %4176 = vst.msk [vmem:[#allocation3] sm:$0xff] %vm3821_vm8, %v7989_v24  ;;  %3551 = vperm.xlu0 %5499, %v7989_v24  }
 0x560   :  { %v3508_v25 = vpop.xlane.xlu1 %3507 }
 0x561   :  { %v7999_v28 = vmax.f32 %v7996_v14, %v3508_v25  ;;  %v8033_v25 = vld [vmem:[#allocation3 + $0x58] sm:$0xff] }
 0x562   :  { %9671 = vst [vmem:[#allocation103_spill] sm:$0xff] %v8033_v25 }
 0x563   :  { %9665 = vst [vmem:[#allocation8_spill] sm:$0xff] %v7999_v28  ;;  %4179 = vst.msk [vmem:[#allocation3 + $0x18] sm:$0xff] %vm3821_vm8, %v7999_v28  ;;  %3566 = vperm.xlu0 %5499, %v7999_v28  }
 0x564   :  { %v3512_v0 = vpop.xlane.xlu1 %3511 }
 0x565   :  { %v8009_v18 = vmax.f32 %v8006_v5, %v3512_v0 }
 0x567   :  { %9667 = vst [vmem:[#allocation93_spill] sm:$0xff] %v8009_v18  ;;  %4181 = vst.msk [vmem:[#allocation3 + $0x28] sm:$0xff] %vm3821_vm8, %v8009_v18 }
 0x568   :  { %v3516_v56 = vpop.xlane.xlu1 %3515 }
 0x569   :  { %v8018_v2 = vmax.f32 %v8015_v34, %v3516_v56 }
 0x56b   :  { %4183 = vst.msk [vmem:[#allocation3 + $0x38] sm:$0xff] %vm3821_vm8, %v8018_v2 }
 0x56c   :  { %v3520_v37 = vpop.xlane.xlu1 %3519 }
 0x56d   :  { %v8027_v44 = vmax.f32 %v8024_v50, %v3520_v37  ;;  %v8042_v37 = vld [vmem:[#allocation3 + $0x68] sm:$0xff] }
 0x56e   :  { %9673 = vst [vmem:[#allocation95_spill] sm:$0xff] %v8042_v37 }
 0x56f   :  { %9670 = vst [vmem:[#allocation102_spill] sm:$0xff] %v8027_v44  ;;  %4185 = vst.msk [vmem:[#allocation3 + $0x48] sm:$0xff] %vm3821_vm8, %v8027_v44 }
 0x570   :  { %v3524_v0 = vpop.xlane.xlu1 %3523 }
 0x571   :  { %v8036_v56 = vmax.f32 %v8033_v25, %v3524_v0  ;;  %v8051_v0 = vld [vmem:[#allocation3 + $0x8] sm:$0xff] }
 0x572   :  { %9675 = vst [vmem:[#allocation99_spill] sm:$0xff] %v8051_v0 }
 0x573   :  { %9672 = vst [vmem:[#allocation104_spill] sm:$0xff] %v8036_v56  ;;  %4187 = vst.msk [vmem:[#allocation3 + $0x58] sm:$0xff] %vm3821_vm8, %v8036_v56 }
 0x574   :  { %v3528_v3 = vpop.xlane.xlu1 %3527 }
 0x575   :  { %v8045_v29 = vmax.f32 %v8042_v37, %v3528_v3  ;;  %v8060_v3 = vld [vmem:[#allocation3 + $0x10] sm:$0xff] }
 0x576   :  { %9676 = vst [vmem:[#allocation101_spill] sm:$0xff] %v8060_v3 }
 0x577   :  { %9674 = vst [vmem:[#allocation96_spill] sm:$0xff] %v8045_v29  ;;  %4189 = vst.msk [vmem:[#allocation3 + $0x68] sm:$0xff] %vm3821_vm8, %v8045_v29 }
 0x57e   :  { %v3504_v26 = vpop.xlane.xlu0 %3503 }
 0x57f   :  { %v8054_v10 = vmax.f32 %v8051_v0, %v3504_v26  ;;  %v8069_v26 = vld [vmem:[#allocation3 + $0x20] sm:$0xff] }
 0x580   :  { %9677 = vst [vmem:[#allocation111_spill] sm:$0xff] %v8069_v26 }
 0x581   :  { %4177 = vst.msk [vmem:[#allocation3 + $0x8] sm:$0xff] %vm3821_vm8, %v8054_v10 }
 0x582   :  { %v3506_v50 = vpop.xlane.xlu0 %3505  ;;  %2916 = vadd.xlane.f32.xlu0 %v2805_v63 }
 0x583   :  { %v8063_v45 = vmax.f32 %v8060_v3, %v3506_v50  ;;  %v8079_v50 = vld [vmem:[#allocation3 + $0x30] sm:$0xff] }
 0x584   :  { %9679 = vst [vmem:[#allocation117_spill] sm:$0xff] %v8079_v50 }
 0x585   :  { %4178 = vst.msk [vmem:[#allocation3 + $0x10] sm:$0xff] %vm3821_vm8, %v8063_v45 }
 0x586   :  { %v3510_v34 = vpop.xlane.xlu0 %3509  ;;  %2912 = vadd.xlane.f32.xlu0 %v7963_v30  ;;  %v8088_v30 = vld [vmem:[#allocation3 + $0x40] sm:$0xff] }
 0x587   :  { %v8073_v25 = vmax.f32 %v8069_v26, %v3510_v34  ;;  %9681 = vst [vmem:[#allocation148_spill] sm:$0xff] %v8088_v30 }
 0x589   :  { %9678 = vst [vmem:[#allocation112_spill] sm:$0xff] %v8073_v25  ;;  %4180 = vst.msk [vmem:[#allocation3 + $0x20] sm:$0xff] %vm3821_vm8, %v8073_v25 }
 0x58a   :  { %v3514_v37 = vpop.xlane.xlu0 %3513 }
 0x58b   :  { %v8082_v0 = vmax.f32 %v8079_v50, %v3514_v37  ;;  %v8097_v37 = vld [vmem:[#allocation3 + $0x50] sm:$0xff] }
 0x58c   :  { %9683 = vst [vmem:[#allocation108_spill] sm:$0xff] %v8097_v37 }
 0x58d   :  { %9680 = vst [vmem:[#allocation118_spill] sm:$0xff] %v8082_v0  ;;  %4182 = vst.msk [vmem:[#allocation3 + $0x30] sm:$0xff] %vm3821_vm8, %v8082_v0 }
 0x58e   :  { %v3518_v34 = vpop.xlane.xlu0 %3517 }
 0x58f   :  { %v8091_v63 = vmax.f32 %v8088_v30, %v3518_v34  ;;  %v8106_v34 = vld [vmem:[#allocation3 + $0x60] sm:$0xff] }
 0x590   :  { %9685 = vst [vmem:[#allocation113_spill] sm:$0xff] %v8106_v34 }
 0x591   :  { %9682 = vst [vmem:[#allocation107_spill] sm:$0xff] %v8091_v63  ;;  %4184 = vst.msk [vmem:[#allocation3 + $0x40] sm:$0xff] %vm3821_vm8, %v8091_v63 }
 0x592   :  { %v3522_v5 = vpop.xlane.xlu0 %3521 }
 0x593   :  { %v8100_v3 = vmax.f32 %v8097_v37, %v3522_v5  ;;  %v8115_v5 = vld [vmem:[#allocation3 + $0x70] sm:$0xff] }
 0x594   :  { %9687 = vst [vmem:[#allocation53_spill] sm:$0xff] %v8115_v5 }
 0x595   :  { %9684 = vst [vmem:[#allocation149_spill] sm:$0xff] %v8100_v3  ;;  %4186 = vst.msk [vmem:[#allocation3 + $0x50] sm:$0xff] %vm3821_vm8, %v8100_v3 }
 0x596   :  { %v3526_v61 = vpop.xlane.xlu0 %3525 }
 0x597   :  { %v8109_v26 = vmax.f32 %v8106_v34, %v3526_v61 }
 0x599   :  { %9686 = vst [vmem:[#allocation114_spill] sm:$0xff] %v8109_v26  ;;  %4188 = vst.msk [vmem:[#allocation3 + $0x60] sm:$0xff] %vm3821_vm8, %v8109_v26 }
 0x59a   :  { %v3530_v28 = vpop.xlane.xlu0 %3529 }
 0x59b   :  { %v8118_v50 = vmax.f32 %v8115_v5, %v3530_v28  ;;  %v9688_v28 = vld [vmem:[#allocation80_spill] sm:$0xff] }
 0x59c   :  { %3576 = vperm.xlu0 %5499, %v8009_v18  }
 0x59d   :  { %4190 = vst.msk [vmem:[#allocation3 + $0x70] sm:$0xff] %vm3821_vm8, %v8118_v50 }
 0x5a0   :  { %3586 = vperm.xlu0 %5499, %v8018_v2  }
 0x5a2   :  { %v3399_v61 = vpop.permute.xlu0 %3398 }
 0x5a3   :  { %v3420_v30 = vadd.f32 %v7842_v16, %v3399_v61 }
 0x5a4   :  { %3596 = vperm.xlu0 %5499, %v8027_v44  }
 0x5a5   :  { %vm3436_vm9 = vcmp.gt.f32.partialorder %v3420_v30, 0.0  ;;  %v3452_v34 = vmul.f32 0.2, %v3420_v30 }
 0x5a7   :  { %v3468_v14 = vsel %vm3436_vm9, %v3420_v30, %v3452_v34 }
 0x5a8   :  { %3606 = vperm.xlu0 %5499, %v8036_v56   ;;  %v8130_v18 = vadd.f32 %v3468_v14, %v9688_v28 }
 0x5aa   :  { %3531 = vmax.xlane.f32.xlu1 %v8130_v18 }
 0x5ac   :  { %3616 = vperm.xlu0 %5499, %v8045_v29  }
 0x5bb   :  { %3556 = vperm.xlu1 %5500, %v8054_v10  }
 0x5bf   :  { %3561 = vperm.xlu1 %5500, %v8063_v45  }
 0x5c3   :  { %3571 = vperm.xlu1 %5500, %v8073_v25  }
 0x5c7   :  { %3581 = vperm.xlu1 %5500, %v8082_v0  }
 0x5c9   :  { %v8138_v16 = vpop.f32.mrb[32].mxu1 }
 0x5ca   :  { %v8140_v30 = vpop.f32.mrb[33].mxu1 }
 0x5cb   :  { %v5337_v34 = vpop.f32.mrb[34].mxu1  ;;  %3591 = vperm.xlu1 %5500, %v8091_v63  }
 0x5cc   :  { %v3132_v14 = vpop.f32.mrb[35].mxu1 }
 0x5cf   :  { %3601 = vperm.xlu1 %5500, %v8100_v3  }
 0x5d1   :  { %v8144_v61 = vpop.f32.mrb[36].mxu1 }
 0x5d2   :  { %v8146_v28 = vpop.f32.mrb[37].mxu1 }
 0x5d3   :  { %v5341_v37 = vpop.f32.mrb[38].mxu1  ;;  %3611 = vperm.xlu1 %5500, %v8109_v26  }
 0x5d4   :  { %v3148_v5 = vpop.f32.mrb[39].mxu1 }
 0x5d7   :  { %3621 = vperm.xlu1 %5500, %v8118_v50  }
 0x5d9   :  { %v8150_v29 = vpop.f32.mrb[40].mxu1 }
 0x5da   :  { %v8152_v0 = vpop.f32.mrb[41].mxu1 }
 0x5db   :  { %v5345_v56 = vpop.f32.mrb[42].mxu1  ;;  %3214 = vrot.lane.b32.xlu1 %v5337_v34, %s5855_s7 }
 0x5dc   :  { %v3164_v63 = vpop.f32.mrb[43].mxu1 }
 0x5df   :  { %3210 = vrot.lane.b32.xlu1 %v3132_v14, %s5855_s7  ;;  %v8187_v14 = vld [vmem:[#allocation3 + $0x78] sm:$0xff] }
 0x5e1   :  { %v8156_v3 = vpop.f32.mrb[44].mxu1 }
 0x5e2   :  { %v8158_v25 = vpop.f32.mrb[45].mxu1 }
 0x5e3   :  { %v5349_v44 = vpop.f32.mrb[46].mxu1  ;;  %3222 = vrot.lane.b32.xlu1 %v5341_v37, %s5855_s7  ;;  %v3552_v37 = vpop.permute.xlu0 %3551 }
 0x5e4   :  { %v3180_v26 = vpop.f32.mrb[47].mxu1 }
 0x5e7   :  { %3218 = vrot.lane.b32.xlu1 %v3148_v5, %s5855_s7  ;;  %v3567_v5 = vpop.permute.xlu0 %3566 }
 0x5eb   :  { %2325 = vrot.lane.b32.xlu1 %v7819_v31, %s5856_s8  ;;  %v2869_v31 = vld [vmem:[#allocation4 + $0x78] sm:$0xff] }
 0x5ef   :  { %2321 = vrot.lane.b32.xlu1 %v7821_v42, %s5856_s8  ;;  %v2885_v42 = vmul.f32 %v7583_v11, %v2869_v31  ;;  %v3629_v11 = vsub.f32 %v7863_v12, %v3552_v37 }
 0x5f3   :  { %3230 = vrot.lane.b32.xlu1 %v5345_v56, %s5855_s7 }
 0x5f7   :  { %3226 = vrot.lane.b32.xlu1 %v3164_v63, %s5855_s7 }
 0x5fb   :  { %2333 = vrot.lane.b32.xlu1 %v7839_v62, %s5856_s8  ;;  %v2867_v62 = vld [vmem:[#allocation4 + $0x68] sm:$0xff] }
 0x5ff   :  { %2329 = vrot.lane.b32.xlu1 %v7844_v46, %s5856_s8  ;;  %v2883_v46 = vmul.f32 %v7578_v40, %v2867_v62 }
 0x603   :  { %3238 = vrot.lane.b32.xlu1 %v5349_v44, %s5855_s7 }
 0x607   :  { %3234 = vrot.lane.b32.xlu1 %v3180_v26, %s5855_s7 }
 0x60b   :  { %2341 = vrot.lane.b32.xlu1 %v7860_v48, %s5856_s8  ;;  %v3645_v48 = vmul.f32 1.442695, %v3629_v11 }
 0x60d   :  { %5749 = vpow2.f32 %v3645_v48 }
 0x60f   :  { %2337 = vrot.lane.b32.xlu1 %v7865_v32, %s5856_s8  ;;  %v2917_v56 = vpop.xlane.xlu0 %2916 }
 0x610   :  { %v2933_v63 = vadd.f32 %v2917_v56, %v2885_v42  ;;  %v3632_v42 = vsub.f32 %v7877_v17, %v3567_v5 }
 0x612   :  { %2950 = vst.msk [vmem:[#allocation4 + $0x78] sm:$0xff] %vm2934_vm6, %v2933_v63  ;;  %v3651_v62 = vmul.f32 1.442695, %v3632_v42  ;;  %v9689_v42 = vld [vmem:[#allocation24_spill] sm:$0xff] }
 0x613   :  { %2349 = vrot.lane.b32.xlu1 %v7903_v52, %s5856_s8  ;;  %v2913_v44 = vpop.xlane.xlu0 %2912 }
 0x614   :  { %v2931_v26 = vadd.f32 %v2913_v44, %v2883_v46 }
 0x616   :  { %2948 = vst.msk [vmem:[#allocation4 + $0x68] sm:$0xff] %vm2934_vm6, %v2931_v26  ;;  %vm2385_vm6 = vcmask 130112  }
 0x617   :  { %2345 = vrot.lane.b32.xlu1 %v7906_v55, %s5856_s8  ;;  %v5750_v32 = vpop.eup %5749 }
 0x618   :  { %v3677_v52 = vmul.f32 %v5750_v32, %v6196_v43 }
 0x61b   :  { %v3577_v34 = vpop.permute.xlu0 %3576 }
 0x61c   :  { %v3634_v63 = vsub.f32 %v7884_v57, %v3577_v34 }
 0x61e   :  { %v3655_v5 = vmul.f32 1.442695, %v3634_v63 }
 0x61f   :  { %v3587_v37 = vpop.permute.xlu0 %3586 }
 0x620   :  { %v3636_v44 = vsub.f32 %v7889_v38, %v3587_v37 }
 0x622   :  { %v3659_v48 = vmul.f32 1.442695, %v3636_v44 }
 0x637   :  { %v3532_v31 = vpop.xlane.xlu1 %3531 }
 0x638   :  { %v8190_v40 = vmax.f32 %v8187_v14, %v3532_v31 }
 0x63a   :  { %v3708_v56 = vsub.f32 %v8187_v14, %v8190_v40  ;;  %4191 = vst.msk [vmem:[#allocation3 + $0x78] sm:$0xff] %vm3821_vm8, %v8190_v40  ;;  %3626 = vperm.xlu0 %5499, %v8190_v40   ;;  %v3745_v14 = vld [vmem:[#allocation4 + $0x20] sm:$0xff]  ;;  %v9740_v40 = vld [vmem:[#allocation113_spill] sm:$0xff] }
 0x63b   :  { %3773 = vadd.xlane.f32.xlu1 %v3677_v52  ;;  %v3557_v12 = vpop.permute.xlu1 %3556 }
 0x63c   :  { %v3630_v55 = vsub.f32 %v7925_v1, %v3557_v12  ;;  %v3597_v1 = vpop.permute.xlu0 %3596 }
 0x63e   :  { %v3647_v46 = vmul.f32 1.442695, %v3630_v55  ;;  %3212 = vrot.lane.b32.xlu0 %v8138_v16, %s5855_s7  ;;  %v3638_v16 = vsub.f32 %v7895_v41, %v3597_v1 }
 0x63f   :  { %v3562_v43 = vpop.permute.xlu1 %3561 }
 0x640   :  { %5751 = vpow2.f32 %v3647_v46  ;;  %v3631_v17 = vsub.f32 %v7932_v15, %v3562_v43 }
 0x641   :  { %5753 = vpow2.f32 %v3651_v62 }
 0x642   :  { %v3649_v26 = vmul.f32 1.442695, %v3631_v17  ;;  %3208 = vrot.lane.b32.xlu0 %v8140_v30, %s5855_s7  ;;  %v3663_v30 = vmul.f32 1.442695, %v3638_v16 }
 0x643   :  { %v3572_v11 = vpop.permute.xlu1 %3571 }
 0x644   :  { %5755 = vpow2.f32 %v3649_v26  ;;  %v3633_v57 = vsub.f32 %v7943_v49, %v3572_v11  ;;  %v3607_v26 = vpop.permute.xlu0 %3606 }
 0x645   :  { %5757 = vpow2.f32 %v3655_v5  ;;  %v9691_v5 = vld [vmem:[#allocation41_spill] sm:$0xff] }
 0x646   :  { %v3653_v32 = vmul.f32 1.442695, %v3633_v57  ;;  %3220 = vrot.lane.b32.xlu0 %v8144_v61, %s5855_s7  ;;  %v9692_v57 = vld [vmem:[#allocation30_spill] sm:$0xff] }
 0x647   :  { %v3582_v15 = vpop.permute.xlu1 %3581 }
 0x648   :  { %5759 = vpow2.f32 %v3653_v32  ;;  %v3635_v38 = vsub.f32 %v7948_v53, %v3582_v15 }
 0x649   :  { %5761 = vpow2.f32 %v3659_v48 }
 0x64a   :  { %v5752_v34 = vpop.eup %5751  ;;  %v3657_v31 = vmul.f32 1.442695, %v3635_v38  ;;  %3216 = vrot.lane.b32.xlu0 %v8146_v28, %s5855_s7  ;;  %v9690_v28 = vld [vmem:[#allocation20_spill] sm:$0xff] }
 0x64b   :  { %v3592_v49 = vpop.permute.xlu1 %3591  ;;  %v8215_v12 = vmul.f32 %v5752_v34, %v9689_v42  ;;  %v5754_v41 = vpop.eup %5753  ;;  %v3640_v34 = vsub.f32 %v7901_v36, %v3607_v26 }
 0x64c   :  { %5763 = vpow2.f32 %v3657_v31  ;;  %v3637_v55 = vsub.f32 %v7959_v22, %v3592_v49  ;;  %v8227_v46 = vmul.f32 %v5754_v41, %v6207_v54 }
 0x64d   :  { %v3950_v61 = vpack.c.bf16 %v8215_v12, %v3677_v52  ;;  %5765 = vpow2.f32 %v3663_v30  ;;  %v3667_v41 = vmul.f32 1.442695, %v3640_v34 }
 0x64e   :  { %v5756_v37 = vpop.eup %5755  ;;  %v3661_v53 = vmul.f32 1.442695, %v3637_v55  ;;  %2327 = vrot.lane.b32.xlu0 %v7825_v8, %s5856_s8 }
 0x64f   :  { %5366 = vmatprep.mubr.bf16.mxu0 %v3950_v61  ;;  %v8221_v62 = vpop.permute.xlu1 %3601  ;;  %v8224_v63 = vmul.f32 %v5756_v37, %v9690_v28  ;;  %v5758_v43 = vpop.eup %5757 }
 0x650   :  { %5767 = vpow2.f32 %v3661_v53  ;;  %v8240_v44 = vmul.f32 %v5758_v43, %v9691_v5  ;;  %v9699_v5 = vld [vmem:[#allocation13_spill] sm:$0xff] }
 0x651   :  { %3777 = vadd.xlane.f32.xlu1 %v8224_v63  ;;  %v3951_v22 = vpack.c.bf16 %v8227_v46, %v8224_v63  ;;  %5769 = vpow2.f32 %v3667_v41 }
 0x652   :  { %v5760_v52 = vpop.eup %5759  ;;  %2323 = vrot.lane.b32.xlu0 %v7828_v58, %s5856_s8 }
 0x653   :  { %v8234_v8 = vpop.permute.xlu1 %3611  ;;  %v8237_v17 = vmul.f32 %v5760_v52, %v9433_v39  ;;  %v5762_v54 = vpop.eup %5761  ;;  %v9693_v39 = vld [vmem:[#allocation37_spill] sm:$0xff]  ;;  %v9697_v52 = vld [vmem:[#allocation11_spill] sm:$0xff] }
 0x654   :  { %v8253_v16 = vmul.f32 %v5762_v54, %v9693_v39 }
 0x655   :  { %3779 = vadd.xlane.f32.xlu1 %v8227_v46  ;;  %v3952_v1 = vpack.c.bf16 %v8240_v44, %v8237_v17  ;;  %v3751_v46 = vld [vmem:[#allocation4 + $0x50] sm:$0xff] }
 0x656   :  { %v5764_v11 = vpop.eup %5763  ;;  %3228 = vrot.lane.b32.xlu0 %v8150_v29, %s5855_s7  ;;  %v3617_v29 = vpop.permute.xlu0 %3616 }
 0x657   :  { %v8247_v58 = vpop.permute.xlu1 %3621  ;;  %v8250_v48 = vmul.f32 %v5764_v11, %v9692_v57  ;;  %v5766_v32 = vpop.eup %5765  ;;  %v3642_v55 = vsub.f32 %v7912_v21, %v3617_v29  ;;  %v9694_v21 = vld [vmem:[#allocation128_spill] sm:$0xff]  ;;  %v3641_v11 = vsub.f32 %v7977_v35, %v8234_v8 }
 0x658   :  { %v3686_v49 = vmul.f32 %v5766_v32, %v9456_v4  ;;  %v3643_v39 = vsub.f32 %v7982_v13, %v8247_v58  ;;  %v9701_v13 = vsub.f32 %v7986_v9, %v7989_v24  ;;  %v9702_v58 = vld [vmem:[#allocation72_spill] sm:$0xff] }
 0x659   :  { %3781 = vadd.xlane.f32.xlu1 %v8237_v17  ;;  %v3953_v15 = vpack.c.bf16 %v8253_v16, %v8250_v48  ;;  %v3669_v57 = vmul.f32 1.442695, %v3641_v11 }
 0x65a   :  { %v5768_v38 = vpop.eup %5767  ;;  %3224 = vrot.lane.b32.xlu0 %v8152_v0, %s5855_s7  ;;  %v3671_v0 = vmul.f32 1.442695, %v3642_v55  ;;  %v3709_v8 = vmul.f32 1.442695, %v9701_v13  ;;  %v9709_v13 = vld [vmem:[#allocation7_spill] sm:$0xff] }
 0x65b   :  { %v8261_v30 = vpop.permute.xlu1 %3214  ;;  %v3685_v31 = vmul.f32 %v5768_v38, %v9457_v19  ;;  %v3673_v38 = vmul.f32 1.442695, %v3643_v39 }
 0x65c   :  { %5771 = vpow2.f32 %v3671_v0 }
 0x65d   :  { %3783 = vadd.xlane.f32.xlu1 %v8240_v44  ;;  %v3954_v42 = vpack.c.bf16 %v3686_v49, %v3685_v31 }
 0x65e   :  { %2335 = vrot.lane.b32.xlu0 %v7848_v23, %s5856_s8  ;;  %v2058_v23 = vld [vmem:[#allocation5 + $0x10] sm:$0xff] }
 0x65f   :  { %5374 = vmatprep.mubr.bf16.mxu1 %v3954_v42  ;;  %v8269_v36 = vpop.permute.xlu1 %3210  ;;  %v2154_v61 = vmul.f32 %v9694_v21, %v2058_v23  ;;  %v9703_v23 = vld [vmem:[#allocation67_spill] sm:$0xff] }
 0x661   :  { %3785 = vadd.xlane.f32.xlu1 %v8250_v48 }
 0x662   :  { %2331 = vrot.lane.b32.xlu0 %v7852_v59, %s5856_s8  ;;  %v5770_v59 = vpop.eup %5769 }
 0x663   :  { %v8274_v19 = vpop.permute.xlu1 %3222 }
 0x665   :  { %3787 = vadd.xlane.f32.xlu1 %v8253_v16 }
 0x666   :  { %3236 = vrot.lane.b32.xlu0 %v8156_v3, %s5855_s7  ;;  %v8288_v3 = vmul.f32 %v5770_v59, %v9451_v47  ;;  %v5772_v28 = vpop.eup %5771  ;;  %v9695_v47 = vld [vmem:[#allocation9_spill] sm:$0xff] }
 0x667   :  { %v8279_v4 = vpop.permute.xlu1 %3218 }
 0x669   :  { %3789 = vadd.xlane.f32.xlu1 %v3685_v31 }
 0x66a   :  { %3232 = vrot.lane.b32.xlu0 %v8158_v25, %s5855_s7  ;;  %v8294_v25 = vmul.f32 %v5772_v28, %v9486_v27  ;;  %v9698_v27 = vld [vmem:[#allocation12_spill] sm:$0xff] }
 0x66b   :  { %v2326_v37 = vpop.permute.xlu1 %2325 }
 0x66c   :  { %v2371_v53 = vadd.f32 %v2326_v37, %v2154_v61  ;;  %v9704_v37 = vld [vmem:[#allocation64_spill] sm:$0xff] }
 0x66d   :  { %3791 = vadd.xlane.f32.xlu1 %v3686_v49 }
 0x66e   :  { %2388 = vst.msk [vmem:[#allocation5 + $0x10] sm:$0xff] %vm2385_vm6, %v2371_v53  ;;  %2343 = vrot.lane.b32.xlu0 %v7867_v6, %s5856_s8  ;;  %v9696_v6 = vld [vmem:[#allocation10_spill] sm:$0xff] }
 0x66f   :  { %v8302_v43 = vpop.permute.xlu1 %2321 }
 0x671   :  { %3795 = vadd.xlane.f32.xlu1 %v8288_v3 }
 0x672   :  { %2339 = vrot.lane.b32.xlu0 %v7872_v60, %s5856_s8 }
 0x673   :  { %v8305_v60 = vpop.permute.xlu1 %3230 }
 0x675   :  { %3799 = vadd.xlane.f32.xlu1 %v8294_v25 }
 0x676   :  { %3958 = vrot.lane.b32.xlu0 %v9509_v20, %s5857_s9 }
 0x677   :  { %v8309_v54 = vpop.permute.xlu1 %3226 }
 0x67a   :  { %3960 = vrot.lane.b32.xlu0 %v9518_v7, %s5857_s9 }
 0x67b   :  { %v8311_v20 = vpop.permute.xlu1 %2333 }
 0x67e   :  { %3962 = vrot.lane.b32.xlu0 %v9511_v33, %s5857_s9  ;;  %v3639_v33 = vsub.f32 %v7967_v51, %v8221_v62  ;;  %v9700_v62 = vld [vmem:[#allocation45_spill] sm:$0xff] }
 0x67f   :  { %v8315_v7 = vpop.permute.xlu1 %2329 }
 0x680   :  { %v3665_v26 = vmul.f32 1.442695, %v3639_v33  ;;  %v9705_v33 = vld [vmem:[#allocation6_spill] sm:$0xff] }
 0x682   :  { %3964 = vrot.lane.b32.xlu0 %v9695_v47, %s5857_s9  ;;  %5773 = vpow2.f32 %v3665_v26  ;;  %v9706_v26 = vld [vmem:[#allocation8_spill] sm:$0xff] }
 0x683   :  { %v8321_v32 = vpop.permute.xlu1 %3238  ;;  %5775 = vpow2.f32 %v3669_v57  ;;  %v9707_v11 = vsub.f32 %v9705_v33, %v9706_v26  ;;  %v9718_v33 = vld [vmem:[#allocation100_spill] sm:$0xff]  ;;  %v9719_v26 = vld [vmem:[#allocation102_spill] sm:$0xff] }
 0x684   :  { %5777 = vpow2.f32 %v3673_v38 }
 0x685   :  { %5779 = vpow2.f32 %v3709_v8  ;;  %v3715_v57 = vmul.f32 1.442695, %v9707_v11  ;;  %v9710_v8 = vld [vmem:[#allocation93_spill] sm:$0xff]  ;;  %v9720_v11 = vsub.f32 %v9718_v33, %v9719_v26 }
 0x686   :  { %3966 = vrot.lane.b32.xlu0 %v9696_v6, %s5857_s9 }
 0x687   :  { %v8323_v34 = vpop.permute.xlu1 %3234 }
 0x68a   :  { %3968 = vrot.lane.b32.xlu0 %v9697_v52, %s5857_s9  ;;  %v3741_v52 = vld [vmem:[#allocation4] sm:$0xff] }
 0x68b   :  { %v8326_v51 = vpop.permute.xlu1 %2341 }
 0x68c   :  { %v5774_v29 = vpop.eup %5773 }
 0x68d   :  { %v8329_v31 = vmul.f32 %v5774_v29, %v9700_v62  ;;  %v5776_v35 = vpop.eup %5775  ;;  %v9708_v62 = vld [vmem:[#allocation75_spill] sm:$0xff] }
 0x68e   :  { %3970 = vrot.lane.b32.xlu0 %v9698_v27, %s5857_s9  ;;  %v8336_v49 = vmul.f32 %v5776_v35, %v9702_v58  ;;  %v5778_v42 = vpop.eup %5777  ;;  %v9711_v58 = vsub.f32 %v9709_v13, %v9710_v8  ;;  %v9726_v8 = vld [vmem:[#allocation104_spill] sm:$0xff] }
 0x68f   :  { %v8338_v41 = vpop.permute.xlu1 %2337  ;;  %v8343_v21 = vmul.f32 %v5778_v42, %v9703_v23  ;;  %v5780_v47 = vpop.eup %5779 }
 0x690   :  { %v3757_v27 = vmul.f32 %v5780_v47, %v3741_v52  ;;  %v3719_v42 = vmul.f32 1.442695, %v9711_v58 }
 0x692   :  { %3972 = vrot.lane.b32.xlu0 %v9699_v5, %s5857_s9 }
 0x693   :  { %v8347_v59 = vpop.permute.xlu1 %2349 }
 0x6b1   :  { %3775 = vadd.xlane.f32.xlu0 %v8215_v12  ;;  %v2953_v12 = vld [vmem:[#allocation5 + $0x10] sm:$0xff] }
 0x6b2   :  { %v3049_v9 = vmul.f32 %v9704_v37, %v2953_v12  ;;  %v9712_v12 = vld [vmem:[#allocation101_spill] sm:$0xff] }
 0x6b5   :  { %3793 = vadd.xlane.f32.xlu0 %v8329_v31 }
 0x6b9   :  { %v3627_v55 = vpop.permute.xlu0 %3626  ;;  %3797 = vadd.xlane.f32.xlu0 %v8336_v49 }
 0x6ba   :  { %v3644_v0 = vsub.f32 %v8130_v18, %v3627_v55  ;;  %v8352_v18 = vpop.permute.xlu1 %2345 }
 0x6bc   :  { %v3675_v61 = vmul.f32 1.442695, %v3644_v0  ;;  %v9713_v0 = vsub.f32 %v9712_v12, %v8063_v45  ;;  %v3727_v45 = vmul.f32 1.442695, %v9720_v11  ;;  %v3743_v11 = vld [vmem:[#allocation4 + $0x10] sm:$0xff] }
 0x6bd   :  { %v3213_v24 = vpop.permute.xlu0 %3212  ;;  %3801 = vadd.xlane.f32.xlu0 %v8343_v21 }
 0x6be   :  { %5781 = vpow2.f32 %v3675_v61  ;;  %v3258_v53 = vadd.f32 %v3213_v24, %v3049_v9  ;;  %v3713_v23 = vmul.f32 1.442695, %v9713_v0  ;;  %v9714_v61 = vld [vmem:[#allocation99_spill] sm:$0xff]  ;;  %v9728_v0 = vld [vmem:[#allocation117_spill] sm:$0xff] }
 0x6bf   :  { %5783 = vpow2.f32 %v3715_v57  ;;  %v9715_v37 = vsub.f32 %v9714_v61, %v8054_v10  ;;  %v9721_v57 = vld [vmem:[#allocation111_spill] sm:$0xff]  ;;  %v9722_v10 = vld [vmem:[#allocation112_spill] sm:$0xff] }
 0x6c0   :  { %3275 = vst.msk [vmem:[#allocation5 + $0x10] sm:$0xff] %vm3272_vm10, %v3258_v53  ;;  %5785 = vpow2.f32 %v3719_v42  ;;  %v9716_v53 = vld [vmem:[#allocation94_spill] sm:$0xff] }
 0x6c1   :  { %v8350_v28 = vpop.permute.xlu0 %3208  ;;  %v3711_v9 = vmul.f32 1.442695, %v9715_v37  ;;  %v9717_v52 = vsub.f32 %v9716_v53, %v8018_v2  ;;  %5787 = vpow2.f32 %v3713_v23  ;;  %v9725_v2 = vld [vmem:[#allocation103_spill] sm:$0xff]  ;;  %v9729_v23 = vld [vmem:[#allocation118_spill] sm:$0xff] }
 0x6c2   :  { %v9727_v58 = vsub.f32 %v9725_v2, %v9726_v8  ;;  %v9730_v61 = vsub.f32 %v9728_v0, %v9729_v23  ;;  %v3744_v23 = vld [vmem:[#allocation4 + $0x18] sm:$0xff] }
 0x6c3   :  { %5789 = vpow2.f32 %v3711_v9 }
 0x6c4   :  { %v3731_v42 = vmul.f32 1.442695, %v9727_v58 }
 0x6c5   :  { %v8354_v6 = vpop.permute.xlu0 %3220 }
 0x6c8   :  { %v5782_v5 = vpop.eup %5781  ;;  %v3774_v39 = vpop.xlane.xlu1 %3773 }
 0x6c9   :  { %v3805_v38 = vadd.f32 %v3774_v39, %v3757_v27  ;;  %v8359_v29 = vpop.permute.xlu0 %3216  ;;  %v8362_v35 = vmul.f32 %v5782_v5, %v9708_v62  ;;  %v3723_v27 = vmul.f32 1.442695, %v9717_v52  ;;  %v9723_v39 = vsub.f32 %v9721_v57, %v9722_v10  ;;  %v5784_v13 = vpop.eup %5783  ;;  %v9731_v52 = vld [vmem:[#allocation95_spill] sm:$0xff] }
 0x6ca   :  { %v5786_v12 = vpop.eup %5785  ;;  %v9735_v57 = vld [vmem:[#allocation107_spill] sm:$0xff] }
 0x6cb   :  { %3822 = vst.msk [vmem:[#allocation4] sm:$0xff] %vm3821_vm8, %v3805_v38  ;;  %3803 = vadd.xlane.f32.xlu1 %v8362_v35  ;;  %v3957_v55 = vpack.c.bf16 %v8362_v35, %v8343_v21  ;;  %5791 = vpow2.f32 %v3723_v27  ;;  %v3717_v38 = vmul.f32 1.442695, %v9723_v39  ;;  %v5788_v9 = vpop.eup %5787  ;;  %v9732_v27 = vld [vmem:[#allocation96_spill] sm:$0xff] }
 0x6cc   :  { %5793 = vpow2.f32 %v3727_v45  ;;  %v9733_v33 = vsub.f32 %v9731_v52, %v9732_v27  ;;  %v9734_v45 = vld [vmem:[#allocation148_spill] sm:$0xff]  ;;  %v3759_v2 = vmul.f32 %v5788_v9, %v3743_v11  ;;  %v9738_v52 = vld [vmem:[#allocation149_spill] sm:$0xff] }
 0x6cd   :  { %v8377_v24 = vpop.permute.xlu0 %2327  ;;  %5795 = vpow2.f32 %v3717_v38  ;;  %v8400_v53 = vpop.eup %5789  ;;  %v9736_v10 = vsub.f32 %v9734_v45, %v9735_v57  ;;  %v3760_v45 = vmul.f32 %v5784_v13, %v3744_v23 }
 0x6ce   :  { %5797 = vpow2.f32 %v3731_v42  ;;  %v3735_v26 = vmul.f32 1.442695, %v9733_v33  ;;  %v3739_v42 = vmul.f32 1.442695, %v3708_v56  ;;  %v9741_v56 = vld [vmem:[#allocation114_spill] sm:$0xff] }
 0x6cf   :  { %v3725_v39 = vmul.f32 1.442695, %v9736_v10 }
 0x6d1   :  { %v8382_v5 = vpop.permute.xlu0 %2323 }
 0x6d3   :  { %3856 = vperm.xlu0 %5499, %v5780_v47   ;;  %v3721_v47 = vmul.f32 1.442695, %v9730_v61 }
 0x6d5   :  { %v8390_v62 = vpop.permute.xlu0 %3228  ;;  %5799 = vpow2.f32 %v3721_v47  ;;  %v5792_v8 = vpop.eup %5791  ;;  %v9737_v47 = vld [vmem:[#allocation108_spill] sm:$0xff] }
 0x6d6   :  { %9724 = vst [vmem:[#allocation97_spill] sm:$0xff] %v8390_v62  ;;  %5801 = vpow2.f32 %v3735_v26  ;;  %v8414_v61 = vpop.eup %5793  ;;  %v9739_v27 = vsub.f32 %v9737_v47, %v9738_v52  ;;  %v9744_v52 = vld [vmem:[#allocation53_spill] sm:$0xff] }
 0x6d7   :  { %3871 = vperm.xlu0 %5499, %v5784_v13   ;;  %5803 = vpow2.f32 %v3725_v39  ;;  %v5796_v57 = vpop.eup %5795 }
 0x6d8   :  { %v3729_v33 = vmul.f32 1.442695, %v9739_v27  ;;  %5805 = vpow2.f32 %v3739_v42  ;;  %v3746_v42 = vld [vmem:[#allocation4 + $0x28] sm:$0xff]  ;;  %v9745_v27 = vsub.f32 %v9744_v52, %v8118_v50 }
 0x6d9   :  { %v8398_v37 = vpop.permute.xlu0 %3224 }
 0x6da   :  { %5807 = vpow2.f32 %v3729_v33  ;;  %v3737_v33 = vmul.f32 1.442695, %v9745_v27 }
 0x6db   :  { %3881 = vperm.xlu0 %5499, %v5786_v12  }
 0x6dc   :  { %3861 = vperm.xlu1 %5500, %v8400_v53  }
 0x6dd   :  { %v8409_v38 = vpop.permute.xlu0 %2335 }
 0x6de   :  { %v3778_v58 = vpop.xlane.xlu1 %3777 }
 0x6df   :  { %v3807_v0 = vadd.f32 %v3778_v58, %v3759_v2  ;;  %3891 = vperm.xlu0 %5499, %v5792_v8   ;;  %v3761_v58 = vmul.f32 %v5796_v57, %v3745_v14 }
 0x6e0   :  { %3866 = vperm.xlu1 %5500, %v5788_v9   ;;  %v9742_v9 = vsub.f32 %v9740_v40, %v9741_v56  ;;  %v3747_v56 = vld [vmem:[#allocation4 + $0x30] sm:$0xff] }
 0x6e1   :  { %3824 = vst.msk [vmem:[#allocation4 + $0x10] sm:$0xff] %vm3821_vm8, %v3807_v0  ;;  %v8420_v11 = vpop.permute.xlu0 %2331  ;;  %v8429_v0 = vpop.eup %5797 }
 0x6e2   :  { %v3780_v26 = vpop.xlane.xlu1 %3779  ;;  %v3733_v39 = vmul.f32 1.442695, %v9742_v9  ;;  %v5800_v23 = vpop.eup %5799 }
 0x6e3   :  { %v3808_v10 = vadd.f32 %v3780_v26, %v3760_v45  ;;  %3901 = vperm.xlu0 %5499, %v8414_v61   ;;  %v3762_v26 = vmul.f32 %v5786_v12, %v3746_v42  ;;  %v3763_v50 = vmul.f32 %v5800_v23, %v3747_v56 }
 0x6e4   :  { %3876 = vperm.xlu1 %5500, %v5796_v57   ;;  %5809 = vpow2.f32 %v3733_v39  ;;  %v8438_v57 = vpop.eup %5801 }
 0x6e5   :  { %3825 = vst.msk [vmem:[#allocation4 + $0x18] sm:$0xff] %vm3821_vm8, %v3808_v10  ;;  %v8427_v2 = vpop.permute.xlu0 %3236  ;;  %v5804_v14 = vpop.eup %5803  ;;  %5811 = vpow2.f32 %v3737_v33 }
 0x6e6   :  { %9743 = vst [vmem:[#allocation98_spill] sm:$0xff] %v8427_v2  ;;  %v3782_v13 = vpop.xlane.xlu1 %3781  ;;  %v8444_v39 = vpop.eup %5805 }
 0x6e7   :  { %v3809_v47 = vadd.f32 %v3782_v13, %v3761_v58  ;;  %3911 = vperm.xlu0 %5499, %v8429_v0   ;;  %v8446_v13 = vpop.eup %5807 }
 0x6e8   :  { %3886 = vperm.xlu1 %5500, %v5800_v23  }
 0x6e9   :  { %3826 = vst.msk [vmem:[#allocation4 + $0x20] sm:$0xff] %vm3821_vm8, %v3809_v47  ;;  %v8436_v45 = vpop.permute.xlu0 %3232  ;;  %v3748_v47 = vld [vmem:[#allocation4 + $0x38] sm:$0xff] }
 0x6ea   :  { %9746 = vst [vmem:[#allocation129_spill] sm:$0xff] %v8436_v45  ;;  %v3784_v10 = vpop.xlane.xlu1 %3783  ;;  %v3764_v52 = vmul.f32 %v5792_v8, %v3748_v47  ;;  %v9749_v47 = vld [vmem:[#allocation89_spill] sm:$0xff] }
 0x6eb   :  { %v3810_v40 = vadd.f32 %v3784_v10, %v3762_v26  ;;  %3921 = vperm.xlu0 %5499, %v8438_v57   ;;  %v9747_v26 = vld [vmem:[#allocation84_spill] sm:$0xff]  ;;  %v3749_v10 = vld [vmem:[#allocation4 + $0x40] sm:$0xff] }
 0x6ec   :  { %3896 = vperm.xlu1 %5500, %v5804_v14  }
 0x6ed   :  { %3827 = vst.msk [vmem:[#allocation4 + $0x28] sm:$0xff] %vm3821_vm8, %v3810_v40  ;;  %v8442_v9 = vpop.permute.xlu0 %2343  ;;  %v9748_v40 = vmov 0  }
 0x6ee   :  { %v3786_v58 = vpop.xlane.xlu1 %3785  ;;  %v8453_v33 = vpop.eup %5809 }
 0x6ef   :  { %v3811_v12 = vadd.f32 %v3786_v58, %v3763_v50  ;;  %3931 = vperm.xlu0 %5499, %v8444_v39   ;;  %v3765_v50 = vmul.f32 %v5804_v14, %v3749_v10  ;;  %v8460_v8 = vpop.eup %5811  ;;  %v9750_v10 = vld [vmem:[#allocation139_spill] sm:$0xff] }
 0x6f0   :  { %3906 = vperm.xlu1 %5500, %v8446_v13  }
 0x6f1   :  { %3828 = vst.msk [vmem:[#allocation4 + $0x30] sm:$0xff] %vm3821_vm8, %v3811_v12  ;;  %v8451_v42 = vpop.permute.xlu0 %2339 }
 0x6f2   :  { %v3788_v27 = vpop.xlane.xlu1 %3787 }
 0x6f3   :  { %v3812_v23 = vadd.f32 %v3788_v27, %v3764_v52  ;;  %2351 = vrot.lane.b32.xlu0 %v9747_v26, %s5856_s8  ;;  %v3750_v52 = vld [vmem:[#allocation4 + $0x48] sm:$0xff] }
 0x6f4   :  { %3916 = vperm.xlu1 %5500, %v8453_v33   ;;  %5501 = vset.pattern.permute.xlu0 %v9748_v40 }
 0x6f5   :  { %3829 = vst.msk [vmem:[#allocation4 + $0x38] sm:$0xff] %vm3821_vm8, %v3812_v23  ;;  %v3959_v56 = vpop.permute.xlu0 %3958  ;;  %v3766_v23 = vmul.f32 %v8414_v61, %v3750_v52  ;;  %v3754_v61 = vld [vmem:[#allocation4 + $0x68] sm:$0xff]  ;;  %v9751_v52 = vld [vmem:[#allocation86_spill] sm:$0xff] }
 0x6f6   :  { %5350 = vmatprep.subr.bf16.mxu0 %v3959_v56  ;;  %5382 = vmatprep.subr.bf16.mxu1 %v3959_v56  ;;  %v3790_v58 = vpop.xlane.xlu1 %3789 }
 0x6f7   :  { %v3813_v12 = vadd.f32 %v3790_v58, %v3765_v50  ;;  %5351 = vmatpush3.bf16.msra.mxu0 %v3959_v56  ;;  %5390 = vmatpush3.bf16.msra.mxu1 %v3959_v56  ;;  %v3752_v56 = vld [vmem:[#allocation4 + $0x58] sm:$0xff] }
 0x6f8   :  { %2347 = vrot.lane.b32.xlu0 %v9749_v47, %s5856_s8  ;;  %3926 = vperm.xlu1 %5500, %v8460_v8   ;;  %v3768_v58 = vmul.f32 %v8429_v0, %v3752_v56  ;;  %v9752_v0 = vld [vmem:[#allocation39_spill] sm:$0xff] }
 0x6f9   :  { %3830 = vst.msk [vmem:[#allocation4 + $0x40] sm:$0xff] %vm3821_vm8, %v3813_v12  ;;  %v3961_v27 = vpop.permute.xlu0 %3960 }
 0x6fa   :  { %5352 = vmatprep.subr.bf16.mxu0 %v3961_v27  ;;  %5383 = vmatprep.subr.bf16.mxu1 %v3961_v27  ;;  %v3792_v14 = vpop.xlane.xlu1 %3791 }
 0x6fb   :  { %v3814_v26 = vadd.f32 %v3792_v14, %v3766_v23  ;;  %5353 = vmatpush3.bf16.msra.mxu0 %v3961_v27  ;;  %5391 = vmatpush3.bf16.msra.mxu1 %v3961_v27  ;;  %v3770_v23 = vmul.f32 %v8438_v57, %v3754_v61  ;;  %v9754_v57 = vld [vmem:[#allocation63_spill] sm:$0xff]  ;;  %v3955_v61 = vpack.c.bf16 %v8288_v3, %v8329_v31 }
 0x6fc   :  { %1280 = vperm.xlu0 %5501, %v9750_v10   ;;  %5502 = vset.pattern.permute.xlu1 %v9748_v40  ;;  %v9753_v10 = vld [vmem:[#allocation56_spill] sm:$0xff]  ;;  %v3742_v3 = vld [vmem:[#allocation4 + $0x8] sm:$0xff] }
 0x6fd   :  { %3831 = vst.msk [vmem:[#allocation4 + $0x48] sm:$0xff] %vm3821_vm8, %v3814_v26  ;;  %v3963_v50 = vpop.permute.xlu0 %3962 }
 0x6fe   :  { %5354 = vmatprep.subr.bf16.mxu0 %v3963_v50  ;;  %5384 = vmatprep.subr.bf16.mxu1 %v3963_v50  ;;  %v3796_v12 = vpop.xlane.xlu1 %3795 }
 0x6ff   :  { %v3816_v47 = vadd.f32 %v3796_v12, %v3768_v58  ;;  %5355 = vmatpush3.bf16.msra.mxu0 %v3963_v50  ;;  %5392 = vmatpush3.bf16.msra.mxu1 %v3963_v50  ;;  %v9755_v58 = vld [vmem:[#allocation40_spill] sm:$0xff] }
 0x700   :  { %1295 = vperm.xlu0 %5501, %v9751_v52   ;;  %v3956_v52 = vpack.c.bf16 %v8294_v25, %v8336_v49  ;;  %v3758_v25 = vmul.f32 %v8400_v53, %v3742_v3  ;;  %v3755_v49 = vld [vmem:[#allocation4 + $0x70] sm:$0xff] }
 0x701   :  { %3833 = vst.msk [vmem:[#allocation4 + $0x58] sm:$0xff] %vm3821_vm8, %v3816_v47  ;;  %v3965_v27 = vpop.permute.xlu0 %3964  ;;  %v9756_v47 = vld [vmem:[#allocation54_spill] sm:$0xff]  ;;  %v3771_v21 = vmul.f32 %v8460_v8, %v3755_v49 }
 0x702   :  { %5356 = vmatprep.subr.bf16.mxu0 %v3965_v27  ;;  %5385 = vmatprep.subr.bf16.mxu1 %v3965_v27  ;;  %v3800_v40 = vpop.xlane.xlu1 %3799  ;;  %v9761_v49 = vld [vmem:[#allocation42_spill] sm:$0xff] }
 0x703   :  { %v3818_v14 = vadd.f32 %v3800_v40, %v3770_v23  ;;  %5357 = vmatpush3.bf16.msra.mxu0 %v3965_v27  ;;  %5393 = vmatpush3.bf16.msra.mxu1 %v3965_v27  ;;  %v3756_v27 = vld [vmem:[#allocation4 + $0x78] sm:$0xff] }
 0x704   :  { %1305 = vperm.xlu0 %5501, %v9752_v0   ;;  %v3772_v23 = vmul.f32 %v8444_v39, %v3756_v27 }
 0x705   :  { %3835 = vst.msk [vmem:[#allocation4 + $0x68] sm:$0xff] %vm3821_vm8, %v3818_v14  ;;  %v3967_v26 = vpop.permute.xlu0 %3966 }
 0x706   :  { %5358 = vmatprep.subr.bf16.mxu0 %v3967_v26  ;;  %5386 = vmatprep.subr.bf16.mxu1 %v3967_v26 }
 0x707   :  { %5359 = vmatpush3.bf16.msra.mxu0 %v3967_v26  ;;  %5394 = vmatpush3.bf16.msra.mxu1 %v3967_v26 }
 0x708   :  { %1315 = vperm.xlu0 %5501, %v9753_v10  }
 0x709   :  { %v3969_v56 = vpop.permute.xlu0 %3968 }
 0x70a   :  { %5360 = vmatprep.subr.bf16.mxu0 %v3969_v56  ;;  %5387 = vmatprep.subr.bf16.mxu1 %v3969_v56 }
 0x70b   :  { %5361 = vmatpush3.bf16.msra.mxu0 %v3969_v56  ;;  %5395 = vmatpush3.bf16.msra.mxu1 %v3969_v56 }
 0x70c   :  { %1325 = vperm.xlu0 %5501, %v9754_v57  }
 0x70d   :  { %v3971_v50 = vpop.permute.xlu0 %3970 }
 0x70e   :  { %5362 = vmatprep.subr.bf16.mxu0 %v3971_v50  ;;  %5388 = vmatprep.subr.bf16.mxu1 %v3971_v50 }
 0x70f   :  { %5363 = vmatpush3.bf16.msra.mxu0 %v3971_v50  ;;  %5396 = vmatpush3.bf16.msra.mxu1 %v3971_v50 }
 0x710   :  { %1335 = vperm.xlu0 %5501, %v9755_v58   ;;  %v5846_v58 = vld [vmem:[#allocation5 + $0x8] sm:$0xff] }
 0x711   :  { %v3973_v12 = vpop.permute.xlu0 %3972 }
 0x712   :  { %5364 = vmatprep.subr.bf16.mxu0 %v3973_v12  ;;  %5389 = vmatprep.subr.bf16.mxu1 %v3973_v12 }
 0x713   :  { %5365 = vmatpush3.bf16.msra.mxu0 %v3973_v12  ;;  %5397 = vmatpush3.bf16.msra.mxu1 %v3973_v12 }
 0x714   :  { %1345 = vperm.xlu0 %5501, %v9756_v47  }
 0x716   :  { %5367 = vmatmul.mubr.bf16.vlgmr.msra.gmra.mrb[48].mxu0 %v3951_v22  ;;  %5375 = vmatmul.mubr.bf16.vlgmr.msra.gmra.mrb[48].mxu1 %v3955_v61  ;;  %v3767_v22 = vmul.f32 %v8446_v13, %v3751_v46  ;;  %v9757_v61 = vld [vmem:[#allocation36_spill] sm:$0xff] }
 0x717   :  { %5370 = vmatprep.mubr.bf16.mxu0 %v3952_v1  ;;  %5378 = vmatprep.mubr.bf16.mxu1 %v3956_v52  ;;  %v3753_v1 = vld [vmem:[#allocation4 + $0x60] sm:$0xff] }
 0x718   :  { %v3769_v48 = vmul.f32 %v8453_v33, %v3753_v1 }
 0x71e   :  { %5371 = vmatmul.mubr.bf16.gmra.mrb[52].mxu0 %v3953_v15  ;;  %5379 = vmatmul.mubr.bf16.gmra.mrb[52].mxu1 %v3957_v55 }
 0x73e   :  { %v3776_v31 = vpop.xlane.xlu0 %3775 }
 0x73f   :  { %v3806_v63 = vadd.f32 %v3776_v31, %v3758_v25  ;;  %v9758_v25 = vld [vmem:[#allocation50_spill] sm:$0xff] }
 0x741   :  { %3823 = vst.msk [vmem:[#allocation4 + $0x8] sm:$0xff] %vm3821_vm8, %v3806_v63 }
 0x742   :  { %v3794_v17 = vpop.xlane.xlu0 %3793 }
 0x743   :  { %v3815_v44 = vadd.f32 %v3794_v17, %v3767_v22  ;;  %v9759_v22 = vld [vmem:[#allocation26_spill] sm:$0xff] }
 0x745   :  { %3832 = vst.msk [vmem:[#allocation4 + $0x50] sm:$0xff] %vm3821_vm8, %v3815_v44 }
 0x746   :  { %v3798_v16 = vpop.xlane.xlu0 %3797 }
 0x747   :  { %v3817_v15 = vadd.f32 %v3798_v16, %v3769_v48  ;;  %v9760_v16 = vld [vmem:[#allocation125_spill] sm:$0xff] }
 0x749   :  { %3834 = vst.msk [vmem:[#allocation4 + $0x60] sm:$0xff] %vm3821_vm8, %v3817_v15 }
 0x74a   :  { %v3802_v35 = vpop.xlane.xlu0 %3801 }
 0x74b   :  { %v3819_v55 = vadd.f32 %v3802_v35, %v3771_v21 }
 0x74d   :  { %3836 = vst.msk [vmem:[#allocation4 + $0x70] sm:$0xff] %vm3821_vm8, %v3819_v55 }
 0x752   :  { %v8504_v53 = vpop.permute.xlu0 %3856 }
 0x756   :  { %v8506_v13 = vpop.permute.xlu0 %3871 }
 0x758   :  { %v3804_v40 = vpop.xlane.xlu1 %3803 }
 0x759   :  { %v3820_v33 = vadd.f32 %v3804_v40, %v3772_v23  ;;  %v9762_v40 = vld [vmem:[#allocation69_spill] sm:$0xff] }
 0x75a   :  { %v8509_v14 = vpop.permute.xlu0 %3881 }
 0x75b   :  { %3837 = vst.msk [vmem:[#allocation4 + $0x78] sm:$0xff] %vm3821_vm8, %v3820_v33 }
 0x75e   :  { %v8512_v0 = vpop.permute.xlu0 %3891 }
 0x762   :  { %v8514_v8 = vpop.permute.xlu0 %3901 }
 0x766   :  { %v8516_v26 = vpop.permute.xlu0 %3911 }
 0x76a   :  { %v8518_v10 = vpop.permute.xlu0 %3921 }
 0x76e   :  { %v8520_v56 = vpop.permute.xlu0 %3931 }
 0x772   :  { %v8522_v57 = vpop.permute.xlu0 %2351 }
 0x776   :  { %v8524_v50 = vpop.permute.xlu0 %2347 }
 0x77b   :  { %v1281_v39 = vpop.permute.xlu0 %1280 }
 0x77c   :  { %v1354_v12 = vmul.f32 %v5846_v58, %v1281_v39  ;;  %v9763_v39 = vld [vmem:[#allocation51_spill] sm:$0xff] }
 0x77e   :  { %v1475_v47 = vadd.f32 %v9757_v61, %v1354_v12 }
 0x77f   :  { %v1296_v52 = vpop.permute.xlu0 %1295 }
 0x780   :  { %1492 = vst.msk [vmem:[#allocation5 + $0x8] sm:$0xff] %vm25_vm0, %v1475_v47  ;;  %v1357_v3 = vmul.f32 %v5846_v58, %v1296_v52 }
 0x782   :  { %v1478_v31 = vadd.f32 %v9758_v25, %v1357_v3 }
 0x783   :  { %v1306_v63 = vpop.permute.xlu0 %1305 }
 0x784   :  { %1495 = vst.msk [vmem:[#allocation5 + $0x20] sm:$0xff] %vm25_vm0, %v1478_v31  ;;  %v1359_v46 = vmul.f32 %v5846_v58, %v1306_v63  ;;  %v9765_v31 = vld [vmem:[#allocation91_spill] sm:$0xff] }
 0x786   :  { %v1480_v17 = vadd.f32 %v9759_v22, %v1359_v46 }
 0x787   :  { %v1316_v44 = vpop.permute.xlu0 %1315  ;;  %v2057_v1 = vld [vmem:[#allocation5 + $0x8] sm:$0xff] }
 0x788   :  { %1497 = vst.msk [vmem:[#allocation5 + $0x30] sm:$0xff] %vm25_vm0, %v1480_v17  ;;  %v1361_v48 = vmul.f32 %v5846_v58, %v1316_v44  ;;  %v2153_v15 = vmul.f32 %v9760_v16, %v2057_v1 }
 0x78a   :  { %v1482_v21 = vadd.f32 %v9761_v49, %v1361_v48  ;;  %v2370_v35 = vadd.f32 %v8382_v5, %v2153_v15  ;;  %v9764_v5 = vld [vmem:[#allocation115_spill] sm:$0xff]  ;;  %v9767_v48 = vld [vmem:[#allocation92_spill] sm:$0xff] }
 0x78b   :  { %v1326_v55 = vpop.permute.xlu0 %1325  ;;  %v2060_v27 = vld [vmem:[#allocation5 + $0x20] sm:$0xff] }
 0x78c   :  { %1499 = vst.msk [vmem:[#allocation5 + $0x40] sm:$0xff] %vm25_vm0, %v1482_v21  ;;  %v1363_v23 = vmul.f32 %v5846_v58, %v1326_v55  ;;  %v2156_v33 = vmul.f32 %v9762_v40, %v2060_v27  ;;  %v9768_v21 = vld [vmem:[#allocation76_spill] sm:$0xff] }
 0x78d   :  { %2387 = vst.msk [vmem:[#allocation5 + $0x8] sm:$0xff] %vm2385_vm6, %v2370_v35 }
 0x78e   :  { %v1484_v12 = vadd.f32 %v9763_v39, %v1363_v23  ;;  %v2373_v61 = vadd.f32 %v8315_v7, %v2156_v33  ;;  %v9766_v7 = vld [vmem:[#allocation52_spill] sm:$0xff] }
 0x78f   :  { %v1336_v47 = vpop.permute.xlu0 %1335  ;;  %v2062_v52 = vld [vmem:[#allocation5 + $0x30] sm:$0xff] }
 0x790   :  { %1501 = vst.msk [vmem:[#allocation5 + $0x50] sm:$0xff] %vm25_vm0, %v1484_v12  ;;  %v1365_v3 = vmul.f32 %v5846_v58, %v1336_v47  ;;  %v2158_v25 = vmul.f32 %v9764_v5, %v2062_v52 }
 0x791   :  { %2390 = vst.msk [vmem:[#allocation5 + $0x20] sm:$0xff] %vm2385_vm6, %v2373_v61 }
 0x792   :  { %v1486_v63 = vadd.f32 %v9765_v31, %v1365_v3  ;;  %v2375_v46 = vadd.f32 %v8311_v20, %v2158_v25 }
 0x793   :  { %v1346_v22 = vpop.permute.xlu0 %1345  ;;  %v2064_v17 = vld [vmem:[#allocation5 + $0x40] sm:$0xff] }
 0x794   :  { %1503 = vst.msk [vmem:[#allocation5 + $0x60] sm:$0xff] %vm25_vm0, %v1486_v63  ;;  %v1367_v44 = vmul.f32 %v5846_v58, %v1346_v22  ;;  %v2160_v1 = vmul.f32 %v9766_v7, %v2064_v17  ;;  %v9769_v58 = vld [vmem:[#allocation130_spill] sm:$0xff] }
 0x795   :  { %2392 = vst.msk [vmem:[#allocation5 + $0x30] sm:$0xff] %vm2385_vm6, %v2375_v46  ;;  %v4211_v7 = vld [vmem:[#allocation4] sm:$0xff] }
 0x796   :  { %v1488_v16 = vadd.f32 %v9767_v48, %v1367_v44  ;;  %v2377_v15 = vadd.f32 %v8338_v41, %v2160_v1  ;;  %v9770_v41 = vld [vmem:[#allocation61_spill] sm:$0xff]  ;;  %v4212_v1 = vld [vmem:[#allocation4 + $0x8] sm:$0xff]  ;;  %5813 = vrcp.f32 %v4211_v7  ;;  %v4213_v48 = vld [vmem:[#allocation4 + $0x10] sm:$0xff] }
 0x797   :  { %v2066_v49 = vld [vmem:[#allocation5 + $0x50] sm:$0xff]  ;;  %5815 = vrcp.f32 %v4212_v1  ;;  %v9772_v7 = vld [vmem:[#allocation83_spill] sm:$0xff] }
 0x798   :  { %1505 = vst.msk [vmem:[#allocation5 + $0x70] sm:$0xff] %vm25_vm0, %v1488_v16  ;;  %v2162_v20 = vmul.f32 %v9768_v21, %v2066_v49  ;;  %v4215_v16 = vld [vmem:[#allocation4 + $0x20] sm:$0xff]  ;;  %5817 = vrcp.f32 %v4213_v48  ;;  %v4217_v49 = vld [vmem:[#allocation4 + $0x30] sm:$0xff]  ;;  %v4216_v21 = vld [vmem:[#allocation4 + $0x28] sm:$0xff]  ;;  %v8628_v48 = vpop.permute.xlu1 %3861 }
 0x799   :  { %2394 = vst.msk [vmem:[#allocation5 + $0x40] sm:$0xff] %vm2385_vm6, %v2377_v15  ;;  %v4214_v15 = vld [vmem:[#allocation4 + $0x18] sm:$0xff]  ;;  %5819 = vrcp.f32 %v4215_v16  ;;  %v9773_v1 = vld [vmem:[#allocation88_spill] sm:$0xff]  ;;  %v9774_v16 = vld [vmem:[#allocation59_spill] sm:$0xff] }
 0x79a   :  { %v2379_v35 = vadd.f32 %v8326_v51, %v2162_v20  ;;  %5821 = vrcp.f32 %v4214_v15 }
 0x79b   :  { %v2068_v55 = vld [vmem:[#allocation5 + $0x60] sm:$0xff]  ;;  %5823 = vrcp.f32 %v4217_v49  ;;  %v9775_v49 = vld [vmem:[#allocation49_spill] sm:$0xff] }
 0x79c   :  { %2396 = vst.msk [vmem:[#allocation5 + $0x50] sm:$0xff] %vm2385_vm6, %v2379_v35  ;;  %v2164_v27 = vmul.f32 %v9769_v58, %v2068_v55  ;;  %v4219_v35 = vld [vmem:[#allocation4 + $0x40] sm:$0xff]  ;;  %5825 = vrcp.f32 %v4216_v21  ;;  %v4218_v58 = vld [vmem:[#allocation4 + $0x38] sm:$0xff]  ;;  %v3867_v15 = vpop.permute.xlu1 %3866 }
 0x79d   :  { %5827 = vrcp.f32 %v4219_v35  ;;  %v9776_v21 = vld [vmem:[#allocation74_spill] sm:$0xff] }
 0x79e   :  { %v2381_v23 = vadd.f32 %v8352_v18, %v2164_v27  ;;  %5829 = vrcp.f32 %v4218_v58  ;;  %v9778_v58 = vld [vmem:[#allocation81_spill] sm:$0xff] }
 0x79f   :  { %v2070_v40 = vld [vmem:[#allocation5 + $0x70] sm:$0xff] }
 0x7a0   :  { %2398 = vst.msk [vmem:[#allocation5 + $0x60] sm:$0xff] %vm2385_vm6, %v2381_v23  ;;  %v2166_v33 = vmul.f32 %v9770_v41, %v2070_v40  ;;  %v8577_v20 = vpop.eup %5813  ;;  %v4221_v23 = vld [vmem:[#allocation4 + $0x50] sm:$0xff]  ;;  %v4220_v41 = vld [vmem:[#allocation4 + $0x48] sm:$0xff]  ;;  %v8637_v35 = vpop.permute.xlu1 %3876 }
 0x7a1   :  { %v8580_v55 = vpop.eup %5815  ;;  %5831 = vrcp.f32 %v4221_v23  ;;  %9777 = vst [vmem:[#allocation134_spill] sm:$0xff] %v8637_v35 }
 0x7a2   :  { %v2383_v39 = vadd.f32 %v8347_v59, %v2166_v33  ;;  %v8583_v27 = vpop.eup %5817  ;;  %5833 = vrcp.f32 %v4220_v41  ;;  %v9780_v41 = vld [vmem:[#allocation119_spill] sm:$0xff] }
 0x7a3   :  { %v8586_v40 = vpop.eup %5819 }
 0x7a4   :  { %2400 = vst.msk [vmem:[#allocation5 + $0x70] sm:$0xff] %vm2385_vm6, %v2383_v39  ;;  %v8589_v33 = vpop.eup %5821  ;;  %v4223_v39 = vld [vmem:[#allocation4 + $0x60] sm:$0xff]  ;;  %v8642_v23 = vpop.permute.xlu1 %3886 }
 0x7a5   :  { %5835 = vrcp.f32 %v4223_v39  ;;  %9779 = vst [vmem:[#allocation47_spill] sm:$0xff] %v8642_v23  ;;  %v9781_v39 = vld [vmem:[#allocation78_spill] sm:$0xff] }
 0x7e9   :  { %v5368_v12 = vpop.f32.mrb[48].mxu0  ;;  %v5376_v61 = vpop.f32.mrb[48].mxu1 }
 0x7ea   :  { %v4016_v47 = vpop.f32.mrb[49].mxu0  ;;  %v4048_v51 = vpop.f32.mrb[49].mxu1 }
 0x7eb   :  { %v5369_v52 = vpop.f32.mrb[50].mxu0  ;;  %4095 = vrot.lane.b32.xlu1 %v4016_v47, %s5858_s10  ;;  %v5377_v3 = vpop.f32.mrb[50].mxu1 }
 0x7ec   :  { %v4019_v5 = vpop.f32.mrb[51].mxu0  ;;  %v4051_v18 = vpop.f32.mrb[51].mxu1 }
 0x7ed   :  { %4097 = vrot.lane.b32.xlu0 %v4019_v5, %s5858_s10 }
 0x7ef   :  { %4099 = vrot.lane.b32.xlu1 %v5368_v12, %s5858_s10  ;;  %v8592_v12 = vpop.eup %5823 }
 0x7f0   :  { %v8595_v47 = vpop.eup %5825 }
 0x7f1   :  { %v5372_v25 = vpop.f32.mrb[52].mxu0  ;;  %4101 = vrot.lane.b32.xlu0 %v5369_v52, %s5858_s10  ;;  %v5380_v59 = vpop.f32.mrb[52].mxu1 }
 0x7f2   :  { %v4032_v31 = vpop.f32.mrb[53].mxu0  ;;  %v4064_v63 = vpop.f32.mrb[53].mxu1 }
 0x7f3   :  { %v5373_v46 = vpop.f32.mrb[54].mxu0  ;;  %4103 = vrot.lane.b32.xlu1 %v4032_v31, %s5858_s10  ;;  %v5381_v22 = vpop.f32.mrb[54].mxu1 }
 0x7f4   :  { %v4035_v17 = vpop.f32.mrb[55].mxu0  ;;  %v4067_v44 = vpop.f32.mrb[55].mxu1 }
 0x7f5   :  { %4105 = vrot.lane.b32.xlu0 %v4035_v17, %s5858_s10  ;;  %v8598_v52 = vpop.eup %5827  ;;  %v9771_v17 = vmov 1  }
 0x7f6   :  { %v8601_v5 = vpop.eup %5829 }
 0x7f7   :  { %4107 = vrot.lane.b32.xlu1 %v5372_v25, %s5858_s10  ;;  %v4226_v25 = vld [vmem:[#allocation4 + $0x78] sm:$0xff] }
 0x7f9   :  { %4109 = vrot.lane.b32.xlu0 %v5373_v46, %s5858_s10 }
 0x7fb   :  { %4111 = vrot.lane.b32.xlu1 %v4048_v51, %s5858_s10  ;;  %v4225_v51 = vld [vmem:[#allocation4 + $0x70] sm:$0xff] }
 0x7fd   :  { %4113 = vrot.lane.b32.xlu0 %v4051_v18, %s5858_s10  ;;  %v8604_v18 = vpop.eup %5831 }
 0x7ff   :  { %4115 = vrot.lane.b32.xlu1 %v5376_v61, %s5858_s10  ;;  %v4222_v61 = vld [vmem:[#allocation4 + $0x58] sm:$0xff] }
 0x800   :  { %5837 = vrcp.f32 %v4222_v61  ;;  %v8647_v61 = vpop.permute.xlu1 %3896 }
 0x801   :  { %4117 = vrot.lane.b32.xlu0 %v5377_v3, %s5858_s10  ;;  %v4224_v3 = vld [vmem:[#allocation4 + $0x68] sm:$0xff]  ;;  %5839 = vrcp.f32 %v4225_v51  ;;  %9782 = vst [vmem:[#allocation137_spill] sm:$0xff] %v8647_v61 }
 0x802   :  { %5841 = vrcp.f32 %v4224_v3  ;;  %v9784_v3 = vmov 2  }
 0x803   :  { %4119 = vrot.lane.b32.xlu1 %v4064_v63, %s5858_s10  ;;  %5843 = vrcp.f32 %v4226_v25 }
 0x804   :  { %v8652_v51 = vpop.permute.xlu1 %3906 }
 0x805   :  { %4121 = vrot.lane.b32.xlu0 %v4067_v44, %s5858_s10  ;;  %9783 = vst [vmem:[#allocation138_spill] sm:$0xff] %v8652_v51  ;;  %v9793_v51 = vmov 3  }
 0x807   :  { %4123 = vrot.lane.b32.xlu1 %v5380_v59, %s5858_s10  ;;  %v8607_v59 = vpop.eup %5833 }
 0x808   :  { %v8610_v31 = vpop.eup %5835  ;;  %v8658_v25 = vpop.permute.xlu1 %3916 }
 0x809   :  { %4125 = vrot.lane.b32.xlu0 %v5381_v22, %s5858_s10  ;;  %9785 = vst [vmem:[#allocation14_spill] sm:$0xff] %v8658_v25 }
 0x80a   :  { %v8613_v63 = vpop.eup %5837 }
 0x80b   :  { %4245 = vperm.xlu1 %5502, %v8577_v20   ;;  %v8616_v46 = vpop.eup %5839 }
 0x80c   :  { %v8619_v22 = vpop.eup %5841 }
 0x80d   :  { %4250 = vperm.xlu0 %5501, %v8580_v55   ;;  %v8623_v44 = vpop.eup %5843 }
 0x80f   :  { %4255 = vperm.xlu1 %5502, %v8583_v27  }
 0x811   :  { %4265 = vperm.xlu0 %5501, %v8586_v40  }
 0x813   :  { %4260 = vperm.xlu1 %5502, %v8589_v33  }
 0x815   :  { %4275 = vperm.xlu0 %5501, %v8592_v12  }
 0x817   :  { %4270 = vperm.xlu1 %5502, %v8595_v47  }
 0x819   :  { %4285 = vperm.xlu0 %5501, %v8598_v52  }
 0x81b   :  { %4280 = vperm.xlu1 %5502, %v8601_v5  }
 0x81d   :  { %4295 = vperm.xlu0 %5501, %v8604_v18  }
 0x81f   :  { %4290 = vperm.xlu1 %5502, %v8607_v59  }
 0x821   :  { %4305 = vperm.xlu0 %5501, %v8610_v31  }
 0x823   :  { %4300 = vperm.xlu1 %5502, %v8613_v63  }
 0x825   :  { %4315 = vperm.xlu0 %5501, %v8616_v46  }
 0x827   :  { %4310 = vperm.xlu1 %5502, %v8619_v22  }
 0x829   :  { %5503 = vset.pattern.permute.xlu0 %v9771_v17 }
 0x82a   :  { %2074 = vperm.xlu0 %5503, %v9772_v7  }
 0x82b   :  { %4320 = vperm.xlu1 %5502, %v8623_v44  }
 0x82e   :  { %2089 = vperm.xlu0 %5503, %v9773_v1   ;;  %v3840_v1 = vld [vmem:[#allocation5 + $0x10] sm:$0xff] }
 0x82f   :  { %5504 = vset.pattern.permute.xlu1 %v9771_v17  ;;  %v8662_v17 = vpop.permute.xlu1 %3926 }
 0x830   :  { %4410 = vperm.xlu1 %5504, %v8580_v55   ;;  %9786 = vst [vmem:[#allocation22_spill] sm:$0xff] %v8662_v17  ;;  %v9791_v17 = vld [vmem:[#allocation44_spill] sm:$0xff] }
 0x832   :  { %2099 = vperm.xlu0 %5503, %v9774_v16  }
 0x834   :  { %4415 = vperm.xlu1 %5504, %v8583_v27  }
 0x836   :  { %2109 = vperm.xlu0 %5503, %v9775_v49   ;;  %v3936_v49 = vmul.f32 %v3867_v15, %v3840_v1  ;;  %v9788_v1 = vld [vmem:[#allocation79_spill] sm:$0xff] }
 0x838   :  { %4425 = vperm.xlu1 %5504, %v8586_v40  }
 0x83a   :  { %2119 = vperm.xlu0 %5503, %v9776_v21  }
 0x83c   :  { %4435 = vperm.xlu1 %5504, %v8592_v12  }
 0x83e   :  { %2129 = vperm.xlu0 %5503, %v9778_v58  }
 0x840   :  { %4445 = vperm.xlu1 %5504, %v8598_v52  }
 0x842   :  { %2139 = vperm.xlu0 %5503, %v9780_v41  }
 0x844   :  { %4455 = vperm.xlu1 %5504, %v8604_v18  }
 0x846   :  { %2149 = vperm.xlu0 %5503, %v9781_v39  }
 0x848   :  { %4465 = vperm.xlu1 %5504, %v8610_v31  }
 0x84a   :  { %4405 = vperm.xlu0 %5503, %v8577_v20  }
 0x84c   :  { %4475 = vperm.xlu1 %5504, %v8616_v46  }
 0x84e   :  { %4420 = vperm.xlu0 %5503, %v8589_v33  }
 0x850   :  { %5506 = vset.pattern.permute.xlu1 %v9784_v3 }
 0x851   :  { %4565 = vperm.xlu1 %5506, %v8577_v20  }
 0x852   :  { %4430 = vperm.xlu0 %5503, %v8595_v47  }
 0x855   :  { %4575 = vperm.xlu1 %5506, %v8583_v27  }
 0x856   :  { %4440 = vperm.xlu0 %5503, %v8601_v5  }
 0x859   :  { %4580 = vperm.xlu1 %5506, %v8589_v33  }
 0x85a   :  { %4450 = vperm.xlu0 %5503, %v8607_v59  }
 0x85d   :  { %4590 = vperm.xlu1 %5506, %v8595_v47   ;;  %v8667_v7 = vpop.permute.xlu1 %4095 }
 0x85e   :  { %4460 = vperm.xlu0 %5503, %v8613_v63  }
 0x85f   :  { %v8670_v16 = vpop.permute.xlu0 %4097 }
 0x861   :  { %4600 = vperm.xlu1 %5506, %v8601_v5   ;;  %v4100_v21 = vpop.permute.xlu1 %4099 }
 0x862   :  { %v4145_v58 = vadd.f32 %v4100_v21, %v3936_v49  ;;  %4470 = vperm.xlu0 %5503, %v8619_v22   ;;  %v9790_v21 = vld [vmem:[#allocation73_spill] sm:$0xff] }
 0x863   :  { %v8675_v41 = vpop.permute.xlu0 %4101 }
 0x864   :  { %4162 = vst.msk [vmem:[#allocation5 + $0x10] sm:$0xff] %vm4159_vm11, %v4145_v58 }
 0x865   :  { %4610 = vperm.xlu1 %5506, %v8607_v59   ;;  %v8679_v39 = vpop.permute.xlu1 %4103 }
 0x866   :  { %4480 = vperm.xlu0 %5503, %v8623_v44   ;;  %9787 = vst [vmem:[#allocation122_spill] sm:$0xff] %v8679_v39 }
 0x867   :  { %v8682_v15 = vpop.permute.xlu0 %4105 }
 0x869   :  { %4620 = vperm.xlu1 %5506, %v8613_v63   ;;  %v8687_v49 = vpop.permute.xlu1 %4107 }
 0x86a   :  { %5505 = vset.pattern.permute.xlu0 %v9784_v3  ;;  %9789 = vst [vmem:[#allocation123_spill] sm:$0xff] %v8687_v49  ;;  %v9794_v3 = vld [vmem:[#allocation68_spill] sm:$0xff] }
 0x86b   :  { %2974 = vperm.xlu0 %5505, %v9788_v1   ;;  %v8690_v58 = vpop.permute.xlu0 %4109  ;;  %v9799_v49 = vld [vmem:[#allocation124_spill] sm:$0xff] }
 0x86d   :  { %4630 = vperm.xlu1 %5506, %v8619_v22   ;;  %v8694_v25 = vpop.permute.xlu1 %4111 }
 0x86e   :  { %9792 = vst [vmem:[#allocation16_spill] sm:$0xff] %v8694_v25 }
 0x86f   :  { %2989 = vperm.xlu0 %5505, %v9790_v21   ;;  %v8697_v2 = vpop.permute.xlu0 %4113  ;;  %v9796_v21 = vld [vmem:[#allocation116_spill] sm:$0xff] }
 0x871   :  { %4640 = vperm.xlu1 %5506, %v8623_v44   ;;  %v8701_v1 = vpop.permute.xlu1 %4115 }
 0x872   :  { %9795 = vst [vmem:[#allocation105_spill] sm:$0xff] %v8701_v1 }
 0x873   :  { %2999 = vperm.xlu0 %5505, %v9791_v17   ;;  %v8705_v61 = vpop.permute.xlu0 %4117  ;;  %v9797_v17 = vld [vmem:[#allocation71_spill] sm:$0xff] }
 0x875   :  { %5508 = vset.pattern.permute.xlu1 %v9793_v51  ;;  %v8709_v25 = vpop.permute.xlu1 %4119 }
 0x876   :  { %4730 = vperm.xlu1 %5508, %v8580_v55   ;;  %9798 = vst [vmem:[#allocation106_spill] sm:$0xff] %v8709_v25  ;;  %v4197_v25 = vld [vmem:[#allocation5 + $0x10] sm:$0xff] }
 0x877   :  { %3009 = vperm.xlu0 %5505, %v9794_v3   ;;  %v8711_v45 = vpop.permute.xlu0 %4121 }
 0x879   :  { %v8715_v3 = vpop.permute.xlu1 %4123 }
 0x87a   :  { %4735 = vperm.xlu1 %5508, %v8583_v27   ;;  %9800 = vst [vmem:[#allocation60_spill] sm:$0xff] %v8715_v3 }
 0x87b   :  { %3019 = vperm.xlu0 %5505, %v9796_v21   ;;  %v8719_v27 = vpop.permute.xlu0 %4125 }
 0x87e   :  { %4745 = vperm.xlu1 %5508, %v8586_v40  }
 0x87f   :  { %3029 = vperm.xlu0 %5505, %v9797_v17  }
 0x882   :  { %4755 = vperm.xlu1 %5508, %v8592_v12  }
 0x883   :  { %3039 = vperm.xlu0 %5505, %v9799_v49  }
 0x886   :  { %4765 = vperm.xlu1 %5508, %v8598_v52  }
 0x887   :  { %4570 = vperm.xlu0 %5505, %v8580_v55  }
 0x88a   :  { %4775 = vperm.xlu1 %5508, %v8604_v18   ;;  %v8722_v21 = vpop.permute.xlu1 %4245 }
 0x88b   :  { %4585 = vperm.xlu0 %5505, %v8586_v40  }
 0x88c   :  { %v8725_v17 = vpop.permute.xlu0 %4250 }
 0x88d   :  { %9801 = vst [vmem:[#allocation135_spill] sm:$0xff] %v8725_v17 }
 0x88e   :  { %4785 = vperm.xlu1 %5508, %v8610_v31   ;;  %v4256_v49 = vpop.permute.xlu1 %4255 }
 0x88f   :  { %v4325_v1 = vmul.f32 %v4256_v49, %v4197_v25  ;;  %4595 = vperm.xlu0 %5505, %v8592_v12  }
 0x890   :  { %v8729_v3 = vpop.permute.xlu0 %4265 }
 0x891   :  { %9802 = vst [vmem:[#allocation136_spill] sm:$0xff] %v8729_v3  ;;  %4341 = vst.msk [vmem:[#allocation5 + $0x10] sm:$0xff] %vm25_vm0, %v4325_v1 }
 0x892   :  { %4795 = vperm.xlu1 %5508, %v8616_v46   ;;  %v8733_v55 = vpop.permute.xlu1 %4260 }
 0x893   :  { %4605 = vperm.xlu0 %5505, %v8598_v52  }
 0x894   :  { %v8736_v40 = vpop.permute.xlu0 %4275 }
 0x895   :  { %9803 = vst [vmem:[#allocation15_spill] sm:$0xff] %v8736_v40 }
 0x896   :  { %v8738_v17 = vpop.permute.xlu1 %4270 }
 0x897   :  { %4615 = vperm.xlu0 %5505, %v8604_v18  }
 0x898   :  { %v8741_v23 = vpop.permute.xlu0 %4285 }
 0x899   :  { %9804 = vst [vmem:[#allocation109_spill] sm:$0xff] %v8741_v23 }
 0x89a   :  { %v8743_v25 = vpop.permute.xlu1 %4280 }
 0x89b   :  { %4625 = vperm.xlu0 %5505, %v8610_v31   ;;  %v2056_v31 = vld [vmem:[#allocation5] sm:$0xff] }
 0x89c   :  { %v8746_v12 = vpop.permute.xlu0 %4295 }
 0x89d   :  { %9805 = vst [vmem:[#allocation110_spill] sm:$0xff] %v8746_v12 }
 0x89e   :  { %v8748_v1 = vpop.permute.xlu1 %4290 }
 0x89f   :  { %4635 = vperm.xlu0 %5505, %v8616_v46  }
 0x8a0   :  { %v8751_v49 = vpop.permute.xlu0 %4305 }
 0x8a1   :  { %9806 = vst [vmem:[#allocation140_spill] sm:$0xff] %v8751_v49  ;;  %v2059_v49 = vld [vmem:[#allocation5 + $0x18] sm:$0xff] }
 0x8a2   :  { %v8753_v52 = vpop.permute.xlu1 %4300 }
 0x8a3   :  { %5507 = vset.pattern.permute.xlu0 %v9793_v51 }
 0x8a4   :  { %v8756_v40 = vpop.permute.xlu0 %4315  ;;  %4725 = vperm.xlu0 %5507, %v8577_v20  }
 0x8a5   :  { %9807 = vst [vmem:[#allocation141_spill] sm:$0xff] %v8756_v40 }
 0x8a6   :  { %v8759_v18 = vpop.permute.xlu1 %4310 }
 0x8a8   :  { %4740 = vperm.xlu0 %5507, %v8589_v33   ;;  %v2061_v33 = vld [vmem:[#allocation5 + $0x28] sm:$0xff] }
 0x8a9   :  { %v2075_v12 = vpop.permute.xlu0 %2074 }
 0x8aa   :  { %v2152_v23 = vmul.f32 %v2075_v12, %v2056_v31  ;;  %v8762_v3 = vpop.permute.xlu1 %4320  ;;  %v4357_v31 = vld [vmem:[#allocation5 + $0x10] sm:$0xff] }
 0x8ac   :  { %v2369_v46 = vadd.f32 %v8302_v43, %v2152_v23  ;;  %4750 = vperm.xlu0 %5507, %v8595_v47  }
 0x8ad   :  { %v2090_v62 = vpop.permute.xlu0 %2089 }
 0x8ae   :  { %2386 = vst.msk [vmem:[#allocation5] sm:$0xff] %vm2385_vm6, %v2369_v46  ;;  %v2155_v51 = vmul.f32 %v2090_v62, %v2059_v49  ;;  %v2063_v62 = vld [vmem:[#allocation5 + $0x38] sm:$0xff] }
 0x8af   :  { %v8767_v40 = vpop.permute.xlu1 %4410 }
 0x8b0   :  { %9808 = vst [vmem:[#allocation18_spill] sm:$0xff] %v8767_v40  ;;  %v2372_v20 = vadd.f32 %v8377_v24, %v2155_v51  ;;  %4760 = vperm.xlu0 %5507, %v8601_v5   ;;  %v9809_v40 = vld [vmem:[#allocation33_spill] sm:$0xff] }
 0x8b1   :  { %v2100_v39 = vpop.permute.xlu0 %2099 }
 0x8b2   :  { %2389 = vst.msk [vmem:[#allocation5 + $0x18] sm:$0xff] %vm2385_vm6, %v2372_v20  ;;  %v2157_v12 = vmul.f32 %v2100_v39, %v2061_v33  ;;  %v9810_v33 = vld [vmem:[#allocation121_spill] sm:$0xff] }
 0x8b3   :  { %v4416_v43 = vpop.permute.xlu1 %4415 }
 0x8b4   :  { %v2374_v47 = vadd.f32 %v8420_v11, %v2157_v12  ;;  %v4485_v23 = vmul.f32 %v4416_v43, %v4357_v31  ;;  %4770 = vperm.xlu0 %5507, %v8607_v59   ;;  %v2065_v59 = vld [vmem:[#allocation5 + $0x48] sm:$0xff] }
 0x8b5   :  { %v2951_v46 = vld [vmem:[#allocation5] sm:$0xff]  ;;  %v2110_v49 = vpop.permute.xlu0 %2109 }
 0x8b6   :  { %v3047_v35 = vmul.f32 %v9809_v40, %v2951_v46  ;;  %2391 = vst.msk [vmem:[#allocation5 + $0x28] sm:$0xff] %vm2385_vm6, %v2374_v47  ;;  %4501 = vst.msk [vmem:[#allocation5 + $0x10] sm:$0xff] %vm2385_vm6, %v4485_v23  ;;  %v2159_v24 = vmul.f32 %v2110_v49, %v2063_v62  ;;  %v9811_v47 = vld [vmem:[#allocation23_spill] sm:$0xff] }
 0x8b7   :  { %v8777_v5 = vpop.permute.xlu1 %4425 }
 0x8b8   :  { %v3256_v39 = vadd.f32 %v8350_v28, %v3047_v35  ;;  %v2376_v51 = vadd.f32 %v8409_v38, %v2159_v24  ;;  %4780 = vperm.xlu0 %5507, %v8613_v63   ;;  %v2067_v63 = vld [vmem:[#allocation5 + $0x58] sm:$0xff] }
 0x8b9   :  { %v2954_v11 = vld [vmem:[#allocation5 + $0x18] sm:$0xff]  ;;  %v2120_v20 = vpop.permute.xlu0 %2119 }
 0x8ba   :  { %3273 = vst.msk [vmem:[#allocation5] sm:$0xff] %vm3272_vm10, %v3256_v39  ;;  %v3050_v40 = vmul.f32 %v9810_v33, %v2954_v11  ;;  %v2161_v12 = vmul.f32 %v2120_v20, %v2065_v59 }
 0x8bb   :  { %2393 = vst.msk [vmem:[#allocation5 + $0x38] sm:$0xff] %vm2385_vm6, %v2376_v51  ;;  %v8785_v31 = vpop.permute.xlu1 %4435  ;;  %v9812_v51 = vld [vmem:[#allocation46_spill] sm:$0xff] }
 0x8bc   :  { %v3259_v43 = vadd.f32 %v8261_v30, %v3050_v40  ;;  %v2378_v28 = vadd.f32 %v8451_v42, %v2161_v12  ;;  %4790 = vperm.xlu0 %5507, %v8619_v22   ;;  %v2069_v22 = vld [vmem:[#allocation5 + $0x68] sm:$0xff]  ;;  %v2071_v12 = vld [vmem:[#allocation5 + $0x78] sm:$0xff] }
 0x8bd   :  { %v2956_v38 = vld [vmem:[#allocation5 + $0x28] sm:$0xff]  ;;  %v2130_v35 = vpop.permute.xlu0 %2129 }
 0x8be   :  { %3276 = vst.msk [vmem:[#allocation5 + $0x18] sm:$0xff] %vm3272_vm10, %v3259_v43  ;;  %v3052_v23 = vmul.f32 %v9811_v47, %v2956_v38  ;;  %v2163_v46 = vmul.f32 %v2130_v35, %v2067_v63  ;;  %v9813_v38 = vld [vmem:[#allocation82_spill] sm:$0xff] }
 0x8bf   :  { %2395 = vst.msk [vmem:[#allocation5 + $0x48] sm:$0xff] %vm2385_vm6, %v2378_v28  ;;  %v8793_v62 = vpop.permute.xlu1 %4445 }
 0x8c0   :  { %v3261_v49 = vadd.f32 %v8279_v4, %v3052_v23  ;;  %v2380_v30 = vadd.f32 %v8442_v9, %v2163_v46  ;;  %4800 = vperm.xlu0 %5507, %v8623_v44  }
 0x8c1   :  { %v2140_v24 = vpop.permute.xlu0 %2139  ;;  %v3838_v39 = vld [vmem:[#allocation5] sm:$0xff] }
 0x8c2   :  { %v2958_v42 = vld [vmem:[#allocation5 + $0x38] sm:$0xff]  ;;  %3278 = vst.msk [vmem:[#allocation5 + $0x28] sm:$0xff] %vm3272_vm10, %v3261_v49  ;;  %v2165_v59 = vmul.f32 %v2140_v24, %v2069_v22  ;;  %v3934_v20 = vmul.f32 %v8504_v53, %v3838_v39 }
 0x8c3   :  { %v3054_v11 = vmul.f32 %v9812_v51, %v2958_v42  ;;  %2397 = vst.msk [vmem:[#allocation5 + $0x58] sm:$0xff] %vm2385_vm6, %v2380_v30  ;;  %v8802_v33 = vpop.permute.xlu1 %4455  ;;  %v9814_v30 = vld [vmem:[#allocation28_spill] sm:$0xff] }
 0x8c4   :  { %v2382_v9 = vadd.f32 %v8524_v50, %v2165_v59  ;;  %v4143_v44 = vadd.f32 %v8667_v7, %v3934_v20 }
 0x8c5   :  { %v3263_v4 = vadd.f32 %v8274_v19, %v3054_v11  ;;  %v2150_v43 = vpop.permute.xlu0 %2149  ;;  %v3841_v28 = vld [vmem:[#allocation5 + $0x18] sm:$0xff]  ;;  %v9815_v11 = vld [vmem:[#allocation62_spill] sm:$0xff] }
 0x8c6   :  { %v2960_v40 = vld [vmem:[#allocation5 + $0x48] sm:$0xff]  ;;  %2399 = vst.msk [vmem:[#allocation5 + $0x68] sm:$0xff] %vm2385_vm6, %v2382_v9  ;;  %v2167_v35 = vmul.f32 %v2150_v43, %v2071_v12  ;;  %v3937_v53 = vmul.f32 %v8506_v13, %v3841_v28  ;;  %v9816_v43 = vld [vmem:[#allocation66_spill] sm:$0xff] }
 0x8c7   :  { %3280 = vst.msk [vmem:[#allocation5 + $0x38] sm:$0xff] %vm3272_vm10, %v3263_v4  ;;  %v3056_v63 = vmul.f32 %v9813_v38, %v2960_v40  ;;  %v8812_v19 = vpop.permute.xlu1 %4465  ;;  %v4517_v38 = vld [vmem:[#allocation5 + $0x10] sm:$0xff] }
 0x8c8   :  { %4160 = vst.msk [vmem:[#allocation5] sm:$0xff] %vm4159_vm11, %v4143_v44  ;;  %v2384_v7 = vadd.f32 %v8522_v57, %v2167_v35  ;;  %v4146_v47 = vadd.f32 %v8675_v41, %v3937_v53 }
 0x8c9   :  { %v3265_v50 = vadd.f32 %v8309_v54, %v3056_v63  ;;  %v4406_v46 = vpop.permute.xlu0 %4405  ;;  %v3843_v49 = vld [vmem:[#allocation5 + $0x28] sm:$0xff] }
 0x8ca   :  { %v2962_v23 = vld [vmem:[#allocation5 + $0x58] sm:$0xff]  ;;  %2401 = vst.msk [vmem:[#allocation5 + $0x78] sm:$0xff] %vm2385_vm6, %v2384_v7  ;;  %v3939_v13 = vmul.f32 %v8509_v14, %v3843_v49 }
 0x8cb   :  { %3282 = vst.msk [vmem:[#allocation5 + $0x48] sm:$0xff] %vm3272_vm10, %v3265_v50  ;;  %v3058_v42 = vmul.f32 %v9814_v30, %v2962_v23  ;;  %v8822_v22 = vpop.permute.xlu1 %4475 }
 0x8cc   :  { %4163 = vst.msk [vmem:[#allocation5 + $0x18] sm:$0xff] %vm4159_vm11, %v4146_v47  ;;  %v4148_v57 = vadd.f32 %v8682_v15, %v3939_v13 }
 0x8cd   :  { %v3267_v54 = vadd.f32 %v8305_v60, %v3058_v42  ;;  %v2964_v41 = vld [vmem:[#allocation5 + $0x68] sm:$0xff]  ;;  %v4421_v39 = vpop.permute.xlu0 %4420 }
 0x8ce   :  { %v3845_v51 = vld [vmem:[#allocation5 + $0x38] sm:$0xff]  ;;  %v3060_v59 = vmul.f32 %v9815_v11, %v2964_v41  ;;  %4165 = vst.msk [vmem:[#allocation5 + $0x28] sm:$0xff] %vm4159_vm11, %v4148_v57 }
 0x8cf   :  { %v4195_v24 = vld [vmem:[#allocation5] sm:$0xff]  ;;  %3284 = vst.msk [vmem:[#allocation5 + $0x58] sm:$0xff] %vm3272_vm10, %v3267_v54  ;;  %v3941_v14 = vmul.f32 %v8512_v0, %v3845_v51 }
 0x8d0   :  { %v4323_v20 = vmul.f32 %v8722_v21, %v4195_v24  ;;  %v3269_v4 = vadd.f32 %v8323_v34, %v3060_v59  ;;  %v4566_v60 = vpop.permute.xlu1 %4565 }
 0x8d1   :  { %v4150_v15 = vadd.f32 %v8690_v58, %v3941_v14  ;;  %v2966_v9 = vld [vmem:[#allocation5 + $0x78] sm:$0xff]  ;;  %v4431_v40 = vpop.permute.xlu0 %4430 }
 0x8d2   :  { %4339 = vst.msk [vmem:[#allocation5] sm:$0xff] %vm25_vm0, %v4323_v20  ;;  %v3847_v12 = vld [vmem:[#allocation5 + $0x48] sm:$0xff]  ;;  %v3062_v28 = vmul.f32 %v9816_v43, %v2966_v9 }
 0x8d3   :  { %v4198_v44 = vld [vmem:[#allocation5 + $0x18] sm:$0xff]  ;;  %3286 = vst.msk [vmem:[#allocation5 + $0x68] sm:$0xff] %vm3272_vm10, %v3269_v4  ;;  %v3943_v0 = vmul.f32 %v8514_v8, %v3847_v12 }
 0x8d4   :  { %v4326_v21 = vmul.f32 %v8733_v55, %v4198_v44  ;;  %4167 = vst.msk [vmem:[#allocation5 + $0x38] sm:$0xff] %vm4159_vm11, %v4150_v15  ;;  %v3271_v34 = vadd.f32 %v8321_v32, %v3062_v28  ;;  %v4576_v58 = vpop.permute.xlu1 %4575 }
 0x8d5   :  { %v4152_v63 = vadd.f32 %v8697_v2, %v3943_v0  ;;  %v4200_v35 = vld [vmem:[#allocation5 + $0x28] sm:$0xff]  ;;  %v4645_v53 = vmul.f32 %v4576_v58, %v4517_v38  ;;  %v4441_v50 = vpop.permute.xlu0 %4440 }
 0x8d6   :  { %4342 = vst.msk [vmem:[#allocation5 + $0x18] sm:$0xff] %vm25_vm0, %v4326_v21  ;;  %v3849_v7 = vld [vmem:[#allocation5 + $0x58] sm:$0xff]  ;;  %v4328_v55 = vmul.f32 %v8738_v17, %v4200_v35  ;;  %v2952_v58 = vld [vmem:[#allocation5 + $0x8] sm:$0xff] }
 0x8d7   :  { %3288 = vst.msk [vmem:[#allocation5 + $0x78] sm:$0xff] %vm3272_vm10, %v3271_v34  ;;  %v3945_v8 = vmul.f32 %v8516_v26, %v3849_v7  ;;  %4661 = vst.msk [vmem:[#allocation5 + $0x10] sm:$0xff] %vm3272_vm10, %v4645_v53 }
 0x8d8   :  { %4169 = vst.msk [vmem:[#allocation5 + $0x48] sm:$0xff] %vm4159_vm11, %v4152_v63  ;;  %v4581_v23 = vpop.permute.xlu1 %4580 }
 0x8d9   :  { %v4355_v47 = vld [vmem:[#allocation5] sm:$0xff]  ;;  %4344 = vst.msk [vmem:[#allocation5 + $0x28] sm:$0xff] %vm25_vm0, %v4328_v55  ;;  %v4154_v2 = vadd.f32 %v8705_v61, %v3945_v8  ;;  %v4451_v30 = vpop.permute.xlu0 %4450 }
 0x8da   :  { %v4483_v32 = vmul.f32 %v4406_v46, %v4355_v47  ;;  %v3851_v42 = vld [vmem:[#allocation5 + $0x68] sm:$0xff]  ;;  %v2955_v47 = vld [vmem:[#allocation5 + $0x20] sm:$0xff] }
 0x8db   :  { %v4202_v49 = vld [vmem:[#allocation5 + $0x38] sm:$0xff]  ;;  %4171 = vst.msk [vmem:[#allocation5 + $0x58] sm:$0xff] %vm4159_vm11, %v4154_v2  ;;  %v3947_v26 = vmul.f32 %v8518_v10, %v3851_v42 }
 0x8dc   :  { %4499 = vst.msk [vmem:[#allocation5] sm:$0xff] %vm2385_vm6, %v4483_v32  ;;  %v4330_v17 = vmul.f32 %v8743_v25, %v4202_v49  ;;  %v4591_v46 = vpop.permute.xlu1 %4590 }
 0x8dd   :  { %v4358_v13 = vld [vmem:[#allocation5 + $0x18] sm:$0xff]  ;;  %v4156_v57 = vadd.f32 %v8711_v45, %v3947_v26  ;;  %v4461_v61 = vpop.permute.xlu0 %4460 }
 0x8de   :  { %v4486_v54 = vmul.f32 %v4421_v39, %v4358_v13  ;;  %4346 = vst.msk [vmem:[#allocation5 + $0x38] sm:$0xff] %vm25_vm0, %v4330_v17  ;;  %v3853_v24 = vld [vmem:[#allocation5 + $0x78] sm:$0xff] }
 0x8df   :  { %v4204_v41 = vld [vmem:[#allocation5 + $0x48] sm:$0xff]  ;;  %4173 = vst.msk [vmem:[#allocation5 + $0x68] sm:$0xff] %vm4159_vm11, %v4156_v57  ;;  %v3949_v25 = vmul.f32 %v8520_v56, %v3853_v24 }
 0x8e0   :  { %4502 = vst.msk [vmem:[#allocation5 + $0x18] sm:$0xff] %vm2385_vm6, %v4486_v54  ;;  %v4332_v51 = vmul.f32 %v8748_v1, %v4204_v41  ;;  %v4360_v11 = vld [vmem:[#allocation5 + $0x28] sm:$0xff]  ;;  %v4601_v39 = vpop.permute.xlu1 %4600 }
 0x8e1   :  { %v4488_v10 = vmul.f32 %v4431_v40, %v4360_v11  ;;  %v4158_v59 = vadd.f32 %v8719_v27, %v3949_v25  ;;  %v4471_v14 = vpop.permute.xlu0 %4470 }
 0x8e2   :  { %4348 = vst.msk [vmem:[#allocation5 + $0x48] sm:$0xff] %vm25_vm0, %v4332_v51  ;;  %v4206_v45 = vld [vmem:[#allocation5 + $0x58] sm:$0xff]  ;;  %v2959_v51 = vld [vmem:[#allocation5 + $0x40] sm:$0xff] }
 0x8e3   :  { %v4515_v20 = vld [vmem:[#allocation5] sm:$0xff]  ;;  %4504 = vst.msk [vmem:[#allocation5 + $0x28] sm:$0xff] %vm2385_vm6, %v4488_v10  ;;  %v4334_v15 = vmul.f32 %v8753_v52, %v4206_v45 }
 0x8e4   :  { %v4643_v4 = vmul.f32 %v4566_v60, %v4515_v20  ;;  %4175 = vst.msk [vmem:[#allocation5 + $0x78] sm:$0xff] %vm4159_vm11, %v4158_v59  ;;  %v4611_v9 = vpop.permute.xlu1 %4610  ;;  %v4677_v20 = vld [vmem:[#allocation5 + $0x10] sm:$0xff] }
 0x8e5   :  { %v4362_v1 = vld [vmem:[#allocation5 + $0x38] sm:$0xff]  ;;  %4350 = vst.msk [vmem:[#allocation5 + $0x58] sm:$0xff] %vm25_vm0, %v4334_v15  ;;  %v4481_v27 = vpop.permute.xlu0 %4480 }
 0x8e6   :  { %4659 = vst.msk [vmem:[#allocation5] sm:$0xff] %vm3272_vm10, %v4643_v4  ;;  %v4490_v56 = vmul.f32 %v4441_v50, %v4362_v1  ;;  %v4208_v40 = vld [vmem:[#allocation5 + $0x68] sm:$0xff]  ;;  %v2961_v1 = vld [vmem:[#allocation5 + $0x50] sm:$0xff] }
 0x8e7   :  { %v4518_v44 = vld [vmem:[#allocation5 + $0x18] sm:$0xff]  ;;  %v4336_v60 = vmul.f32 %v8759_v18, %v4208_v40 }
 0x8e8   :  { %4506 = vst.msk [vmem:[#allocation5 + $0x38] sm:$0xff] %vm2385_vm6, %v4490_v56  ;;  %v4646_v12 = vmul.f32 %v4581_v23, %v4518_v44  ;;  %v4621_v28 = vpop.permute.xlu1 %4620 }
 0x8e9   :  { %v4364_v43 = vld [vmem:[#allocation5 + $0x48] sm:$0xff]  ;;  %4352 = vst.msk [vmem:[#allocation5 + $0x68] sm:$0xff] %vm25_vm0, %v4336_v60 }
 0x8ea   :  { %4662 = vst.msk [vmem:[#allocation5 + $0x18] sm:$0xff] %vm3272_vm10, %v4646_v12  ;;  %v4492_v52 = vmul.f32 %v4451_v30, %v4364_v43  ;;  %v4520_v21 = vld [vmem:[#allocation5 + $0x28] sm:$0xff]  ;;  %v2975_v63 = vpop.permute.xlu0 %2974 }
 0x8eb   :  { %v4210_v0 = vld [vmem:[#allocation5 + $0x78] sm:$0xff]  ;;  %v4648_v34 = vmul.f32 %v4591_v46, %v4520_v21  ;;  %v3048_v53 = vmul.f32 %v2975_v63, %v2952_v58  ;;  %v9820_v21 = vld [vmem:[#allocation47_spill] sm:$0xff] }
 0x8ec   :  { %4508 = vst.msk [vmem:[#allocation5 + $0x48] sm:$0xff] %vm2385_vm6, %v4492_v52  ;;  %v4338_v38 = vmul.f32 %v8762_v3, %v4210_v0  ;;  %v4366_v35 = vld [vmem:[#allocation5 + $0x58] sm:$0xff]  ;;  %v4631_v50 = vpop.permute.xlu1 %4630  ;;  %v2963_v52 = vld [vmem:[#allocation5 + $0x60] sm:$0xff] }
 0x8ed   :  { %4664 = vst.msk [vmem:[#allocation5 + $0x28] sm:$0xff] %vm3272_vm10, %v4648_v34  ;;  %v4494_v18 = vmul.f32 %v4461_v61, %v4366_v35  ;;  %v3257_v55 = vadd.f32 %v8269_v36, %v3048_v53  ;;  %v2957_v36 = vld [vmem:[#allocation5 + $0x30] sm:$0xff]  ;;  %v9822_v63 = vld [vmem:[#allocation129_spill] sm:$0xff] }
 0x8ee   :  { %4354 = vst.msk [vmem:[#allocation5 + $0x78] sm:$0xff] %vm25_vm0, %v4338_v38  ;;  %v2990_v32 = vpop.permute.xlu0 %2989  ;;  %v9821_v38 = vld [vmem:[#allocation123_spill] sm:$0xff] }
 0x8ef   :  { %v4522_v7 = vld [vmem:[#allocation5 + $0x38] sm:$0xff]  ;;  %4510 = vst.msk [vmem:[#allocation5 + $0x58] sm:$0xff] %vm2385_vm6, %v4494_v18  ;;  %v3051_v3 = vmul.f32 %v2990_v32, %v2955_v47  ;;  %v2965_v18 = vld [vmem:[#allocation5 + $0x70] sm:$0xff]  ;;  %v9824_v32 = vld [vmem:[#allocation135_spill] sm:$0xff] }
 0x8f0   :  { %v4650_v8 = vmul.f32 %v4601_v39, %v4522_v7  ;;  %v4368_v23 = vld [vmem:[#allocation5 + $0x68] sm:$0xff]  ;;  %3274 = vst.msk [vmem:[#allocation5 + $0x8] sm:$0xff] %vm3272_vm10, %v3257_v55  ;;  %v4641_v49 = vpop.permute.xlu1 %4640  ;;  %v9823_v55 = vld [vmem:[#allocation137_spill] sm:$0xff] }
 0x8f1   :  { %v4496_v2 = vmul.f32 %v4471_v14, %v4368_v23  ;;  %v3260_v42 = vadd.f32 %v8359_v29, %v3051_v3  ;;  %v9825_v3 = vld [vmem:[#allocation16_spill] sm:$0xff] }
 0x8f2   :  { %4666 = vst.msk [vmem:[#allocation5 + $0x38] sm:$0xff] %vm3272_vm10, %v4650_v8  ;;  %v3000_v26 = vpop.permute.xlu0 %2999 }
 0x8f3   :  { %v4524_v30 = vld [vmem:[#allocation5 + $0x48] sm:$0xff]  ;;  %4512 = vst.msk [vmem:[#allocation5 + $0x68] sm:$0xff] %vm2385_vm6, %v4496_v2  ;;  %v3053_v54 = vmul.f32 %v3000_v26, %v2957_v36  ;;  %v9827_v26 = vld [vmem:[#allocation138_spill] sm:$0xff] }
 0x8f4   :  { %v4652_v17 = vmul.f32 %v4611_v9, %v4524_v30  ;;  %3277 = vst.msk [vmem:[#allocation5 + $0x20] sm:$0xff] %vm3272_vm10, %v3260_v42 }
 0x8f5   :  { %v4370_v13 = vld [vmem:[#allocation5 + $0x78] sm:$0xff]  ;;  %v3262_v41 = vadd.f32 %v8354_v6, %v3053_v54  ;;  %v8883_v61 = vpop.permute.xlu1 %4730  ;;  %v9828_v54 = vld [vmem:[#allocation136_spill] sm:$0xff] }
 0x8f6   :  { %4668 = vst.msk [vmem:[#allocation5 + $0x48] sm:$0xff] %vm3272_vm10, %v4652_v17  ;;  %v4498_v46 = vmul.f32 %v4481_v27, %v4370_v13  ;;  %v4526_v57 = vld [vmem:[#allocation5 + $0x58] sm:$0xff]  ;;  %v3010_v25 = vpop.permute.xlu0 %3009 }
 0x8f7   :  { %v4654_v29 = vmul.f32 %v4621_v28, %v4526_v57  ;;  %v3839_v24 = vld [vmem:[#allocation5 + $0x8] sm:$0xff]  ;;  %3279 = vst.msk [vmem:[#allocation5 + $0x30] sm:$0xff] %vm3272_vm10, %v3262_v41  ;;  %v3055_v10 = vmul.f32 %v3010_v25, %v2959_v51  ;;  %v9819_v27 = vld [vmem:[#allocation97_spill] sm:$0xff]  ;;  %v9830_v25 = vld [vmem:[#allocation14_spill] sm:$0xff] }
 0x8f8   :  { %4514 = vst.msk [vmem:[#allocation5 + $0x78] sm:$0xff] %vm2385_vm6, %v4498_v46  ;;  %v3935_v11 = vmul.f32 %v8628_v48, %v3839_v24  ;;  %v9817_v48 = vld [vmem:[#allocation134_spill] sm:$0xff]  ;;  %v9829_v57 = vld [vmem:[#allocation105_spill] sm:$0xff] }
 0x8f9   :  { %4670 = vst.msk [vmem:[#allocation5 + $0x58] sm:$0xff] %vm3272_vm10, %v4654_v29  ;;  %v3264_v6 = vadd.f32 %v8398_v37, %v3055_v10  ;;  %v4736_v45 = vpop.permute.xlu1 %4735  ;;  %v9831_v10 = vld [vmem:[#allocation15_spill] sm:$0xff] }
 0x8fa   :  { %v4144_v39 = vadd.f32 %v8670_v16, %v3935_v11  ;;  %v4528_v59 = vld [vmem:[#allocation5 + $0x68] sm:$0xff]  ;;  %v4805_v15 = vmul.f32 %v4736_v45, %v4677_v20  ;;  %v3020_v56 = vpop.permute.xlu0 %3019  ;;  %v9818_v16 = vld [vmem:[#allocation122_spill] sm:$0xff] }
 0x8fb   :  { %v4656_v14 = vmul.f32 %v4631_v50, %v4528_v59  ;;  %v3842_v4 = vld [vmem:[#allocation5 + $0x20] sm:$0xff]  ;;  %3281 = vst.msk [vmem:[#allocation5 + $0x40] sm:$0xff] %vm3272_vm10, %v3264_v6  ;;  %v3057_v44 = vmul.f32 %v3020_v56, %v2961_v1 }
 0x8fc   :  { %4161 = vst.msk [vmem:[#allocation5 + $0x8] sm:$0xff] %vm4159_vm11, %v4144_v39  ;;  %v3938_v9 = vmul.f32 %v9817_v48, %v3842_v4  ;;  %4821 = vst.msk [vmem:[#allocation5 + $0x10] sm:$0xff] %vm4159_vm11, %v4805_v15  ;;  %v9832_v6 = vld [vmem:[#allocation106_spill] sm:$0xff] }
 0x8fd   :  { %4672 = vst.msk [vmem:[#allocation5 + $0x68] sm:$0xff] %vm3272_vm10, %v4656_v14  ;;  %v3266_v12 = vadd.f32 %v9819_v27, %v3057_v44  ;;  %v9833_v45 = vld [vmem:[#allocation18_spill] sm:$0xff] }
 0x8fe   :  { %v4147_v37 = vadd.f32 %v9818_v16, %v3938_v9  ;;  %v3844_v43 = vld [vmem:[#allocation5 + $0x30] sm:$0xff]  ;;  %v3030_v28 = vpop.permute.xlu0 %3029  ;;  %v9834_v56 = vld [vmem:[#allocation22_spill] sm:$0xff]  ;;  %v9835_v9 = vld [vmem:[#allocation109_spill] sm:$0xff] }
 0x8ff   :  { %v4530_v40 = vld [vmem:[#allocation5 + $0x78] sm:$0xff]  ;;  %v3940_v0 = vmul.f32 %v9820_v21, %v3844_v43  ;;  %3283 = vst.msk [vmem:[#allocation5 + $0x50] sm:$0xff] %vm3272_vm10, %v3266_v12  ;;  %v3059_v34 = vmul.f32 %v3030_v28, %v2963_v52  ;;  %v9837_v43 = vld [vmem:[#allocation110_spill] sm:$0xff] }
 0x900   :  { %v4658_v60 = vmul.f32 %v4641_v49, %v4530_v40  ;;  %4164 = vst.msk [vmem:[#allocation5 + $0x20] sm:$0xff] %vm4159_vm11, %v4147_v37  ;;  %v9826_v49 = vld [vmem:[#allocation98_spill] sm:$0xff]  ;;  %v9836_v37 = vld [vmem:[#allocation60_spill] sm:$0xff] }
 0x901   :  { %v4149_v58 = vadd.f32 %v9821_v38, %v3940_v0  ;;  %v3268_v35 = vadd.f32 %v9822_v63, %v3059_v34 }
 0x902   :  { %4674 = vst.msk [vmem:[#allocation5 + $0x78] sm:$0xff] %vm3272_vm10, %v4658_v60  ;;  %v3846_v53 = vld [vmem:[#allocation5 + $0x40] sm:$0xff]  ;;  %v3040_v50 = vpop.permute.xlu0 %3039 }
 0x903   :  { %v4196_v7 = vld [vmem:[#allocation5 + $0x8] sm:$0xff]  ;;  %4166 = vst.msk [vmem:[#allocation5 + $0x30] sm:$0xff] %vm4159_vm11, %v4149_v58  ;;  %v3942_v8 = vmul.f32 %v9823_v55, %v3846_v53  ;;  %v3061_v47 = vmul.f32 %v3040_v50, %v2965_v18  ;;  %v4746_v18 = vpop.permute.xlu1 %4745 }
 0x904   :  { %3285 = vst.msk [vmem:[#allocation5 + $0x60] sm:$0xff] %vm3272_vm10, %v3268_v35  ;;  %v4324_v23 = vmul.f32 %v9824_v32, %v4196_v7 }
 0x905   :  { %v4151_v2 = vadd.f32 %v9825_v3, %v3942_v8  ;;  %v3270_v30 = vadd.f32 %v9826_v49, %v3061_v47  ;;  %v9839_v8 = vld [vmem:[#allocation141_spill] sm:$0xff] }
 0x906   :  { %4340 = vst.msk [vmem:[#allocation5 + $0x8] sm:$0xff] %vm25_vm0, %v4324_v23  ;;  %v3848_v42 = vld [vmem:[#allocation5 + $0x50] sm:$0xff]  ;;  %v4571_v17 = vpop.permute.xlu0 %4570 }
 0x907   :  { %v4199_v36 = vld [vmem:[#allocation5 + $0x20] sm:$0xff]  ;;  %4168 = vst.msk [vmem:[#allocation5 + $0x40] sm:$0xff] %vm4159_vm11, %v4151_v2  ;;  %v3944_v13 = vmul.f32 %v9827_v26, %v3848_v42  ;;  %v4756_v49 = vpop.permute.xlu1 %4755 }
 0x908   :  { %3287 = vst.msk [vmem:[#allocation5 + $0x70] sm:$0xff] %vm3272_vm10, %v3270_v30  ;;  %v4327_v46 = vmul.f32 %v9828_v54, %v4199_v36  ;;  %v4675_v54 = vld [vmem:[#allocation5] sm:$0xff] }
 0x909   :  { %v4153_v41 = vadd.f32 %v9829_v57, %v3944_v13 }
 0x90a   :  { %4343 = vst.msk [vmem:[#allocation5 + $0x20] sm:$0xff] %vm25_vm0, %v4327_v46  ;;  %v4586_v24 = vpop.permute.xlu0 %4585  ;;  %v4201_v51 = vld [vmem:[#allocation5 + $0x30] sm:$0xff] }
 0x90b   :  { %v3850_v29 = vld [vmem:[#allocation5 + $0x60] sm:$0xff]  ;;  %4170 = vst.msk [vmem:[#allocation5 + $0x50] sm:$0xff] %vm4159_vm11, %v4153_v41  ;;  %v4329_v39 = vmul.f32 %v9831_v10, %v4201_v51 }
 0x90c   :  { %v3946_v11 = vmul.f32 %v9830_v25, %v3850_v29 }
 0x90d   :  { %v4356_v59 = vld [vmem:[#allocation5 + $0x8] sm:$0xff]  ;;  %4345 = vst.msk [vmem:[#allocation5 + $0x30] sm:$0xff] %vm25_vm0, %v4329_v39 }
 0x90e   :  { %v4155_v20 = vadd.f32 %v9832_v6, %v3946_v11  ;;  %v4484_v14 = vmul.f32 %v9833_v45, %v4356_v59  ;;  %v4596_v15 = vpop.permute.xlu0 %4595  ;;  %v4203_v1 = vld [vmem:[#allocation5 + $0x40] sm:$0xff]  ;;  %v4678_v11 = vld [vmem:[#allocation5 + $0x18] sm:$0xff] }
 0x90f   :  { %v3852_v4 = vld [vmem:[#allocation5 + $0x70] sm:$0xff]  ;;  %v4331_v44 = vmul.f32 %v9835_v9, %v4203_v1 }
 0x910   :  { %4172 = vst.msk [vmem:[#allocation5 + $0x60] sm:$0xff] %vm4159_vm11, %v4155_v20  ;;  %v3948_v48 = vmul.f32 %v9834_v56, %v3852_v4  ;;  %v4680_v4 = vld [vmem:[#allocation5 + $0x28] sm:$0xff]  ;;  %v4837_v9 = vld [vmem:[#allocation5 + $0x10] sm:$0xff] }
 0x911   :  { %4500 = vst.msk [vmem:[#allocation5 + $0x8] sm:$0xff] %vm2385_vm6, %v4484_v14  ;;  %v4359_v16 = vld [vmem:[#allocation5 + $0x20] sm:$0xff] }
 0x912   :  { %v4157_v40 = vadd.f32 %v9836_v37, %v3948_v48  ;;  %v4487_v27 = vmul.f32 %v8777_v5, %v4359_v16  ;;  %4347 = vst.msk [vmem:[#allocation5 + $0x40] sm:$0xff] %vm25_vm0, %v4331_v44  ;;  %v4606_v12 = vpop.permute.xlu0 %4605  ;;  %v4205_v60 = vld [vmem:[#allocation5 + $0x50] sm:$0xff] }
 0x913   :  { %v4333_v52 = vmul.f32 %v9837_v43, %v4205_v60  ;;  %v9838_v5 = vld [vmem:[#allocation140_spill] sm:$0xff]  ;;  %v4682_v60 = vld [vmem:[#allocation5 + $0x38] sm:$0xff] }
 0x914   :  { %4174 = vst.msk [vmem:[#allocation5 + $0x70] sm:$0xff] %vm4159_vm11, %v4157_v40  ;;  %v4361_v28 = vld [vmem:[#allocation5 + $0x30] sm:$0xff] }
 0x915   :  { %4503 = vst.msk [vmem:[#allocation5 + $0x20] sm:$0xff] %vm2385_vm6, %v4487_v27  ;;  %v4489_v21 = vmul.f32 %v8785_v31, %v4361_v28 }
 0x916   :  { %4349 = vst.msk [vmem:[#allocation5 + $0x50] sm:$0xff] %vm25_vm0, %v4333_v52  ;;  %v4616_v34 = vpop.permute.xlu0 %4615 }
 0x917   :  { %v4207_v38 = vld [vmem:[#allocation5 + $0x60] sm:$0xff]  ;;  %4505 = vst.msk [vmem:[#allocation5 + $0x30] sm:$0xff] %vm2385_vm6, %v4489_v21 }
 0x918   :  { %v4516_v0 = vld [vmem:[#allocation5 + $0x8] sm:$0xff]  ;;  %v4335_v63 = vmul.f32 %v9838_v5, %v4207_v38 }
 0x919   :  { %v4644_v58 = vmul.f32 %v4571_v17, %v4516_v0  ;;  %v4363_v35 = vld [vmem:[#allocation5 + $0x40] sm:$0xff] }
 0x91a   :  { %v4491_v53 = vmul.f32 %v8793_v62, %v4363_v35  ;;  %4351 = vst.msk [vmem:[#allocation5 + $0x60] sm:$0xff] %vm25_vm0, %v4335_v63  ;;  %v4626_v31 = vpop.permute.xlu0 %4625 }
 0x91b   :  { %4660 = vst.msk [vmem:[#allocation5 + $0x8] sm:$0xff] %vm3272_vm10, %v4644_v58  ;;  %v4209_v7 = vld [vmem:[#allocation5 + $0x70] sm:$0xff] }
 0x91c   :  { %v4519_v50 = vld [vmem:[#allocation5 + $0x20] sm:$0xff]  ;;  %4507 = vst.msk [vmem:[#allocation5 + $0x40] sm:$0xff] %vm2385_vm6, %v4491_v53  ;;  %v4337_v47 = vmul.f32 %v9839_v8, %v4209_v7 }
 0x91d   :  { %v4647_v55 = vmul.f32 %v4586_v24, %v4519_v50  ;;  %v4365_v32 = vld [vmem:[#allocation5 + $0x50] sm:$0xff]  ;;  %v4766_v24 = vpop.permute.xlu1 %4765 }
 0x91e   :  { %v4493_v23 = vmul.f32 %v8802_v33, %v4365_v32  ;;  %4353 = vst.msk [vmem:[#allocation5 + $0x70] sm:$0xff] %vm25_vm0, %v4337_v47  ;;  %v4521_v3 = vld [vmem:[#allocation5 + $0x30] sm:$0xff]  ;;  %v4636_v62 = vpop.permute.xlu0 %4635 }
 0x91f   :  { %4663 = vst.msk [vmem:[#allocation5 + $0x20] sm:$0xff] %vm3272_vm10, %v4647_v55  ;;  %v4649_v2 = vmul.f32 %v4596_v15, %v4521_v3 }
 0x920   :  { %4509 = vst.msk [vmem:[#allocation5 + $0x50] sm:$0xff] %vm2385_vm6, %v4493_v23 }
 0x921   :  { %v4367_v42 = vld [vmem:[#allocation5 + $0x60] sm:$0xff]  ;;  %4665 = vst.msk [vmem:[#allocation5 + $0x30] sm:$0xff] %vm3272_vm10, %v4649_v2  ;;  %v4776_v1 = vpop.permute.xlu1 %4775 }
 0x922   :  { %v4676_v30 = vld [vmem:[#allocation5 + $0x8] sm:$0xff]  ;;  %v4495_v36 = vmul.f32 %v8812_v19, %v4367_v42 }
 0x923   :  { %v4804_v17 = vmul.f32 %v8883_v61, %v4676_v30  ;;  %v4523_v26 = vld [vmem:[#allocation5 + $0x40] sm:$0xff]  ;;  %v4726_v13 = vpop.permute.xlu0 %4725 }
 0x924   :  { %v4651_v33 = vmul.f32 %v4606_v12, %v4523_v26  ;;  %4511 = vst.msk [vmem:[#allocation5 + $0x60] sm:$0xff] %vm2385_vm6, %v4495_v36  ;;  %v4803_v41 = vmul.f32 %v4726_v13, %v4675_v54 }
 0x925   :  { %4820 = vst.msk [vmem:[#allocation5 + $0x8] sm:$0xff] %vm4159_vm11, %v4804_v17  ;;  %v4369_v57 = vld [vmem:[#allocation5 + $0x70] sm:$0xff]  ;;  %v4786_v5 = vpop.permute.xlu1 %4785 }
 0x926   :  { %v4679_v46 = vld [vmem:[#allocation5 + $0x20] sm:$0xff]  ;;  %4667 = vst.msk [vmem:[#allocation5 + $0x40] sm:$0xff] %vm3272_vm10, %v4651_v33  ;;  %v4497_v61 = vmul.f32 %v8822_v22, %v4369_v57 }
 0x927   :  { %v4807_v29 = vmul.f32 %v4746_v18, %v4679_v46  ;;  %v4525_v51 = vld [vmem:[#allocation5 + $0x50] sm:$0xff]  ;;  %4819 = vst.msk [vmem:[#allocation5] sm:$0xff] %vm4159_vm11, %v4803_v41  ;;  %v4741_v25 = vpop.permute.xlu0 %4740  ;;  %v8961_v22 = vld [vmem:[%s9020_s4] ss:$0 sm:$0xff]  ;;  %v4684_v18 = vld [vmem:[#allocation5 + $0x48] sm:$0xff] }
 0x928   :  { %v4653_v19 = vmul.f32 %v4616_v34, %v4525_v51  ;;  %4513 = vst.msk [vmem:[#allocation5 + $0x70] sm:$0xff] %vm2385_vm6, %v4497_v61  ;;  %v4681_v10 = vld [vmem:[#allocation5 + $0x30] sm:$0xff]  ;;  %v4806_v39 = vmul.f32 %v4741_v25, %v4678_v11  ;;  %v4860_v43 = vadd.f32 %v8961_v22, %v4837_v9  ;;  %v4688_v61 = vld [vmem:[#allocation5 + $0x68] sm:$0xff] }
 0x929   :  { %4823 = vst.msk [vmem:[#allocation5 + $0x20] sm:$0xff] %vm4159_vm11, %v4807_v29  ;;  %v4809_v59 = vmul.f32 %v4756_v49, %v4681_v10  ;;  %v4686_v49 = vld [vmem:[#allocation5 + $0x58] sm:$0xff]  ;;  %v4796_v42 = vpop.permute.xlu1 %4795 }
 0x92a   :  { %4669 = vst.msk [vmem:[#allocation5 + $0x50] sm:$0xff] %vm3272_vm10, %v4653_v19  ;;  %v4876_v50 = vmax.f32 %v4860_v43, 0.0 }
 0x92b   :  { %v4527_v20 = vld [vmem:[#allocation5 + $0x60] sm:$0xff]  ;;  %4822 = vst.msk [vmem:[#allocation5 + $0x18] sm:$0xff] %vm4159_vm11, %v4806_v39  ;;  %4825 = vst.msk [vmem:[#allocation5 + $0x30] sm:$0xff] %vm4159_vm11, %v4809_v59  ;;  %v4751_v14 = vpop.permute.xlu0 %4750 }
 0x92c   :  { %v4836_v6 = vld [vmem:[#allocation5 + $0x8] sm:$0xff]  ;;  %v4655_v45 = vmul.f32 %v4626_v31, %v4527_v20  ;;  %v4808_v48 = vmul.f32 %v4751_v14, %v4680_v4  ;;  %v4690_v20 = vld [vmem:[#allocation5 + $0x78] sm:$0xff] }
 0x92d   :  { %v4859_v15 = vadd.f32 %v8961_v22, %v4836_v6  ;;  %v4683_v56 = vld [vmem:[#allocation5 + $0x40] sm:$0xff] }
 0x92e   :  { %v4811_v44 = vmul.f32 %v4766_v24, %v4683_v56  ;;  %4671 = vst.msk [vmem:[#allocation5 + $0x60] sm:$0xff] %vm3272_vm10, %v4655_v45  ;;  %v4835_v16 = vld [vmem:[#allocation5] sm:$0xff] }
 0x92f   :  { %v4529_v37 = vld [vmem:[#allocation5 + $0x70] sm:$0xff]  ;;  %v4858_v40 = vadd.f32 %v8961_v22, %v4835_v16  ;;  %4824 = vst.msk [vmem:[#allocation5 + $0x28] sm:$0xff] %vm4159_vm11, %v4808_v48  ;;  %v4761_v12 = vpop.permute.xlu0 %4760  ;;  %v4875_v21 = vmax.f32 %v4859_v15, 0.0 }
 0x930   :  { %4827 = vst.msk [vmem:[#allocation5 + $0x40] sm:$0xff] %vm4159_vm11, %v4811_v44  ;;  %v4657_v27 = vmul.f32 %v4636_v62, %v4529_v37  ;;  %v4810_v0 = vmul.f32 %v4761_v12, %v4682_v60  ;;  %v4839_v34 = vld [vmem:[#allocation5 + $0x20] sm:$0xff] }
 0x931   :  { %v4685_v52 = vld [vmem:[#allocation5 + $0x50] sm:$0xff]  ;;  %v4874_v28 = vmax.f32 %v4858_v40, 0.0  ;;  %v4862_v31 = vadd.f32 %v8961_v22, %v4839_v34 }
 0x932   :  { %v4813_v38 = vmul.f32 %v4776_v1, %v4685_v52  ;;  %4673 = vst.msk [vmem:[#allocation5 + $0x70] sm:$0xff] %vm3272_vm10, %v4657_v27  ;;  %v4838_v58 = vld [vmem:[#allocation5 + $0x18] sm:$0xff]  ;;  %v4841_v47 = vld [vmem:[#allocation5 + $0x30] sm:$0xff] }
 0x933   :  { %v5066_v63 = vpack.c.bf16 %v4875_v21, %v4874_v28  ;;  %v4861_v35 = vadd.f32 %v8961_v22, %v4838_v58  ;;  %4826 = vst.msk [vmem:[#allocation5 + $0x38] sm:$0xff] %vm4159_vm11, %v4810_v0  ;;  %v4771_v53 = vpop.permute.xlu0 %4770  ;;  %v4864_v30 = vadd.f32 %v8961_v22, %v4841_v47  ;;  %v4878_v36 = vmax.f32 %v4862_v31, 0.0 }
 0x934   :  { %4829 = vst.msk [vmem:[#allocation5 + $0x50] sm:$0xff] %vm4159_vm11, %v4813_v38  ;;  %v4812_v8 = vmul.f32 %v4771_v53, %v4684_v18 }
 0x935   :  { %v4687_v7 = vld [vmem:[#allocation5 + $0x60] sm:$0xff]  ;;  %5067 = vst [vmem:[%s9021_s5] sm:$0xff] %v5066_v63   ;;  %v4877_v55 = vmax.f32 %v4861_v35, 0.0  ;;  %v4880_v51 = vmax.f32 %v4864_v30, 0.0 }
 0x936   :  { %v4815_v32 = vmul.f32 %v4786_v5, %v4687_v7  ;;  %v4840_v23 = vld [vmem:[#allocation5 + $0x28] sm:$0xff]  ;;  %4828 = vst.msk [vmem:[#allocation5 + $0x48] sm:$0xff] %vm4159_vm11, %v4812_v8 }
 0x937   :  { %v5071_v3 = vpack.c.bf16 %v4877_v55, %v4876_v50  ;;  %v4863_v62 = vadd.f32 %v8961_v22, %v4840_v23  ;;  %v4781_v2 = vpop.permute.xlu0 %4780  ;;  %v4843_v13 = vld [vmem:[#allocation5 + $0x40] sm:$0xff] }
 0x938   :  { %4831 = vst.msk [vmem:[#allocation5 + $0x60] sm:$0xff] %vm4159_vm11, %v4815_v32  ;;  %v4814_v33 = vmul.f32 %v4781_v2, %v4686_v49  ;;  %v4866_v24 = vadd.f32 %v8961_v22, %v4843_v13 }
 0x939   :  { %v4689_v17 = vld [vmem:[#allocation5 + $0x70] sm:$0xff]  ;;  %5103 = vst [vmem:[%s9021_s5 + $0x8] sm:$0xff] %v5071_v3   ;;  %v4879_v26 = vmax.f32 %v4863_v62, 0.0 }
 0x93a   :  { %v4817_v54 = vmul.f32 %v4796_v42, %v4689_v17  ;;  %v4842_v46 = vld [vmem:[#allocation5 + $0x38] sm:$0xff]  ;;  %4830 = vst.msk [vmem:[#allocation5 + $0x58] sm:$0xff] %vm4159_vm11, %v4814_v33  ;;  %v4882_v14 = vmax.f32 %v4866_v24, 0.0 }
 0x93b   :  { %v5076_v57 = vpack.c.bf16 %v4879_v26, %v4878_v36  ;;  %v4865_v41 = vadd.f32 %v8961_v22, %v4842_v46  ;;  %v4791_v29 = vpop.permute.xlu0 %4790  ;;  %v4845_v11 = vld [vmem:[#allocation5 + $0x50] sm:$0xff] }
 0x93c   :  { %4833 = vst.msk [vmem:[#allocation5 + $0x70] sm:$0xff] %vm4159_vm11, %v4817_v54  ;;  %v4816_v25 = vmul.f32 %v4791_v29, %v4688_v61  ;;  %v4868_v45 = vadd.f32 %v8961_v22, %v4845_v11 }
 0x93d   :  { %5104 = vst [vmem:[%s9021_s5 + $0x10] sm:$0xff] %v5076_v57   ;;  %v4881_v19 = vmax.f32 %v4865_v41, 0.0  ;;  %v4844_v10 = vld [vmem:[#allocation5 + $0x48] sm:$0xff] }
 0x93e   :  { %v4867_v59 = vadd.f32 %v8961_v22, %v4844_v10  ;;  %4832 = vst.msk [vmem:[#allocation5 + $0x68] sm:$0xff] %vm4159_vm11, %v4816_v25  ;;  %v4884_v16 = vmax.f32 %v4868_v45, 0.0 }
 0x93f   :  { %v5081_v39 = vpack.c.bf16 %v4881_v19, %v4880_v51  ;;  %v4801_v6 = vpop.permute.xlu0 %4800  ;;  %v4847_v1 = vld [vmem:[#allocation5 + $0x60] sm:$0xff] }
 0x940   :  { %v4883_v4 = vmax.f32 %v4867_v59, 0.0  ;;  %v4818_v15 = vmul.f32 %v4801_v6, %v4690_v20  ;;  %v4870_v44 = vadd.f32 %v8961_v22, %v4847_v1 }
 0x941   :  { %5105 = vst [vmem:[%s9021_s5 + $0x18] sm:$0xff] %v5081_v39   ;;  %v4846_v56 = vld [vmem:[#allocation5 + $0x58] sm:$0xff] }
 0x942   :  { %v5086_v48 = vpack.c.bf16 %v4883_v4, %v4882_v14  ;;  %v4869_v9 = vadd.f32 %v8961_v22, %v4846_v56  ;;  %4834 = vst.msk [vmem:[#allocation5 + $0x78] sm:$0xff] %vm4159_vm11, %v4818_v15  ;;  %v4886_v52 = vmax.f32 %v4870_v44, 0.0 }
 0x943   :  { %v4849_v40 = vld [vmem:[#allocation5 + $0x70] sm:$0xff] }
 0x944   :  { %5106 = vst [vmem:[%s9021_s5 + $0x20] sm:$0xff] %v5086_v48   ;;  %v4885_v37 = vmax.f32 %v4869_v9, 0.0  ;;  %v4872_v43 = vadd.f32 %v8961_v22, %v4849_v40 }
 0x945   :  { %v4848_v27 = vld [vmem:[#allocation5 + $0x68] sm:$0xff] }
 0x946   :  { %v5091_v12 = vpack.c.bf16 %v4885_v37, %v4884_v16  ;;  %v4871_v60 = vadd.f32 %v8961_v22, %v4848_v27  ;;  %v4888_v38 = vmax.f32 %v4872_v43, 0.0 }
 0x948   :  { %5107 = vst [vmem:[%s9021_s5 + $0x28] sm:$0xff] %v5091_v12   ;;  %v4887_v28 = vmax.f32 %v4871_v60, 0.0 }
 0x949   :  { %v4850_v21 = vld [vmem:[#allocation5 + $0x78] sm:$0xff] }
 0x94a   :  { %v5096_v0 = vpack.c.bf16 %v4887_v28, %v4886_v52  ;;  %v4873_v34 = vadd.f32 %v8961_v22, %v4850_v21 }
 0x94c   :  { %5108 = vst [vmem:[%s9021_s5 + $0x30] sm:$0xff] %v5096_v0   ;;  %v4889_v58 = vmax.f32 %v4873_v34, 0.0 }
 0x94e   :  { %v5101_v5 = vpack.c.bf16 %v4889_v58, %v4888_v38 }
 0x950   :  { %5109 = vst [vmem:[%s9021_s5 + $0x38] sm:$0xff] %v5101_v5  }

</bundles_post_ra>
